<compile_context>
chip_gen: v7x
topology: tpu7x:2x2x1
jax: 0.10.0
libtpu: 0.0.40
codegen_flags: <defaults>
</compile_context>

<pallas_src>
import jax
import jax.numpy as jnp
from jax.experimental import pallas as pl
from jax.experimental.pallas import tpu as pltpu

GRID = 50                  # grid_size in the PyTorch module
PADG = GRID + 2            # 52: zero-padded image side
NPF = PADG * PADG          # 2704: flattened padded plane length
WPC = 2816                 # per-channel fc4 column width (NPF rounded to 128)
BASE = 128                 # left guard band in the conv scratch rows
ROWLEN = BASE + WPC        # 2944 = 23 * 128 (guard + data + zero tail)


def _const_spec(a):
    """Full-array BlockSpec with a constant index map (weight stays resident)."""
    nd = a.ndim
    return pl.BlockSpec(a.shape, lambda b, _nd=nd: (0,) * _nd)


# ----------------------------------------------------------------------------
# Fused forward kernel: one grid step == one batch element
# ----------------------------------------------------------------------------
def _fused_kernel(src_ref,
                  fc1w_ref, fc1b_ref, fc2w_ref, fc2b_ref, fc3w_ref, fc3b_ref,
                  aw_ref, ab_ref, g1_ref, be1_ref,
                  fw1_ref, fb1_ref, fw2_ref, fb2_ref, g2_ref, be2_ref,
                  fc4w_ref, fc4b_ref,
                  c1w_ref, c1b_ref, c2w_ref, c2b_ref, mask_ref,
                  o_ref, buf_a, buf_b):
    f32 = jnp.float32
    bf16 = jnp.bfloat16
    num_layers = aw_ref.shape[0]
    cin = fc4b_ref.shape[0]

    # ---- dense front-end -------------------------------------------------
    x = src_ref[0]                                                 # (1, in_dim)
    h = jnp.maximum(
        jnp.dot(x, fc1w_ref[...], preferred_element_type=f32) + fc1b_ref[...], 0.0)
    h = jnp.maximum(
        jnp.dot(h, fc2w_ref[...], preferred_element_type=f32) + fc2b_ref[...], 0.0)
    h = jnp.maximum(
        jnp.dot(h, fc3w_ref[...], preferred_element_type=f32) + fc3b_ref[...], 0.0)

    def layer_norm(v, g, b):
        mu = jnp.mean(v, axis=-1, keepdims=True)
        var = jnp.mean((v - mu) ** 2, axis=-1, keepdims=True)
        return (v - mu) * jax.lax.rsqrt(var + 1e-5) * g + b

    # ---- transformer encoder layers (seq_len == 1) -------------------------
    for l in range(num_layers):
        # attention == folded (V @ out_proj) since softmax over one key is 1
        attn = jnp.dot(h, aw_ref[l], preferred_element_type=f32) + ab_ref[l]
        h = layer_norm(h + attn, g1_ref[l], be1_ref[l])
        f = jnp.dot(h.astype(bf16), fw1_ref[l],
                    preferred_element_type=f32) + fb1_ref[l]
        f = jnp.maximum(f, 0.0)
        f = jnp.dot(f.astype(bf16), fw2_ref[l],
                    preferred_element_type=f32) + fb2_ref[l]
        h = layer_norm(h + f, g2_ref[l], be2_ref[l])

    # ---- fc4: emits the zero-padded, channel-major conv1 input -------------
    buf_a[...] = jnp.zeros_like(buf_a)
    buf_b[...] = jnp.zeros_like(buf_b)
    hb = h.astype(bf16)
    for c in range(cin):
        yc = jnp.dot(hb, fc4w_ref[:, c * WPC:(c + 1) * WPC],
                     preferred_element_type=f32) + fc4b_ref[c:c + 1, :]
        buf_a[c:c + 1, BASE:BASE + WPC] = jnp.maximum(yc, 0.0)    # (1, WPC)

    mask = mask_ref[...] > 0.0                                    # (1, NPF)

    # ---- 3x3 conv as lane-dense (Cout, Cin) @ (Cin, 52*52) per tap ----------
    def conv3x3(in_buf, w_ref, bias):
        acc = None
        for dy in range(3):
            for dx in range(3):
                off = (dy - 1) * PADG + (dx - 1)                  # -53 .. +53
                xt = in_buf[:, BASE + off:BASE + off + NPF]       # (Cin, NPF)
                d = jnp.dot(w_ref[dy * 3 + dx], xt,
                            preferred_element_type=f32)           # (Cout, NPF)
                acc = d if acc is None else acc + d
        acc = jnp.maximum(acc + bias, 0.0)
        return jnp.where(mask, acc, 0.0)      # re-zero the padding ring

    y1 = conv3x3(buf_a, c1w_ref, c1b_ref[...])                    # (hidden, NPF)
    buf_b[:, BASE:BASE + NPF] = y1
    y2 = conv3x3(buf_b, c2w_ref, c2b_ref[...])                    # (1, NPF)
    o_ref[0] = y2


# ----------------------------------------------------------------------------
# Parameter init (deterministic, synthetic) in the kernel-ready layouts
# ----------------------------------------------------------------------------
def _init_linear(key, fan_in, fan_out):
    kw, kb = jax.random.split(key)
    w = jax.random.normal(kw, (fan_in, fan_out), jnp.float32) / jnp.sqrt(fan_in)
    b = jax.random.normal(kb, (fan_out,), jnp.float32) * 0.01
    return w, b


def init_params(key, input_dim, intermediate_dim, hidden_dim, d_model,
                num_layers, dim_feedforward):
    keys = jax.random.split(key, 5 + num_layers)
    p = {}
    w, b = _init_linear(keys[0], input_dim, intermediate_dim)
    p["fc1_w"], p["fc1_b"] = w, b.reshape(1, -1)
    w, b = _init_linear(keys[1], intermediate_dim, hidden_dim)
    p["fc2_w"], p["fc2_b"] = w, b.reshape(1, -1)
    w, b = _init_linear(keys[2], hidden_dim, d_model)
    p["fc3_w"], p["fc3_b"] = w, b.reshape(1, -1)

    # transformer layers: fold V and output projections (exact for seq_len==1)
    aw, ab, g1, be1, fw1, fb1, fw2, fb2, g2, be2 = ([] for _ in range(10))
    for l in range(num_layers):
        lk = jax.random.split(keys[3 + l], 4)
        wv, bv = _init_linear(lk[0], d_model, d_model)
        wo, bo = _init_linear(lk[1], d_model, d_model)
        w1, b1 = _init_linear(lk[2], d_model, dim_feedforward)
        w2, b2 = _init_linear(lk[3], dim_feedforward, d_model)
        aw.append(wv @ wo)
        ab.append((bv @ wo + bo).reshape(1, d_model))
        g1.append(jnp.ones((1, d_model), jnp.float32))
        be1.append(jnp.zeros((1, d_model), jnp.float32))
        fw1.append(w1)
        fb1.append(b1.reshape(1, dim_feedforward))
        fw2.append(w2)
        fb2.append(b2.reshape(1, d_model))
        g2.append(jnp.ones((1, d_model), jnp.float32))
        be2.append(jnp.zeros((1, d_model), jnp.float32))
    p["attn_w"] = jnp.stack(aw)
    p["attn_b"] = jnp.stack(ab)
    p["ln1_g"] = jnp.stack(g1)
    p["ln1_b"] = jnp.stack(be1)
    p["ffn_w1"] = jnp.stack(fw1).astype(jnp.bfloat16)   # big weights -> bf16
    p["ffn_b1"] = jnp.stack(fb1)
    p["ffn_w2"] = jnp.stack(fw2).astype(jnp.bfloat16)
    p["ffn_b2"] = jnp.stack(fb2)
    p["ln2_g"] = jnp.stack(g2)
    p["ln2_b"] = jnp.stack(be2)

    # fc4 (d_model -> hidden*50*50), re-laid out per conv channel as a
    # zero-padded 52x52 plane (flattened, padded to WPC=2816 = 22*128 columns)
    # so the fc4 output is directly the zero-padded conv1 input.
    w4, b4 = _init_linear(keys[3 + num_layers], d_model,
                          hidden_dim * GRID * GRID)
    w4 = w4.reshape(d_model, hidden_dim, GRID, GRID)
    w4 = jnp.pad(w4, ((0, 0), (0, 0), (1, 1), (1, 1)))
    w4 = w4.reshape(d_model, hidden_dim, NPF)
    w4 = jnp.pad(w4, ((0, 0), (0, 0), (0, WPC - NPF)))
    p["fc4_w"] = w4.reshape(d_model, hidden_dim * WPC).astype(jnp.bfloat16)
    b4 = b4.reshape(hidden_dim, GRID, GRID)
    b4 = jnp.pad(b4, ((0, 0), (1, 1), (1, 1))).reshape(hidden_dim, NPF)
    p["fc4_b"] = jnp.pad(b4, ((0, 0), (0, WPC - NPF)))            # (hidden, WPC)

    # conv weights: OIHW -> (tap, O, I) for the (Cout, Cin) x (Cin, H*W) matmuls
    kc1, kc2 = jax.random.split(keys[4 + num_layers])
    c1 = jax.random.normal(kc1, (hidden_dim, hidden_dim, 3, 3), jnp.float32) * 0.1
    p["conv1_w"] = c1.transpose(2, 3, 0, 1).reshape(9, hidden_dim, hidden_dim)
    p["conv1_b"] = jnp.zeros((hidden_dim, 1), jnp.float32)
    c2 = jax.random.normal(kc2, (1, hidden_dim, 3, 3), jnp.float32) * 0.1
    p["conv2_w"] = c2.transpose(2, 3, 0, 1).reshape(9, 1, hidden_dim)
    p["conv2_b"] = jnp.zeros((1, 1), jnp.float32)

    # interior (non-padding) mask on the flattened 52x52 plane
    m = jnp.zeros((PADG, PADG), jnp.float32).at[1:1 + GRID, 1:1 + GRID].set(1.0)
    p["mask"] = m.reshape(1, NPF)
    return p


# ----------------------------------------------------------------------------
# Forward pass wrapper (one pallas_call, grid over batch)
# ----------------------------------------------------------------------------
def transformer_to_conv_forward(src, params):
    B = src.shape[0]
    src3 = src.reshape(B, 1, -1).astype(jnp.float32)
    hidden_dim = params["fc4_b"].shape[0]

    args = [
        src3,
        params["fc1_w"], params["fc1_b"],
        params["fc2_w"], params["fc2_b"],
        params["fc3_w"], params["fc3_b"],
        params["attn_w"], params["attn_b"],
        params["ln1_g"], params["ln1_b"],
        params["ffn_w1"], params["ffn_b1"],
        params["ffn_w2"], params["ffn_b2"],
        params["ln2_g"], params["ln2_b"],
        params["fc4_w"], params["fc4_b"],
        params["conv1_w"], params["conv1_b"],
        params["conv2_w"], params["conv2_b"],
        params["mask"],
    ]
    in_specs = [pl.BlockSpec((1, 1, src3.shape[-1]), lambda b: (b, 0, 0))]
    in_specs += [_const_spec(a) for a in args[1:]]

    out = pl.pallas_call(
        _fused_kernel,
        out_shape=jax.ShapeDtypeStruct((B, 1, NPF), jnp.float32),
        grid=(B,),
        in_specs=in_specs,
        out_specs=pl.BlockSpec((1, 1, NPF), lambda b: (b, 0, 0)),
        scratch_shapes=[pltpu.VMEM((hidden_dim, ROWLEN), jnp.float32),
                        pltpu.VMEM((hidden_dim, ROWLEN), jnp.float32)],
        compiler_params=pltpu.CompilerParams(
            dimension_semantics=("parallel",)),
    )(*args)

    # drop the padding ring: (B, 1, 2704) -> (B, 1, 50, 50)  (NCHW, as PyTorch)
    out = out.reshape(B, PADG, PADG)[:, 1:1 + GRID, 1:1 + GRID]
    return out.reshape(B, 1, GRID, GRID)


if __name__ == "__main__":
    B = 2
    input_dim = 32
    intermediate_dim = 64
    hidden_dim = 8
    d_model = 32
    nhead = 4                     # numerically irrelevant (seq_len == 1)
    num_layers = 2
    dim_feedforward = 2048        # PyTorch TransformerEncoderLayer default
    assert d_model % nhead == 0

    key = jax.random.PRNGKey(0)
    kp, kx = jax.random.split(key)
    params = init_params(kp, input_dim, intermediate_dim, hidden_dim, d_model,
                         num_layers, dim_feedforward)
    src = jax.random.normal(kx, (B, input_dim), jnp.float32)

    fwd = jax.jit(transformer_to_conv_forward)
    out = jax.block_until_ready(fwd(src, params))
    assert out.shape == (B, 1, GRID, GRID), out.shape
    assert bool(jnp.all(jnp.isfinite(out)))
    print("KERNEL_OK")
</pallas_src>

<mosaic_0001>
module attributes {stable_mosaic.version = 11 : i64} {
  func.func @_fused_kernel(%arg0: i32, %arg1: memref<1x1x32xf32, #tpu.memory_space<vmem>>, %arg2: memref<32x64xf32, #tpu.memory_space<vmem>>, %arg3: memref<1x64xf32, #tpu.memory_space<vmem>>, %arg4: memref<64x8xf32, #tpu.memory_space<vmem>>, %arg5: memref<1x8xf32, #tpu.memory_space<vmem>>, %arg6: memref<8x32xf32, #tpu.memory_space<vmem>>, %arg7: memref<1x32xf32, #tpu.memory_space<vmem>>, %arg8: memref<2x32x32xf32, #tpu.memory_space<vmem>>, %arg9: memref<2x1x32xf32, #tpu.memory_space<vmem>>, %arg10: memref<2x1x32xf32, #tpu.memory_space<vmem>>, %arg11: memref<2x1x32xf32, #tpu.memory_space<vmem>>, %arg12: memref<2x32x2048xbf16, #tpu.memory_space<vmem>>, %arg13: memref<2x1x2048xf32, #tpu.memory_space<vmem>>, %arg14: memref<2x2048x32xbf16, #tpu.memory_space<vmem>>, %arg15: memref<2x1x32xf32, #tpu.memory_space<vmem>>, %arg16: memref<2x1x32xf32, #tpu.memory_space<vmem>>, %arg17: memref<2x1x32xf32, #tpu.memory_space<vmem>>, %arg18: memref<32x22528xbf16, #tpu.memory_space<vmem>>, %arg19: memref<8x2816xf32, #tpu.memory_space<vmem>>, %arg20: memref<9x8x8xf32, #tpu.memory_space<vmem>>, %arg21: memref<8x1xf32, #tpu.memory_space<vmem>>, %arg22: memref<9x1x8xf32, #tpu.memory_space<vmem>>, %arg23: memref<1x1xf32, #tpu.memory_space<vmem>>, %arg24: memref<1x2704xf32, #tpu.memory_space<vmem>>, %arg25: memref<1x1x2704xf32, #tpu.memory_space<vmem>>, %arg26: memref<8x2944xf32, #tpu.memory_space<vmem>>, %arg27: memref<8x2944xf32, #tpu.memory_space<vmem>>) attributes {dimension_semantics = [#tpu.dimension_semantics<parallel>], iteration_bounds = array<i64: 2>, scalar_prefetch = 0 : i64, scratch_operands = 2 : i64, tpu.core_type = #tpu.core_type<tc>, window_params = [{transform_indices = @transform_0, window_bounds = array<i64: 1, 1, 32>}, {pipeline_mode = #tpu.pipeline_mode<synchronous>, transform_indices = @transform_1, window_bounds = array<i64: 32, 64>}, {pipeline_mode = #tpu.pipeline_mode<synchronous>, transform_indices = @transform_2, window_bounds = array<i64: 1, 64>}, {pipeline_mode = #tpu.pipeline_mode<synchronous>, transform_indices = @transform_3, window_bounds = array<i64: 64, 8>}, {pipeline_mode = #tpu.pipeline_mode<synchronous>, transform_indices = @transform_4, window_bounds = array<i64: 1, 8>}, {pipeline_mode = #tpu.pipeline_mode<synchronous>, transform_indices = @transform_5, window_bounds = array<i64: 8, 32>}, {pipeline_mode = #tpu.pipeline_mode<synchronous>, transform_indices = @transform_6, window_bounds = array<i64: 1, 32>}, {pipeline_mode = #tpu.pipeline_mode<synchronous>, transform_indices = @transform_7, window_bounds = array<i64: 2, 32, 32>}, {pipeline_mode = #tpu.pipeline_mode<synchronous>, transform_indices = @transform_8, window_bounds = array<i64: 2, 1, 32>}, {pipeline_mode = #tpu.pipeline_mode<synchronous>, transform_indices = @transform_9, window_bounds = array<i64: 2, 1, 32>}, {pipeline_mode = #tpu.pipeline_mode<synchronous>, transform_indices = @transform_10, window_bounds = array<i64: 2, 1, 32>}, {pipeline_mode = #tpu.pipeline_mode<synchronous>, transform_indices = @transform_11, window_bounds = array<i64: 2, 32, 2048>}, {pipeline_mode = #tpu.pipeline_mode<synchronous>, transform_indices = @transform_12, window_bounds = array<i64: 2, 1, 2048>}, {pipeline_mode = #tpu.pipeline_mode<synchronous>, transform_indices = @transform_13, window_bounds = array<i64: 2, 2048, 32>}, {pipeline_mode = #tpu.pipeline_mode<synchronous>, transform_indices = @transform_14, window_bounds = array<i64: 2, 1, 32>}, {pipeline_mode = #tpu.pipeline_mode<synchronous>, transform_indices = @transform_15, window_bounds = array<i64: 2, 1, 32>}, {pipeline_mode = #tpu.pipeline_mode<synchronous>, transform_indices = @transform_16, window_bounds = array<i64: 2, 1, 32>}, {pipeline_mode = #tpu.pipeline_mode<synchronous>, transform_indices = @transform_17, window_bounds = array<i64: 32, 22528>}, {pipeline_mode = #tpu.pipeline_mode<synchronous>, transform_indices = @transform_18, window_bounds = array<i64: 8, 2816>}, {pipeline_mode = #tpu.pipeline_mode<synchronous>, transform_indices = @transform_19, window_bounds = array<i64: 9, 8, 8>}, {pipeline_mode = #tpu.pipeline_mode<synchronous>, transform_indices = @transform_20, window_bounds = array<i64: 8, 1>}, {pipeline_mode = #tpu.pipeline_mode<synchronous>, transform_indices = @transform_21, window_bounds = array<i64: 9, 1, 8>}, {pipeline_mode = #tpu.pipeline_mode<synchronous>, transform_indices = @transform_22, window_bounds = array<i64: 1, 1>}, {pipeline_mode = #tpu.pipeline_mode<synchronous>, transform_indices = @transform_23, window_bounds = array<i64: 1, 2704>}, {transform_indices = @transform_24, window_bounds = array<i64: 1, 1, 2704>}]} {
    %c0 = arith.constant 0 : index
    %c0_0 = arith.constant 0 : index
    %c0_1 = arith.constant 0 : index
    %0 = vector.load %arg1[%c0, %c0_0, %c0_1] : memref<1x1x32xf32, #tpu.memory_space<vmem>>, vector<1x1x32xf32>
    %1 = vector.shape_cast %0 : vector<1x1x32xf32> to vector<1x32xf32>
    %c0_2 = arith.constant 0 : index
    %c0_3 = arith.constant 0 : index
    %2 = vector.load %arg2[%c0_2, %c0_3] : memref<32x64xf32, #tpu.memory_space<vmem>>, vector<32x64xf32>
    %cst = arith.constant dense<0.000000e+00> : vector<1x64xf32>
    %3 = tpu.matmul %1, %2, %cst {dimension_numbers = #tpu.dot_dimension_numbers<[1], [0], [0], [1], [0, 0, 1, 1], [], []>} : vector<1x32xf32>, vector<32x64xf32>, vector<1x64xf32> -> vector<1x64xf32>
    %c0_4 = arith.constant 0 : index
    %c0_5 = arith.constant 0 : index
    %4 = vector.load %arg3[%c0_4, %c0_5] : memref<1x64xf32, #tpu.memory_space<vmem>>, vector<1x64xf32>
    %5 = arith.addf %3, %4 : vector<1x64xf32>
    %cst_6 = arith.constant 0.000000e+00 : f32
    %6 = vector.broadcast %cst_6 : f32 to vector<1x64xf32>
    %7 = arith.maximumf %5, %6 : vector<1x64xf32>
    %c0_7 = arith.constant 0 : index
    %c0_8 = arith.constant 0 : index
    %8 = vector.load %arg4[%c0_7, %c0_8] : memref<64x8xf32, #tpu.memory_space<vmem>>, vector<64x8xf32>
    %cst_9 = arith.constant dense<0.000000e+00> : vector<1x8xf32>
    %9 = tpu.matmul %7, %8, %cst_9 {dimension_numbers = #tpu.dot_dimension_numbers<[1], [0], [0], [1], [0, 0, 1, 1], [], []>} : vector<1x64xf32>, vector<64x8xf32>, vector<1x8xf32> -> vector<1x8xf32>
    %c0_10 = arith.constant 0 : index
    %c0_11 = arith.constant 0 : index
    %10 = vector.load %arg5[%c0_10, %c0_11] : memref<1x8xf32, #tpu.memory_space<vmem>>, vector<1x8xf32>
    %11 = arith.addf %9, %10 : vector<1x8xf32>
    %cst_12 = arith.constant 0.000000e+00 : f32
    %12 = vector.broadcast %cst_12 : f32 to vector<1x8xf32>
    %13 = arith.maximumf %11, %12 : vector<1x8xf32>
    %c0_13 = arith.constant 0 : index
    %c0_14 = arith.constant 0 : index
    %14 = vector.load %arg6[%c0_13, %c0_14] : memref<8x32xf32, #tpu.memory_space<vmem>>, vector<8x32xf32>
    %cst_15 = arith.constant dense<0.000000e+00> : vector<1x32xf32>
    %15 = tpu.matmul %13, %14, %cst_15 {dimension_numbers = #tpu.dot_dimension_numbers<[1], [0], [0], [1], [0, 0, 1, 1], [], []>} : vector<1x8xf32>, vector<8x32xf32>, vector<1x32xf32> -> vector<1x32xf32>
    %c0_16 = arith.constant 0 : index
    %c0_17 = arith.constant 0 : index
    %16 = vector.load %arg7[%c0_16, %c0_17] : memref<1x32xf32, #tpu.memory_space<vmem>>, vector<1x32xf32>
    %17 = arith.addf %15, %16 : vector<1x32xf32>
    %cst_18 = arith.constant 0.000000e+00 : f32
    %18 = vector.broadcast %cst_18 : f32 to vector<1x32xf32>
    %19 = arith.maximumf %17, %18 : vector<1x32xf32>
    %c0_19 = arith.constant 0 : index
    %c0_20 = arith.constant 0 : index
    %c0_21 = arith.constant 0 : index
    %20 = vector.load %arg8[%c0_19, %c0_20, %c0_21] : memref<2x32x32xf32, #tpu.memory_space<vmem>>, vector<1x32x32xf32>
    %21 = vector.shape_cast %20 : vector<1x32x32xf32> to vector<32x32xf32>
    %cst_22 = arith.constant dense<0.000000e+00> : vector<1x32xf32>
    %22 = tpu.matmul %19, %21, %cst_22 {dimension_numbers = #tpu.dot_dimension_numbers<[1], [0], [0], [1], [0, 0, 1, 1], [], []>} : vector<1x32xf32>, vector<32x32xf32>, vector<1x32xf32> -> vector<1x32xf32>
    %c0_23 = arith.constant 0 : index
    %c0_24 = arith.constant 0 : index
    %c0_25 = arith.constant 0 : index
    %23 = vector.load %arg9[%c0_23, %c0_24, %c0_25] : memref<2x1x32xf32, #tpu.memory_space<vmem>>, vector<1x1x32xf32>
    %24 = vector.shape_cast %23 : vector<1x1x32xf32> to vector<1x32xf32>
    %25 = arith.addf %22, %24 : vector<1x32xf32>
    %26 = arith.addf %19, %25 : vector<1x32xf32>
    %c0_26 = arith.constant 0 : index
    %c0_27 = arith.constant 0 : index
    %c0_28 = arith.constant 0 : index
    %27 = vector.load %arg10[%c0_26, %c0_27, %c0_28] : memref<2x1x32xf32, #tpu.memory_space<vmem>>, vector<1x1x32xf32>
    %28 = vector.shape_cast %27 : vector<1x1x32xf32> to vector<1x32xf32>
    %c0_29 = arith.constant 0 : index
    %c0_30 = arith.constant 0 : index
    %c0_31 = arith.constant 0 : index
    %29 = vector.load %arg11[%c0_29, %c0_30, %c0_31] : memref<2x1x32xf32, #tpu.memory_space<vmem>>, vector<1x1x32xf32>
    %30 = vector.shape_cast %29 : vector<1x1x32xf32> to vector<1x32xf32>
    %cst_32 = arith.constant dense<0.000000e+00> : vector<1xf32>
    %31 = vector.multi_reduction <add>, %26, %cst_32 [1] : vector<1x32xf32> to vector<1xf32>
    %32 = vector.shape_cast %31 : vector<1xf32> to vector<1x1xf32>
    %cst_33 = arith.constant 3.200000e+01 : f32
    %33 = vector.broadcast %cst_33 : f32 to vector<1x1xf32>
    %34 = arith.divf %32, %33 : vector<1x1xf32>
    %35 = vector.broadcast %34 : vector<1x1xf32> to vector<1x32xf32>
    %36 = arith.subf %26, %35 : vector<1x32xf32>
    %37 = arith.mulf %36, %36 : vector<1x32xf32>
    %cst_34 = arith.constant dense<0.000000e+00> : vector<1xf32>
    %38 = vector.multi_reduction <add>, %37, %cst_34 [1] : vector<1x32xf32> to vector<1xf32>
    %39 = vector.shape_cast %38 : vector<1xf32> to vector<1x1xf32>
    %cst_35 = arith.constant 3.200000e+01 : f32
    %40 = vector.broadcast %cst_35 : f32 to vector<1x1xf32>
    %41 = arith.divf %39, %40 : vector<1x1xf32>
    %42 = vector.broadcast %34 : vector<1x1xf32> to vector<1x32xf32>
    %43 = arith.subf %26, %42 : vector<1x32xf32>
    %cst_36 = arith.constant 9.99999974E-6 : f32
    %44 = vector.broadcast %cst_36 : f32 to vector<1x1xf32>
    %45 = arith.addf %41, %44 : vector<1x1xf32>
    %46 = math.rsqrt %45 : vector<1x1xf32>
    %47 = vector.broadcast %46 : vector<1x1xf32> to vector<1x32xf32>
    %48 = arith.mulf %43, %47 : vector<1x32xf32>
    %49 = arith.mulf %48, %28 : vector<1x32xf32>
    %50 = arith.addf %49, %30 : vector<1x32xf32>
    %51 = arith.truncf %50 : vector<1x32xf32> to vector<1x32xbf16>
    %c0_37 = arith.constant 0 : index
    %c0_38 = arith.constant 0 : index
    %c0_39 = arith.constant 0 : index
    %52 = vector.load %arg12[%c0_37, %c0_38, %c0_39] : memref<2x32x2048xbf16, #tpu.memory_space<vmem>>, vector<1x32x2048xbf16>
    %53 = vector.shape_cast %52 : vector<1x32x2048xbf16> to vector<32x2048xbf16>
    %cst_40 = arith.constant dense<0.000000e+00> : vector<1x2048xf32>
    %54 = tpu.matmul %51, %53, %cst_40 {dimension_numbers = #tpu.dot_dimension_numbers<[1], [0], [0], [1], [0, 0, 1, 1], [], []>} : vector<1x32xbf16>, vector<32x2048xbf16>, vector<1x2048xf32> -> vector<1x2048xf32>
    %c0_41 = arith.constant 0 : index
    %c0_42 = arith.constant 0 : index
    %c0_43 = arith.constant 0 : index
    %55 = vector.load %arg13[%c0_41, %c0_42, %c0_43] : memref<2x1x2048xf32, #tpu.memory_space<vmem>>, vector<1x1x2048xf32>
    %56 = vector.shape_cast %55 : vector<1x1x2048xf32> to vector<1x2048xf32>
    %57 = arith.addf %54, %56 : vector<1x2048xf32>
    %cst_44 = arith.constant 0.000000e+00 : f32
    %58 = vector.broadcast %cst_44 : f32 to vector<1x2048xf32>
    %59 = arith.maximumf %57, %58 : vector<1x2048xf32>
    %60 = arith.truncf %59 : vector<1x2048xf32> to vector<1x2048xbf16>
    %c0_45 = arith.constant 0 : index
    %c0_46 = arith.constant 0 : index
    %c0_47 = arith.constant 0 : index
    %61 = vector.load %arg14[%c0_45, %c0_46, %c0_47] : memref<2x2048x32xbf16, #tpu.memory_space<vmem>>, vector<1x2048x32xbf16>
    %62 = vector.shape_cast %61 : vector<1x2048x32xbf16> to vector<2048x32xbf16>
    %cst_48 = arith.constant dense<0.000000e+00> : vector<1x32xf32>
    %63 = tpu.matmul %60, %62, %cst_48 {dimension_numbers = #tpu.dot_dimension_numbers<[1], [0], [0], [1], [0, 0, 1, 1], [], []>} : vector<1x2048xbf16>, vector<2048x32xbf16>, vector<1x32xf32> -> vector<1x32xf32>
    %c0_49 = arith.constant 0 : index
    %c0_50 = arith.constant 0 : index
    %c0_51 = arith.constant 0 : index
    %64 = vector.load %arg15[%c0_49, %c0_50, %c0_51] : memref<2x1x32xf32, #tpu.memory_space<vmem>>, vector<1x1x32xf32>
    %65 = vector.shape_cast %64 : vector<1x1x32xf32> to vector<1x32xf32>
    %66 = arith.addf %63, %65 : vector<1x32xf32>
    %67 = arith.addf %50, %66 : vector<1x32xf32>
    %c0_52 = arith.constant 0 : index
    %c0_53 = arith.constant 0 : index
    %c0_54 = arith.constant 0 : index
    %68 = vector.load %arg16[%c0_52, %c0_53, %c0_54] : memref<2x1x32xf32, #tpu.memory_space<vmem>>, vector<1x1x32xf32>
    %69 = vector.shape_cast %68 : vector<1x1x32xf32> to vector<1x32xf32>
    %c0_55 = arith.constant 0 : index
    %c0_56 = arith.constant 0 : index
    %c0_57 = arith.constant 0 : index
    %70 = vector.load %arg17[%c0_55, %c0_56, %c0_57] : memref<2x1x32xf32, #tpu.memory_space<vmem>>, vector<1x1x32xf32>
    %71 = vector.shape_cast %70 : vector<1x1x32xf32> to vector<1x32xf32>
    %cst_58 = arith.constant dense<0.000000e+00> : vector<1xf32>
    %72 = vector.multi_reduction <add>, %67, %cst_58 [1] : vector<1x32xf32> to vector<1xf32>
    %73 = vector.shape_cast %72 : vector<1xf32> to vector<1x1xf32>
    %cst_59 = arith.constant 3.200000e+01 : f32
    %74 = vector.broadcast %cst_59 : f32 to vector<1x1xf32>
    %75 = arith.divf %73, %74 : vector<1x1xf32>
    %76 = vector.broadcast %75 : vector<1x1xf32> to vector<1x32xf32>
    %77 = arith.subf %67, %76 : vector<1x32xf32>
    %78 = arith.mulf %77, %77 : vector<1x32xf32>
    %cst_60 = arith.constant dense<0.000000e+00> : vector<1xf32>
    %79 = vector.multi_reduction <add>, %78, %cst_60 [1] : vector<1x32xf32> to vector<1xf32>
    %80 = vector.shape_cast %79 : vector<1xf32> to vector<1x1xf32>
    %cst_61 = arith.constant 3.200000e+01 : f32
    %81 = vector.broadcast %cst_61 : f32 to vector<1x1xf32>
    %82 = arith.divf %80, %81 : vector<1x1xf32>
    %83 = vector.broadcast %75 : vector<1x1xf32> to vector<1x32xf32>
    %84 = arith.subf %67, %83 : vector<1x32xf32>
    %cst_62 = arith.constant 9.99999974E-6 : f32
    %85 = vector.broadcast %cst_62 : f32 to vector<1x1xf32>
    %86 = arith.addf %82, %85 : vector<1x1xf32>
    %87 = math.rsqrt %86 : vector<1x1xf32>
    %88 = vector.broadcast %87 : vector<1x1xf32> to vector<1x32xf32>
    %89 = arith.mulf %84, %88 : vector<1x32xf32>
    %90 = arith.mulf %89, %69 : vector<1x32xf32>
    %91 = arith.addf %90, %71 : vector<1x32xf32>
    %c1 = arith.constant 1 : index
    %c0_63 = arith.constant 0 : index
    %c0_64 = arith.constant 0 : index
    %92 = vector.load %arg8[%c1, %c0_63, %c0_64] : memref<2x32x32xf32, #tpu.memory_space<vmem>>, vector<1x32x32xf32>
    %93 = vector.shape_cast %92 : vector<1x32x32xf32> to vector<32x32xf32>
    %cst_65 = arith.constant dense<0.000000e+00> : vector<1x32xf32>
    %94 = tpu.matmul %91, %93, %cst_65 {dimension_numbers = #tpu.dot_dimension_numbers<[1], [0], [0], [1], [0, 0, 1, 1], [], []>} : vector<1x32xf32>, vector<32x32xf32>, vector<1x32xf32> -> vector<1x32xf32>
    %c1_66 = arith.constant 1 : index
    %c0_67 = arith.constant 0 : index
    %c0_68 = arith.constant 0 : index
    %95 = vector.load %arg9[%c1_66, %c0_67, %c0_68] : memref<2x1x32xf32, #tpu.memory_space<vmem>>, vector<1x1x32xf32>
    %96 = vector.shape_cast %95 : vector<1x1x32xf32> to vector<1x32xf32>
    %97 = arith.addf %94, %96 : vector<1x32xf32>
    %98 = arith.addf %91, %97 : vector<1x32xf32>
    %c1_69 = arith.constant 1 : index
    %c0_70 = arith.constant 0 : index
    %c0_71 = arith.constant 0 : index
    %99 = vector.load %arg10[%c1_69, %c0_70, %c0_71] : memref<2x1x32xf32, #tpu.memory_space<vmem>>, vector<1x1x32xf32>
    %100 = vector.shape_cast %99 : vector<1x1x32xf32> to vector<1x32xf32>
    %c1_72 = arith.constant 1 : index
    %c0_73 = arith.constant 0 : index
    %c0_74 = arith.constant 0 : index
    %101 = vector.load %arg11[%c1_72, %c0_73, %c0_74] : memref<2x1x32xf32, #tpu.memory_space<vmem>>, vector<1x1x32xf32>
    %102 = vector.shape_cast %101 : vector<1x1x32xf32> to vector<1x32xf32>
    %cst_75 = arith.constant dense<0.000000e+00> : vector<1xf32>
    %103 = vector.multi_reduction <add>, %98, %cst_75 [1] : vector<1x32xf32> to vector<1xf32>
    %104 = vector.shape_cast %103 : vector<1xf32> to vector<1x1xf32>
    %cst_76 = arith.constant 3.200000e+01 : f32
    %105 = vector.broadcast %cst_76 : f32 to vector<1x1xf32>
    %106 = arith.divf %104, %105 : vector<1x1xf32>
    %107 = vector.broadcast %106 : vector<1x1xf32> to vector<1x32xf32>
    %108 = arith.subf %98, %107 : vector<1x32xf32>
    %109 = arith.mulf %108, %108 : vector<1x32xf32>
    %cst_77 = arith.constant dense<0.000000e+00> : vector<1xf32>
    %110 = vector.multi_reduction <add>, %109, %cst_77 [1] : vector<1x32xf32> to vector<1xf32>
    %111 = vector.shape_cast %110 : vector<1xf32> to vector<1x1xf32>
    %cst_78 = arith.constant 3.200000e+01 : f32
    %112 = vector.broadcast %cst_78 : f32 to vector<1x1xf32>
    %113 = arith.divf %111, %112 : vector<1x1xf32>
    %114 = vector.broadcast %106 : vector<1x1xf32> to vector<1x32xf32>
    %115 = arith.subf %98, %114 : vector<1x32xf32>
    %cst_79 = arith.constant 9.99999974E-6 : f32
    %116 = vector.broadcast %cst_79 : f32 to vector<1x1xf32>
    %117 = arith.addf %113, %116 : vector<1x1xf32>
    %118 = math.rsqrt %117 : vector<1x1xf32>
    %119 = vector.broadcast %118 : vector<1x1xf32> to vector<1x32xf32>
    %120 = arith.mulf %115, %119 : vector<1x32xf32>
    %121 = arith.mulf %120, %100 : vector<1x32xf32>
    %122 = arith.addf %121, %102 : vector<1x32xf32>
    %123 = arith.truncf %122 : vector<1x32xf32> to vector<1x32xbf16>
    %c1_80 = arith.constant 1 : index
    %c0_81 = arith.constant 0 : index
    %c0_82 = arith.constant 0 : index
    %124 = vector.load %arg12[%c1_80, %c0_81, %c0_82] : memref<2x32x2048xbf16, #tpu.memory_space<vmem>>, vector<1x32x2048xbf16>
    %125 = vector.shape_cast %124 : vector<1x32x2048xbf16> to vector<32x2048xbf16>
    %cst_83 = arith.constant dense<0.000000e+00> : vector<1x2048xf32>
    %126 = tpu.matmul %123, %125, %cst_83 {dimension_numbers = #tpu.dot_dimension_numbers<[1], [0], [0], [1], [0, 0, 1, 1], [], []>} : vector<1x32xbf16>, vector<32x2048xbf16>, vector<1x2048xf32> -> vector<1x2048xf32>
    %c1_84 = arith.constant 1 : index
    %c0_85 = arith.constant 0 : index
    %c0_86 = arith.constant 0 : index
    %127 = vector.load %arg13[%c1_84, %c0_85, %c0_86] : memref<2x1x2048xf32, #tpu.memory_space<vmem>>, vector<1x1x2048xf32>
    %128 = vector.shape_cast %127 : vector<1x1x2048xf32> to vector<1x2048xf32>
    %129 = arith.addf %126, %128 : vector<1x2048xf32>
    %cst_87 = arith.constant 0.000000e+00 : f32
    %130 = vector.broadcast %cst_87 : f32 to vector<1x2048xf32>
    %131 = arith.maximumf %129, %130 : vector<1x2048xf32>
    %132 = arith.truncf %131 : vector<1x2048xf32> to vector<1x2048xbf16>
    %c1_88 = arith.constant 1 : index
    %c0_89 = arith.constant 0 : index
    %c0_90 = arith.constant 0 : index
    %133 = vector.load %arg14[%c1_88, %c0_89, %c0_90] : memref<2x2048x32xbf16, #tpu.memory_space<vmem>>, vector<1x2048x32xbf16>
    %134 = vector.shape_cast %133 : vector<1x2048x32xbf16> to vector<2048x32xbf16>
    %cst_91 = arith.constant dense<0.000000e+00> : vector<1x32xf32>
    %135 = tpu.matmul %132, %134, %cst_91 {dimension_numbers = #tpu.dot_dimension_numbers<[1], [0], [0], [1], [0, 0, 1, 1], [], []>} : vector<1x2048xbf16>, vector<2048x32xbf16>, vector<1x32xf32> -> vector<1x32xf32>
    %c1_92 = arith.constant 1 : index
    %c0_93 = arith.constant 0 : index
    %c0_94 = arith.constant 0 : index
    %136 = vector.load %arg15[%c1_92, %c0_93, %c0_94] : memref<2x1x32xf32, #tpu.memory_space<vmem>>, vector<1x1x32xf32>
    %137 = vector.shape_cast %136 : vector<1x1x32xf32> to vector<1x32xf32>
    %138 = arith.addf %135, %137 : vector<1x32xf32>
    %139 = arith.addf %122, %138 : vector<1x32xf32>
    %c1_95 = arith.constant 1 : index
    %c0_96 = arith.constant 0 : index
    %c0_97 = arith.constant 0 : index
    %140 = vector.load %arg16[%c1_95, %c0_96, %c0_97] : memref<2x1x32xf32, #tpu.memory_space<vmem>>, vector<1x1x32xf32>
    %141 = vector.shape_cast %140 : vector<1x1x32xf32> to vector<1x32xf32>
    %c1_98 = arith.constant 1 : index
    %c0_99 = arith.constant 0 : index
    %c0_100 = arith.constant 0 : index
    %142 = vector.load %arg17[%c1_98, %c0_99, %c0_100] : memref<2x1x32xf32, #tpu.memory_space<vmem>>, vector<1x1x32xf32>
    %143 = vector.shape_cast %142 : vector<1x1x32xf32> to vector<1x32xf32>
    %cst_101 = arith.constant dense<0.000000e+00> : vector<1xf32>
    %144 = vector.multi_reduction <add>, %139, %cst_101 [1] : vector<1x32xf32> to vector<1xf32>
    %145 = vector.shape_cast %144 : vector<1xf32> to vector<1x1xf32>
    %cst_102 = arith.constant 3.200000e+01 : f32
    %146 = vector.broadcast %cst_102 : f32 to vector<1x1xf32>
    %147 = arith.divf %145, %146 : vector<1x1xf32>
    %148 = vector.broadcast %147 : vector<1x1xf32> to vector<1x32xf32>
    %149 = arith.subf %139, %148 : vector<1x32xf32>
    %150 = arith.mulf %149, %149 : vector<1x32xf32>
    %cst_103 = arith.constant dense<0.000000e+00> : vector<1xf32>
    %151 = vector.multi_reduction <add>, %150, %cst_103 [1] : vector<1x32xf32> to vector<1xf32>
    %152 = vector.shape_cast %151 : vector<1xf32> to vector<1x1xf32>
    %cst_104 = arith.constant 3.200000e+01 : f32
    %153 = vector.broadcast %cst_104 : f32 to vector<1x1xf32>
    %154 = arith.divf %152, %153 : vector<1x1xf32>
    %155 = vector.broadcast %147 : vector<1x1xf32> to vector<1x32xf32>
    %156 = arith.subf %139, %155 : vector<1x32xf32>
    %cst_105 = arith.constant 9.99999974E-6 : f32
    %157 = vector.broadcast %cst_105 : f32 to vector<1x1xf32>
    %158 = arith.addf %154, %157 : vector<1x1xf32>
    %159 = math.rsqrt %158 : vector<1x1xf32>
    %160 = vector.broadcast %159 : vector<1x1xf32> to vector<1x32xf32>
    %161 = arith.mulf %156, %160 : vector<1x32xf32>
    %162 = arith.mulf %161, %141 : vector<1x32xf32>
    %163 = arith.addf %162, %143 : vector<1x32xf32>
    %cst_106 = arith.constant 0.000000e+00 : f32
    %164 = vector.broadcast %cst_106 : f32 to vector<8x2944xf32>
    %c0_107 = arith.constant 0 : index
    %c0_108 = arith.constant 0 : index
    %165 = vector.load %arg26[%c0_107, %c0_108] : memref<8x2944xf32, #tpu.memory_space<vmem>>, vector<8x2944xf32>
    tpu.vector_store %arg26[%c0_107, %c0_108], %164 {strides = array<i32>} : memref<8x2944xf32, #tpu.memory_space<vmem>>, vector<8x2944xf32>,
    %cst_109 = arith.constant 0.000000e+00 : f32
    %166 = vector.broadcast %cst_109 : f32 to vector<8x2944xf32>
    %c0_110 = arith.constant 0 : index
    %c0_111 = arith.constant 0 : index
    %167 = vector.load %arg27[%c0_110, %c0_111] : memref<8x2944xf32, #tpu.memory_space<vmem>>, vector<8x2944xf32>
    tpu.vector_store %arg27[%c0_110, %c0_111], %166 {strides = array<i32>} : memref<8x2944xf32, #tpu.memory_space<vmem>>, vector<8x2944xf32>,
    %168 = arith.truncf %163 : vector<1x32xf32> to vector<1x32xbf16>
    %c0_112 = arith.constant 0 : index
    %c0_113 = arith.constant 0 : index
    %169 = vector.load %arg18[%c0_112, %c0_113] : memref<32x22528xbf16, #tpu.memory_space<vmem>>, vector<32x2816xbf16>
    %cst_114 = arith.constant dense<0.000000e+00> : vector<1x2816xf32>
    %170 = tpu.matmul %168, %169, %cst_114 {dimension_numbers = #tpu.dot_dimension_numbers<[1], [0], [0], [1], [0, 0, 1, 1], [], []>} : vector<1x32xbf16>, vector<32x2816xbf16>, vector<1x2816xf32> -> vector<1x2816xf32>
    %c0_115 = arith.constant 0 : index
    %c0_116 = arith.constant 0 : index
    %171 = vector.load %arg19[%c0_115, %c0_116] : memref<8x2816xf32, #tpu.memory_space<vmem>>, vector<1x2816xf32>
    %172 = arith.addf %170, %171 : vector<1x2816xf32>
    %cst_117 = arith.constant 0.000000e+00 : f32
    %173 = vector.broadcast %cst_117 : f32 to vector<1x2816xf32>
    %174 = arith.maximumf %172, %173 : vector<1x2816xf32>
    %c0_118 = arith.constant 0 : index
    %c128 = arith.constant 128 : index
    %175 = vector.load %arg26[%c0_118, %c128] : memref<8x2944xf32, #tpu.memory_space<vmem>>, vector<1x2816xf32>
    tpu.vector_store %arg26[%c0_118, %c128], %174 {strides = array<i32>} : memref<8x2944xf32, #tpu.memory_space<vmem>>, vector<1x2816xf32>,
    %c0_119 = arith.constant 0 : index
    %c2816 = arith.constant 2816 : index
    %176 = vector.load %arg18[%c0_119, %c2816] : memref<32x22528xbf16, #tpu.memory_space<vmem>>, vector<32x2816xbf16>
    %cst_120 = arith.constant dense<0.000000e+00> : vector<1x2816xf32>
    %177 = tpu.matmul %168, %176, %cst_120 {dimension_numbers = #tpu.dot_dimension_numbers<[1], [0], [0], [1], [0, 0, 1, 1], [], []>} : vector<1x32xbf16>, vector<32x2816xbf16>, vector<1x2816xf32> -> vector<1x2816xf32>
    %c1_121 = arith.constant 1 : index
    %c0_122 = arith.constant 0 : index
    %178 = vector.load %arg19[%c1_121, %c0_122] : memref<8x2816xf32, #tpu.memory_space<vmem>>, vector<1x2816xf32>
    %179 = arith.addf %177, %178 : vector<1x2816xf32>
    %cst_123 = arith.constant 0.000000e+00 : f32
    %180 = vector.broadcast %cst_123 : f32 to vector<1x2816xf32>
    %181 = arith.maximumf %179, %180 : vector<1x2816xf32>
    %c1_124 = arith.constant 1 : index
    %c128_125 = arith.constant 128 : index
    %182 = vector.load %arg26[%c1_124, %c128_125] : memref<8x2944xf32, #tpu.memory_space<vmem>>, vector<1x2816xf32>
    tpu.vector_store %arg26[%c1_124, %c128_125], %181 {strides = array<i32>} : memref<8x2944xf32, #tpu.memory_space<vmem>>, vector<1x2816xf32>,
    %c0_126 = arith.constant 0 : index
    %c5632 = arith.constant 5632 : index
    %183 = vector.load %arg18[%c0_126, %c5632] : memref<32x22528xbf16, #tpu.memory_space<vmem>>, vector<32x2816xbf16>
    %cst_127 = arith.constant dense<0.000000e+00> : vector<1x2816xf32>
    %184 = tpu.matmul %168, %183, %cst_127 {dimension_numbers = #tpu.dot_dimension_numbers<[1], [0], [0], [1], [0, 0, 1, 1], [], []>} : vector<1x32xbf16>, vector<32x2816xbf16>, vector<1x2816xf32> -> vector<1x2816xf32>
    %c2 = arith.constant 2 : index
    %c0_128 = arith.constant 0 : index
    %185 = vector.load %arg19[%c2, %c0_128] : memref<8x2816xf32, #tpu.memory_space<vmem>>, vector<1x2816xf32>
    %186 = arith.addf %184, %185 : vector<1x2816xf32>
    %cst_129 = arith.constant 0.000000e+00 : f32
    %187 = vector.broadcast %cst_129 : f32 to vector<1x2816xf32>
    %188 = arith.maximumf %186, %187 : vector<1x2816xf32>
    %c2_130 = arith.constant 2 : index
    %c128_131 = arith.constant 128 : index
    %189 = vector.load %arg26[%c2_130, %c128_131] : memref<8x2944xf32, #tpu.memory_space<vmem>>, vector<1x2816xf32>
    tpu.vector_store %arg26[%c2_130, %c128_131], %188 {strides = array<i32>} : memref<8x2944xf32, #tpu.memory_space<vmem>>, vector<1x2816xf32>,
    %c0_132 = arith.constant 0 : index
    %c8448 = arith.constant 8448 : index
    %190 = vector.load %arg18[%c0_132, %c8448] : memref<32x22528xbf16, #tpu.memory_space<vmem>>, vector<32x2816xbf16>
    %cst_133 = arith.constant dense<0.000000e+00> : vector<1x2816xf32>
    %191 = tpu.matmul %168, %190, %cst_133 {dimension_numbers = #tpu.dot_dimension_numbers<[1], [0], [0], [1], [0, 0, 1, 1], [], []>} : vector<1x32xbf16>, vector<32x2816xbf16>, vector<1x2816xf32> -> vector<1x2816xf32>
    %c3 = arith.constant 3 : index
    %c0_134 = arith.constant 0 : index
    %192 = vector.load %arg19[%c3, %c0_134] : memref<8x2816xf32, #tpu.memory_space<vmem>>, vector<1x2816xf32>
    %193 = arith.addf %191, %192 : vector<1x2816xf32>
    %cst_135 = arith.constant 0.000000e+00 : f32
    %194 = vector.broadcast %cst_135 : f32 to vector<1x2816xf32>
    %195 = arith.maximumf %193, %194 : vector<1x2816xf32>
    %c3_136 = arith.constant 3 : index
    %c128_137 = arith.constant 128 : index
    %196 = vector.load %arg26[%c3_136, %c128_137] : memref<8x2944xf32, #tpu.memory_space<vmem>>, vector<1x2816xf32>
    tpu.vector_store %arg26[%c3_136, %c128_137], %195 {strides = array<i32>} : memref<8x2944xf32, #tpu.memory_space<vmem>>, vector<1x2816xf32>,
    %c0_138 = arith.constant 0 : index
    %c11264 = arith.constant 11264 : index
    %197 = vector.load %arg18[%c0_138, %c11264] : memref<32x22528xbf16, #tpu.memory_space<vmem>>, vector<32x2816xbf16>
    %cst_139 = arith.constant dense<0.000000e+00> : vector<1x2816xf32>
    %198 = tpu.matmul %168, %197, %cst_139 {dimension_numbers = #tpu.dot_dimension_numbers<[1], [0], [0], [1], [0, 0, 1, 1], [], []>} : vector<1x32xbf16>, vector<32x2816xbf16>, vector<1x2816xf32> -> vector<1x2816xf32>
    %c4 = arith.constant 4 : index
    %c0_140 = arith.constant 0 : index
    %199 = vector.load %arg19[%c4, %c0_140] : memref<8x2816xf32, #tpu.memory_space<vmem>>, vector<1x2816xf32>
    %200 = arith.addf %198, %199 : vector<1x2816xf32>
    %cst_141 = arith.constant 0.000000e+00 : f32
    %201 = vector.broadcast %cst_141 : f32 to vector<1x2816xf32>
    %202 = arith.maximumf %200, %201 : vector<1x2816xf32>
    %c4_142 = arith.constant 4 : index
    %c128_143 = arith.constant 128 : index
    %203 = vector.load %arg26[%c4_142, %c128_143] : memref<8x2944xf32, #tpu.memory_space<vmem>>, vector<1x2816xf32>
    tpu.vector_store %arg26[%c4_142, %c128_143], %202 {strides = array<i32>} : memref<8x2944xf32, #tpu.memory_space<vmem>>, vector<1x2816xf32>,
    %c0_144 = arith.constant 0 : index
    %c14080 = arith.constant 14080 : index
    %204 = vector.load %arg18[%c0_144, %c14080] : memref<32x22528xbf16, #tpu.memory_space<vmem>>, vector<32x2816xbf16>
    %cst_145 = arith.constant dense<0.000000e+00> : vector<1x2816xf32>
    %205 = tpu.matmul %168, %204, %cst_145 {dimension_numbers = #tpu.dot_dimension_numbers<[1], [0], [0], [1], [0, 0, 1, 1], [], []>} : vector<1x32xbf16>, vector<32x2816xbf16>, vector<1x2816xf32> -> vector<1x2816xf32>
    %c5 = arith.constant 5 : index
    %c0_146 = arith.constant 0 : index
    %206 = vector.load %arg19[%c5, %c0_146] : memref<8x2816xf32, #tpu.memory_space<vmem>>, vector<1x2816xf32>
    %207 = arith.addf %205, %206 : vector<1x2816xf32>
    %cst_147 = arith.constant 0.000000e+00 : f32
    %208 = vector.broadcast %cst_147 : f32 to vector<1x2816xf32>
    %209 = arith.maximumf %207, %208 : vector<1x2816xf32>
    %c5_148 = arith.constant 5 : index
    %c128_149 = arith.constant 128 : index
    %210 = vector.load %arg26[%c5_148, %c128_149] : memref<8x2944xf32, #tpu.memory_space<vmem>>, vector<1x2816xf32>
    tpu.vector_store %arg26[%c5_148, %c128_149], %209 {strides = array<i32>} : memref<8x2944xf32, #tpu.memory_space<vmem>>, vector<1x2816xf32>,
    %c0_150 = arith.constant 0 : index
    %c16896 = arith.constant 16896 : index
    %211 = vector.load %arg18[%c0_150, %c16896] : memref<32x22528xbf16, #tpu.memory_space<vmem>>, vector<32x2816xbf16>
    %cst_151 = arith.constant dense<0.000000e+00> : vector<1x2816xf32>
    %212 = tpu.matmul %168, %211, %cst_151 {dimension_numbers = #tpu.dot_dimension_numbers<[1], [0], [0], [1], [0, 0, 1, 1], [], []>} : vector<1x32xbf16>, vector<32x2816xbf16>, vector<1x2816xf32> -> vector<1x2816xf32>
    %c6 = arith.constant 6 : index
    %c0_152 = arith.constant 0 : index
    %213 = vector.load %arg19[%c6, %c0_152] : memref<8x2816xf32, #tpu.memory_space<vmem>>, vector<1x2816xf32>
    %214 = arith.addf %212, %213 : vector<1x2816xf32>
    %cst_153 = arith.constant 0.000000e+00 : f32
    %215 = vector.broadcast %cst_153 : f32 to vector<1x2816xf32>
    %216 = arith.maximumf %214, %215 : vector<1x2816xf32>
    %c6_154 = arith.constant 6 : index
    %c128_155 = arith.constant 128 : index
    %217 = vector.load %arg26[%c6_154, %c128_155] : memref<8x2944xf32, #tpu.memory_space<vmem>>, vector<1x2816xf32>
    tpu.vector_store %arg26[%c6_154, %c128_155], %216 {strides = array<i32>} : memref<8x2944xf32, #tpu.memory_space<vmem>>, vector<1x2816xf32>,
    %c0_156 = arith.constant 0 : index
    %c19712 = arith.constant 19712 : index
    %218 = vector.load %arg18[%c0_156, %c19712] : memref<32x22528xbf16, #tpu.memory_space<vmem>>, vector<32x2816xbf16>
    %cst_157 = arith.constant dense<0.000000e+00> : vector<1x2816xf32>
    %219 = tpu.matmul %168, %218, %cst_157 {dimension_numbers = #tpu.dot_dimension_numbers<[1], [0], [0], [1], [0, 0, 1, 1], [], []>} : vector<1x32xbf16>, vector<32x2816xbf16>, vector<1x2816xf32> -> vector<1x2816xf32>
    %c7 = arith.constant 7 : index
    %c0_158 = arith.constant 0 : index
    %220 = vector.load %arg19[%c7, %c0_158] : memref<8x2816xf32, #tpu.memory_space<vmem>>, vector<1x2816xf32>
    %221 = arith.addf %219, %220 : vector<1x2816xf32>
    %cst_159 = arith.constant 0.000000e+00 : f32
    %222 = vector.broadcast %cst_159 : f32 to vector<1x2816xf32>
    %223 = arith.maximumf %221, %222 : vector<1x2816xf32>
    %c7_160 = arith.constant 7 : index
    %c128_161 = arith.constant 128 : index
    %224 = vector.load %arg26[%c7_160, %c128_161] : memref<8x2944xf32, #tpu.memory_space<vmem>>, vector<1x2816xf32>
    tpu.vector_store %arg26[%c7_160, %c128_161], %223 {strides = array<i32>} : memref<8x2944xf32, #tpu.memory_space<vmem>>, vector<1x2816xf32>,
    %c0_162 = arith.constant 0 : index
    %c0_163 = arith.constant 0 : index
    %225 = vector.load %arg24[%c0_162, %c0_163] : memref<1x2704xf32, #tpu.memory_space<vmem>>, vector<1x2704xf32>
    %cst_164 = arith.constant 0.000000e+00 : f32
    %226 = vector.broadcast %cst_164 : f32 to vector<1x2704xf32>
    %227 = arith.cmpf ogt, %225, %226 : vector<1x2704xf32>
    %c0_165 = arith.constant 0 : index
    %c0_166 = arith.constant 0 : index
    %228 = vector.load %arg21[%c0_165, %c0_166] : memref<8x1xf32, #tpu.memory_space<vmem>>, vector<8x1xf32>
    %c0_167 = arith.constant 0 : index
    %c75 = arith.constant 75 : index
    %229 = vector.load %arg26[%c0_167, %c75] : memref<8x2944xf32, #tpu.memory_space<vmem>>, vector<8x2704xf32>
    %c0_168 = arith.constant 0 : index
    %c0_169 = arith.constant 0 : index
    %c0_170 = arith.constant 0 : index
    %230 = vector.load %arg20[%c0_168, %c0_169, %c0_170] : memref<9x8x8xf32, #tpu.memory_space<vmem>>, vector<1x8x8xf32>
    %231 = vector.shape_cast %230 : vector<1x8x8xf32> to vector<8x8xf32>
    %cst_171 = arith.constant dense<0.000000e+00> : vector<8x2704xf32>
    %232 = tpu.matmul %231, %229, %cst_171 {dimension_numbers = #tpu.dot_dimension_numbers<[1], [0], [0], [1], [0, 0, 1, 1], [], []>} : vector<8x8xf32>, vector<8x2704xf32>, vector<8x2704xf32> -> vector<8x2704xf32>
    %c0_172 = arith.constant 0 : index
    %c76 = arith.constant 76 : index
    %233 = vector.load %arg26[%c0_172, %c76] : memref<8x2944xf32, #tpu.memory_space<vmem>>, vector<8x2704xf32>
    %c1_173 = arith.constant 1 : index
    %c0_174 = arith.constant 0 : index
    %c0_175 = arith.constant 0 : index
    %234 = vector.load %arg20[%c1_173, %c0_174, %c0_175] : memref<9x8x8xf32, #tpu.memory_space<vmem>>, vector<1x8x8xf32>
    %235 = vector.shape_cast %234 : vector<1x8x8xf32> to vector<8x8xf32>
    %cst_176 = arith.constant dense<0.000000e+00> : vector<8x2704xf32>
    %236 = tpu.matmul %235, %233, %cst_176 {dimension_numbers = #tpu.dot_dimension_numbers<[1], [0], [0], [1], [0, 0, 1, 1], [], []>} : vector<8x8xf32>, vector<8x2704xf32>, vector<8x2704xf32> -> vector<8x2704xf32>
    %237 = arith.addf %232, %236 : vector<8x2704xf32>
    %c0_177 = arith.constant 0 : index
    %c77 = arith.constant 77 : index
    %238 = vector.load %arg26[%c0_177, %c77] : memref<8x2944xf32, #tpu.memory_space<vmem>>, vector<8x2704xf32>
    %c2_178 = arith.constant 2 : index
    %c0_179 = arith.constant 0 : index
    %c0_180 = arith.constant 0 : index
    %239 = vector.load %arg20[%c2_178, %c0_179, %c0_180] : memref<9x8x8xf32, #tpu.memory_space<vmem>>, vector<1x8x8xf32>
    %240 = vector.shape_cast %239 : vector<1x8x8xf32> to vector<8x8xf32>
    %cst_181 = arith.constant dense<0.000000e+00> : vector<8x2704xf32>
    %241 = tpu.matmul %240, %238, %cst_181 {dimension_numbers = #tpu.dot_dimension_numbers<[1], [0], [0], [1], [0, 0, 1, 1], [], []>} : vector<8x8xf32>, vector<8x2704xf32>, vector<8x2704xf32> -> vector<8x2704xf32>
    %242 = arith.addf %237, %241 : vector<8x2704xf32>
    %c0_182 = arith.constant 0 : index
    %c127 = arith.constant 127 : index
    %243 = vector.load %arg26[%c0_182, %c127] : memref<8x2944xf32, #tpu.memory_space<vmem>>, vector<8x2704xf32>
    %c3_183 = arith.constant 3 : index
    %c0_184 = arith.constant 0 : index
    %c0_185 = arith.constant 0 : index
    %244 = vector.load %arg20[%c3_183, %c0_184, %c0_185] : memref<9x8x8xf32, #tpu.memory_space<vmem>>, vector<1x8x8xf32>
    %245 = vector.shape_cast %244 : vector<1x8x8xf32> to vector<8x8xf32>
    %cst_186 = arith.constant dense<0.000000e+00> : vector<8x2704xf32>
    %246 = tpu.matmul %245, %243, %cst_186 {dimension_numbers = #tpu.dot_dimension_numbers<[1], [0], [0], [1], [0, 0, 1, 1], [], []>} : vector<8x8xf32>, vector<8x2704xf32>, vector<8x2704xf32> -> vector<8x2704xf32>
    %247 = arith.addf %242, %246 : vector<8x2704xf32>
    %c0_187 = arith.constant 0 : index
    %c128_188 = arith.constant 128 : index
    %248 = vector.load %arg26[%c0_187, %c128_188] : memref<8x2944xf32, #tpu.memory_space<vmem>>, vector<8x2704xf32>
    %c4_189 = arith.constant 4 : index
    %c0_190 = arith.constant 0 : index
    %c0_191 = arith.constant 0 : index
    %249 = vector.load %arg20[%c4_189, %c0_190, %c0_191] : memref<9x8x8xf32, #tpu.memory_space<vmem>>, vector<1x8x8xf32>
    %250 = vector.shape_cast %249 : vector<1x8x8xf32> to vector<8x8xf32>
    %cst_192 = arith.constant dense<0.000000e+00> : vector<8x2704xf32>
    %251 = tpu.matmul %250, %248, %cst_192 {dimension_numbers = #tpu.dot_dimension_numbers<[1], [0], [0], [1], [0, 0, 1, 1], [], []>} : vector<8x8xf32>, vector<8x2704xf32>, vector<8x2704xf32> -> vector<8x2704xf32>
    %252 = arith.addf %247, %251 : vector<8x2704xf32>
    %c0_193 = arith.constant 0 : index
    %c129 = arith.constant 129 : index
    %253 = vector.load %arg26[%c0_193, %c129] : memref<8x2944xf32, #tpu.memory_space<vmem>>, vector<8x2704xf32>
    %c5_194 = arith.constant 5 : index
    %c0_195 = arith.constant 0 : index
    %c0_196 = arith.constant 0 : index
    %254 = vector.load %arg20[%c5_194, %c0_195, %c0_196] : memref<9x8x8xf32, #tpu.memory_space<vmem>>, vector<1x8x8xf32>
    %255 = vector.shape_cast %254 : vector<1x8x8xf32> to vector<8x8xf32>
    %cst_197 = arith.constant dense<0.000000e+00> : vector<8x2704xf32>
    %256 = tpu.matmul %255, %253, %cst_197 {dimension_numbers = #tpu.dot_dimension_numbers<[1], [0], [0], [1], [0, 0, 1, 1], [], []>} : vector<8x8xf32>, vector<8x2704xf32>, vector<8x2704xf32> -> vector<8x2704xf32>
    %257 = arith.addf %252, %256 : vector<8x2704xf32>
    %c0_198 = arith.constant 0 : index
    %c179 = arith.constant 179 : index
    %258 = vector.load %arg26[%c0_198, %c179] : memref<8x2944xf32, #tpu.memory_space<vmem>>, vector<8x2704xf32>
    %c6_199 = arith.constant 6 : index
    %c0_200 = arith.constant 0 : index
    %c0_201 = arith.constant 0 : index
    %259 = vector.load %arg20[%c6_199, %c0_200, %c0_201] : memref<9x8x8xf32, #tpu.memory_space<vmem>>, vector<1x8x8xf32>
    %260 = vector.shape_cast %259 : vector<1x8x8xf32> to vector<8x8xf32>
    %cst_202 = arith.constant dense<0.000000e+00> : vector<8x2704xf32>
    %261 = tpu.matmul %260, %258, %cst_202 {dimension_numbers = #tpu.dot_dimension_numbers<[1], [0], [0], [1], [0, 0, 1, 1], [], []>} : vector<8x8xf32>, vector<8x2704xf32>, vector<8x2704xf32> -> vector<8x2704xf32>
    %262 = arith.addf %257, %261 : vector<8x2704xf32>
    %c0_203 = arith.constant 0 : index
    %c180 = arith.constant 180 : index
    %263 = vector.load %arg26[%c0_203, %c180] : memref<8x2944xf32, #tpu.memory_space<vmem>>, vector<8x2704xf32>
    %c7_204 = arith.constant 7 : index
    %c0_205 = arith.constant 0 : index
    %c0_206 = arith.constant 0 : index
    %264 = vector.load %arg20[%c7_204, %c0_205, %c0_206] : memref<9x8x8xf32, #tpu.memory_space<vmem>>, vector<1x8x8xf32>
    %265 = vector.shape_cast %264 : vector<1x8x8xf32> to vector<8x8xf32>
    %cst_207 = arith.constant dense<0.000000e+00> : vector<8x2704xf32>
    %266 = tpu.matmul %265, %263, %cst_207 {dimension_numbers = #tpu.dot_dimension_numbers<[1], [0], [0], [1], [0, 0, 1, 1], [], []>} : vector<8x8xf32>, vector<8x2704xf32>, vector<8x2704xf32> -> vector<8x2704xf32>
    %267 = arith.addf %262, %266 : vector<8x2704xf32>
    %c0_208 = arith.constant 0 : index
    %c181 = arith.constant 181 : index
    %268 = vector.load %arg26[%c0_208, %c181] : memref<8x2944xf32, #tpu.memory_space<vmem>>, vector<8x2704xf32>
    %c8 = arith.constant 8 : index
    %c0_209 = arith.constant 0 : index
    %c0_210 = arith.constant 0 : index
    %269 = vector.load %arg20[%c8, %c0_209, %c0_210] : memref<9x8x8xf32, #tpu.memory_space<vmem>>, vector<1x8x8xf32>
    %270 = vector.shape_cast %269 : vector<1x8x8xf32> to vector<8x8xf32>
    %cst_211 = arith.constant dense<0.000000e+00> : vector<8x2704xf32>
    %271 = tpu.matmul %270, %268, %cst_211 {dimension_numbers = #tpu.dot_dimension_numbers<[1], [0], [0], [1], [0, 0, 1, 1], [], []>} : vector<8x8xf32>, vector<8x2704xf32>, vector<8x2704xf32> -> vector<8x2704xf32>
    %272 = arith.addf %267, %271 : vector<8x2704xf32>
    %273 = vector.broadcast %228 : vector<8x1xf32> to vector<8x2704xf32>
    %274 = arith.addf %272, %273 : vector<8x2704xf32>
    %cst_212 = arith.constant 0.000000e+00 : f32
    %275 = vector.broadcast %cst_212 : f32 to vector<8x2704xf32>
    %276 = arith.maximumf %274, %275 : vector<8x2704xf32>
    %cst_213 = arith.constant 0.000000e+00 : f32
    %277 = vector.shape_cast %227 : vector<1x2704xi1> to vector<1x2704xi1>
    %278 = vector.broadcast %277 : vector<1x2704xi1> to vector<8x2704xi1>
    %279 = vector.broadcast %cst_213 : f32 to vector<8x2704xf32>
    %280 = arith.select %278, %276, %279 : vector<8x2704xi1>, vector<8x2704xf32>
    %c0_214 = arith.constant 0 : index
    %c128_215 = arith.constant 128 : index
    %281 = vector.load %arg27[%c0_214, %c128_215] : memref<8x2944xf32, #tpu.memory_space<vmem>>, vector<8x2704xf32>
    tpu.vector_store %arg27[%c0_214, %c128_215], %280 {strides = array<i32>} : memref<8x2944xf32, #tpu.memory_space<vmem>>, vector<8x2704xf32>,
    %c0_216 = arith.constant 0 : index
    %c0_217 = arith.constant 0 : index
    %282 = vector.load %arg23[%c0_216, %c0_217] : memref<1x1xf32, #tpu.memory_space<vmem>>, vector<1x1xf32>
    %c0_218 = arith.constant 0 : index
    %c75_219 = arith.constant 75 : index
    %283 = vector.load %arg27[%c0_218, %c75_219] : memref<8x2944xf32, #tpu.memory_space<vmem>>, vector<8x2704xf32>
    %c0_220 = arith.constant 0 : index
    %c0_221 = arith.constant 0 : index
    %c0_222 = arith.constant 0 : index
    %284 = vector.load %arg22[%c0_220, %c0_221, %c0_222] : memref<9x1x8xf32, #tpu.memory_space<vmem>>, vector<1x1x8xf32>
    %285 = vector.shape_cast %284 : vector<1x1x8xf32> to vector<1x8xf32>
    %cst_223 = arith.constant dense<0.000000e+00> : vector<1x2704xf32>
    %286 = tpu.matmul %285, %283, %cst_223 {dimension_numbers = #tpu.dot_dimension_numbers<[1], [0], [0], [1], [0, 0, 1, 1], [], []>} : vector<1x8xf32>, vector<8x2704xf32>, vector<1x2704xf32> -> vector<1x2704xf32>
    %c0_224 = arith.constant 0 : index
    %c76_225 = arith.constant 76 : index
    %287 = vector.load %arg27[%c0_224, %c76_225] : memref<8x2944xf32, #tpu.memory_space<vmem>>, vector<8x2704xf32>
    %c1_226 = arith.constant 1 : index
    %c0_227 = arith.constant 0 : index
    %c0_228 = arith.constant 0 : index
    %288 = vector.load %arg22[%c1_226, %c0_227, %c0_228] : memref<9x1x8xf32, #tpu.memory_space<vmem>>, vector<1x1x8xf32>
    %289 = vector.shape_cast %288 : vector<1x1x8xf32> to vector<1x8xf32>
    %cst_229 = arith.constant dense<0.000000e+00> : vector<1x2704xf32>
    %290 = tpu.matmul %289, %287, %cst_229 {dimension_numbers = #tpu.dot_dimension_numbers<[1], [0], [0], [1], [0, 0, 1, 1], [], []>} : vector<1x8xf32>, vector<8x2704xf32>, vector<1x2704xf32> -> vector<1x2704xf32>
    %291 = arith.addf %286, %290 : vector<1x2704xf32>
    %c0_230 = arith.constant 0 : index
    %c77_231 = arith.constant 77 : index
    %292 = vector.load %arg27[%c0_230, %c77_231] : memref<8x2944xf32, #tpu.memory_space<vmem>>, vector<8x2704xf32>
    %c2_232 = arith.constant 2 : index
    %c0_233 = arith.constant 0 : index
    %c0_234 = arith.constant 0 : index
    %293 = vector.load %arg22[%c2_232, %c0_233, %c0_234] : memref<9x1x8xf32, #tpu.memory_space<vmem>>, vector<1x1x8xf32>
    %294 = vector.shape_cast %293 : vector<1x1x8xf32> to vector<1x8xf32>
    %cst_235 = arith.constant dense<0.000000e+00> : vector<1x2704xf32>
    %295 = tpu.matmul %294, %292, %cst_235 {dimension_numbers = #tpu.dot_dimension_numbers<[1], [0], [0], [1], [0, 0, 1, 1], [], []>} : vector<1x8xf32>, vector<8x2704xf32>, vector<1x2704xf32> -> vector<1x2704xf32>
    %296 = arith.addf %291, %295 : vector<1x2704xf32>
    %c0_236 = arith.constant 0 : index
    %c127_237 = arith.constant 127 : index
    %297 = vector.load %arg27[%c0_236, %c127_237] : memref<8x2944xf32, #tpu.memory_space<vmem>>, vector<8x2704xf32>
    %c3_238 = arith.constant 3 : index
    %c0_239 = arith.constant 0 : index
    %c0_240 = arith.constant 0 : index
    %298 = vector.load %arg22[%c3_238, %c0_239, %c0_240] : memref<9x1x8xf32, #tpu.memory_space<vmem>>, vector<1x1x8xf32>
    %299 = vector.shape_cast %298 : vector<1x1x8xf32> to vector<1x8xf32>
    %cst_241 = arith.constant dense<0.000000e+00> : vector<1x2704xf32>
    %300 = tpu.matmul %299, %297, %cst_241 {dimension_numbers = #tpu.dot_dimension_numbers<[1], [0], [0], [1], [0, 0, 1, 1], [], []>} : vector<1x8xf32>, vector<8x2704xf32>, vector<1x2704xf32> -> vector<1x2704xf32>
    %301 = arith.addf %296, %300 : vector<1x2704xf32>
    %c0_242 = arith.constant 0 : index
    %c128_243 = arith.constant 128 : index
    %302 = vector.load %arg27[%c0_242, %c128_243] : memref<8x2944xf32, #tpu.memory_space<vmem>>, vector<8x2704xf32>
    %c4_244 = arith.constant 4 : index
    %c0_245 = arith.constant 0 : index
    %c0_246 = arith.constant 0 : index
    %303 = vector.load %arg22[%c4_244, %c0_245, %c0_246] : memref<9x1x8xf32, #tpu.memory_space<vmem>>, vector<1x1x8xf32>
    %304 = vector.shape_cast %303 : vector<1x1x8xf32> to vector<1x8xf32>
    %cst_247 = arith.constant dense<0.000000e+00> : vector<1x2704xf32>
    %305 = tpu.matmul %304, %302, %cst_247 {dimension_numbers = #tpu.dot_dimension_numbers<[1], [0], [0], [1], [0, 0, 1, 1], [], []>} : vector<1x8xf32>, vector<8x2704xf32>, vector<1x2704xf32> -> vector<1x2704xf32>
    %306 = arith.addf %301, %305 : vector<1x2704xf32>
    %c0_248 = arith.constant 0 : index
    %c129_249 = arith.constant 129 : index
    %307 = vector.load %arg27[%c0_248, %c129_249] : memref<8x2944xf32, #tpu.memory_space<vmem>>, vector<8x2704xf32>
    %c5_250 = arith.constant 5 : index
    %c0_251 = arith.constant 0 : index
    %c0_252 = arith.constant 0 : index
    %308 = vector.load %arg22[%c5_250, %c0_251, %c0_252] : memref<9x1x8xf32, #tpu.memory_space<vmem>>, vector<1x1x8xf32>
    %309 = vector.shape_cast %308 : vector<1x1x8xf32> to vector<1x8xf32>
    %cst_253 = arith.constant dense<0.000000e+00> : vector<1x2704xf32>
    %310 = tpu.matmul %309, %307, %cst_253 {dimension_numbers = #tpu.dot_dimension_numbers<[1], [0], [0], [1], [0, 0, 1, 1], [], []>} : vector<1x8xf32>, vector<8x2704xf32>, vector<1x2704xf32> -> vector<1x2704xf32>
    %311 = arith.addf %306, %310 : vector<1x2704xf32>
    %c0_254 = arith.constant 0 : index
    %c179_255 = arith.constant 179 : index
    %312 = vector.load %arg27[%c0_254, %c179_255] : memref<8x2944xf32, #tpu.memory_space<vmem>>, vector<8x2704xf32>
    %c6_256 = arith.constant 6 : index
    %c0_257 = arith.constant 0 : index
    %c0_258 = arith.constant 0 : index
    %313 = vector.load %arg22[%c6_256, %c0_257, %c0_258] : memref<9x1x8xf32, #tpu.memory_space<vmem>>, vector<1x1x8xf32>
    %314 = vector.shape_cast %313 : vector<1x1x8xf32> to vector<1x8xf32>
    %cst_259 = arith.constant dense<0.000000e+00> : vector<1x2704xf32>
    %315 = tpu.matmul %314, %312, %cst_259 {dimension_numbers = #tpu.dot_dimension_numbers<[1], [0], [0], [1], [0, 0, 1, 1], [], []>} : vector<1x8xf32>, vector<8x2704xf32>, vector<1x2704xf32> -> vector<1x2704xf32>
    %316 = arith.addf %311, %315 : vector<1x2704xf32>
    %c0_260 = arith.constant 0 : index
    %c180_261 = arith.constant 180 : index
    %317 = vector.load %arg27[%c0_260, %c180_261] : memref<8x2944xf32, #tpu.memory_space<vmem>>, vector<8x2704xf32>
    %c7_262 = arith.constant 7 : index
    %c0_263 = arith.constant 0 : index
    %c0_264 = arith.constant 0 : index
    %318 = vector.load %arg22[%c7_262, %c0_263, %c0_264] : memref<9x1x8xf32, #tpu.memory_space<vmem>>, vector<1x1x8xf32>
    %319 = vector.shape_cast %318 : vector<1x1x8xf32> to vector<1x8xf32>
    %cst_265 = arith.constant dense<0.000000e+00> : vector<1x2704xf32>
    %320 = tpu.matmul %319, %317, %cst_265 {dimension_numbers = #tpu.dot_dimension_numbers<[1], [0], [0], [1], [0, 0, 1, 1], [], []>} : vector<1x8xf32>, vector<8x2704xf32>, vector<1x2704xf32> -> vector<1x2704xf32>
    %321 = arith.addf %316, %320 : vector<1x2704xf32>
    %c0_266 = arith.constant 0 : index
    %c181_267 = arith.constant 181 : index
    %322 = vector.load %arg27[%c0_266, %c181_267] : memref<8x2944xf32, #tpu.memory_space<vmem>>, vector<8x2704xf32>
    %c8_268 = arith.constant 8 : index
    %c0_269 = arith.constant 0 : index
    %c0_270 = arith.constant 0 : index
    %323 = vector.load %arg22[%c8_268, %c0_269, %c0_270] : memref<9x1x8xf32, #tpu.memory_space<vmem>>, vector<1x1x8xf32>
    %324 = vector.shape_cast %323 : vector<1x1x8xf32> to vector<1x8xf32>
    %cst_271 = arith.constant dense<0.000000e+00> : vector<1x2704xf32>
    %325 = tpu.matmul %324, %322, %cst_271 {dimension_numbers = #tpu.dot_dimension_numbers<[1], [0], [0], [1], [0, 0, 1, 1], [], []>} : vector<1x8xf32>, vector<8x2704xf32>, vector<1x2704xf32> -> vector<1x2704xf32>
    %326 = arith.addf %321, %325 : vector<1x2704xf32>
    %327 = vector.broadcast %282 : vector<1x1xf32> to vector<1x2704xf32>
    %328 = arith.addf %326, %327 : vector<1x2704xf32>
    %cst_272 = arith.constant 0.000000e+00 : f32
    %329 = vector.broadcast %cst_272 : f32 to vector<1x2704xf32>
    %330 = arith.maximumf %328, %329 : vector<1x2704xf32>
    %cst_273 = arith.constant 0.000000e+00 : f32
    %331 = vector.broadcast %cst_273 : f32 to vector<1x2704xf32>
    %332 = arith.select %227, %330, %331 : vector<1x2704xi1>, vector<1x2704xf32>
    %c0_274 = arith.constant 0 : index
    %c0_275 = arith.constant 0 : index
    %c0_276 = arith.constant 0 : index
    %333 = vector.load %arg25[%c0_274, %c0_275, %c0_276] : memref<1x1x2704xf32, #tpu.memory_space<vmem>>, vector<1x1x2704xf32>
    %334 = vector.shape_cast %333 : vector<1x1x2704xf32> to vector<1x2704xf32>
    %335 = vector.shape_cast %332 : vector<1x2704xf32> to vector<1x1x2704xf32>
    tpu.vector_store %arg25[%c0_274, %c0_275, %c0_276], %335 {strides = array<i32>} : memref<1x1x2704xf32, #tpu.memory_space<vmem>>, vector<1x1x2704xf32>,
    return
  }
  func.func @transform_0(%arg0: i32) -> (i32, i32, i32) {
    %c0_i32 = arith.constant 0 : i32
    %c0_i32_0 = arith.constant 0 : i32
    %c0_i32_1 = arith.constant 0 : i32
    return %arg0, %c0_i32, %c0_i32_0 : i32, i32, i32
  }
  func.func @transform_1(%arg0: i32) -> (i32, i32) {
    %c0_i32 = arith.constant 0 : i32
    %c0_i32_0 = arith.constant 0 : i32
    %c0_i32_1 = arith.constant 0 : i32
    return %c0_i32, %c0_i32_0 : i32, i32
  }
  func.func @transform_2(%arg0: i32) -> (i32, i32) {
    %c0_i32 = arith.constant 0 : i32
    %c0_i32_0 = arith.constant 0 : i32
    %c0_i32_1 = arith.constant 0 : i32
    return %c0_i32, %c0_i32_0 : i32, i32
  }
  func.func @transform_3(%arg0: i32) -> (i32, i32) {
    %c0_i32 = arith.constant 0 : i32
    %c0_i32_0 = arith.constant 0 : i32
    %c0_i32_1 = arith.constant 0 : i32
    return %c0_i32, %c0_i32_0 : i32, i32
  }
  func.func @transform_4(%arg0: i32) -> (i32, i32) {
    %c0_i32 = arith.constant 0 : i32
    %c0_i32_0 = arith.constant 0 : i32
    %c0_i32_1 = arith.constant 0 : i32
    return %c0_i32, %c0_i32_0 : i32, i32
  }
  func.func @transform_5(%arg0: i32) -> (i32, i32) {
    %c0_i32 = arith.constant 0 : i32
    %c0_i32_0 = arith.constant 0 : i32
    %c0_i32_1 = arith.constant 0 : i32
    return %c0_i32, %c0_i32_0 : i32, i32
  }
  func.func @transform_6(%arg0: i32) -> (i32, i32) {
    %c0_i32 = arith.constant 0 : i32
    %c0_i32_0 = arith.constant 0 : i32
    %c0_i32_1 = arith.constant 0 : i32
    return %c0_i32, %c0_i32_0 : i32, i32
  }
  func.func @transform_7(%arg0: i32) -> (i32, i32, i32) {
    %c0_i32 = arith.constant 0 : i32
    %c0_i32_0 = arith.constant 0 : i32
    %c0_i32_1 = arith.constant 0 : i32
    %c0_i32_2 = arith.constant 0 : i32
    return %c0_i32, %c0_i32_0, %c0_i32_1 : i32, i32, i32
  }
  func.func @transform_8(%arg0: i32) -> (i32, i32, i32) {
    %c0_i32 = arith.constant 0 : i32
    %c0_i32_0 = arith.constant 0 : i32
    %c0_i32_1 = arith.constant 0 : i32
    %c0_i32_2 = arith.constant 0 : i32
    return %c0_i32, %c0_i32_0, %c0_i32_1 : i32, i32, i32
  }
  func.func @transform_9(%arg0: i32) -> (i32, i32, i32) {
    %c0_i32 = arith.constant 0 : i32
    %c0_i32_0 = arith.constant 0 : i32
    %c0_i32_1 = arith.constant 0 : i32
    %c0_i32_2 = arith.constant 0 : i32
    return %c0_i32, %c0_i32_0, %c0_i32_1 : i32, i32, i32
  }
  func.func @transform_10(%arg0: i32) -> (i32, i32, i32) {
    %c0_i32 = arith.constant 0 : i32
    %c0_i32_0 = arith.constant 0 : i32
    %c0_i32_1 = arith.constant 0 : i32
    %c0_i32_2 = arith.constant 0 : i32
    return %c0_i32, %c0_i32_0, %c0_i32_1 : i32, i32, i32
  }
  func.func @transform_11(%arg0: i32) -> (i32, i32, i32) {
    %c0_i32 = arith.constant 0 : i32
    %c0_i32_0 = arith.constant 0 : i32
    %c0_i32_1 = arith.constant 0 : i32
    %c0_i32_2 = arith.constant 0 : i32
    return %c0_i32, %c0_i32_0, %c0_i32_1 : i32, i32, i32
  }
  func.func @transform_12(%arg0: i32) -> (i32, i32, i32) {
    %c0_i32 = arith.constant 0 : i32
    %c0_i32_0 = arith.constant 0 : i32
    %c0_i32_1 = arith.constant 0 : i32
    %c0_i32_2 = arith.constant 0 : i32
    return %c0_i32, %c0_i32_0, %c0_i32_1 : i32, i32, i32
  }
  func.func @transform_13(%arg0: i32) -> (i32, i32, i32) {
    %c0_i32 = arith.constant 0 : i32
    %c0_i32_0 = arith.constant 0 : i32
    %c0_i32_1 = arith.constant 0 : i32
    %c0_i32_2 = arith.constant 0 : i32
    return %c0_i32, %c0_i32_0, %c0_i32_1 : i32, i32, i32
  }
  func.func @transform_14(%arg0: i32) -> (i32, i32, i32) {
    %c0_i32 = arith.constant 0 : i32
    %c0_i32_0 = arith.constant 0 : i32
    %c0_i32_1 = arith.constant 0 : i32
    %c0_i32_2 = arith.constant 0 : i32
    return %c0_i32, %c0_i32_0, %c0_i32_1 : i32, i32, i32
  }
  func.func @transform_15(%arg0: i32) -> (i32, i32, i32) {
    %c0_i32 = arith.constant 0 : i32
    %c0_i32_0 = arith.constant 0 : i32
    %c0_i32_1 = arith.constant 0 : i32
    %c0_i32_2 = arith.constant 0 : i32
    return %c0_i32, %c0_i32_0, %c0_i32_1 : i32, i32, i32
  }
  func.func @transform_16(%arg0: i32) -> (i32, i32, i32) {
    %c0_i32 = arith.constant 0 : i32
    %c0_i32_0 = arith.constant 0 : i32
    %c0_i32_1 = arith.constant 0 : i32
    %c0_i32_2 = arith.constant 0 : i32
    return %c0_i32, %c0_i32_0, %c0_i32_1 : i32, i32, i32
  }
  func.func @transform_17(%arg0: i32) -> (i32, i32) {
    %c0_i32 = arith.constant 0 : i32
    %c0_i32_0 = arith.constant 0 : i32
    %c0_i32_1 = arith.constant 0 : i32
    return %c0_i32, %c0_i32_0 : i32, i32
  }
  func.func @transform_18(%arg0: i32) -> (i32, i32) {
    %c0_i32 = arith.constant 0 : i32
    %c0_i32_0 = arith.constant 0 : i32
    %c0_i32_1 = arith.constant 0 : i32
    return %c0_i32, %c0_i32_0 : i32, i32
  }
  func.func @transform_19(%arg0: i32) -> (i32, i32, i32) {
    %c0_i32 = arith.constant 0 : i32
    %c0_i32_0 = arith.constant 0 : i32
    %c0_i32_1 = arith.constant 0 : i32
    %c0_i32_2 = arith.constant 0 : i32
    return %c0_i32, %c0_i32_0, %c0_i32_1 : i32, i32, i32
  }
  func.func @transform_20(%arg0: i32) -> (i32, i32) {
    %c0_i32 = arith.constant 0 : i32
    %c0_i32_0 = arith.constant 0 : i32
    %c0_i32_1 = arith.constant 0 : i32
    return %c0_i32, %c0_i32_0 : i32, i32
  }
  func.func @transform_21(%arg0: i32) -> (i32, i32, i32) {
    %c0_i32 = arith.constant 0 : i32
    %c0_i32_0 = arith.constant 0 : i32
    %c0_i32_1 = arith.constant 0 : i32
    %c0_i32_2 = arith.constant 0 : i32
    return %c0_i32, %c0_i32_0, %c0_i32_1 : i32, i32, i32
  }
  func.func @transform_22(%arg0: i32) -> (i32, i32) {
    %c0_i32 = arith.constant 0 : i32
    %c0_i32_0 = arith.constant 0 : i32
    %c0_i32_1 = arith.constant 0 : i32
    return %c0_i32, %c0_i32_0 : i32, i32
  }
  func.func @transform_23(%arg0: i32) -> (i32, i32) {
    %c0_i32 = arith.constant 0 : i32
    %c0_i32_0 = arith.constant 0 : i32
    %c0_i32_1 = arith.constant 0 : i32
    return %c0_i32, %c0_i32_0 : i32, i32
  }
  func.func @transform_24(%arg0: i32) -> (i32, i32, i32) {
    %c0_i32 = arith.constant 0 : i32
    %c0_i32_0 = arith.constant 0 : i32
    %c0_i32_1 = arith.constant 0 : i32
    return %arg0, %c0_i32, %c0_i32_0 : i32, i32, i32
  }
}

</mosaic_0001>

<bundles_post_ra>
// kernel: transformer_to_conv_forward.1
= control target key start
LH: loop header
LB: loop body
LE: loop exit
PB: predicated region body
PF: predicated region fallthrough
CT: control target
= control target key end

     0   :  { %s39956_s0 = inlined_call_operand.hbm [shape: f32[2,1,32], index: 0, kind: input, shape index: {}]   ;;  %s39957_s1 = inlined_call_operand.vmem [shape: f32[32,64], index: 1, kind: input, shape index: {}]   ;;  %s39958_s2 = inlined_call_operand.vmem [shape: f32[1,64], index: 2, kind: input, shape index: {}]   ;;  %s39959_s3 = inlined_call_operand.vmem [shape: f32[64,8], index: 3, kind: input, shape index: {}]   ;;  %s39960_s4 = inlined_call_operand.vmem [shape: f32[1,8], index: 4, kind: input, shape index: {}]   ;;  %s39961_s5 = inlined_call_operand.hbm [shape: f32[8,32], index: 5, kind: input, shape index: {}]   ;;  %s39962_s6 = inlined_call_operand.hbm [shape: f32[1,32], index: 6, kind: input, shape index: {}]   ;;  %s39963_s7 = inlined_call_operand.hbm [shape: f32[2,32,32], index: 7, kind: input, shape index: {}]   ;;  %s39964_s8 = inlined_call_operand.hbm [shape: f32[2,1,32], index: 8, kind: input, shape index: {}]   ;;  %s39965_s9 = inlined_call_operand.vmem [shape: f32[2,1,32], index: 9, kind: input, shape index: {}]   ;;  %s39966_s10 = inlined_call_operand.vmem [shape: f32[2,1,32], index: 10, kind: input, shape index: {}]   ;;  %s39967_s11 = inlined_call_operand.hbm [shape: bf16[2,32,2048], index: 11, kind: input, shape index: {}]   ;;  %s39968_s12 = inlined_call_operand.hbm [shape: f32[2,1,2048], index: 12, kind: input, shape index: {}]   ;;  %s39969_s13 = inlined_call_operand.vmem [shape: bf16[2,2048,32], index: 13, kind: input, shape index: {}]   ;;  %s39970_s14 = inlined_call_operand.vmem [shape: f32[2,1,32], index: 14, kind: input, shape index: {}]   ;;  %s39971_s15 = inlined_call_operand.vmem [shape: f32[2,1,32], index: 15, kind: input, shape index: {}]   ;;  %s39972_s16 = inlined_call_operand.vmem [shape: f32[2,1,32], index: 16, kind: input, shape index: {}]   ;;  %s39973_s17 = inlined_call_operand.vmem [shape: bf16[32,22528], index: 17, kind: input, shape index: {}]   ;;  %s39974_s18 = inlined_call_operand.hbm [shape: f32[8,2816], index: 18, kind: input, shape index: {}]   ;;  %s39975_s19 = inlined_call_operand.vmem [shape: f32[9,8,8], index: 19, kind: input, shape index: {}]   ;;  %s39976_s20 = inlined_call_operand.vmem [shape: f32[8,1], index: 20, kind: input, shape index: {}]   ;;  %s39977_s21 = inlined_call_operand.vmem [shape: f32[9,1,8], index: 21, kind: input, shape index: {}]   ;;  %s39978_s22 = inlined_call_operand.<no memory space> [shape: f32[1,1], index: 22, kind: input, shape index: {}]   ;;  %s39979_s23 = inlined_call_operand.vmem [shape: f32[1,2704], index: 23, kind: input, shape index: {}]   ;;  %s39980_s24 = inlined_call_operand.vmem [shape: f32[2,1,2704], index: 24, kind: output, shape index: {}]  }
   0x1   :  { %40056 = sst [smem:[#allocation61_spill]] %s39956_s0  ;;  %v29_v0 = vstv %s39978_s22 }
   0x2   :  { %40057 = sst [smem:[#allocation62_spill]] %s39957_s1  ;;  %30 = vst [vmem:[#allocation4] sm:$0x1] %v29_v0 }
   0x3   :  { %40058 = sst [smem:[#allocation63_spill]] %s39958_s2 }
   0x4   :  { %40059 = sst [smem:[#allocation64_spill]] %s39959_s3 }
   0x5   :  { %40060 = sst [smem:[#allocation65_spill]] %s39960_s4 }
   0x6   :  { %40061 = sst [smem:[#allocation66_spill]] %s39961_s5 }
   0x7   :  { %40062 = sst [smem:[#allocation67_spill]] %s39962_s6 }
   0x8   :  { %40063 = sst [smem:[#allocation68_spill]] %s39963_s7 }
   0x9   :  { %40064 = sst [smem:[#allocation69_spill]] %s39964_s8 }
   0xa   :  { %40065 = sst [smem:[#allocation70_spill]] %s39970_s14 }
   0xb   :  { %40066 = sst [smem:[#allocation71_spill]] %s39971_s15 }
   0xc   :  { %40067 = sst [smem:[#allocation72_spill]] %s39972_s16 }
   0xd   :  { %40068 = sst [smem:[#allocation73_spill]] %s39973_s17 }
   0xe   :  { %40069 = sst [smem:[#allocation74_spill]] %s39975_s19 }
   0xf   :  { %40070 = sst [smem:[#allocation75_spill]] %s39976_s20 }
  0x10   :  { %40071 = sst [smem:[#allocation76_spill]] %s39977_s21 }
  0x11   :  { %40072 = sst [smem:[#allocation77_spill]] %s39979_s23 }
  0x12   :  { %40073 = sst [smem:[#allocation78_spill]] %s39980_s24 }
  0x13   :  { %31 = vsyncpa [#allocation6], 0 }
  0x14   :  { %33 = vsyncpa [#allocation6 + $0x1], 0 }
  0x15   :  { %34 = vsyncpa [#allocation8], 0 }
  0x16   :  { %35 = vsyncpa [#allocation11], 0 }
  0x17   :  { %36 = vsyncpa [#allocation14], 0 }
  0x18   :  { %37 = vsyncpa [#allocation17], 0  ;;  %s33203_s27 = smov 0   ;;  %s33205_s28 = smov 0  }
  0x19   :  { %s33207_s6 = smov 0   ;;  %s33209_s2 = smov 0  }
  0x1a LB: > { %s33047_s22 = smov [#allocation7]   ;;  %s33224_s0 = sadd.s32 4294967295, %s33045_s2   ;;  %s33045_s2 = sphi %s33209_s2, %s40218_s2   ;;  %s33041_s6 = sphi %s33207_s6, %s40217_s6   ;;  %s33037_s28 = sphi %s33205_s28, %s40216_s28   ;;  %s33033_s27 = sphi %s33203_s27, %s40215_s27  }
  0x1b   : > { %s608_s29 = sshll.u32 %s33047_s22, 4  ;;  %p30235_p0 = scmp.ge.s32.totalorder %s33045_s2, 1  ;;  %s609_s29 = int_to_ptr.vmem [resolvable:$true] %s608_s29 }
  0x1c   : > { %p39990_p1 = scmp.eq.s32.totalorder %s33224_s0, 0  ;;  %p583_p2 = scmp.lt.s32.totalorder %s33045_s2, 3 }
  0x1d   : > { %s33048_s30 = smov [#allocation10]   ;;  %s33049_s8 = smov [#allocation13]  }
  0x1e   : > { %p33229_p3 = pnand %p30235_p0, %p583_p2  ;;  %s629_s3 = sshll.u32 %s33048_s30, 4  ;;  %s33235_s3 = int_to_ptr.vmem [resolvable:$true] %s629_s3 }
  0x1f   : > { %s661_s4 = sshll.u32 %s33049_s8, 4  ;;  %s40076_s26 = sld [smem:[#allocation66_spill]]  ;;  %s33243_s4 = int_to_ptr.vmem [resolvable:$true] %s661_s4 }
  0x20   : > { %s40074_s7 = scalar_select %p33229_p3, 1, 0 }
  0x21   : > { %p32359_p4 = pneg %p33229_p3 }
  0x23   : > { %p33239_p5 = pnand %p32359_p4, %p39990_p1 }
  0x25   : > { %s32769_s22 = scalar_lea.hbm %s40076_s26, 128  ;;  %p33253_p7 = pneg %p33239_p5 }
  0x26   : > { %p32770_p6 = scmp.ne.s32.totalorder %s40076_s26, %s32769_s22  ;;  %p32776_p10 = scmp.lt.u32.totalorder %s32769_s22, %s40076_s26 }
  0x28   : > { %p32772_p8 = pnand %p33253_p7, %p32770_p6 }
  0x2a   : > { %p32773_p9 = pneg %p32772_p8 }
  0x2c   : > { %p32778_p11 = pnand %p32776_p10, %p32773_p9 }
  0x2e   : > { %32781 = shalt.err (!%p32778_p11)
}
  0x2f   : > { %s32782_s1 = scalar_lea.vmem %s609_s29, 128  ;;  %p32790_p2 = scmp.lt.s32.totalorder %s609_s29, %s609_s29 }
  0x30   : > { %p32783_p12 = scmp.ne.s32.totalorder %s609_s29, %s32782_s1  ;;  %p32791_p4 = scmp.lt.s32.totalorder %s32782_s1, %s32782_s1 }
  0x32   : > { %p32785_p13 = pnand %p32783_p12, %p33253_p7  ;;  %p32792_p1 = por %p32791_p4, %p32790_p2 }
  0x34   : > { %p32786_p0 = pneg %p32785_p13 }
  0x36   : > { %p32793_p3 = pnand %p32792_p1, %p32786_p0 }
  0x38   : > { %32796 = shalt.err (!%p32793_p3)
}
  0x39   : > { %32362 = dma.hbm_to_vmem [thread:$0]  (!%p33239_p5), %s40076_s26, 128, %s609_s29, [#allocation8]  }
  0x3a   : > { %s40078_s22 = sld [smem:[#allocation68_spill]] }
  0x40   : > { %s32797_s8 = scalar_lea.hbm %s40078_s22, 1024 }
  0x41   : > { %p32798_p6 = scmp.ne.s32.totalorder %s40078_s22, %s32797_s8  ;;  %p32804_p1 = scmp.lt.u32.totalorder %s32797_s8, %s40078_s22 }
  0x43   : > { %p32800_p8 = pnand %p32798_p6, %p33253_p7 }
  0x45   : > { %p32801_p9 = pneg %p32800_p8 }
  0x47   : > { %p32806_p3 = pnand %p32804_p1, %p32801_p9 }
  0x49   : > { %32809 = shalt.err (!%p32806_p3)
}
  0x4a   : > { %s32810_s29 = scalar_lea.vmem %s33235_s3, 1024  ;;  %p32818_p13 = scmp.lt.s32.totalorder %s33235_s3, %s33235_s3 }
  0x4b   : > { %p32811_p10 = scmp.ne.s32.totalorder %s33235_s3, %s32810_s29  ;;  %p32819_p0 = scmp.lt.s32.totalorder %s32810_s29, %s32810_s29 }
  0x4d   : > { %p32813_p11 = pnand %p32811_p10, %p33253_p7  ;;  %p32820_p2 = por %p32819_p0, %p32818_p13 }
  0x4f   : > { %p32814_p12 = pneg %p32813_p11 }
  0x51   : > { %p32821_p4 = pnand %p32820_p2, %p32814_p12 }
  0x53   : > { %32824 = shalt.err (!%p32821_p4)
}
  0x54   : > { %s33050_s19 = smov 128   ;;  %s33051_s17 = smov 8  }
  0x55   : > { %32368 = dma.hbm_to_vmem [thread:$0]  (!%p33239_p5), %s40078_s22, 1024, %s33235_s3, [#allocation11], %s33050_s19, %s33050_s19, %s33051_s17  }
  0x56   : > { %s32825_s5 = scalar_lea.hbm %s39967_s11, 8192 }
  0x57   : > { %p32826_p6 = scmp.ne.s32.totalorder %s39967_s11, %s32825_s5  ;;  %p32832_p1 = scmp.lt.u32.totalorder %s32825_s5, %s39967_s11 }
  0x59   : > { %p32828_p8 = pnand %p32826_p6, %p33253_p7 }
  0x5b   : > { %p32829_p9 = pneg %p32828_p8 }
  0x5d   : > { %p32834_p3 = pnand %p32832_p1, %p32829_p9 }
  0x5f   : > { %32837 = shalt.err (!%p32834_p3)
}
  0x60   : > { %s32838_s3 = scalar_lea.vmem %s33243_s4, 8192  ;;  %p32846_p13 = scmp.lt.s32.totalorder %s33243_s4, %s33243_s4 }
  0x61   : > { %p32839_p10 = scmp.ne.s32.totalorder %s33243_s4, %s32838_s3  ;;  %p32847_p0 = scmp.lt.s32.totalorder %s32838_s3, %s32838_s3 }
  0x63   : > { %p32841_p11 = pnand %p32839_p10, %p33253_p7  ;;  %p32848_p2 = por %p32847_p0, %p32846_p13 }
  0x65   : > { %p32842_p12 = pneg %p32841_p11 }
  0x67   : > { %p32849_p4 = pnand %p32848_p2, %p32842_p12 }
  0x69   : > { %32852 = shalt.err (!%p32849_p4)
}
  0x6a   : > { %s33052_s19 = smov 1024   ;;  %s33053_s26 = smov 64  }
  0x6b   : > { %32374 = dma.hbm_to_vmem [thread:$0]  (!%p33239_p5), %s39967_s11, 8192, %s33243_s4, [#allocation14], %s33052_s19, %s33052_s19, %s33053_s26  }
  0x6c   : > { %s33054_s21 = smov [#allocation9]   ;;  %s33055_s23 = smov [#allocation12]  }
  0x6d   : > { %s619_s24 = sshll.u32 %s33054_s21, 4  ;;  %s642_s5 = sshll.u32 %s33055_s23, 4  ;;  %s620_s24 = int_to_ptr.vmem [resolvable:$true] %s619_s24  ;;  %s643_s5 = int_to_ptr.vmem [resolvable:$true] %s642_s5 }
  0x6e   : > { %s40079_s29 = sld [smem:[#allocation67_spill]] }
  0x74   : > { %s32853_s3 = scalar_lea.hbm %s40079_s29, 16 }
  0x75   : > { %p32854_p6 = scmp.ne.s32.totalorder %s40079_s29, %s32853_s3  ;;  %p32860_p1 = scmp.lt.u32.totalorder %s32853_s3, %s40079_s29 }
  0x77   : > { %p32856_p8 = pnand %p32854_p6, %p33253_p7 }
  0x79   : > { %p32857_p9 = pneg %p32856_p8 }
  0x7b   : > { %p32862_p3 = pnand %p32860_p1, %p32857_p9 }
  0x7d   : > { %32865 = shalt.err (!%p32862_p3)
}
  0x7e   : > { %s32866_s4 = scalar_lea.vmem %s620_s24, 16  ;;  %s32873_s19 = scalar_lea.vmem %s620_s24, 32 }
  0x7f   : > { %p32867_p10 = scmp.ne.s32.totalorder %s620_s24, %s32866_s4  ;;  %p32874_p13 = scmp.lt.s32.totalorder %s620_s24, %s620_s24 }
  0x80   : > { %p32875_p0 = scmp.lt.s32.totalorder %s32873_s19, %s32866_s4 }
  0x81   : > { %p32869_p11 = pnand %p32867_p10, %p33253_p7 }
  0x82   : > { %p32876_p2 = por %p32875_p0, %p32874_p13 }
  0x83   : > { %p32870_p12 = pneg %p32869_p11 }
  0x85   : > { %p32877_p4 = pnand %p32876_p2, %p32870_p12 }
  0x87   : > { %32880 = shalt.err (!%p32877_p4)
}
  0x88   : > { %32365 = dma.hbm_to_vmem [thread:$0]  (!%p33239_p5), %s40079_s29, 16, %s620_s24, [#allocation8]  }
  0x89   : > { %s40080_s26 = sld [smem:[#allocation69_spill]] }
  0x8f   : > { %s32881_s17 = scalar_lea.hbm %s40080_s26, 32 }
  0x90   : > { %p32882_p6 = scmp.ne.s32.totalorder %s40080_s26, %s32881_s17  ;;  %p32888_p1 = scmp.lt.u32.totalorder %s32881_s17, %s40080_s26 }
  0x92   : > { %p32884_p8 = pnand %p32882_p6, %p33253_p7 }
  0x94   : > { %p32885_p9 = pneg %p32884_p8 }
  0x96   : > { %p32890_p3 = pnand %p32888_p1, %p32885_p9 }
  0x98   : > { %32893 = shalt.err (!%p32890_p3)
}
  0x99   : > { %s32894_s1 = scalar_lea.vmem %s643_s5, 32  ;;  %p32902_p13 = scmp.lt.s32.totalorder %s643_s5, %s643_s5 }
  0x9a   : > { %p32895_p10 = scmp.ne.s32.totalorder %s643_s5, %s32894_s1  ;;  %p32903_p0 = scmp.lt.s32.totalorder %s32894_s1, %s32894_s1 }
  0x9c   : > { %p32897_p11 = pnand %p32895_p10, %p33253_p7  ;;  %p32904_p2 = por %p32903_p0, %p32902_p13 }
  0x9e   : > { %p32898_p12 = pneg %p32897_p11 }
  0xa0   : > { %p32905_p4 = pnand %p32904_p2, %p32898_p12 }
  0xa2   : > { %32908 = shalt.err (!%p32905_p4)
}
  0xa3   : > { %s33056_s24 = smov 16   ;;  %s33057_s3 = smov 1  }
  0xa4   : > { %32371 = dma.hbm_to_vmem [thread:$0]  (!%p33239_p5), %s40080_s26, 32, %s643_s5, [#allocation11], %s33056_s24, %s33056_s24, %s33057_s3  }
  0xa5   : > { %s33058_s16 = smov [#allocation15]   ;;  %s32909_s17 = scalar_lea.hbm %s39968_s12, 512 }
  0xa6   : > { %s674_s22 = sshll.u32 %s33058_s16, 4  ;;  %p32910_p6 = scmp.ne.s32.totalorder %s39968_s12, %s32909_s17  ;;  %s675_s22 = int_to_ptr.vmem [resolvable:$true] %s674_s22 }
  0xa7   : > { %p32916_p1 = scmp.lt.u32.totalorder %s32909_s17, %s39968_s12 }
  0xa8   : > { %p32912_p8 = pnand %p32910_p6, %p33253_p7 }
  0xaa   : > { %p32913_p9 = pneg %p32912_p8 }
  0xac   : > { %p32918_p3 = pnand %p32916_p1, %p32913_p9 }
  0xae   : > { %32921 = shalt.err (!%p32918_p3)
}
  0xaf   : > { %s32922_s5 = scalar_lea.vmem %s675_s22, 512  ;;  %p32930_p13 = scmp.lt.s32.totalorder %s675_s22, %s675_s22 }
  0xb0   : > { %p32923_p10 = scmp.ne.s32.totalorder %s675_s22, %s32922_s5  ;;  %p32931_p0 = scmp.lt.s32.totalorder %s32922_s5, %s32922_s5 }
  0xb2   : > { %p32925_p11 = pnand %p32923_p10, %p33253_p7  ;;  %p32932_p2 = por %p32931_p0, %p32930_p13 }
  0xb4   : > { %p32926_p12 = pneg %p32925_p11 }
  0xb6   : > { %p32933_p4 = pnand %p32932_p2, %p32926_p12 }
  0xb8   : > { %32936 = shalt.err (!%p32933_p4)
}
  0xb9   : > { %s33059_s1 = smov 256   ;;  %s33060_s19 = smov [#allocation16]  }
  0xba   : > { %32377 = dma.hbm_to_vmem [thread:$0]  (!%p33239_p5), %s39968_s12, 512, %s675_s22, [#allocation14], %s33059_s1, %s33059_s1, %s33056_s24  }
  0xbb   : > { %s703_s16 = sshll.u32 %s33060_s19, 4  ;;  %s32937_s17 = scalar_lea.hbm %s39974_s18, 2816  ;;  %s704_s16 = int_to_ptr.vmem [resolvable:$true] %s703_s16 }
  0xbc   : > { %p32938_p6 = scmp.ne.s32.totalorder %s39974_s18, %s32937_s17  ;;  %p32944_p1 = scmp.lt.u32.totalorder %s32937_s17, %s39974_s18 }
  0xbe   : > { %p32940_p8 = pnand %p32938_p6, %p33253_p7 }
  0xc0   : > { %p32941_p9 = pneg %p32940_p8 }
  0xc2   : > { %p32946_p3 = pnand %p32944_p1, %p32941_p9 }
  0xc4   : > { %32949 = shalt.err (!%p32946_p3)
}
  0xc5   : > { %s32950_s24 = scalar_lea.vmem %s704_s16, 2816  ;;  %p32958_p13 = scmp.lt.s32.totalorder %s704_s16, %s704_s16 }
  0xc6   : > { %p32951_p10 = scmp.ne.s32.totalorder %s704_s16, %s32950_s24  ;;  %p32959_p0 = scmp.lt.s32.totalorder %s32950_s24, %s32950_s24 }
  0xc8   : > { %p32953_p11 = pnand %p32951_p10, %p33253_p7  ;;  %p32960_p2 = por %p32959_p0, %p32958_p13 }
  0xca   : > { %p32954_p12 = pneg %p32953_p11 }
  0xcc   : > { %p32961_p4 = pnand %p32960_p2, %p32954_p12 }
  0xce   : > { %32964 = shalt.err (!%p32961_p4)
}
  0xcf   : > { %32380 = dma.hbm_to_vmem [thread:$0]  (!%p33239_p5), %s39974_s18, 2816, %s704_s16, [#allocation17]  }
  0xd0   : > { %s33388_s30 = sadd.s32 1, %s33045_s2   ;;  %s50_s25 = sadd.s32 1, %s33041_s6 }
  0xd1   : > { %s47_s1 = ssub.s32 %s33045_s2, %s33388_s30  ;;  %p57_p7 = scmp.ne.s32.totalorder %s33041_s6, %s33037_s28 }
  0xd2   : > { %p48_p6 = scmp.eq.s32.totalorder %s47_s1, 0  ;;  %p58_p8 = scmp.eq.s32.totalorder %s33045_s2, 0 }
  0xd3   : > { %p63_p9 = scmp.ne.s32.totalorder %s33037_s28, %s33033_s27  ;;  %p32392_p1 = scmp.lt.s32.totalorder %s33045_s2, 2 }
  0xd4   : > { %s33400_s3 = scalar_select %p48_p6, %s33041_s6, %s50_s25  }
  0xd5   : > { %p59_p3 = por %p58_p8, %p57_p7  ;;  %p40081_p10 = scmp.eq.s32.totalorder %s33224_s0, 0 }
  0xd6   : > { %s729_s19 = sand.u32 1, %s33041_s6   ;;  %s30244_s16 = sshll.u32 %s33045_s2, 4 }
  0xd7   : > { %p33404_p11 = por %p40081_p10, %p63_p9  ;;  %s40083_s17 = sld [smem:[#allocation61_spill]] }
  0xd8   : > { %s732_s27 = scalar_lea.vmem [#allocation5], %s729_s19  ;;  %p33417_p5 = pnand %p32392_p1, %p59_p3 }
  0xd9   : > { %s739_s21 = sshll.u32 %s732_s27, 4  ;;  %s730_s2 = scalar_lea.sflag [#allocation6], %s729_s19  ;;  %s33415_s21 = int_to_ptr.vmem [resolvable:$true] %s739_s21 }
  0xda   : > { %p32967_p13 = pneg %p33417_p5 }
  0xdd   : > { %s33413_s20 = scalar_lea.hbm %s40083_s17, %s30244_s16  ;;  %s32970_s5 = scalar_lea.hbm %s40083_s17, 32 }
  0xde   : > { %s32965_s8 = scalar_lea.hbm %s33413_s20, 16  ;;  %p32971_p4 = scmp.lt.u32.totalorder %s33413_s20, %s40083_s17 }
  0xdf   : > { %p32966_p12 = scmp.ne.s32.totalorder %s33413_s20, %s32965_s8  ;;  %p32972_p7 = scmp.lt.u32.totalorder %s32970_s5, %s32965_s8 }
  0xe0   : > { %p32974_p8 = scmp.lt.u32.totalorder %s32965_s8, %s33413_s20 }
  0xe1   : > { %p32968_p0 = pnand %p32967_p13, %p32966_p12  ;;  %p32973_p6 = por %p32972_p7, %p32971_p4 }
  0xe3   : > { %p32969_p2 = pneg %p32968_p0  ;;  %p32975_p9 = por %p32974_p8, %p32973_p6 }
  0xe5   : > { %p32976_p1 = pnand %p32975_p9, %p32969_p2 }
  0xe7   : > { %32979 = shalt.err (!%p32976_p1)
}
  0xe8   : > { %s32980_s19 = scalar_lea.vmem %s33415_s21, 16  ;;  %s33061_s16 = smov [#allocation5]  }
  0xe9   : > { %p32981_p3 = scmp.ne.s32.totalorder %s33415_s21, %s32980_s19  ;;  %s32985_s14 = sshll.u32 %s33061_s16, 4  ;;  %s32986_s14 = int_to_ptr.vmem [resolvable:$false] %s32985_s14 }
  0xea   : > { %s32987_s15 = scalar_lea.vmem %s32986_s14, 32  ;;  %p32988_p0 = scmp.lt.s32.totalorder %s33415_s21, %s32986_s14 }
  0xeb   : > { %p32983_p10 = pnand %p32981_p3, %p32967_p13  ;;  %p32989_p4 = scmp.lt.s32.totalorder %s32987_s15, %s32980_s19 }
  0xed   : > { %p32984_p12 = pneg %p32983_p10  ;;  %p32990_p7 = por %p32989_p4, %p32988_p0 }
  0xef   : > { %p32991_p6 = pnand %p32990_p7, %p32984_p12 }
  0xf1   : > { %32994 = shalt.err (!%p32991_p6)
}
  0xf2   : > { %32384 = dma.hbm_to_vmem [thread:$0]  (!%p33417_p5), %s33413_s20, 16, %s33415_s21, %s730_s2  }
  0xf3   : > { %p40085_p2 = scmp.ne.s32.totalorder %s40074_s7, 0 }
  0xf5   : > { %748 = sbr.rel (%p40085_p2) target bundleno = 5711 (0x164f), region = 116 }
  0xfc   : > { %s750_s27 = sand.u32 1, %s33037_s28  }
  0xfd   : > { %s751_s8 = scalar_lea.sflag [#allocation6], %s750_s27  ;;  %s33449_s24 = scalar_lea.vmem [#allocation5], %s750_s27 }
  0xfe   : > { %33012 = dma.done.wait (%p33404_p11), %s751_s8, 16  }
  0xff   : > { %33014 = vsyncadd (%p33404_p11), %s751_s8, 4294967280  ;;  %p40086_p13 = scmp.eq.s32.totalorder %s33224_s0, 0 }
 0x101   : > { %33016 = dma.done.wait (%p40086_p13), [#allocation8], 144   ;;  %p40087_p8 = pmov %p40086_p13 }
 0x103   : > { %33018 = vsyncadd (%p40087_p8), [#allocation8], 4294967152  ;;  %p40088_p5 = pmov %p40087_p8 }
 0x105   : > { %33020 = dma.done.wait (%p40088_p5), [#allocation11], 1056   ;;  %p40089_p9 = pmov %p40088_p5 }
 0x106   : > { %p40090_p1 = pmov %p40088_p5 }
 0x107   : > { %33022 = vsyncadd (%p40089_p9), [#allocation11], 4294966240 }
 0x108   : > { %33024 = dma.done.wait (%p40090_p1), [#allocation14], 8704   ;;  %p40091_p3 = pmov %p40090_p1 }
 0x109   : > { %p40092_p11 = pmov %p40090_p1 }
 0x10a   : > { %33026 = vsyncadd (%p40091_p3), [#allocation14], 4294958592 }
 0x10b   : > { %33028 = dma.done.wait (%p40092_p11), [#allocation17], 2816   ;;  %p40093_p10 = pmov %p40090_p1 }
 0x10c   : > { %v33062_v1 = vmov 0.0|0.0   ;;  %vm33063_vm0 = vmmov 0   ;;  %v33064_v2 = vmov 0.0   ;;  %s40094_s20 = sld [smem:[#allocation62_spill]]  ;;  %vm855_vm1 = vcmask 261120   ;;  %s40095_s16 = sld [smem:[#allocation64_spill]] }
 0x10d   : > { %33030 = vsyncadd (%p40093_p10), [#allocation17], 4294964480  ;;  %31946 = vmatprep.subr.bf16.mxu0 %v33062_v1  ;;  %31897 = vmatprep.mubr.msk.f32.mxu0 %vm33063_vm0, %v33064_v2  ;;  %5301 = vst [vmem:[#allocation2] sm:$0xff] %v33064_v2  ;;  %v849_v11 = vld [vmem:[%s33449_s24] sm:$0x1]  ;;  %s40096_s15 = sld [smem:[#allocation63_spill]] }
 0x10e   : > { %5302 = vst [vmem:[#allocation2 + $0x8] sm:$0xff] %v33064_v2  ;;  %5303 = vst [vmem:[#allocation2 + $0x10] sm:$0xff] %v33064_v2  ;;  %31919 = vmatprep.subr.mxu1 %v33064_v2  ;;  %31921 = vmatprep.mubr.msk.f32.mxu1 %vm33063_vm0, %v33064_v2  ;;  %vm939_vm2 = vcmask 523264   ;;  %v1014_v28 = vld [vmem:[#allocation7] sm:$0xff]  ;;  %v1091_v29 = vld [vmem:[#allocation10] sm:$0xff]  ;;  %s40097_s7 = sld [smem:[#allocation65_spill]] }
 0x10f   : > { %5304 = vst [vmem:[#allocation2 + $0x18] sm:$0xff] %v33064_v2  ;;  %5305 = vst [vmem:[#allocation2 + $0x20] sm:$0xff] %v33064_v2  ;;  %31920 = vmatpush3.msra.mxu1 %v1014_v28  ;;  %v1092_v30 = vld [vmem:[#allocation10 + $0x8] sm:$0xff]  ;;  %vm1016_vm3 = vcmask 64512   ;;  %v1093_v37 = vld [vmem:[#allocation10 + $0x10] sm:$0xff]  ;;  %vm1172_vm4 = vcmask 253952  }
 0x110   : > { %5306 = vst [vmem:[#allocation2 + $0x28] sm:$0xff] %v33064_v2  ;;  %5307 = vst [vmem:[#allocation2 + $0x30] sm:$0xff] %v33064_v2  ;;  %v31965_v31 = vpack.c.bf16 %v1092_v30, %v1091_v29  ;;  %v1094_v38 = vld [vmem:[#allocation10 + $0x18] sm:$0xff]  ;;  %v1095_v45 = vld [vmem:[#allocation12] sm:$0x1]  ;;  %s40106_s25 = sld [smem:[#allocation70_spill]] }
 0x111   : > { %5308 = vst [vmem:[#allocation2 + $0x38] sm:$0xff] %v33064_v2  ;;  %5309 = vst [vmem:[#allocation2 + $0x40] sm:$0xff] %v33064_v2  ;;  %v31968_v39 = vpack.c.bf16 %v1094_v38, %v1093_v37  ;;  %v1015_v40 = vld [vmem:[#allocation9] sm:$0x1]  ;;  %v1190_v56 = vld [vmem:[#allocation13] sm:$0xff]  ;;  %s40107_s14 = sld [smem:[#allocation71_spill]] }
 0x112   : > { %5310 = vst [vmem:[#allocation2 + $0x48] sm:$0xff] %v33064_v2  ;;  %5311 = vst [vmem:[#allocation2 + $0x50] sm:$0xff] %v33064_v2  ;;  %v850_v3 = vld [vmem:[%s40094_s20] sm:$0xff]  ;;  %v851_v4 = vld [vmem:[%s40094_s20 + $0x8] sm:$0xff]  ;;  %s40108_s8 = sld [smem:[#allocation72_spill]]  ;;  %s33067_s23 = smov 52  }
 0x113   : > { %5312 = vst [vmem:[#allocation2 + $0x58] sm:$0xff] %v33064_v2  ;;  %5313 = vst [vmem:[#allocation2 + $0x60] sm:$0xff] %v33064_v2  ;;  %v852_v5 = vld [vmem:[%s40094_s20 + $0x10] sm:$0xff]  ;;  %v31947_v6 = vpack.c.bf16 %v851_v4, %v850_v3  ;;  %v853_v7 = vld [vmem:[%s40094_s20 + $0x18] sm:$0xff]  ;;  %s33068_s2 = smov 53   ;;  %s33069_s24 = smov 1  }
 0x114   : > { %5314 = vst [vmem:[#allocation2 + $0x68] sm:$0xff] %v33064_v2  ;;  %5315 = vst [vmem:[#allocation2 + $0x70] sm:$0xff] %v33064_v2  ;;  %v31950_v8 = vpack.c.bf16 %v853_v7, %v852_v5  ;;  %v930_v9 = vld [vmem:[%s40095_s16] sm:$0xff]  ;;  %v931_v10 = vld [vmem:[%s40095_s16 + $0x8] sm:$0xff]  ;;  %s33070_s22 = smov 51   ;;  %s33071_s5 = smov 127  }
 0x115   : > { %5316 = vst [vmem:[#allocation2 + $0x78] sm:$0xff] %v33064_v2  ;;  %5317 = vst [vmem:[#allocation2 + $0x80] sm:$0xff] %v33064_v2  ;;  %31948 = vmatpush3.bf16.msra.mxu0 %v31947_v6  ;;  %v932_v12 = vld [vmem:[%s40095_s16 + $0x10] sm:$0xff]  ;;  %v933_v13 = vld [vmem:[%s40095_s16 + $0x18] sm:$0xff]  ;;  %v31953_v14 = vpack.c.bf16 %v931_v10, %v930_v9  ;;  %vm13724_vm6 = vcmask 424960   ;;  %s40052_s27 = smov 77  }
 0x116   : > { %5318 = vst [vmem:[#allocation2 + $0x88] sm:$0xff] %v33064_v2  ;;  %5319 = vst [vmem:[#allocation2 + $0x90] sm:$0xff] %v33064_v2  ;;  %31949 = vmatprep.subr.bf16.mxu0 %v33062_v1  ;;  %v934_v15 = vld [vmem:[%s40095_s16 + $0x20] sm:$0xff]  ;;  %v935_v16 = vld [vmem:[%s40095_s16 + $0x28] sm:$0xff]  ;;  %v31956_v17 = vpack.c.bf16 %v933_v13, %v932_v12  ;;  %s40050_s4 = smov 76   ;;  %vm14596_vm7 = vcmask 433152  }
 0x117   : > { %5320 = vst [vmem:[#allocation2 + $0x98] sm:$0xff] %v33064_v2  ;;  %5321 = vst [vmem:[#allocation2 + $0xa0] sm:$0xff] %v33064_v2  ;;  %v31959_v18 = vpack.c.bf16 %v935_v16, %v934_v15  ;;  %v936_v19 = vld [vmem:[%s40095_s16 + $0x30] sm:$0xff]  ;;  %v937_v20 = vld [vmem:[%s40095_s16 + $0x38] sm:$0xff]  ;;  %vm15470_vm8 = vcmask 416768   ;;  %s40048_s1 = smov 75  }
 0x118   : > { %5322 = vst [vmem:[#allocation2 + $0xa8] sm:$0xff] %v33064_v2  ;;  %5323 = vst [vmem:[#allocation2 + $0xb0] sm:$0xff] %v33064_v2  ;;  %v31962_v21 = vpack.c.bf16 %v937_v20, %v936_v19  ;;  %v854_v22 = vld [vmem:[%s40096_s15] sm:$0x1]  ;;  %v1191_v58 = vld [vmem:[#allocation13 + $0x8] sm:$0xff]  ;;  %s40116_s15 = sld [smem:[#allocation74_spill]] }
 0x119   : > { %5346 = vst [vmem:[#allocation3 + $0xb0] sm:$0xff] %v33064_v2  ;;  %31951 = vmatpush3.bf16.msra.mxu0 %v31950_v8  ;;  %v33522_v27 = vld [vmem:[#allocation2] sm:$0xff]  ;;  %v1192_v9 = vld [vmem:[#allocation13 + $0x10] sm:$0xff]  ;;  %v1201_v13 = vld [vmem:[#allocation13 + $0x58] sm:$0xff]  ;;  %vm16414_vm9 = vcmask 7168   ;;  %vm18119_vm10 = vcmask 1039360  }
 0x11a   : > { %31952 = vmatprep.subr.bf16.mxu0 %v33062_v1  ;;  %v938_v32 = vld [vmem:[%s40097_s7] sm:$0x1]  ;;  %v1199_v60 = vld [vmem:[#allocation13 + $0x48] sm:$0xff]  ;;  %v1200_v10 = vld [vmem:[#allocation13 + $0x50] sm:$0xff]  ;;  %s40109_s7 = sld [smem:[#allocation73_spill]]  ;;  %vm19015_vm11 = vcmask 629760  }
 0x11b   : > { %v1198_v57 = vld [vmem:[#allocation13 + $0x40] sm:$0xff]  ;;  %v30259_v62 = vcombine.low %v1191_v58, %v1199_v60  ;;  %v30260_v63 = vcombine.high %v1191_v58, %v1199_v60  ;;  %v1207_v3 = vld [vmem:[#allocation13 + $0x88] sm:$0xff]  ;;  %v30262_v12 = vcombine.high %v1192_v9, %v1200_v10  ;;  %v30261_v15 = vcombine.low %v1192_v9, %v1200_v10  ;;  %v1216_v28 = vld [vmem:[#allocation13 + $0xd0] sm:$0xff]  ;;  %s40173_s21 = sld [smem:[#allocation77_spill]]  ;;  %p844_p12 = scmp.lt.s32.totalorder %s33224_s0, 1 }
 0x11c   : > { %31898 = vmatmul.mubr.msk.f32.vlgmr.msra.gmra.mrb[0].mxu0 %vm855_vm1, %v849_v11  ;;  %v30258_v59 = vcombine.high %v1190_v56, %v1198_v57  ;;  %v30257_v61 = vcombine.low %v1190_v56, %v1198_v57  ;;  %v1206_v0 = vld [vmem:[#allocation13 + $0x80] sm:$0xff]  ;;  %v1215_v5 = vld [vmem:[#allocation13 + $0xc8] sm:$0xff]  ;;  %v1193_v11 = vld [vmem:[#allocation13 + $0x18] sm:$0xff]  ;;  %vm19911_vm12 = vcmask 621568   ;;  %vm20807_vm13 = vcmask 613376  }
 0x11d   : > { %31954 = vmatpush3.bf16.msra.mxu0 %v31953_v14  ;;  %31916 = vmatprep.mubr.msk.f32.mxu0 %vm33063_vm0, %v33064_v2  ;;  %v1214_v2 = vld [vmem:[#allocation13 + $0xc0] sm:$0xff]  ;;  %v30275_v7 = vcombine.low %v1207_v3, %v1215_v5  ;;  %v30276_v8 = vcombine.high %v1207_v3, %v1215_v5  ;;  %v40000_v14 = vmov 0   ;;  %v30263_v16 = vcombine.low %v1193_v11, %v1201_v13  ;;  %v1209_v29 = vld [vmem:[#allocation13 + $0x98] sm:$0xff]  ;;  %v1195_v37 = vld [vmem:[#allocation13 + $0x28] sm:$0xff]  ;;  %s40220_s0 = smov (!%p844_p12, %s33224_s0), 1 }
 0x11e   : > { %31955 = vmatprep.subr.bf16.mxu0 %v33062_v1  ;;  %1469 = vmatprep.subr.bf16.mxu1 %v30258_v59  ;;  %v30274_v4 = vcombine.high %v1206_v0, %v1214_v2  ;;  %v30273_v6 = vcombine.low %v1206_v0, %v1214_v2  ;;  %v1217_v30 = vld [vmem:[#allocation13 + $0xd8] sm:$0xff]  ;;  %v1203_v38 = vld [vmem:[#allocation13 + $0x68] sm:$0xff]  ;;  %v1212_v59 = vld [vmem:[#allocation13 + $0xb0] sm:$0xff] }
 0x11f   : > { %32459 = vset.pattern.permute.xlu0 %v40000_v14  ;;  %v1220_v60 = vld [vmem:[#allocation13 + $0xf0] sm:$0xff] }
 0x120   : > { %v30286_v2 = vcombine.high %v1212_v59, %v1220_v60  ;;  %v32463_v9 = vld [vmem:[%s39969_s13 + $0x8] sm:$0xff]   ;;  %v32464_v10 = vld [vmem:[%s39969_s13 + $0x50] sm:$0xff]  }
 0x121   : > { %31957 = vmatpush3.bf16.msra.mxu0 %v31956_v17  ;;  %v30264_v17 = vcombine.high %v1193_v11, %v1201_v13  ;;  %v32465_v11 = vld [vmem:[%s39969_s13 + $0x10] sm:$0xff]   ;;  %v32467_v13 = vld [vmem:[%s39969_s13 + $0x18] sm:$0xff]  }
 0x122   : > { %31958 = vmatprep.subr.bf16.mxu0 %v33062_v1 }
 0x125   : > { %31960 = vmatpush3.bf16.msra.mxu0 %v31959_v18 }
 0x126   : > { %31961 = vmatprep.subr.bf16.mxu0 %v33062_v1 }
 0x129   : > { %31963 = vmatpush3.bf16.msra.mxu0 %v31962_v21 }
 0x12a   : > { %31964 = vmatprep.subr.bf16.mxu0 %v33062_v1 }
 0x1ef   : > { %v925_v23 = vpop.f32.mrb[0].mxu0 }
 0x1f0   : > { %v926_v24 = vadd.f32 %v925_v23, %v854_v22  ;;  %v31899_v25 = vpop.f32.mrb[1].mxu0  ;;  %v1170_v22 = vld [vmem:[%s39965_s9] sm:$0x1] }
 0x1f2   : > { %v929_v26 = vmax.f32 %v926_v24, 0.0  ;;  %v1171_v24 = vld [vmem:[%s39966_s10] sm:$0x1] }
 0x1f4   : > { %31917 = vmatmul.mubr.msk.f32.vlgmr.msra.gmra.mrb[2].mxu0 %vm939_vm2, %v929_v26  ;;  %v1208_v26 = vld [vmem:[#allocation13 + $0x90] sm:$0xff] }
 0x1f5   : > { %31932 = vmatprep.mubr.msk.f32.mxu0 %vm33063_vm0, %v33522_v27  ;;  %31966 = vmatpush3.bf16.msra.mxu0 %v31965_v31 }
 0x1f6   : > { %31967 = vmatprep.subr.bf16.mxu0 %v33062_v1 }
 0x1f9   : > { %31969 = vmatpush3.bf16.msra.mxu0 %v31968_v39  ;;  %v30277_v39 = vcombine.low %v1208_v26, %v1216_v28 }
 0x1fa   : > { %1510 = vmatprep.subr.bf16.mxu0 %v30260_v63 }
 0x2c7   : > { %v1009_v33 = vpop.f32.mrb[2].mxu0 }
 0x2c8   : > { %v1010_v34 = vadd.f32 %v1009_v33, %v938_v32  ;;  %v31918_v35 = vpop.f32.mrb[3].mxu0  ;;  %v30278_v33 = vcombine.high %v1208_v26, %v1216_v28  ;;  %v32479_v26 = vld [vmem:[%s39969_s13 + $0x308] sm:$0xff]   ;;  %v32480_v28 = vld [vmem:[%s39969_s13 + $0xc0] sm:$0xff]  }
 0x2c9   : > { %v1194_v35 = vld [vmem:[#allocation13 + $0x20] sm:$0xff] }
 0x2ca   : > { %v1013_v36 = vmax.f32 %v1010_v34, 0.0  ;;  %v30280_v34 = vcombine.high %v1209_v29, %v1217_v30 }
 0x2cc   : > { %31922 = vmatmul.mubr.msk.f32.vlgmr.msra.gmra.mrb[0].mxu1 %vm1016_vm3, %v1013_v36  ;;  %v1202_v36 = vld [vmem:[#allocation13 + $0x60] sm:$0xff] }
 0x2cd   : > { %1470 = vmatpush1.bf16.msra.mxu1 %v30257_v61  ;;  %1501 = vmatprep.mubr.bf16.mxu1 %v40000_v14  ;;  %v1213_v61 = vld [vmem:[#allocation13 + $0xb8] sm:$0xff] }
 0x2ce   : > { %1471 = vmatprep.subr.bf16.mxu1 %v30274_v4  ;;  %v30285_v4 = vcombine.low %v1212_v59, %v1220_v60 }
 0x2d1   : > { %1472 = vmatpush1.bf16.msra.mxu1 %v30273_v6  ;;  %v32460_v6 = vld [vmem:[%s39969_s13 + $0x40] sm:$0xff]  }
 0x2d2   : > { %1551 = vmatprep.subr.bf16.mxu1 %v30262_v12  ;;  %v32466_v12 = vld [vmem:[%s39969_s13 + $0x58] sm:$0xff]  }
 0x39f   : > { %v1086_v41 = vpop.f32.mrb[0].mxu1 }
 0x3a0   : > { %v31923_v42 = vpop.f32.mrb[1].mxu1  ;;  %v1087_v43 = vadd.f32 %v1086_v41, %v1015_v40  ;;  %v30279_v40 = vcombine.low %v1209_v29, %v1217_v30  ;;  %v30266_v41 = vcombine.high %v1194_v35, %v1202_v36  ;;  %v32482_v29 = vld [vmem:[%s39969_s13 + $0x350] sm:$0xff]  }
 0x3a1   : > { %v30268_v42 = vcombine.high %v1195_v37, %v1203_v38  ;;  %v32483_v30 = vld [vmem:[%s39969_s13 + $0x310] sm:$0xff]  }
 0x3a2   : > { %v1090_v44 = vmax.f32 %v1087_v43, 0.0  ;;  %v1210_v43 = vld [vmem:[#allocation13 + $0xa0] sm:$0xff] }
 0x3a4   : > { %31933 = vmatmul.mubr.msk.f32.vlgmr.msra.gmra.mrb[4].mxu0 %vm855_vm1, %v1090_v44 }
 0x3a5   : > { %1511 = vmatpush1.bf16.msra.mxu0 %v30259_v62  ;;  %1542 = vmatprep.mubr.bf16.mxu0 %v40000_v14  ;;  %v1221_v62 = vld [vmem:[#allocation13 + $0xf8] sm:$0xff] }
 0x3a6   : > { %1512 = vmatprep.subr.bf16.mxu0 %v30276_v8  ;;  %v30288_v3 = vcombine.high %v1213_v61, %v1221_v62  ;;  %v30287_v5 = vcombine.low %v1213_v61, %v1221_v62  ;;  %v32462_v8 = vld [vmem:[%s39969_s13 + $0x48] sm:$0xff]  }
 0x3a9   : > { %1513 = vmatpush1.bf16.msra.mxu0 %v30275_v7  ;;  %v32461_v7 = vld [vmem:[%s39969_s13] sm:$0xff]  }
 0x3aa   : > { %1592 = vmatprep.subr.bf16.mxu0 %v30264_v17  ;;  %v32470_v17 = vld [vmem:[%s39969_s13 + $0x68] sm:$0xff]  }
 0x477   : > { %v1165_v46 = vpop.f32.mrb[4].mxu0 }
 0x478   : > { %v31934_v47 = vpop.f32.mrb[5].mxu0  ;;  %v1166_v48 = vadd.f32 %v1165_v46, %v1095_v45  ;;  %v1211_v45 = vld [vmem:[#allocation13 + $0xa8] sm:$0xff] }
 0x479   : > { %v1219_v46 = vld [vmem:[#allocation13 + $0xe8] sm:$0xff]  ;;  %v30265_v47 = vcombine.low %v1194_v35, %v1202_v36 }
 0x47a   : > { %v1169_v49 = vadd.f32 %v1166_v48, %v1090_v44  ;;  %v1218_v44 = vld [vmem:[#allocation13 + $0xe0] sm:$0xff]  ;;  %v30267_v48 = vcombine.low %v1195_v37, %v1203_v38  ;;  %v30283_v56 = vcombine.low %v1211_v45, %v1219_v46  ;;  %v32494_v36 = vld [vmem:[%s39969_s13 + $0x368] sm:$0xff]   ;;  %v32498_v38 = vld [vmem:[%s39969_s13 + $0x370] sm:$0xff]  }
 0x47b   : > { %v32491_v35 = vld [vmem:[%s39969_s13 + $0x320] sm:$0xff]   ;;  %v32495_v37 = vld [vmem:[%s39969_s13 + $0x328] sm:$0xff]  }
 0x47c   : > { %v1173_v50 = vsel %vm1172_vm4, %v1169_v49, 0.0 }
 0x47d   : > { %1174 = vadd.xlane.f32.xlu0 %v1173_v50  ;;  %v30284_v50 = vcombine.high %v1211_v45, %v1219_v46  ;;  %v33677_v45 = vld [vmem:[#allocation15] sm:$0xff] }
 0x50a   : > { %v1175_v51 = vpop.xlane.xlu0 %1174 }
 0x50b   : > { %v1177_v52 = vmul.f32 0.03125, %v1175_v51  ;;  %v1196_v51 = vld [vmem:[#allocation13 + $0x30] sm:$0xff] }
 0x50d   : > { %v1178_v53 = vsub.f32 %v1169_v49, %v1177_v52  ;;  %v30282_v49 = vcombine.high %v1210_v43, %v1218_v44  ;;  %v1204_v52 = vld [vmem:[#allocation13 + $0x70] sm:$0xff] }
 0x50e   : > { %v30270_v57 = vcombine.high %v1196_v51, %v1204_v52  ;;  %v30269_v63 = vcombine.low %v1196_v51, %v1204_v52 }
 0x50f   : > { %v1179_v54 = vmul.f32 %v1178_v53, %v1178_v53 }
 0x511   : > { %v1180_v55 = vsel %vm1172_vm4, %v1179_v54, 0.0  ;;  %v1205_v54 = vld [vmem:[#allocation13 + $0x78] sm:$0xff] }
 0x512   : > { %1181 = vadd.xlane.f32.xlu0 %v1180_v55  ;;  %v30281_v55 = vcombine.low %v1210_v43, %v1218_v44 }
 0x59f   : > { %v1182_v18 = vpop.xlane.xlu0 %1181 }
 0x5a0   : > { %v1183_v19 = vmul.f32 0.03125, %v1182_v18  ;;  %v32471_v18 = vld [vmem:[%s39969_s13 + $0x28] sm:$0xff]  }
 0x5a2   : > { %v1184_v20 = vadd.f32 1e-05, %v1183_v19  ;;  %v32472_v19 = vld [vmem:[%s39969_s13 + $0x70] sm:$0xff]  }
 0x5a4   : > { %32716 = vrsqrt.f32 %v1184_v20  ;;  %v32473_v20 = vld [vmem:[%s39969_s13 + $0x30] sm:$0xff]  }
 0x5ae   : > { %v32717_v21 = vpop.eup %32716 }
 0x5af   : > { %v1186_v23 = vmul.f32 %v32717_v21, %v1178_v53  ;;  %v1197_v53 = vld [vmem:[#allocation13 + $0x38] sm:$0xff]  ;;  %v32474_v21 = vld [vmem:[%s39969_s13 + $0x340] sm:$0xff]  }
 0x5b0   : > { %v30272_v58 = vcombine.high %v1197_v53, %v1205_v54  ;;  %v30271_v0 = vcombine.low %v1197_v53, %v1205_v54 }
 0x5b1   : > { %v1187_v25 = vmul.f32 %v1186_v23, %v1170_v22  ;;  %v32475_v22 = vld [vmem:[%s39969_s13 + $0x300] sm:$0xff]   ;;  %v32476_v23 = vld [vmem:[%s39969_s13 + $0x78] sm:$0xff]  }
 0x5b3   : > { %v33543_v31 = vadd.f32 %v1187_v25, %v1171_v24  ;;  %v32477_v24 = vld [vmem:[%s39969_s13 + $0x38] sm:$0xff]   ;;  %v32478_v25 = vld [vmem:[%s39969_s13 + $0x348] sm:$0xff]  }
 0x5b5   : > { %v33547_v32 = vpack.c.bf16 %v33543_v31, %v33543_v31 }
 0x5b7   : > { %30289 = vmatmul.mubr.msk.bf16.vlgmr.msra.gmra.mrb[4].mxu1 %vm855_vm1, %v33547_v32  ;;  %30290 = vmatmul.mubr.msk.bf16.vlgmr.msra.gmra.mrb[8].mxu0 %vm855_vm1, %v33547_v32 }
 0x5b8   : > { %1552 = vmatpush1.bf16.msra.mxu1 %v30261_v15  ;;  %1593 = vmatpush1.bf16.msra.mxu0 %v30263_v16  ;;  %v32468_v15 = vld [vmem:[%s39969_s13 + $0x60] sm:$0xff]  }
 0x5b9   : > { %1553 = vmatprep.subr.bf16.mxu1 %v30278_v33  ;;  %1594 = vmatprep.subr.bf16.mxu0 %v30280_v34  ;;  %v32469_v16 = vld [vmem:[%s39969_s13 + $0x20] sm:$0xff]   ;;  %v32487_v33 = vld [vmem:[%s39969_s13 + $0x318] sm:$0xff]  }
 0x5ba   : > { %1583 = vmatprep.mubr.bf16.mxu1 %v40000_v14  ;;  %1624 = vmatprep.mubr.bf16.mxu0 %v40000_v14  ;;  %v32490_v34 = vld [vmem:[%s39969_s13 + $0x360] sm:$0xff]  }
 0x5bc   : > { %1554 = vmatpush1.bf16.msra.mxu1 %v30277_v39  ;;  %1595 = vmatpush1.bf16.msra.mxu0 %v30279_v40  ;;  %v32499_v39 = vld [vmem:[%s39969_s13 + $0x330] sm:$0xff]   ;;  %v32502_v40 = vld [vmem:[%s39969_s13 + $0x378] sm:$0xff]  }
 0x5bd   : > { %1633 = vmatprep.subr.bf16.mxu1 %v30266_v41  ;;  %1674 = vmatprep.subr.bf16.mxu0 %v30268_v42  ;;  %v32503_v41 = vld [vmem:[%s39969_s13 + $0x338] sm:$0xff]   ;;  %v39999_v42 = vlaneseq }
 0x5bf   : > { %30291 = vmatmul.mubr.msk.bf16.vlgmr.msra.gmra.mrb[8].mxu1 %vm855_vm1, %v33547_v32  ;;  %30292 = vmatmul.mubr.msk.bf16.vlgmr.msra.gmra.mrb[12].mxu0 %vm855_vm1, %v33547_v32  ;;  %v33672_v43 = vshrl.u32 %v39999_v42, 7  ;;  %vm35919_vm5 = vcmp.lt.s32.totalorder %v39999_v42, 768 }
 0x5c0   : > { %1634 = vmatpush1.bf16.msra.mxu1 %v30265_v47  ;;  %1675 = vmatpush1.bf16.msra.mxu0 %v30267_v48 }
 0x5c1   : > { %1635 = vmatprep.subr.bf16.mxu1 %v30282_v49  ;;  %1676 = vmatprep.subr.bf16.mxu0 %v30284_v50  ;;  %v33675_v44 = vsub.s32 0, %v33672_v43  ;;  %v33680_v46 = vsub.s32 1, %v33672_v43  ;;  %v33683_v47 = vsub.s32 3, %v33672_v43  ;;  %v33700_v62 = vsub.s32 7, %v33672_v43 }
 0x5c2   : > { %1665 = vmatprep.mubr.bf16.mxu1 %v40000_v14  ;;  %1706 = vmatprep.mubr.bf16.mxu0 %v40000_v14 }
 0x5c3   : > { %40098 = vst [vmem:[#allocation23_spill] sm:$0xff] %v33675_v44  ;;  %40099 = vst [vmem:[#allocation24_spill] sm:$0xff] %v33680_v46  ;;  %v1389_v48 = vrot.slane %v33677_v45, %v33675_v44  ;;  %v1393_v49 = vrot.slane %v33677_v45, %v33680_v46  ;;  %v1401_v50 = vrot.slane %v33677_v45, %v33683_v47 }
 0x5c4   : > { %1636 = vmatpush1.bf16.msra.mxu1 %v30281_v55  ;;  %1677 = vmatpush1.bf16.msra.mxu0 %v30283_v56  ;;  %40100 = vst [vmem:[#allocation25_spill] sm:$0xff] %v33683_v47  ;;  %v33694_v55 = vsub.s32 4, %v33672_v43  ;;  %40103 = vst [vmem:[#allocation28_spill] sm:$0xff] %v33700_v62 }
 0x5c5   : > { %1715 = vmatprep.subr.bf16.mxu1 %v30270_v57  ;;  %1756 = vmatprep.subr.bf16.mxu0 %v30272_v58  ;;  %v33697_v57 = vsub.s32 6, %v33672_v43 }
 0x5c6   : > { %40101 = vst [vmem:[#allocation26_spill] sm:$0xff] %v33694_v55 }
 0x5c7   : > { %30293 = vmatmul.mubr.msk.bf16.vlgmr.msra.gmra.mrb[12].mxu1 %vm855_vm1, %v33547_v32  ;;  %30294 = vmatmul.mubr.msk.bf16.vlgmr.msra.gmra.mrb[16].mxu0 %vm855_vm1, %v33547_v32  ;;  %40102 = vst [vmem:[#allocation27_spill] sm:$0xff] %v33697_v57 }
 0x5c8   : > { %1716 = vmatpush1.bf16.msra.mxu1 %v30269_v63  ;;  %1757 = vmatpush1.bf16.msra.mxu0 %v30271_v0 }
 0x5c9   : > { %1717 = vmatprep.subr.bf16.mxu1 %v30286_v2  ;;  %1758 = vmatprep.subr.bf16.mxu0 %v30288_v3 }
 0x5ca   : > { %1747 = vmatprep.mubr.bf16.mxu1 %v40000_v14  ;;  %1788 = vmatprep.mubr.bf16.mxu0 %v40000_v14 }
 0x5cc   : > { %1718 = vmatpush1.bf16.msra.mxu1 %v30285_v4  ;;  %1759 = vmatpush1.bf16.msra.mxu0 %v30287_v5  ;;  %v1405_v5 = vrot.slane %v33677_v45, %v33694_v55 }
 0x5cd   : > { %31532 = vmatprep.subr.bf16.mxu0 %v32460_v6  ;;  %31664 = vmatprep.subr.bf16.mxu1 %v32474_v21  ;;  %v1413_v6 = vrot.slane %v33677_v45, %v33697_v57 }
 0x5cf   : > { %30295 = vmatmul.mubr.msk.bf16.vlgmr.msra.gmra.mrb[16].mxu1 %vm855_vm1, %v33547_v32  ;;  %30296 = vmatmul.mubr.msk.bf16.vlgmr.msra.gmra.mrb[20].mxu0 %vm855_vm1, %v33547_v32  ;;  %v32486_v32 = vld [vmem:[%s39969_s13 + $0x358] sm:$0xff]  }
 0x5d0   : > { %31533 = vmatpush3.bf16.msra.mxu0 %v32461_v7  ;;  %31665 = vmatpush3.bf16.msra.mxu1 %v32475_v22  ;;  %v32485_v22 = vld [vmem:[%s39969_s13 + $0x88] sm:$0xff]  }
 0x5d1   : > { %31534 = vmatprep.subr.bf16.mxu0 %v32462_v8  ;;  %31666 = vmatprep.subr.bf16.mxu1 %v32478_v25  ;;  %v32481_v8 = vld [vmem:[%s39969_s13 + $0x80] sm:$0xff]  }
 0x5d4   : > { %31535 = vmatpush3.bf16.msra.mxu0 %v32463_v9  ;;  %31667 = vmatpush3.bf16.msra.mxu1 %v32479_v26  ;;  %v1417_v9 = vrot.slane %v33677_v45, %v33700_v62 }
 0x5d5   : > { %31536 = vmatprep.subr.bf16.mxu0 %v32464_v10  ;;  %31668 = vmatprep.subr.bf16.mxu1 %v32482_v29  ;;  %v33729_v29 = vsub.s32 2, %v33672_v43 }
 0x5d7   : > { %40104 = vst [vmem:[#allocation29_spill] sm:$0xff] %v33729_v29 }
 0x5d8   : > { %31537 = vmatpush3.bf16.msra.mxu0 %v32465_v11  ;;  %31669 = vmatpush3.bf16.msra.mxu1 %v32483_v30  ;;  %v32484_v11 = vld [vmem:[%s39969_s13 + $0xc8] sm:$0xff]  }
 0x5d9   : > { %31538 = vmatprep.subr.bf16.mxu0 %v32466_v12  ;;  %31670 = vmatprep.subr.bf16.mxu1 %v32486_v32 }
 0x5dc   : > { %31539 = vmatpush3.bf16.msra.mxu0 %v32467_v13  ;;  %31671 = vmatpush3.bf16.msra.mxu1 %v32487_v33 }
 0x5dd   : > { %31540 = vmatprep.subr.bf16.mxu0 %v32468_v15  ;;  %31672 = vmatprep.subr.bf16.mxu1 %v32490_v34  ;;  %v32489_v34 = vld [vmem:[%s39969_s13 + $0x90] sm:$0xff]  }
 0x5e0   : > { %31541 = vmatpush3.bf16.msra.mxu0 %v32469_v16  ;;  %31673 = vmatpush3.bf16.msra.mxu1 %v32491_v35 }
 0x5e1   : > { %31542 = vmatprep.subr.bf16.mxu0 %v32470_v17  ;;  %31674 = vmatprep.subr.bf16.mxu1 %v32494_v36  ;;  %v32492_v36 = vld [vmem:[%s39969_s13 + $0xd8] sm:$0xff]  }
 0x5e4   : > { %31543 = vmatpush3.bf16.msra.mxu0 %v32471_v18  ;;  %31675 = vmatpush3.bf16.msra.mxu1 %v32495_v37 }
 0x5e5   : > { %31544 = vmatprep.subr.bf16.mxu0 %v32472_v19  ;;  %31676 = vmatprep.subr.bf16.mxu1 %v32498_v38 }
 0x5e8   : > { %31545 = vmatpush3.bf16.msra.mxu0 %v32473_v20  ;;  %31677 = vmatpush3.bf16.msra.mxu1 %v32499_v39 }
 0x5e9   : > { %31546 = vmatprep.subr.bf16.mxu0 %v32476_v23  ;;  %31678 = vmatprep.subr.bf16.mxu1 %v32502_v40  ;;  %v1223_v23 = vld [vmem:[#allocation15 + $0x8] sm:$0xff] }
 0x5ea   : > { %v1421_v30 = vrot.slane %v1223_v23, %v33675_v44  ;;  %v1429_v32 = vrot.slane %v1223_v23, %v33729_v29  ;;  %v1425_v33 = vrot.slane %v1223_v23, %v33680_v46  ;;  %v1433_v35 = vrot.slane %v1223_v23, %v33683_v47 }
 0x5ec   : > { %31547 = vmatpush3.bf16.msra.mxu0 %v32477_v24  ;;  %31679 = vmatpush3.bf16.msra.mxu1 %v32503_v41 }
 0x5ed   : > { %31554 = vmatprep.subr.bf16.mxu0 %v32480_v28  ;;  %31970 = vmatprep.subr.bf16.mxu1 %v33062_v1  ;;  %v32488_v28 = vld [vmem:[%s39969_s13 + $0xd0] sm:$0xff]  }
 0x68a   : > { %v1503_v51 = vpop.f32.mrb[4].mxu1  ;;  %v33691_v52 = vpop.f32.mrb[8].mxu0 }
 0x68b   : > { %v1505_v53 = vpop.f32.mrb[5].mxu1  ;;  %v1546_v54 = vpop.f32.mrb[9].mxu0  ;;  %v1504_v56 = vadd.f32 %v1503_v51, %v1389_v48 }
 0x68c   : > { %v1507_v58 = vpop.f32.mrb[6].mxu1  ;;  %v1548_v59 = vpop.f32.mrb[10].mxu0  ;;  %v1506_v60 = vadd.f32 %v1505_v53, %v1393_v49  ;;  %v1547_v61 = vadd.f32 %v1546_v54, %v1401_v50  ;;  %v32493_v53 = vld [vmem:[%s39969_s13 + $0x98] sm:$0xff]  }
 0x68d   : > { %v1508_v63 = vpop.f32.mrb[7].mxu1  ;;  %v1549_v0 = vpop.f32.mrb[11].mxu0  ;;  %v1797_v2 = vmax.f32 %v1504_v56, 0.0  ;;  %v32496_v59 = vld [vmem:[%s39969_s13 + $0xe0] sm:$0xff]  }
 0x68e   : > { %v1798_v3 = vmax.f32 %v1506_v60, 0.0  ;;  %v1800_v4 = vmax.f32 %v1547_v61, 0.0  ;;  %v33756_v60 = vsub.s32 5, %v33672_v43  ;;  %v1437_v61 = vrot.slane %v1223_v23, %v33694_v55 }
 0x68f   : > { %v1813_v10 = vpack.c.bf16 %v1797_v2, %v1797_v2  ;;  %v1445_v63 = vrot.slane %v1223_v23, %v33697_v57  ;;  %v1449_v2 = vrot.slane %v1223_v23, %v33700_v62 }
 0x690   : > { %v1814_v7 = vpack.c.bf16 %v1798_v3, %v1798_v3  ;;  %v1816_v15 = vpack.c.bf16 %v1800_v4, %v1800_v4  ;;  %40105 = vst [vmem:[#allocation30_spill] sm:$0xff] %v33756_v60  ;;  %v1441_v0 = vrot.slane %v1223_v23, %v33756_v60  ;;  %v32497_v3 = vld [vmem:[%s39969_s13 + $0xa0] sm:$0xff]   ;;  %v32500_v4 = vld [vmem:[%s39969_s13 + $0xe8] sm:$0xff]   ;;  %v32504_v23 = vld [vmem:[%s39969_s13 + $0xf0] sm:$0xff]  }
 0x692   : > { %v1585_v12 = vpop.f32.mrb[8].mxu1  ;;  %v1626_v13 = vpop.f32.mrb[12].mxu0  ;;  %2886 = vmatprep.mubr.bf16.mxu0 %v1814_v7 }
 0x693   : > { %v33714_v16 = vadd.f32 %v1585_v12, %v1405_v5  ;;  %v33716_v17 = vpop.f32.mrb[9].mxu1  ;;  %v1628_v18 = vpop.f32.mrb[13].mxu0  ;;  %2887 = vmatmul.mubr.bf16.vlgmr.msra.gmra.mrb[24].mxu0 %v1813_v10  ;;  %v33718_v19 = vadd.f32 %v1626_v13, %v1413_v6 }
 0x694   : > { %31555 = vmatpush3.bf16.msra.mxu0 %v32481_v8  ;;  %v1589_v20 = vpop.f32.mrb[10].mxu1  ;;  %v1630_v21 = vpop.f32.mrb[14].mxu0  ;;  %2926 = vmatprep.mubr.bf16.mxu0 %v1816_v15  ;;  %v33723_v24 = vadd.f32 %v1628_v18, %v1417_v9  ;;  %v32501_v18 = vld [vmem:[%s39969_s13 + $0xa8] sm:$0xff]  }
 0x695   : > { %v1590_v25 = vpop.f32.mrb[11].mxu1  ;;  %v1631_v26 = vpop.f32.mrb[15].mxu0  ;;  %31556 = vmatprep.subr.bf16.mxu0 %v32484_v11 }
 0x696   : > { %v1397_v25 = vrot.slane %v33677_v45, %v33729_v29  ;;  %v1409_v26 = vrot.slane %v33677_v45, %v33756_v60  ;;  %v32507_v45 = vld [vmem:[%s39969_s13 + $0xb8] sm:$0xff]  }
 0x698   : > { %31557 = vmatpush3.bf16.msra.mxu0 %v32485_v22 }
 0x699   : > { %31558 = vmatprep.subr.bf16.mxu0 %v32488_v28 }
 0x69a   : > { %v1667_v37 = vpop.f32.mrb[12].mxu1  ;;  %v1708_v38 = vpop.f32.mrb[16].mxu0 }
 0x69b   : > { %v33741_v39 = vadd.f32 %v1667_v37, %v1421_v30  ;;  %v1669_v40 = vpop.f32.mrb[13].mxu1  ;;  %v1710_v41 = vpop.f32.mrb[17].mxu0  ;;  %v33743_v48 = vadd.f32 %v1708_v38, %v1429_v32  ;;  %v32505_v32 = vld [vmem:[%s39969_s13 + $0xb0] sm:$0xff]   ;;  %v32508_v38 = vld [vmem:[%s39969_s13 + $0x140] sm:$0xff]  }
 0x69c   : > { %v33745_v49 = vadd.f32 %v1669_v40, %v1425_v33  ;;  %31559 = vmatpush3.bf16.msra.mxu0 %v32489_v34  ;;  %v1671_v50 = vpop.f32.mrb[14].mxu1  ;;  %v1712_v51 = vpop.f32.mrb[18].mxu0  ;;  %v33750_v54 = vadd.f32 %v1710_v41, %v1433_v35  ;;  %v32506_v34 = vld [vmem:[%s39969_s13 + $0xf8] sm:$0xff]   ;;  %v1545_v35 = vadd.f32 %v33691_v52, %v1397_v25  ;;  %v32509_v52 = vld [vmem:[%s39969_s13 + $0x100] sm:$0xff]   ;;  %v32510_v41 = vld [vmem:[%s39969_s13 + $0x148] sm:$0xff]  }
 0x69d   : > { %v1672_v56 = vpop.f32.mrb[15].mxu1  ;;  %v1713_v58 = vpop.f32.mrb[19].mxu0  ;;  %31560 = vmatprep.subr.bf16.mxu0 %v32492_v36  ;;  %v1588_v36 = vadd.f32 %v33716_v17, %v1409_v26  ;;  %v32512_v51 = vld [vmem:[%s39969_s13 + $0x150] sm:$0xff]   ;;  %v32534_v25 = vld [vmem:[%s39969_s13 + $0x1e8] sm:$0xff]  }
 0x69e   : > { %v1799_v37 = vmax.f32 %v1545_v35, 0.0  ;;  %v32514_v56 = vld [vmem:[%s39969_s13 + $0x158] sm:$0xff]   ;;  %v32535_v26 = vld [vmem:[%s39969_s13 + $0x1a8] sm:$0xff]   ;;  %v32540_v35 = vld [vmem:[%s39969_s13 + $0x240] sm:$0xff]  }
 0x69f   : > { %v1802_v40 = vmax.f32 %v1588_v36, 0.0  ;;  %v32515_v58 = vld [vmem:[%s39969_s13 + $0x118] sm:$0xff]   ;;  %v1806_v36 = vmax.f32 %v33745_v49, 0.0  ;;  %v32544_v49 = vld [vmem:[%s39969_s13 + $0x250] sm:$0xff]  }
 0x6a0   : > { %31561 = vmatpush3.bf16.msra.mxu0 %v32493_v53  ;;  %v1815_v17 = vpack.c.bf16 %v1799_v37, %v1799_v37  ;;  %v32513_v53 = vld [vmem:[%s39969_s13 + $0x110] sm:$0xff]  }
 0x6a1   : > { %31562 = vmatprep.subr.bf16.mxu0 %v32496_v59  ;;  %v1818_v50 = vpack.c.bf16 %v1802_v40, %v1802_v40  ;;  %v32516_v59 = vld [vmem:[%s39969_s13 + $0x160] sm:$0xff]   ;;  %v1822_v40 = vpack.c.bf16 %v1806_v36, %v1806_v36 }
 0x6a2   : > { %v1749_v5 = vpop.f32.mrb[16].mxu1  ;;  %v1790_v6 = vpop.f32.mrb[20].mxu0  ;;  %v32580_v36 = vld [vmem:[%s39969_s13 + $0x3e0] sm:$0xff]  }
 0x6a3   : > { %v1750_v7 = vadd.f32 %v1749_v5, %v1437_v61  ;;  %v33768_v8 = vadd.f32 %v1790_v6, %v1445_v63  ;;  %v1751_v9 = vpop.f32.mrb[17].mxu1  ;;  %v1792_v10 = vpop.f32.mrb[21].mxu0  ;;  %v32517_v61 = vld [vmem:[%s39969_s13 + $0x120] sm:$0xff]   ;;  %v32518_v63 = vld [vmem:[%s39969_s13 + $0x168] sm:$0xff]   ;;  %v32523_v5 = vld [vmem:[%s39969_s13 + $0x138] sm:$0xff]   ;;  %v1801_v6 = vmax.f32 %v33714_v16, 0.0 }
 0x6a4   : > { %v1752_v11 = vadd.f32 %v1751_v9, %v1441_v0  ;;  %v33770_v12 = vadd.f32 %v1792_v10, %v1449_v2  ;;  %31563 = vmatpush3.bf16.msra.mxu0 %v32497_v3  ;;  %v1753_v13 = vpop.f32.mrb[18].mxu1  ;;  %v1794_v15 = vpop.f32.mrb[22].mxu0  ;;  %v32519_v0 = vld [vmem:[%s39969_s13 + $0x128] sm:$0xff]   ;;  %v32520_v2 = vld [vmem:[%s39969_s13 + $0x170] sm:$0xff]   ;;  %v1804_v9 = vmax.f32 %v33723_v24, 0.0  ;;  %v32525_v10 = vld [vmem:[%s39969_s13 + $0x180] sm:$0xff]  }
 0x6a5   : > { %v1809_v20 = vmax.f32 %v1750_v7, 0.0  ;;  %v1754_v21 = vpop.f32.mrb[19].mxu1  ;;  %v1795_v22 = vpop.f32.mrb[23].mxu0  ;;  %31564 = vmatprep.subr.bf16.mxu0 %v32500_v4  ;;  %v32521_v3 = vld [vmem:[%s39969_s13 + $0x130] sm:$0xff]   ;;  %v32522_v4 = vld [vmem:[%s39969_s13 + $0x178] sm:$0xff]   ;;  %v32524_v7 = vld [vmem:[%s39969_s13 + $0x1c0] sm:$0xff]  }
 0x6a6   : > { %v1810_v28 = vmax.f32 %v1752_v11, 0.0  ;;  %v1817_v11 = vpack.c.bf16 %v1801_v6, %v1801_v6  ;;  %v32526_v13 = vld [vmem:[%s39969_s13 + $0x1c8] sm:$0xff]   ;;  %v1820_v15 = vpack.c.bf16 %v1804_v9, %v1804_v9  ;;  %v32528_v24 = vld [vmem:[%s39969_s13 + $0x1d0] sm:$0xff]   ;;  %v32531_v21 = vld [vmem:[%s39969_s13 + $0x198] sm:$0xff]  }
 0x6a7   : > { %v1825_v33 = vpack.c.bf16 %v1809_v20, %v1809_v20  ;;  %v32527_v16 = vld [vmem:[%s39969_s13 + $0x188] sm:$0xff]   ;;  %v32530_v20 = vld [vmem:[%s39969_s13 + $0x1d8] sm:$0xff]   ;;  %v32532_v22 = vld [vmem:[%s39969_s13 + $0x1e0] sm:$0xff]  }
 0x6a8   : > { %v1826_v30 = vpack.c.bf16 %v1810_v28, %v1810_v28  ;;  %31565 = vmatpush3.bf16.msra.mxu0 %v32501_v18  ;;  %v32529_v18 = vld [vmem:[%s39969_s13 + $0x190] sm:$0xff]   ;;  %v32562_v9 = vld [vmem:[%s39969_s13 + $0x2d8] sm:$0xff]  }
 0x6a9   : > { %31566 = vmatprep.subr.bf16.mxu0 %v32504_v23  ;;  %v32533_v23 = vld [vmem:[%s39969_s13 + $0x1a0] sm:$0xff]   ;;  %v32536_v28 = vld [vmem:[%s39969_s13 + $0x1f0] sm:$0xff]  }
 0x6aa   : > { %3126 = vmatprep.mubr.bf16.mxu1 %v1826_v30  ;;  %v32537_v30 = vld [vmem:[%s39969_s13 + $0x1b0] sm:$0xff]  }
 0x6ab   : > { %3127 = vmatmul.mubr.bf16.vlgmr.msra.gmra.mrb[20].mxu1 %v1825_v33  ;;  %v32539_v33 = vld [vmem:[%s39969_s13 + $0x1b8] sm:$0xff]  }
 0x6ac   : > { %31567 = vmatpush3.bf16.msra.mxu0 %v32505_v32  ;;  %31943 = vmatprep.mubr.msk.f32.mxu1 %vm33063_vm0, %v33522_v27  ;;  %v32511_v27 = vld [vmem:[%s39969_s13 + $0x108] sm:$0xff]   ;;  %v32538_v32 = vld [vmem:[%s39969_s13 + $0x1f8] sm:$0xff]  }
 0x6ad   : > { %31568 = vmatprep.subr.bf16.mxu0 %v32506_v34  ;;  %v1803_v34 = vmax.f32 %v33718_v19, 0.0  ;;  %v32543_v19 = vld [vmem:[%s39969_s13 + $0x208] sm:$0xff]  }
 0x6af   : > { %v1819_v37 = vpack.c.bf16 %v1803_v34, %v1803_v34  ;;  %v32578_v34 = vld [vmem:[%s39969_s13 + $0x3d8] sm:$0xff]  }
 0x6b0   : > { %31569 = vmatpush3.bf16.msra.mxu0 %v32507_v45  ;;  %v32541_v45 = vld [vmem:[%s39969_s13 + $0x200] sm:$0xff]  }
 0x6b1   : > { %31576 = vmatprep.subr.bf16.mxu0 %v32508_v38  ;;  %v32542_v38 = vld [vmem:[%s39969_s13 + $0x248] sm:$0xff]  }
 0x6b3   : > { %2927 = vmatmul.mubr.bf16.vlgmr.msra.gmra.mrb[28].mxu0 %v1815_v17  ;;  %v32546_v17 = vld [vmem:[%s39969_s13 + $0x258] sm:$0xff]  }
 0x6b4   : > { %31577 = vmatpush3.bf16.msra.mxu0 %v32509_v52  ;;  %2966 = vmatprep.mubr.bf16.mxu0 %v1818_v50  ;;  %v32545_v52 = vld [vmem:[%s39969_s13 + $0x210] sm:$0xff]   ;;  %v32548_v50 = vld [vmem:[%s39969_s13 + $0x260] sm:$0xff]  }
 0x6b5   : > { %31578 = vmatprep.subr.bf16.mxu0 %v32510_v41  ;;  %v32547_v41 = vld [vmem:[%s39969_s13 + $0x218] sm:$0xff]  }
 0x6b8   : > { %31579 = vmatpush3.bf16.msra.mxu0 %v32511_v27  ;;  %v32549_v27 = vld [vmem:[%s39969_s13 + $0x220] sm:$0xff]  }
 0x6b9   : > { %31580 = vmatprep.subr.bf16.mxu0 %v32512_v51  ;;  %v32550_v51 = vld [vmem:[%s39969_s13 + $0x268] sm:$0xff]  }
 0x6bc   : > { %31581 = vmatpush3.bf16.msra.mxu0 %v32513_v53  ;;  %v32551_v53 = vld [vmem:[%s39969_s13 + $0x228] sm:$0xff]  }
 0x6bd   : > { %31582 = vmatprep.subr.bf16.mxu0 %v32514_v56  ;;  %v32552_v56 = vld [vmem:[%s39969_s13 + $0x270] sm:$0xff]  }
 0x6c0   : > { %31583 = vmatpush3.bf16.msra.mxu0 %v32515_v58  ;;  %v32553_v58 = vld [vmem:[%s39969_s13 + $0x230] sm:$0xff]  }
 0x6c1   : > { %31584 = vmatprep.subr.bf16.mxu0 %v32516_v59  ;;  %v32554_v59 = vld [vmem:[%s39969_s13 + $0x278] sm:$0xff]  }
 0x6c4   : > { %31585 = vmatpush3.bf16.msra.mxu0 %v32517_v61  ;;  %v32555_v61 = vld [vmem:[%s39969_s13 + $0x238] sm:$0xff]  }
 0x6c5   : > { %31586 = vmatprep.subr.bf16.mxu0 %v32518_v63  ;;  %v1805_v63 = vmax.f32 %v33741_v39, 0.0  ;;  %v32559_v39 = vld [vmem:[%s39969_s13 + $0x288] sm:$0xff]  }
 0x6c8   : > { %31587 = vmatpush3.bf16.msra.mxu0 %v32519_v0  ;;  %v32556_v0 = vld [vmem:[%s39969_s13 + $0x2c0] sm:$0xff]  }
 0x6c9   : > { %31588 = vmatprep.subr.bf16.mxu0 %v32520_v2  ;;  %v1808_v2 = vmax.f32 %v33750_v54, 0.0  ;;  %v32560_v54 = vld [vmem:[%s39969_s13 + $0x2d0] sm:$0xff]  }
 0x6cb   : > { %v1824_v6 = vpack.c.bf16 %v1808_v2, %v1808_v2 }
 0x6cc   : > { %31589 = vmatpush3.bf16.msra.mxu0 %v32521_v3  ;;  %v32557_v3 = vld [vmem:[%s39969_s13 + $0x280] sm:$0xff]  }
 0x6cd   : > { %31590 = vmatprep.subr.bf16.mxu0 %v32522_v4  ;;  %v1821_v4 = vpack.c.bf16 %v1805_v63, %v1805_v63 }
 0x6d0   : > { %31591 = vmatpush3.bf16.msra.mxu0 %v32523_v5  ;;  %v32558_v5 = vld [vmem:[%s39969_s13 + $0x2c8] sm:$0xff]  }
 0x6d1   : > { %31598 = vmatprep.subr.bf16.mxu0 %v32524_v7  ;;  %v32561_v7 = vld [vmem:[%s39969_s13 + $0x290] sm:$0xff]  }
 0x6d3   : > { %2967 = vmatmul.mubr.bf16.vlgmr.msra.gmra.mrb[32].mxu0 %v1817_v11  ;;  %v32564_v11 = vld [vmem:[%s39969_s13 + $0x2e0] sm:$0xff]  }
 0x6d4   : > { %31599 = vmatpush3.bf16.msra.mxu0 %v32525_v10  ;;  %3006 = vmatprep.mubr.bf16.mxu0 %v1820_v15  ;;  %v32563_v10 = vld [vmem:[%s39969_s13 + $0x298] sm:$0xff]   ;;  %v32566_v15 = vld [vmem:[%s39969_s13 + $0x2e8] sm:$0xff]  }
 0x6d5   : > { %31600 = vmatprep.subr.bf16.mxu0 %v32526_v13  ;;  %v32565_v13 = vld [vmem:[%s39969_s13 + $0x2a0] sm:$0xff]  }
 0x6d8   : > { %31601 = vmatpush3.bf16.msra.mxu0 %v32527_v16  ;;  %v32567_v16 = vld [vmem:[%s39969_s13 + $0x2a8] sm:$0xff]  }
 0x6d9   : > { %31602 = vmatprep.subr.bf16.mxu0 %v32528_v24  ;;  %v32568_v24 = vld [vmem:[%s39969_s13 + $0x2f0] sm:$0xff]  }
 0x6dc   : > { %31603 = vmatpush3.bf16.msra.mxu0 %v32529_v18  ;;  %v32569_v18 = vld [vmem:[%s39969_s13 + $0x2b0] sm:$0xff]  }
 0x6dd   : > { %31604 = vmatprep.subr.bf16.mxu0 %v32530_v20  ;;  %v32570_v20 = vld [vmem:[%s39969_s13 + $0x2f8] sm:$0xff]  }
 0x6e0   : > { %31605 = vmatpush3.bf16.msra.mxu0 %v32531_v21  ;;  %v32571_v21 = vld [vmem:[%s39969_s13 + $0x2b8] sm:$0xff]  }
 0x6e1   : > { %31606 = vmatprep.subr.bf16.mxu0 %v32532_v22  ;;  %v1807_v22 = vmax.f32 %v33743_v48, 0.0  ;;  %v32575_v48 = vld [vmem:[%s39969_s13 + $0x388] sm:$0xff]  }
 0x6e4   : > { %31607 = vmatpush3.bf16.msra.mxu0 %v32533_v23  ;;  %v32572_v23 = vld [vmem:[%s39969_s13 + $0x3c0] sm:$0xff]  }
 0x6e5   : > { %31608 = vmatprep.subr.bf16.mxu0 %v32534_v25  ;;  %v1812_v25 = vmax.f32 %v33770_v12, 0.0  ;;  %v32576_v12 = vld [vmem:[%s39969_s13 + $0x3d0] sm:$0xff]  }
 0x6e8   : > { %31609 = vmatpush3.bf16.msra.mxu0 %v32535_v26  ;;  %v32573_v26 = vld [vmem:[%s39969_s13 + $0x380] sm:$0xff]  }
 0x6e9   : > { %31610 = vmatprep.subr.bf16.mxu0 %v32536_v28  ;;  %v1823_v28 = vpack.c.bf16 %v1807_v22, %v1807_v22 }
 0x6ec   : > { %31611 = vmatpush3.bf16.msra.mxu0 %v32537_v30  ;;  %v32574_v30 = vld [vmem:[%s39969_s13 + $0x3c8] sm:$0xff]  }
 0x6ed   : > { %31612 = vmatprep.subr.bf16.mxu0 %v32538_v32  ;;  %v1828_v32 = vpack.c.bf16 %v1812_v25, %v1812_v25 }
 0x6f0   : > { %31613 = vmatpush3.bf16.msra.mxu0 %v32539_v33  ;;  %v32577_v33 = vld [vmem:[%s39969_s13 + $0x390] sm:$0xff]  }
 0x6f1   : > { %31620 = vmatprep.subr.bf16.mxu0 %v32540_v35  ;;  %v32579_v35 = vld [vmem:[%s39969_s13 + $0x398] sm:$0xff]  }
 0x6f3   : > { %3007 = vmatmul.mubr.bf16.vlgmr.msra.gmra.mrb[36].mxu0 %v1819_v37  ;;  %v32582_v37 = vld [vmem:[%s39969_s13 + $0x3e8] sm:$0xff]  }
 0x6f4   : > { %31621 = vmatpush3.bf16.msra.mxu0 %v32541_v45  ;;  %3046 = vmatprep.mubr.bf16.mxu0 %v1822_v40  ;;  %v32581_v45 = vld [vmem:[%s39969_s13 + $0x3a0] sm:$0xff]   ;;  %v32584_v40 = vld [vmem:[%s39969_s13 + $0x3f0] sm:$0xff]  }
 0x6f5   : > { %31622 = vmatprep.subr.bf16.mxu0 %v32542_v38  ;;  %v32583_v38 = vld [vmem:[%s39969_s13 + $0x3a8] sm:$0xff]  }
 0x6f8   : > { %31623 = vmatpush3.bf16.msra.mxu0 %v32543_v19  ;;  %v32585_v19 = vld [vmem:[%s39969_s13 + $0x3b0] sm:$0xff]  }
 0x6f9   : > { %31624 = vmatprep.subr.bf16.mxu0 %v32544_v49  ;;  %v32586_v49 = vld [vmem:[%s39969_s13 + $0x3f8] sm:$0xff]  }
 0x6fc   : > { %31625 = vmatpush3.bf16.msra.mxu0 %v32545_v52  ;;  %v32587_v52 = vld [vmem:[%s39969_s13 + $0x3b8] sm:$0xff]  }
 0x6fd   : > { %31626 = vmatprep.subr.bf16.mxu0 %v32546_v17  ;;  %v1811_v17 = vmax.f32 %v33768_v8, 0.0  ;;  %v2085_v8 = vld [vmem:[%s40106_s25] sm:$0x1] }
 0x700   : > { %31627 = vmatpush3.bf16.msra.mxu0 %v32547_v41  ;;  %v1827_v41 = vpack.c.bf16 %v1811_v17, %v1811_v17 }
 0x701   : > { %31628 = vmatprep.subr.bf16.mxu0 %v32548_v50 }
 0x704   : > { %31629 = vmatpush3.bf16.msra.mxu0 %v32549_v27 }
 0x705   : > { %31630 = vmatprep.subr.bf16.mxu0 %v32550_v51 }
 0x708   : > { %31631 = vmatpush3.bf16.msra.mxu0 %v32551_v53 }
 0x709   : > { %31632 = vmatprep.subr.bf16.mxu0 %v32552_v56 }
 0x70c   : > { %31633 = vmatpush3.bf16.msra.mxu0 %v32553_v58 }
 0x70d   : > { %31634 = vmatprep.subr.bf16.mxu0 %v32554_v59 }
 0x710   : > { %31635 = vmatpush3.bf16.msra.mxu0 %v32555_v61 }
 0x711   : > { %31642 = vmatprep.subr.bf16.mxu0 %v32556_v0 }
 0x713   : > { %3047 = vmatmul.mubr.bf16.vlgmr.msra.gmra.mrb[40].mxu0 %v1821_v4 }
 0x714   : > { %31643 = vmatpush3.bf16.msra.mxu0 %v32557_v3  ;;  %3086 = vmatprep.mubr.bf16.mxu0 %v1824_v6 }
 0x715   : > { %31644 = vmatprep.subr.bf16.mxu0 %v32558_v5 }
 0x718   : > { %31645 = vmatpush3.bf16.msra.mxu0 %v32559_v39 }
 0x719   : > { %31646 = vmatprep.subr.bf16.mxu0 %v32560_v54 }
 0x71c   : > { %31647 = vmatpush3.bf16.msra.mxu0 %v32561_v7 }
 0x71d   : > { %31648 = vmatprep.subr.bf16.mxu0 %v32562_v9 }
 0x720   : > { %31649 = vmatpush3.bf16.msra.mxu0 %v32563_v10 }
 0x721   : > { %31650 = vmatprep.subr.bf16.mxu0 %v32564_v11 }
 0x724   : > { %31651 = vmatpush3.bf16.msra.mxu0 %v32565_v13 }
 0x725   : > { %31652 = vmatprep.subr.bf16.mxu0 %v32566_v15 }
 0x728   : > { %31653 = vmatpush3.bf16.msra.mxu0 %v32567_v16 }
 0x729   : > { %31654 = vmatprep.subr.bf16.mxu0 %v32568_v24 }
 0x72c   : > { %31655 = vmatpush3.bf16.msra.mxu0 %v32569_v18 }
 0x72d   : > { %31656 = vmatprep.subr.bf16.mxu0 %v32570_v20 }
 0x730   : > { %31657 = vmatpush3.bf16.msra.mxu0 %v32571_v21 }
 0x731   : > { %31686 = vmatprep.subr.bf16.mxu0 %v32572_v23 }
 0x733   : > { %3087 = vmatmul.mubr.bf16.vlgmr.msra.gmra.mrb[44].mxu0 %v1823_v28 }
 0x734   : > { %31687 = vmatpush3.bf16.msra.mxu0 %v32573_v26  ;;  %3166 = vmatprep.mubr.bf16.mxu0 %v1828_v32 }
 0x735   : > { %31688 = vmatprep.subr.bf16.mxu0 %v32574_v30 }
 0x738   : > { %31689 = vmatpush3.bf16.msra.mxu0 %v32575_v48 }
 0x739   : > { %31690 = vmatprep.subr.bf16.mxu0 %v32576_v12 }
 0x73c   : > { %31691 = vmatpush3.bf16.msra.mxu0 %v32577_v33 }
 0x73d   : > { %31692 = vmatprep.subr.bf16.mxu0 %v32578_v34 }
 0x740   : > { %31693 = vmatpush3.bf16.msra.mxu0 %v32579_v35 }
 0x741   : > { %31694 = vmatprep.subr.bf16.mxu0 %v32580_v36 }
 0x744   : > { %31695 = vmatpush3.bf16.msra.mxu0 %v32581_v45 }
 0x745   : > { %31696 = vmatprep.subr.bf16.mxu0 %v32582_v37 }
 0x748   : > { %31697 = vmatpush3.bf16.msra.mxu0 %v32583_v38 }
 0x749   : > { %31698 = vmatprep.subr.bf16.mxu0 %v32584_v40 }
 0x74c   : > { %31699 = vmatpush3.bf16.msra.mxu0 %v32585_v19 }
 0x74d   : > { %31700 = vmatprep.subr.bf16.mxu0 %v32586_v49 }
 0x750   : > { %31701 = vmatpush3.bf16.msra.mxu0 %v32587_v52 }
 0x753   : > { %3167 = vmatmul.mubr.bf16.vlgmr.msra.gmra.mrb[48].mxu0 %v1827_v41 }
 0x754   : > { %3606 = vmatprep.mubr.bf16.mxu0 %v40000_v14 }
 0x766   : > { %v31548_v50 = vpop.f32.mrb[24].mxu0 }
 0x767   : > { %v31549_v27 = vpop.f32.mrb[25].mxu0 }
 0x768   : > { %v31550_v51 = vadd.f32 %v31549_v27, %v31548_v50  ;;  %v31551_v53 = vpop.f32.mrb[26].mxu0 }
 0x769   : > { %v31552_v56 = vpop.f32.mrb[27].mxu0 }
 0x76a   : > { %v2889_v4 = vadd.f32 %v31550_v51, %v2085_v8 }
 0x77e   : > { %v31680_v58 = vpop.f32.mrb[20].mxu1 }
 0x77f   : > { %v31681_v59 = vpop.f32.mrb[21].mxu1 }
 0x780   : > { %v31682_v61 = vadd.f32 %v31681_v59, %v31680_v58  ;;  %v31683_v63 = vpop.f32.mrb[22].mxu1  ;;  %v3193_v58 = vld [vmem:[#allocation10 + $0x20] sm:$0xff]  ;;  %v3194_v59 = vld [vmem:[#allocation10 + $0x28] sm:$0xff] }
 0x781   : > { %v31684_v0 = vpop.f32.mrb[23].mxu1  ;;  %v3195_v63 = vld [vmem:[#allocation10 + $0x30] sm:$0xff] }
 0x782   : > { %v3196_v0 = vld [vmem:[#allocation10 + $0x38] sm:$0xff] }
 0x783   : > { %v31974_v8 = vpack.c.bf16 %v3196_v0, %v3195_v63  ;;  %v30427_v63 = vld [vmem:[%s39966_s10 + $0x1] sm:$0x1] }
 0x786   : > { %v31570_v2 = vpop.f32.mrb[28].mxu0 }
 0x787   : > { %v31571_v3 = vpop.f32.mrb[29].mxu0 }
 0x788   : > { %v31572_v5 = vadd.f32 %v31571_v3, %v31570_v2  ;;  %v31573_v6 = vpop.f32.mrb[30].mxu0 }
 0x789   : > { %v31574_v39 = vpop.f32.mrb[31].mxu0 }
 0x78a   : > { %v2929_v54 = vadd.f32 %v31572_v5, %v2889_v4  ;;  %v3175_v5 = vld [vmem:[%s40107_s14] sm:$0x1] }
 0x78b   : > { %v3176_v39 = vld [vmem:[%s40108_s8] sm:$0x1] }
 0x7a6   : > { %v31592_v7 = vpop.f32.mrb[32].mxu0 }
 0x7a7   : > { %v31593_v9 = vpop.f32.mrb[33].mxu0 }
 0x7a8   : > { %v31594_v10 = vadd.f32 %v31593_v9, %v31592_v7  ;;  %v31595_v11 = vpop.f32.mrb[34].mxu0  ;;  %v3198_v7 = vld [vmem:[#allocation12 + $0x1] sm:$0x1] }
 0x7a9   : > { %v31596_v13 = vpop.f32.mrb[35].mxu0 }
 0x7aa   : > { %v2969_v15 = vadd.f32 %v31594_v10, %v2929_v54 }
 0x7c6   : > { %v31614_v16 = vpop.f32.mrb[36].mxu0 }
 0x7c7   : > { %v31615_v24 = vpop.f32.mrb[37].mxu0 }
 0x7c8   : > { %v31616_v18 = vadd.f32 %v31615_v24, %v31614_v16  ;;  %v31617_v20 = vpop.f32.mrb[38].mxu0 }
 0x7c9   : > { %v31618_v21 = vpop.f32.mrb[39].mxu0 }
 0x7ca   : > { %v3009_v22 = vadd.f32 %v31616_v18, %v2969_v15 }
 0x7e6   : > { %v31636_v23 = vpop.f32.mrb[40].mxu0 }
 0x7e7   : > { %v31637_v25 = vpop.f32.mrb[41].mxu0 }
 0x7e8   : > { %v31638_v26 = vadd.f32 %v31637_v25, %v31636_v23  ;;  %v31639_v28 = vpop.f32.mrb[42].mxu0  ;;  %v3302_v23 = vld [vmem:[#allocation13 + $0x140] sm:$0xff]  ;;  %v3295_v25 = vld [vmem:[#allocation13 + $0x108] sm:$0xff] }
 0x7e9   : > { %v31640_v30 = vpop.f32.mrb[43].mxu0  ;;  %v3303_v28 = vld [vmem:[#allocation13 + $0x148] sm:$0xff] }
 0x7ea   : > { %v3049_v32 = vadd.f32 %v31638_v26, %v3009_v22  ;;  %v3294_v22 = vld [vmem:[#allocation13 + $0x100] sm:$0xff] }
 0x7eb   : > { %v30429_v26 = vcombine.high %v3294_v22, %v3302_v23  ;;  %v30428_v30 = vcombine.low %v3294_v22, %v3302_v23 }
 0x7ed   : > { %3574 = vmatprep.subr.bf16.mxu0 %v30429_v26  ;;  %v3300_v26 = vld [vmem:[#allocation13 + $0x130] sm:$0xff] }
 0x7ee   : > { %3575 = vmatpush1.bf16.msra.mxu0 %v30428_v30  ;;  %v3301_v30 = vld [vmem:[#allocation13 + $0x138] sm:$0xff] }
 0x806   : > { %v31658_v48 = vpop.f32.mrb[44].mxu0 }
 0x807   : > { %v31659_v12 = vpop.f32.mrb[45].mxu0 }
 0x808   : > { %v31660_v33 = vadd.f32 %v31659_v12, %v31658_v48  ;;  %v31661_v34 = vpop.f32.mrb[46].mxu0  ;;  %v30431_v48 = vcombine.high %v3295_v25, %v3303_v28  ;;  %v3310_v12 = vld [vmem:[#allocation13 + $0x180] sm:$0xff] }
 0x809   : > { %v31662_v35 = vpop.f32.mrb[47].mxu0  ;;  %v3311_v34 = vld [vmem:[#allocation13 + $0x188] sm:$0xff] }
 0x80a   : > { %v3089_v36 = vadd.f32 %v31660_v33, %v3049_v32  ;;  %v30430_v32 = vcombine.low %v3295_v25, %v3303_v28  ;;  %v3318_v33 = vld [vmem:[#allocation13 + $0x1c0] sm:$0xff]  ;;  %v3308_v28 = vld [vmem:[#allocation13 + $0x170] sm:$0xff] }
 0x80b   : > { %v30445_v35 = vcombine.high %v3310_v12, %v3318_v33 }
 0x80c   : > { %v3129_v45 = vadd.f32 %v31682_v61, %v3089_v36  ;;  %v31971_v61 = vpack.c.bf16 %v3194_v59, %v3193_v58  ;;  %v3319_v36 = vld [vmem:[#allocation13 + $0x1c8] sm:$0xff]  ;;  %v30426_v59 = vld [vmem:[%s39965_s9 + $0x1] sm:$0x1] }
 0x80d   : > { %3576 = vmatprep.subr.bf16.mxu0 %v30445_v35  ;;  %v3316_v35 = vld [vmem:[#allocation13 + $0x1b0] sm:$0xff] }
 0x80e   : > { %31972 = vmatpush3.bf16.msra.mxu1 %v31971_v61 }
 0x80f   : > { %31973 = vmatprep.subr.bf16.mxu1 %v33062_v1 }
 0x812   : > { %31975 = vmatpush3.bf16.msra.mxu1 %v31974_v8  ;;  %v3312_v8 = vld [vmem:[#allocation13 + $0x190] sm:$0xff] }
 0x813   : > { %3615 = vmatprep.subr.bf16.mxu1 %v30431_v48 }
 0x826   : > { %v31702_v37 = vpop.f32.mrb[48].mxu0 }
 0x827   : > { %v31703_v38 = vpop.f32.mrb[49].mxu0 }
 0x828   : > { %v31704_v40 = vadd.f32 %v31703_v38, %v31702_v37  ;;  %v31705_v19 = vpop.f32.mrb[50].mxu0  ;;  %v30446_v37 = vcombine.low %v3311_v34, %v3319_v36  ;;  %v30447_v38 = vcombine.high %v3311_v34, %v3319_v36  ;;  %v3324_v36 = vld [vmem:[#allocation13 + $0x1f0] sm:$0xff] }
 0x829   : > { %v31706_v49 = vpop.f32.mrb[51].mxu0  ;;  %v3304_v19 = vld [vmem:[#allocation13 + $0x150] sm:$0xff] }
 0x82a   : > { %v3169_v52 = vadd.f32 %v31704_v40, %v3129_v45  ;;  %v30444_v45 = vcombine.low %v3310_v12, %v3318_v33  ;;  %v3296_v40 = vld [vmem:[#allocation13 + $0x110] sm:$0xff]  ;;  %v3297_v49 = vld [vmem:[#allocation13 + $0x118] sm:$0xff]  ;;  %v30441_v33 = vcombine.high %v3300_v26, %v3308_v28 }
 0x82c   : > { %v3174_v17 = vadd.f32 %v3169_v52, %v33543_v31  ;;  %3577 = vmatpush1.bf16.msra.mxu0 %v30444_v45  ;;  %v30433_v52 = vcombine.high %v3296_v40, %v3304_v19  ;;  %v3317_v45 = vld [vmem:[#allocation13 + $0x1b8] sm:$0xff] }
 0x82e   : > { %v3177_v41 = vsel %vm1172_vm4, %v3174_v17, 0.0  ;;  %3656 = vmatprep.subr.bf16.mxu0 %v30433_v52  ;;  %v30456_v52 = vcombine.low %v3316_v35, %v3324_v36 }
 0x82f   : > { %3178 = vadd.xlane.f32.xlu1 %v3177_v41  ;;  %v30432_v41 = vcombine.low %v3296_v40, %v3304_v19  ;;  %v30457_v19 = vcombine.high %v3316_v35, %v3324_v36 }
 0x8bc   : > { %v3179_v50 = vpop.xlane.xlu1 %3178 }
 0x8bd   : > { %v3180_v27 = vmul.f32 0.03125, %v3179_v50 }
 0x8bf   : > { %v3181_v51 = vsub.f32 %v3174_v17, %v3180_v27  ;;  %v3305_v17 = vld [vmem:[#allocation13 + $0x158] sm:$0xff] }
 0x8c0   : > { %v30434_v50 = vcombine.low %v3297_v49, %v3305_v17  ;;  %v30435_v27 = vcombine.high %v3297_v49, %v3305_v17 }
 0x8c1   : > { %v3182_v53 = vmul.f32 %v3181_v51, %v3181_v51 }
 0x8c3   : > { %v3183_v56 = vsel %vm1172_vm4, %v3182_v53, 0.0 }
 0x8c4   : > { %3184 = vadd.xlane.f32.xlu1 %v3183_v56 }
 0x951   : > { %v3185_v31 = vpop.xlane.xlu1 %3184 }
 0x952   : > { %v3186_v2 = vmul.f32 0.03125, %v3185_v31  ;;  %v3320_v31 = vld [vmem:[#allocation13 + $0x1d0] sm:$0xff] }
 0x954   : > { %v3187_v3 = vadd.f32 1e-05, %v3186_v2  ;;  %v3313_v2 = vld [vmem:[#allocation13 + $0x198] sm:$0xff] }
 0x956   : > { %32718 = vrsqrt.f32 %v3187_v3  ;;  %v3321_v3 = vld [vmem:[#allocation13 + $0x1d8] sm:$0xff] }
 0x960   : > { %v32719_v4 = vpop.eup %32718 }
 0x961   : > { %v3189_v6 = vmul.f32 %v32719_v4, %v3181_v51 }
 0x963   : > { %v3190_v54 = vmul.f32 %v3189_v6, %v3175_v5  ;;  %v30449_v6 = vcombine.high %v3312_v8, %v3320_v31 }
 0x965   : > { %v3191_v1 = vadd.f32 %v3190_v54, %v3176_v39  ;;  %v30451_v39 = vcombine.high %v3313_v2, %v3321_v3  ;;  %v3298_v54 = vld [vmem:[#allocation13 + $0x120] sm:$0xff] }
 0x967   : > { %31944 = vmatmul.mubr.msk.f32.vlgmr.msra.gmra.mrb[2].mxu1 %vm855_vm1, %v3191_v1 }
 0x968   : > { %3647 = vmatprep.mubr.bf16.mxu1 %v40000_v14  ;;  %3616 = vmatpush1.bf16.msra.mxu1 %v30430_v32  ;;  %v3309_v32 = vld [vmem:[#allocation13 + $0x178] sm:$0xff] }
 0x969   : > { %3617 = vmatprep.subr.bf16.mxu1 %v30447_v38  ;;  %v30443_v34 = vcombine.high %v3301_v30, %v3309_v32  ;;  %v30440_v38 = vcombine.low %v3300_v26, %v3308_v28  ;;  %v30442_v40 = vcombine.low %v3301_v30, %v3309_v32  ;;  %v34198_v26 = vld [vmem:[#allocation15 + $0x10] sm:$0xff] }
 0x96a   : > { %v3494_v28 = vrot.slane %v34198_v26, %v33675_v44  ;;  %v3502_v30 = vrot.slane %v34198_v26, %v33729_v29  ;;  %v3498_v32 = vrot.slane %v34198_v26, %v33680_v46 }
 0x96c   : > { %3618 = vmatpush1.bf16.msra.mxu1 %v30446_v37  ;;  %v3325_v37 = vld [vmem:[#allocation13 + $0x1f8] sm:$0xff] }
 0x96d   : > { %3697 = vmatprep.subr.bf16.mxu1 %v30435_v27  ;;  %v30459_v49 = vcombine.high %v3317_v45, %v3325_v37  ;;  %v30458_v17 = vcombine.low %v3317_v45, %v3325_v37  ;;  %v32590_v27 = vld [vmem:[%s39969_s13 + $0x400] sm:$0xff]  }
 0xa3a   : > { %v3268_v9 = vpop.f32.mrb[2].mxu1 }
 0xa3b   : > { %v3269_v10 = vadd.f32 %v3268_v9, %v3198_v7  ;;  %v31945_v11 = vpop.f32.mrb[3].mxu1  ;;  %v3299_v7 = vld [vmem:[#allocation13 + $0x128] sm:$0xff] }
 0xa3c   : > { %v3307_v9 = vld [vmem:[#allocation13 + $0x168] sm:$0xff]  ;;  %v30450_v11 = vcombine.low %v3313_v2, %v3321_v3  ;;  %v32601_v2 = vld [vmem:[%s39969_s13 + $0x4d8] sm:$0xff]  }
 0xa3d   : > { %v3272_v13 = vadd.f32 %v3269_v10, %v3191_v1  ;;  %v3306_v1 = vld [vmem:[#allocation13 + $0x160] sm:$0xff]  ;;  %v30448_v10 = vcombine.low %v3312_v8, %v3320_v31  ;;  %v30438_v22 = vcombine.low %v3299_v7, %v3307_v9  ;;  %v32599_v8 = vld [vmem:[%s39969_s13 + $0x490] sm:$0xff]  }
 0xa3e   : > { %v32600_v31 = vld [vmem:[%s39969_s13 + $0x458] sm:$0xff]  }
 0xa3f   : > { %v3277_v15 = vsel %vm1172_vm4, %v3272_v13, 0.0  ;;  %v32602_v3 = vld [vmem:[%s39969_s13 + $0x418] sm:$0xff]  }
 0xa40   : > { %3278 = vadd.xlane.f32.xlu0 %v3277_v15  ;;  %v30439_v15 = vcombine.high %v3299_v7, %v3307_v9  ;;  %v32608_v7 = vld [vmem:[%s39969_s13 + $0x468] sm:$0xff]  }
 0xa41   : > { %v32609_v9 = vld [vmem:[%s39969_s13 + $0x4e8] sm:$0xff]  }
 0xacd   : > { %v3279_v16 = vpop.xlane.xlu0 %3278 }
 0xace   : > { %v3280_v24 = vmul.f32 0.03125, %v3279_v16  ;;  %v3314_v16 = vld [vmem:[#allocation13 + $0x1a0] sm:$0xff] }
 0xad0   : > { %v3281_v18 = vsub.f32 %v3272_v13, %v3280_v24  ;;  %v30437_v13 = vcombine.high %v3298_v54, %v3306_v1  ;;  %v3322_v24 = vld [vmem:[#allocation13 + $0x1e0] sm:$0xff] }
 0xad1   : > { %v30453_v23 = vcombine.high %v3314_v16, %v3322_v24  ;;  %v30452_v48 = vcombine.low %v3314_v16, %v3322_v24  ;;  %v32614_v16 = vld [vmem:[%s39969_s13 + $0x430] sm:$0xff]  }
 0xad2   : > { %v3282_v20 = vmul.f32 %v3281_v18, %v3281_v18  ;;  %v32615_v24 = vld [vmem:[%s39969_s13 + $0x4b0] sm:$0xff]  }
 0xad4   : > { %v3283_v21 = vsel %vm1172_vm4, %v3282_v20, 0.0  ;;  %v3323_v20 = vld [vmem:[#allocation13 + $0x1e8] sm:$0xff] }
 0xad5   : > { %3284 = vadd.xlane.f32.xlu1 %v3283_v21  ;;  %v30436_v21 = vcombine.low %v3298_v54, %v3306_v1  ;;  %v32606_v54 = vld [vmem:[%s39969_s13 + $0x420] sm:$0xff]  }
 0xad6   : > { %v32607_v1 = vld [vmem:[%s39969_s13 + $0x4a0] sm:$0xff]  }
 0xb62   : > { %v3285_v51 = vpop.xlane.xlu1 %3284 }
 0xb63   : > { %v3286_v53 = vmul.f32 0.03125, %v3285_v51  ;;  %v32591_v51 = vld [vmem:[%s39969_s13 + $0x480] sm:$0xff]  }
 0xb65   : > { %v3287_v56 = vadd.f32 1e-05, %v3286_v53  ;;  %v32592_v53 = vld [vmem:[%s39969_s13 + $0x448] sm:$0xff]  }
 0xb67   : > { %32720 = vrsqrt.f32 %v3287_v56  ;;  %v32593_v56 = vld [vmem:[%s39969_s13 + $0x4c8] sm:$0xff]  }
 0xb71   : > { %v32721_v58 = vpop.eup %32720 }
 0xb72   : > { %v3289_v61 = vmul.f32 %v32721_v58, %v3281_v18  ;;  %v3315_v18 = vld [vmem:[#allocation13 + $0x1a8] sm:$0xff] }
 0xb73   : > { %v30455_v25 = vcombine.high %v3315_v18, %v3323_v20  ;;  %v30454_v12 = vcombine.low %v3315_v18, %v3323_v20  ;;  %v32594_v58 = vld [vmem:[%s39969_s13 + $0x408] sm:$0xff]   ;;  %v32616_v18 = vld [vmem:[%s39969_s13 + $0x478] sm:$0xff]  }
 0xb74   : > { %v3290_v0 = vmul.f32 %v30426_v59, %v3289_v61  ;;  %v32595_v59 = vld [vmem:[%s39969_s13 + $0x488] sm:$0xff]   ;;  %v32596_v61 = vld [vmem:[%s39969_s13 + $0x450] sm:$0xff]   ;;  %v32617_v20 = vld [vmem:[%s39969_s13 + $0x4f8] sm:$0xff]  }
 0xb76   : > { %v34068_v4 = vadd.f32 %v30427_v63, %v3290_v0  ;;  %v32597_v63 = vld [vmem:[%s39969_s13 + $0x4d0] sm:$0xff]  }
 0xb77   : > { %v32598_v0 = vld [vmem:[%s39969_s13 + $0x410] sm:$0xff]  }
 0xb78   : > { %v34072_v5 = vpack.c.bf16 %v34068_v4, %v34068_v4 }
 0xb7a   : > { %30460 = vmatmul.mubr.msk.bf16.vlgmr.msra.gmra.mrb[52].mxu0 %vm855_vm1, %v34072_v5  ;;  %30461 = vmatmul.mubr.msk.bf16.vlgmr.msra.gmra.mrb[24].mxu1 %vm855_vm1, %v34072_v5 }
 0xb7b   : > { %3657 = vmatpush1.bf16.msra.mxu0 %v30432_v41  ;;  %3698 = vmatpush1.bf16.msra.mxu1 %v30434_v50  ;;  %v32588_v41 = vld [vmem:[%s39969_s13 + $0x440] sm:$0xff]  }
 0xb7c   : > { %3658 = vmatprep.subr.bf16.mxu0 %v30449_v6  ;;  %3699 = vmatprep.subr.bf16.mxu1 %v30451_v39  ;;  %v32589_v50 = vld [vmem:[%s39969_s13 + $0x4c0] sm:$0xff]  }
 0xb7d   : > { %3688 = vmatprep.mubr.bf16.mxu0 %v40000_v14  ;;  %3729 = vmatprep.mubr.bf16.mxu1 %v40000_v14  ;;  %v32604_v6 = vld [vmem:[%s39969_s13 + $0x460] sm:$0xff]  }
 0xb7e   : > { %v32605_v39 = vld [vmem:[%s39969_s13 + $0x4e0] sm:$0xff]  }
 0xb7f   : > { %3659 = vmatpush1.bf16.msra.mxu0 %v30448_v10  ;;  %3700 = vmatpush1.bf16.msra.mxu1 %v30450_v11  ;;  %v32610_v10 = vld [vmem:[%s39969_s13 + $0x428] sm:$0xff]  }
 0xb80   : > { %3738 = vmatprep.subr.bf16.mxu0 %v30437_v13  ;;  %3779 = vmatprep.subr.bf16.mxu1 %v30439_v15  ;;  %v32611_v11 = vld [vmem:[%s39969_s13 + $0x4a8] sm:$0xff]   ;;  %v32612_v13 = vld [vmem:[%s39969_s13 + $0x470] sm:$0xff]  }
 0xb81   : > { %v32613_v15 = vld [vmem:[%s39969_s13 + $0x4f0] sm:$0xff]  }
 0xb82   : > { %30462 = vmatmul.mubr.msk.bf16.vlgmr.msra.gmra.mrb[56].mxu0 %vm855_vm1, %v34072_v5  ;;  %30463 = vmatmul.mubr.msk.bf16.vlgmr.msra.gmra.mrb[28].mxu1 %vm855_vm1, %v34072_v5 }
 0xb83   : > { %3739 = vmatpush1.bf16.msra.mxu0 %v30436_v21  ;;  %3780 = vmatpush1.bf16.msra.mxu1 %v30438_v22  ;;  %v32618_v21 = vld [vmem:[%s39969_s13 + $0x438] sm:$0xff]  }
 0xb84   : > { %3740 = vmatprep.subr.bf16.mxu0 %v30453_v23  ;;  %3781 = vmatprep.subr.bf16.mxu1 %v30455_v25  ;;  %v32619_v22 = vld [vmem:[%s39969_s13 + $0x4b8] sm:$0xff]   ;;  %v32620_v23 = vld [vmem:[%s39969_s13 + $0x540] sm:$0xff]  }
 0xb85   : > { %3770 = vmatprep.mubr.bf16.mxu0 %v40000_v14  ;;  %3811 = vmatprep.mubr.bf16.mxu1 %v40000_v14  ;;  %v32621_v25 = vld [vmem:[%s39969_s13 + $0x5c0] sm:$0xff]  }
 0xb87   : > { %3741 = vmatpush1.bf16.msra.mxu0 %v30452_v48  ;;  %3782 = vmatpush1.bf16.msra.mxu1 %v30454_v12  ;;  %v3506_v48 = vrot.slane %v34198_v26, %v33683_v47 }
 0xb88   : > { %3820 = vmatprep.subr.bf16.mxu0 %v30441_v33  ;;  %3861 = vmatprep.subr.bf16.mxu1 %v30443_v34 }
 0xb8a   : > { %30464 = vmatmul.mubr.msk.bf16.vlgmr.msra.gmra.mrb[60].mxu0 %vm855_vm1, %v34072_v5  ;;  %30465 = vmatmul.mubr.msk.bf16.vlgmr.msra.gmra.mrb[32].mxu1 %vm855_vm1, %v34072_v5 }
 0xb8b   : > { %3821 = vmatpush1.bf16.msra.mxu0 %v30440_v38  ;;  %3862 = vmatpush1.bf16.msra.mxu1 %v30442_v40 }
 0xb8c   : > { %3822 = vmatprep.subr.bf16.mxu0 %v30457_v19  ;;  %3863 = vmatprep.subr.bf16.mxu1 %v30459_v49 }
 0xb8d   : > { %3852 = vmatprep.mubr.bf16.mxu0 %v40000_v14  ;;  %3893 = vmatprep.mubr.bf16.mxu1 %v40000_v14 }
 0xb8f   : > { %3823 = vmatpush1.bf16.msra.mxu0 %v30456_v52  ;;  %3864 = vmatpush1.bf16.msra.mxu1 %v30458_v17 }
 0xb90   : > { %31713 = vmatprep.subr.bf16.mxu0 %v32588_v41  ;;  %31735 = vmatprep.subr.bf16.mxu1 %v32589_v50 }
 0xb92   : > { %30466 = vmatmul.mubr.msk.bf16.vlgmr.msra.gmra.mrb[64].mxu0 %vm855_vm1, %v34072_v5  ;;  %30467 = vmatmul.mubr.msk.bf16.vlgmr.msra.gmra.mrb[36].mxu1 %vm855_vm1, %v34072_v5  ;;  %v32603_v5 = vld [vmem:[%s39969_s13 + $0x498] sm:$0xff]  }
 0xb93   : > { %31714 = vmatpush3.bf16.msra.mxu0 %v32590_v27  ;;  %31736 = vmatpush3.bf16.msra.mxu1 %v32591_v51 }
 0xb94   : > { %31715 = vmatprep.subr.bf16.mxu0 %v32592_v53  ;;  %31737 = vmatprep.subr.bf16.mxu1 %v32593_v56  ;;  %v3514_v56 = vrot.slane %v34198_v26, %v33756_v60 }
 0xb97   : > { %31716 = vmatpush3.bf16.msra.mxu0 %v32594_v58  ;;  %31738 = vmatpush3.bf16.msra.mxu1 %v32595_v59  ;;  %v3522_v58 = vrot.slane %v34198_v26, %v33700_v62  ;;  %v32622_v59 = vld [vmem:[%s39969_s13 + $0x500] sm:$0xff]  }
 0xb98   : > { %31717 = vmatprep.subr.bf16.mxu0 %v32596_v61  ;;  %31739 = vmatprep.subr.bf16.mxu1 %v32597_v63  ;;  %v32623_v61 = vld [vmem:[%s39969_s13 + $0x580] sm:$0xff]  }
 0xb9b   : > { %31718 = vmatpush3.bf16.msra.mxu0 %v32598_v0  ;;  %31740 = vmatpush3.bf16.msra.mxu1 %v32599_v8  ;;  %v32624_v8 = vld [vmem:[%s39969_s13 + $0x548] sm:$0xff]  }
 0xb9c   : > { %31719 = vmatprep.subr.bf16.mxu0 %v32600_v31  ;;  %31741 = vmatprep.subr.bf16.mxu1 %v32601_v2  ;;  %v32625_v31 = vld [vmem:[%s39969_s13 + $0x5c8] sm:$0xff]  }
 0xb9f   : > { %31720 = vmatpush3.bf16.msra.mxu0 %v32602_v3  ;;  %31742 = vmatpush3.bf16.msra.mxu1 %v32603_v5 }
 0xba0   : > { %31721 = vmatprep.subr.bf16.mxu0 %v32604_v6  ;;  %31743 = vmatprep.subr.bf16.mxu1 %v32605_v39 }
 0xba3   : > { %31722 = vmatpush3.bf16.msra.mxu0 %v32606_v54  ;;  %31744 = vmatpush3.bf16.msra.mxu1 %v32607_v1 }
 0xba4   : > { %31723 = vmatprep.subr.bf16.mxu0 %v32608_v7  ;;  %31745 = vmatprep.subr.bf16.mxu1 %v32609_v9  ;;  %v32626_v9 = vld [vmem:[%s39969_s13 + $0x508] sm:$0xff]  }
 0xba7   : > { %31724 = vmatpush3.bf16.msra.mxu0 %v32610_v10  ;;  %31746 = vmatpush3.bf16.msra.mxu1 %v32611_v11  ;;  %v32627_v10 = vld [vmem:[%s39969_s13 + $0x588] sm:$0xff]  }
 0xba8   : > { %31725 = vmatprep.subr.bf16.mxu0 %v32612_v13  ;;  %31747 = vmatprep.subr.bf16.mxu1 %v32613_v15  ;;  %v32628_v15 = vld [vmem:[%s39969_s13 + $0x550] sm:$0xff]  }
 0xbab   : > { %31726 = vmatpush3.bf16.msra.mxu0 %v32614_v16  ;;  %31748 = vmatpush3.bf16.msra.mxu1 %v32615_v24  ;;  %v32629_v16 = vld [vmem:[%s39969_s13 + $0x5d0] sm:$0xff]  }
 0xbac   : > { %31727 = vmatprep.subr.bf16.mxu0 %v32616_v18  ;;  %31749 = vmatprep.subr.bf16.mxu1 %v32617_v20 }
 0xbaf   : > { %31728 = vmatpush3.bf16.msra.mxu0 %v32618_v21  ;;  %31750 = vmatpush3.bf16.msra.mxu1 %v32619_v22  ;;  %v32630_v22 = vld [vmem:[%s39969_s13 + $0x510] sm:$0xff]  }
 0xbb0   : > { %31757 = vmatprep.subr.bf16.mxu0 %v32620_v23  ;;  %31779 = vmatprep.subr.bf16.mxu1 %v32621_v25  ;;  %v32631_v23 = vld [vmem:[%s39969_s13 + $0x590] sm:$0xff]   ;;  %v32632_v25 = vld [vmem:[%s39969_s13 + $0x558] sm:$0xff]  }
 0xc4d   : > { %v3608_v12 = vpop.f32.mrb[52].mxu0  ;;  %v3649_v33 = vpop.f32.mrb[24].mxu1 }
 0xc4e   : > { %v3609_v34 = vadd.f32 %v3608_v12, %v3494_v28  ;;  %v3650_v35 = vadd.f32 %v3649_v33, %v3502_v30  ;;  %v3610_v36 = vpop.f32.mrb[53].mxu0  ;;  %v3651_v45 = vpop.f32.mrb[25].mxu1  ;;  %v32633_v28 = vld [vmem:[%s39969_s13 + $0x5d8] sm:$0xff]  }
 0xc4f   : > { %v3611_v37 = vadd.f32 %v3610_v36, %v3498_v32  ;;  %v3652_v38 = vadd.f32 %v3651_v45, %v3506_v48  ;;  %v3612_v40 = vpop.f32.mrb[54].mxu0  ;;  %v3653_v19 = vpop.f32.mrb[26].mxu1  ;;  %v32635_v36 = vld [vmem:[%s39969_s13 + $0x598] sm:$0xff]  }
 0xc50   : > { %v3902_v49 = vmax.f32 %v3609_v34, 0.0  ;;  %v3904_v52 = vmax.f32 %v3650_v35, 0.0  ;;  %v3613_v17 = vpop.f32.mrb[55].mxu0  ;;  %v3654_v41 = vpop.f32.mrb[27].mxu1  ;;  %v32634_v35 = vld [vmem:[%s39969_s13 + $0x518] sm:$0xff]   ;;  %v32637_v40 = vld [vmem:[%s39969_s13 + $0x5e0] sm:$0xff]  }
 0xc51   : > { %v3903_v50 = vmax.f32 %v3611_v37, 0.0  ;;  %v3905_v27 = vmax.f32 %v3652_v38, 0.0  ;;  %v32636_v38 = vld [vmem:[%s39969_s13 + $0x560] sm:$0xff]   ;;  %v34268_v19 = vld [vmem:[#allocation15 + $0x18] sm:$0xff]  ;;  %v32640_v41 = vld [vmem:[%s39969_s13 + $0x568] sm:$0xff]  }
 0xc52   : > { %v3918_v63 = vpack.c.bf16 %v3902_v49, %v3902_v49  ;;  %v3920_v0 = vpack.c.bf16 %v3904_v52, %v3904_v52  ;;  %v3550_v49 = vrot.slane %v34268_v19, %v33697_v57  ;;  %v32638_v52 = vld [vmem:[%s39969_s13 + $0x520] sm:$0xff]  }
 0xc53   : > { %v3919_v51 = vpack.c.bf16 %v3903_v50, %v3903_v50  ;;  %v3921_v53 = vpack.c.bf16 %v3905_v27, %v3905_v27  ;;  %v32639_v17 = vld [vmem:[%s39969_s13 + $0x5a0] sm:$0xff]   ;;  %v32641_v50 = vld [vmem:[%s39969_s13 + $0x5e8] sm:$0xff]  }
 0xc55   : > { %v34224_v2 = vpop.f32.mrb[56].mxu0  ;;  %v34226_v3 = vpop.f32.mrb[28].mxu1  ;;  %4993 = vmatprep.mubr.bf16.mxu0 %v3919_v51  ;;  %5033 = vmatprep.mubr.bf16.mxu1 %v3921_v53 }
 0xc56   : > { %v3692_v5 = vpop.f32.mrb[57].mxu0  ;;  %v3733_v6 = vpop.f32.mrb[29].mxu1  ;;  %4994 = vmatmul.mubr.bf16.vlgmr.msra.gmra.mrb[68].mxu0 %v3918_v63  ;;  %5034 = vmatmul.mubr.bf16.vlgmr.msra.gmra.mrb[40].mxu1 %v3920_v0  ;;  %v32642_v63 = vld [vmem:[%s39969_s13 + $0x528] sm:$0xff]  }
 0xc57   : > { %v3693_v39 = vadd.f32 %v3692_v5, %v3514_v56  ;;  %v3734_v54 = vadd.f32 %v3733_v6, %v3522_v58  ;;  %31758 = vmatpush3.bf16.msra.mxu0 %v32622_v59  ;;  %31780 = vmatpush3.bf16.msra.mxu1 %v32623_v61  ;;  %v3694_v1 = vpop.f32.mrb[58].mxu0  ;;  %v3735_v7 = vpop.f32.mrb[30].mxu1  ;;  %v32643_v0 = vld [vmem:[%s39969_s13 + $0x5a8] sm:$0xff]  }
 0xc58   : > { %v3695_v11 = vpop.f32.mrb[59].mxu0  ;;  %v3736_v13 = vpop.f32.mrb[31].mxu1  ;;  %31759 = vmatprep.subr.bf16.mxu0 %v32624_v8  ;;  %31781 = vmatprep.subr.bf16.mxu1 %v32625_v31  ;;  %v3510_v8 = vrot.slane %v34198_v26, %v33694_v55  ;;  %v3518_v31 = vrot.slane %v34198_v26, %v33697_v57  ;;  %v3530_v1 = vrot.slane %v34268_v19, %v33680_v46  ;;  %v32646_v26 = vld [vmem:[%s39969_s13 + $0x530] sm:$0xff]  }
 0xc59   : > { %v3907_v24 = vmax.f32 %v3693_v39, 0.0  ;;  %v3909_v18 = vmax.f32 %v3734_v54, 0.0  ;;  %v32644_v39 = vld [vmem:[%s39969_s13 + $0x570] sm:$0xff]   ;;  %v3538_v7 = vrot.slane %v34268_v19, %v33683_v47  ;;  %v32648_v13 = vld [vmem:[%s39969_s13 + $0x578] sm:$0xff]  }
 0xc5a   : > { %v32645_v54 = vld [vmem:[%s39969_s13 + $0x5f0] sm:$0xff]   ;;  %v3732_v11 = vadd.f32 %v34226_v3, %v3518_v31  ;;  %v32651_v3 = vld [vmem:[%s39969_s13 + $0x5b8] sm:$0xff]   ;;  %v32672_v31 = vld [vmem:[%s39969_s13 + $0x668] sm:$0xff]  }
 0xc5b   : > { %v3923_v20 = vpack.c.bf16 %v3907_v24, %v3907_v24  ;;  %v3925_v21 = vpack.c.bf16 %v3909_v18, %v3909_v18  ;;  %31760 = vmatpush3.bf16.msra.mxu0 %v32626_v9  ;;  %31782 = vmatpush3.bf16.msra.mxu1 %v32627_v10  ;;  %v32647_v9 = vld [vmem:[%s39969_s13 + $0x5b0] sm:$0xff]   ;;  %v3691_v10 = vadd.f32 %v34224_v2, %v3510_v8  ;;  %v32650_v2 = vld [vmem:[%s39969_s13 + $0x538] sm:$0xff]   ;;  %v32671_v8 = vld [vmem:[%s39969_s13 + $0x6a0] sm:$0xff]  }
 0xc5c   : > { %31761 = vmatprep.subr.bf16.mxu0 %v32628_v15  ;;  %31783 = vmatprep.subr.bf16.mxu1 %v32629_v16  ;;  %v32649_v15 = vld [vmem:[%s39969_s13 + $0x5f8] sm:$0xff]  }
 0xc5d   : > { %v34252_v30 = vpop.f32.mrb[60].mxu0  ;;  %v34254_v32 = vpop.f32.mrb[32].mxu1  ;;  %5073 = vmatprep.mubr.bf16.mxu0 %v3923_v20  ;;  %5113 = vmatprep.mubr.bf16.mxu1 %v3925_v21  ;;  %v3906_v18 = vmax.f32 %v3691_v10, 0.0  ;;  %v3908_v20 = vmax.f32 %v3732_v11, 0.0  ;;  %v32652_v21 = vld [vmem:[%s39969_s13 + $0x640] sm:$0xff]   ;;  %v3554_v10 = vrot.slane %v34268_v19, %v33700_v62  ;;  %v32678_v11 = vld [vmem:[%s39969_s13 + $0x630] sm:$0xff]  }
 0xc5e   : > { %v3774_v48 = vpop.f32.mrb[61].mxu0  ;;  %v3815_v12 = vpop.f32.mrb[33].mxu1 }
 0xc5f   : > { %31762 = vmatpush3.bf16.msra.mxu0 %v32630_v22  ;;  %31784 = vmatpush3.bf16.msra.mxu1 %v32631_v23  ;;  %v3776_v33 = vpop.f32.mrb[62].mxu0  ;;  %v3817_v34 = vpop.f32.mrb[34].mxu1  ;;  %v3775_v16 = vadd.f32 %v3774_v48, %v3530_v1  ;;  %v3816_v24 = vadd.f32 %v3815_v12, %v3538_v7  ;;  %v32653_v22 = vld [vmem:[%s39969_s13 + $0x6c0] sm:$0xff]   ;;  %v3922_v48 = vpack.c.bf16 %v3906_v18, %v3906_v18  ;;  %v32676_v1 = vld [vmem:[%s39969_s13 + $0x670] sm:$0xff]   ;;  %v32682_v18 = vld [vmem:[%s39969_s13 + $0x638] sm:$0xff]  }
 0xc60   : > { %v3777_v45 = vpop.f32.mrb[63].mxu0  ;;  %v3818_v37 = vpop.f32.mrb[35].mxu1  ;;  %31763 = vmatprep.subr.bf16.mxu0 %v32632_v25  ;;  %31785 = vmatprep.subr.bf16.mxu1 %v32633_v28  ;;  %v32654_v28 = vld [vmem:[%s39969_s13 + $0x600] sm:$0xff]   ;;  %v3924_v12 = vpack.c.bf16 %v3908_v20, %v3908_v20  ;;  %v3534_v7 = vrot.slane %v34268_v19, %v33729_v29 }
 0xc61   : > { %v3911_v23 = vmax.f32 %v3775_v16, 0.0  ;;  %v3913_v25 = vmax.f32 %v3816_v24, 0.0  ;;  %v32655_v33 = vld [vmem:[%s39969_s13 + $0x680] sm:$0xff]   ;;  %v32658_v37 = vld [vmem:[%s39969_s13 + $0x608] sm:$0xff]   ;;  %v32680_v16 = vld [vmem:[%s39969_s13 + $0x678] sm:$0xff]  }
 0xc62   : > { %v3814_v24 = vadd.f32 %v34254_v32, %v3534_v7  ;;  %v32683_v32 = vld [vmem:[%s39969_s13 + $0x6b8] sm:$0xff]  }
 0xc63   : > { %31764 = vmatpush3.bf16.msra.mxu0 %v32634_v35  ;;  %31786 = vmatpush3.bf16.msra.mxu1 %v32635_v36  ;;  %v3927_v34 = vpack.c.bf16 %v3911_v23, %v3911_v23  ;;  %v32656_v35 = vld [vmem:[%s39969_s13 + $0x648] sm:$0xff]   ;;  %v3929_v45 = vpack.c.bf16 %v3913_v25, %v3913_v25  ;;  %v32686_v25 = vld [vmem:[%s39969_s13 + $0x700] sm:$0xff]  }
 0xc64   : > { %31765 = vmatprep.subr.bf16.mxu0 %v32636_v38  ;;  %31787 = vmatprep.subr.bf16.mxu1 %v32637_v40  ;;  %v32657_v36 = vld [vmem:[%s39969_s13 + $0x6c8] sm:$0xff]   ;;  %v32660_v40 = vld [vmem:[%s39969_s13 + $0x650] sm:$0xff]  }
 0xc65   : > { %v34284_v27 = vpop.f32.mrb[64].mxu0  ;;  %v3895_v51 = vpop.f32.mrb[36].mxu1  ;;  %v32659_v38 = vld [vmem:[%s39969_s13 + $0x688] sm:$0xff]  }
 0xc66   : > { %v34286_v53 = vadd.f32 %v3895_v51, %v3550_v49  ;;  %v34288_v56 = vpop.f32.mrb[65].mxu0  ;;  %v34290_v58 = vpop.f32.mrb[37].mxu1  ;;  %v32661_v49 = vld [vmem:[%s39969_s13 + $0x6d0] sm:$0xff]   ;;  %v32666_v51 = vld [vmem:[%s39969_s13 + $0x618] sm:$0xff]  }
 0xc67   : > { %31766 = vmatpush3.bf16.msra.mxu0 %v32638_v52  ;;  %31788 = vmatpush3.bf16.msra.mxu1 %v32639_v17  ;;  %v3858_v59 = vpop.f32.mrb[66].mxu0  ;;  %v3899_v61 = vpop.f32.mrb[38].mxu1  ;;  %v32662_v52 = vld [vmem:[%s39969_s13 + $0x610] sm:$0xff]  }
 0xc68   : > { %v3859_v5 = vpop.f32.mrb[67].mxu0  ;;  %v3900_v6 = vpop.f32.mrb[39].mxu1  ;;  %31767 = vmatprep.subr.bf16.mxu0 %v32640_v41  ;;  %31789 = vmatprep.subr.bf16.mxu1 %v32641_v50  ;;  %v32663_v17 = vld [vmem:[%s39969_s13 + $0x690] sm:$0xff]   ;;  %v32664_v41 = vld [vmem:[%s39969_s13 + $0x658] sm:$0xff]   ;;  %v32668_v61 = vld [vmem:[%s39969_s13 + $0x660] sm:$0xff]  }
 0xc69   : > { %v32665_v50 = vld [vmem:[%s39969_s13 + $0x6d8] sm:$0xff]   ;;  %v32673_v5 = vld [vmem:[%s39969_s13 + $0x6e8] sm:$0xff]  }
 0xc6a   : > { %v32667_v59 = vld [vmem:[%s39969_s13 + $0x698] sm:$0xff]   ;;  %v32674_v6 = vld [vmem:[%s39969_s13 + $0x628] sm:$0xff]  }
 0xc6b   : > { %31768 = vmatpush3.bf16.msra.mxu0 %v32642_v63  ;;  %31790 = vmatpush3.bf16.msra.mxu1 %v32643_v0  ;;  %v32669_v63 = vld [vmem:[%s39969_s13 + $0x6e0] sm:$0xff]  }
 0xc6c   : > { %31769 = vmatprep.subr.bf16.mxu0 %v32644_v39  ;;  %31791 = vmatprep.subr.bf16.mxu1 %v32645_v54  ;;  %v32670_v0 = vld [vmem:[%s39969_s13 + $0x620] sm:$0xff]   ;;  %v3526_v39 = vrot.slane %v34268_v19, %v33675_v44  ;;  %v32675_v54 = vld [vmem:[%s39969_s13 + $0x6a8] sm:$0xff]  }
 0xc6f   : > { %31770 = vmatpush3.bf16.msra.mxu0 %v32646_v26  ;;  %31792 = vmatpush3.bf16.msra.mxu1 %v32647_v9  ;;  %v32677_v26 = vld [vmem:[%s39969_s13 + $0x6f0] sm:$0xff]   ;;  %v3546_v9 = vrot.slane %v34268_v19, %v33756_v60 }
 0xc70   : > { %31771 = vmatprep.subr.bf16.mxu0 %v32648_v13  ;;  %31793 = vmatprep.subr.bf16.mxu1 %v32649_v15  ;;  %v3773_v13 = vadd.f32 %v34252_v30, %v3526_v39  ;;  %v32679_v15 = vld [vmem:[%s39969_s13 + $0x6b0] sm:$0xff]   ;;  %v3898_v30 = vadd.f32 %v34290_v58, %v3554_v10  ;;  %v32707_v39 = vld [vmem:[%s39969_s13 + $0x7a8] sm:$0xff]   ;;  %v32713_v10 = vld [vmem:[%s39969_s13 + $0x7f8] sm:$0xff]  }
 0xc72   : > { %v3910_v20 = vmax.f32 %v3773_v13, 0.0  ;;  %v3917_v23 = vmax.f32 %v3898_v30, 0.0  ;;  %v32715_v13 = vld [vmem:[%s39969_s13 + $0x7b8] sm:$0xff]   ;;  %v30724_v30 = vld [vmem:[%s40106_s25 + $0x1] sm:$0x1] }
 0xc73   : > { %31772 = vmatpush3.bf16.msra.mxu0 %v32650_v2  ;;  %31794 = vmatpush3.bf16.msra.mxu1 %v32651_v3  ;;  %v32681_v2 = vld [vmem:[%s39969_s13 + $0x6f8] sm:$0xff]   ;;  %v3857_v3 = vadd.f32 %v34288_v56, %v3546_v9  ;;  %v32685_v56 = vld [vmem:[%s39969_s13 + $0x7c0] sm:$0xff]  }
 0xc74   : > { %31801 = vmatprep.subr.bf16.mxu0 %v32652_v21  ;;  %31823 = vmatprep.subr.bf16.mxu1 %v32653_v22  ;;  %v32684_v21 = vld [vmem:[%s39969_s13 + $0x740] sm:$0xff]   ;;  %v3912_v22 = vmax.f32 %v3814_v24, 0.0  ;;  %v32712_v9 = vld [vmem:[%s39969_s13 + $0x778] sm:$0xff]  }
 0xc75   : > { %v3915_v58 = vmax.f32 %v3857_v3, 0.0 }
 0xc76   : > { %5074 = vmatmul.mubr.bf16.vlgmr.msra.gmra.mrb[72].mxu0 %v3922_v48  ;;  %5114 = vmatmul.mubr.bf16.vlgmr.msra.gmra.mrb[44].mxu1 %v3924_v12  ;;  %v32687_v48 = vld [vmem:[%s39969_s13 + $0x780] sm:$0xff]   ;;  %v3928_v12 = vpack.c.bf16 %v3912_v22, %v3912_v22 }
 0xc77   : > { %31802 = vmatpush3.bf16.msra.mxu0 %v32654_v28  ;;  %5153 = vmatprep.mubr.bf16.mxu0 %v3927_v34  ;;  %v3926_v28 = vpack.c.bf16 %v3910_v20, %v3910_v20  ;;  %v3931_v34 = vpack.c.bf16 %v3915_v58, %v3915_v58 }
 0xc78   : > { %31824 = vmatpush3.bf16.msra.mxu1 %v32655_v33  ;;  %5193 = vmatprep.mubr.bf16.mxu1 %v3929_v45  ;;  %v32688_v33 = vld [vmem:[%s39969_s13 + $0x748] sm:$0xff]  }
 0xc79   : > { %31803 = vmatprep.subr.bf16.mxu0 %v32656_v35  ;;  %31825 = vmatprep.subr.bf16.mxu1 %v32657_v36  ;;  %v32689_v35 = vld [vmem:[%s39969_s13 + $0x7c8] sm:$0xff]   ;;  %v3933_v36 = vpack.c.bf16 %v3917_v23, %v3917_v23 }
 0xc7a   : > { %v32690_v45 = vld [vmem:[%s39969_s13 + $0x708] sm:$0xff]  }
 0xc7b   : > { %31804 = vmatpush3.bf16.msra.mxu0 %v32658_v37  ;;  %v32691_v37 = vld [vmem:[%s39969_s13 + $0x788] sm:$0xff]  }
 0xc7c   : > { %31826 = vmatpush3.bf16.msra.mxu1 %v32659_v38  ;;  %31805 = vmatprep.subr.bf16.mxu0 %v32660_v40  ;;  %v32692_v38 = vld [vmem:[%s39969_s13 + $0x750] sm:$0xff]  }
 0xc7d   : > { %31827 = vmatprep.subr.bf16.mxu1 %v32661_v49  ;;  %v32693_v40 = vld [vmem:[%s39969_s13 + $0x7d0] sm:$0xff]  }
 0xc7e   : > { %v32694_v49 = vld [vmem:[%s39969_s13 + $0x710] sm:$0xff]  }
 0xc7f   : > { %31806 = vmatpush3.bf16.msra.mxu0 %v32662_v52  ;;  %v32695_v52 = vld [vmem:[%s39969_s13 + $0x790] sm:$0xff]  }
 0xc80   : > { %31828 = vmatpush3.bf16.msra.mxu1 %v32663_v17  ;;  %31807 = vmatprep.subr.bf16.mxu0 %v32664_v41  ;;  %v32696_v17 = vld [vmem:[%s39969_s13 + $0x758] sm:$0xff]  }
 0xc81   : > { %31829 = vmatprep.subr.bf16.mxu1 %v32665_v50  ;;  %v32697_v41 = vld [vmem:[%s39969_s13 + $0x7d8] sm:$0xff]  }
 0xc82   : > { %v32698_v50 = vld [vmem:[%s39969_s13 + $0x718] sm:$0xff]  }
 0xc83   : > { %31808 = vmatpush3.bf16.msra.mxu0 %v32666_v51  ;;  %v32699_v51 = vld [vmem:[%s39969_s13 + $0x798] sm:$0xff]  }
 0xc84   : > { %31830 = vmatpush3.bf16.msra.mxu1 %v32667_v59  ;;  %31809 = vmatprep.subr.bf16.mxu0 %v32668_v61  ;;  %v32700_v59 = vld [vmem:[%s39969_s13 + $0x760] sm:$0xff]  }
 0xc85   : > { %31831 = vmatprep.subr.bf16.mxu1 %v32669_v63  ;;  %v32701_v61 = vld [vmem:[%s39969_s13 + $0x7e0] sm:$0xff]  }
 0xc86   : > { %v32702_v63 = vld [vmem:[%s39969_s13 + $0x720] sm:$0xff]  }
 0xc87   : > { %31810 = vmatpush3.bf16.msra.mxu0 %v32670_v0  ;;  %v32703_v0 = vld [vmem:[%s39969_s13 + $0x7a0] sm:$0xff]  }
 0xc88   : > { %31832 = vmatpush3.bf16.msra.mxu1 %v32671_v8  ;;  %31811 = vmatprep.subr.bf16.mxu0 %v32672_v31  ;;  %v32704_v8 = vld [vmem:[%s39969_s13 + $0x768] sm:$0xff]  }
 0xc89   : > { %31833 = vmatprep.subr.bf16.mxu1 %v32673_v5  ;;  %v32705_v31 = vld [vmem:[%s39969_s13 + $0x7e8] sm:$0xff]  }
 0xc8a   : > { %v32706_v5 = vld [vmem:[%s39969_s13 + $0x728] sm:$0xff]  }
 0xc8b   : > { %31812 = vmatpush3.bf16.msra.mxu0 %v32674_v6  ;;  %v3542_v6 = vrot.slane %v34268_v19, %v33694_v55  ;;  %v32710_v19 = vld [vmem:[%s39969_s13 + $0x730] sm:$0xff]  }
 0xc8c   : > { %31834 = vmatpush3.bf16.msra.mxu1 %v32675_v54  ;;  %31813 = vmatprep.subr.bf16.mxu0 %v32676_v1  ;;  %v32708_v54 = vld [vmem:[%s39969_s13 + $0x770] sm:$0xff]  }
 0xc8d   : > { %31835 = vmatprep.subr.bf16.mxu1 %v32677_v26  ;;  %v32709_v1 = vld [vmem:[%s39969_s13 + $0x7f0] sm:$0xff]   ;;  %v3855_v7 = vadd.f32 %v34284_v27, %v3542_v6  ;;  %v32714_v27 = vld [vmem:[%s39969_s13 + $0x738] sm:$0xff]  }
 0xc8e   : > { %v32711_v26 = vld [vmem:[%s39969_s13 + $0x7b0] sm:$0xff]  }
 0xc8f   : > { %31814 = vmatpush3.bf16.msra.mxu0 %v32678_v11  ;;  %v3914_v11 = vmax.f32 %v3855_v7, 0.0 }
 0xc90   : > { %31836 = vmatpush3.bf16.msra.mxu1 %v32679_v15  ;;  %31815 = vmatprep.subr.bf16.mxu0 %v32680_v16  ;;  %v3916_v15 = vmax.f32 %v34286_v53, 0.0 }
 0xc91   : > { %31837 = vmatprep.subr.bf16.mxu1 %v32681_v2  ;;  %v3930_v16 = vpack.c.bf16 %v3914_v11, %v3914_v11 }
 0xc92   : > { %v3932_v24 = vpack.c.bf16 %v3916_v15, %v3916_v15 }
 0xc93   : > { %31816 = vmatpush3.bf16.msra.mxu0 %v32682_v18 }
 0xc94   : > { %31838 = vmatpush3.bf16.msra.mxu1 %v32683_v32  ;;  %31845 = vmatprep.subr.bf16.mxu0 %v32684_v21 }
 0xc95   : > { %31867 = vmatprep.subr.bf16.mxu1 %v32685_v56 }
 0xc96   : > { %5154 = vmatmul.mubr.bf16.vlgmr.msra.gmra.mrb[76].mxu0 %v3926_v28 }
 0xc97   : > { %5194 = vmatmul.mubr.bf16.vlgmr.msra.gmra.mrb[48].mxu1 %v3928_v12  ;;  %31846 = vmatpush3.bf16.msra.mxu0 %v32686_v25 }
 0xc98   : > { %5233 = vmatprep.mubr.bf16.mxu0 %v3931_v34  ;;  %31868 = vmatpush3.bf16.msra.mxu1 %v32687_v48 }
 0xc99   : > { %5273 = vmatprep.mubr.bf16.mxu1 %v3933_v36  ;;  %31847 = vmatprep.subr.bf16.mxu0 %v32688_v33 }
 0xc9a   : > { %31869 = vmatprep.subr.bf16.mxu1 %v32689_v35 }
 0xc9b   : > { %31848 = vmatpush3.bf16.msra.mxu0 %v32690_v45 }
 0xc9c   : > { %31870 = vmatpush3.bf16.msra.mxu1 %v32691_v37  ;;  %31849 = vmatprep.subr.bf16.mxu0 %v32692_v38 }
 0xc9d   : > { %31871 = vmatprep.subr.bf16.mxu1 %v32693_v40 }
 0xc9f   : > { %31850 = vmatpush3.bf16.msra.mxu0 %v32694_v49 }
 0xca0   : > { %31872 = vmatpush3.bf16.msra.mxu1 %v32695_v52  ;;  %31851 = vmatprep.subr.bf16.mxu0 %v32696_v17 }
 0xca1   : > { %31873 = vmatprep.subr.bf16.mxu1 %v32697_v41 }
 0xca3   : > { %31852 = vmatpush3.bf16.msra.mxu0 %v32698_v50 }
 0xca4   : > { %31874 = vmatpush3.bf16.msra.mxu1 %v32699_v51  ;;  %31853 = vmatprep.subr.bf16.mxu0 %v32700_v59 }
 0xca5   : > { %31875 = vmatprep.subr.bf16.mxu1 %v32701_v61 }
 0xca7   : > { %31854 = vmatpush3.bf16.msra.mxu0 %v32702_v63 }
 0xca8   : > { %31876 = vmatpush3.bf16.msra.mxu1 %v32703_v0  ;;  %31855 = vmatprep.subr.bf16.mxu0 %v32704_v8 }
 0xca9   : > { %31877 = vmatprep.subr.bf16.mxu1 %v32705_v31 }
 0xcab   : > { %31856 = vmatpush3.bf16.msra.mxu0 %v32706_v5 }
 0xcac   : > { %31878 = vmatpush3.bf16.msra.mxu1 %v32707_v39  ;;  %31857 = vmatprep.subr.bf16.mxu0 %v32708_v54 }
 0xcad   : > { %31879 = vmatprep.subr.bf16.mxu1 %v32709_v1 }
 0xcaf   : > { %31858 = vmatpush3.bf16.msra.mxu0 %v32710_v19 }
 0xcb0   : > { %31880 = vmatpush3.bf16.msra.mxu1 %v32711_v26  ;;  %31859 = vmatprep.subr.bf16.mxu0 %v32712_v9 }
 0xcb1   : > { %31881 = vmatprep.subr.bf16.mxu1 %v32713_v10 }
 0xcb3   : > { %31860 = vmatpush3.bf16.msra.mxu0 %v32714_v27 }
 0xcb4   : > { %31882 = vmatpush3.bf16.msra.mxu1 %v32715_v13 }
 0xcb6   : > { %5234 = vmatmul.mubr.bf16.vlgmr.msra.gmra.mrb[80].mxu0 %v3930_v16 }
 0xcb7   : > { %5274 = vmatmul.mubr.bf16.vlgmr.msra.gmra.mrb[52].mxu1 %v3932_v24  ;;  %5771 = vmatprep.mubr.bf16.mxu0 %v40000_v14 }
 0xcb8   : > { %5812 = vmatprep.mubr.bf16.mxu1 %v40000_v14 }
 0xd29   : > { %v31729_v2 = vpop.f32.mrb[68].mxu0  ;;  %v31751_v3 = vpop.f32.mrb[40].mxu1 }
 0xd2a   : > { %v31730_v18 = vpop.f32.mrb[69].mxu0  ;;  %v31752_v20 = vpop.f32.mrb[41].mxu1 }
 0xd2b   : > { %v31731_v53 = vadd.f32 %v31730_v18, %v31729_v2  ;;  %v31753_v32 = vadd.f32 %v31752_v20, %v31751_v3  ;;  %v31732_v21 = vpop.f32.mrb[70].mxu0  ;;  %v31754_v22 = vpop.f32.mrb[42].mxu1  ;;  %v5348_v20 = vld [vmem:[%s40109_s7] sm:$0xff] }
 0xd2c   : > { %v31733_v56 = vpop.f32.mrb[71].mxu0  ;;  %v31755_v58 = vpop.f32.mrb[43].mxu1  ;;  %v5360_v21 = vld [vmem:[%s40109_s7 + $0x2c8] sm:$0xff] }
 0xd2d   : > { %v4996_v23 = vadd.f32 %v31731_v53, %v30724_v30  ;;  %v5359_v53 = vld [vmem:[%s40109_s7 + $0x2c0] sm:$0xff] }
 0xd2e   : > { %v30855_v22 = vcombine.low %v5348_v20, %v5359_v53 }
 0xd2f   : > { %v5036_v25 = vadd.f32 %v31753_v32, %v4996_v23  ;;  %v30856_v32 = vcombine.high %v5348_v20, %v5359_v53  ;;  %v5370_v23 = vld [vmem:[%s40109_s7 + $0x580] sm:$0xff] }
 0xd31   : > { %5739 = vmatprep.subr.bf16.mxu0 %v30856_v32  ;;  %v5354_v32 = vld [vmem:[%s40109_s7 + $0x30] sm:$0xff] }
 0xd32   : > { %5740 = vmatpush1.bf16.msra.mxu0 %v30855_v22  ;;  %v5355_v22 = vld [vmem:[%s40109_s7 + $0x38] sm:$0xff] }
 0xd49   : > { %v31773_v28 = vpop.f32.mrb[72].mxu0  ;;  %v31795_v48 = vpop.f32.mrb[44].mxu1 }
 0xd4a   : > { %v31774_v12 = vpop.f32.mrb[73].mxu0  ;;  %v31796_v33 = vpop.f32.mrb[45].mxu1 }
 0xd4b   : > { %v31775_v34 = vadd.f32 %v31774_v12, %v31773_v28  ;;  %v31797_v35 = vadd.f32 %v31796_v33, %v31795_v48  ;;  %v31776_v36 = vpop.f32.mrb[74].mxu0  ;;  %v31798_v45 = vpop.f32.mrb[46].mxu1  ;;  %v5371_v28 = vld [vmem:[%s40109_s7 + $0x588] sm:$0xff] }
 0xd4c   : > { %v31777_v37 = vpop.f32.mrb[75].mxu0  ;;  %v31799_v38 = vpop.f32.mrb[47].mxu1  ;;  %v5382_v12 = vld [vmem:[%s40109_s7 + $0x848] sm:$0xff]  ;;  %v5350_v36 = vld [vmem:[%s40109_s7 + $0x10] sm:$0xff] }
 0xd4d   : > { %v5076_v40 = vadd.f32 %v31775_v34, %v5036_v25  ;;  %v5381_v25 = vld [vmem:[%s40109_s7 + $0x840] sm:$0xff]  ;;  %v30879_v34 = vcombine.low %v5371_v28, %v5382_v12  ;;  %v5361_v45 = vld [vmem:[%s40109_s7 + $0x2d0] sm:$0xff]  ;;  %v5351_v37 = vld [vmem:[%s40109_s7 + $0x18] sm:$0xff] }
 0xd4e   : > { %v30878_v48 = vcombine.high %v5370_v23, %v5381_v25  ;;  %v30877_v33 = vcombine.low %v5370_v23, %v5381_v25  ;;  %v30859_v38 = vcombine.low %v5350_v36, %v5361_v45 }
 0xd4f   : > { %v5116_v49 = vadd.f32 %v31797_v35, %v5076_v40  ;;  %v30880_v35 = vcombine.high %v5371_v28, %v5382_v12  ;;  %v30860_v40 = vcombine.high %v5350_v36, %v5361_v45  ;;  %v5387_v12 = vld [vmem:[%s40109_s7 + $0x870] sm:$0xff] }
 0xd50   : > { %5741 = vmatprep.subr.bf16.mxu0 %v30878_v48  ;;  %v5376_v48 = vld [vmem:[%s40109_s7 + $0x5b0] sm:$0xff] }
 0xd51   : > { %5742 = vmatpush1.bf16.msra.mxu0 %v30877_v33  ;;  %v5377_v33 = vld [vmem:[%s40109_s7 + $0x5b8] sm:$0xff]  ;;  %v30890_v45 = vcombine.high %v5376_v48, %v5387_v12 }
 0xd52   : > { %5821 = vmatprep.subr.bf16.mxu0 %v30860_v40  ;;  %v5367_v40 = vld [vmem:[%s40109_s7 + $0x300] sm:$0xff] }
 0xd69   : > { %v31817_v52 = vpop.f32.mrb[76].mxu0 }
 0xd6a   : > { %v31839_v17 = vpop.f32.mrb[48].mxu1  ;;  %v31818_v41 = vpop.f32.mrb[77].mxu0 }
 0xd6b   : > { %v31819_v50 = vadd.f32 %v31818_v41, %v31817_v52  ;;  %v31840_v51 = vpop.f32.mrb[49].mxu1  ;;  %v31820_v59 = vpop.f32.mrb[78].mxu0 }
 0xd6c   : > { %v31841_v61 = vadd.f32 %v31840_v51, %v31839_v17  ;;  %v31842_v63 = vpop.f32.mrb[50].mxu1  ;;  %v31821_v0 = vpop.f32.mrb[79].mxu0 }
 0xd6d   : > { %v5156_v8 = vadd.f32 %v31819_v50, %v5116_v49  ;;  %v31843_v31 = vpop.f32.mrb[51].mxu1  ;;  %v5362_v49 = vld [vmem:[%s40109_s7 + $0x2d8] sm:$0xff]  ;;  %v30854_v0 = vld [vmem:[%s40108_s8 + $0x1] sm:$0x1] }
 0xd6e   : > { %v30861_v52 = vcombine.low %v5351_v37, %v5362_v49  ;;  %v30862_v17 = vcombine.high %v5351_v37, %v5362_v49  ;;  %v5372_v31 = vld [vmem:[%s40109_s7 + $0x590] sm:$0xff]  ;;  %v5357_v49 = vld [vmem:[%s40109_s7 + $0x48] sm:$0xff] }
 0xd6f   : > { %v5196_v5 = vadd.f32 %v31841_v61, %v5156_v8  ;;  %v30853_v61 = vld [vmem:[%s40107_s14 + $0x1] sm:$0x1] }
 0xd89   : > { %v31861_v6 = vpop.f32.mrb[80].mxu0 }
 0xd8a   : > { %v31883_v39 = vpop.f32.mrb[52].mxu1  ;;  %v31862_v54 = vpop.f32.mrb[81].mxu0 }
 0xd8b   : > { %v31863_v1 = vadd.f32 %v31862_v54, %v31861_v6  ;;  %v31884_v19 = vpop.f32.mrb[53].mxu1  ;;  %v31864_v7 = vpop.f32.mrb[82].mxu0  ;;  %v5373_v6 = vld [vmem:[%s40109_s7 + $0x598] sm:$0xff] }
 0xd8c   : > { %v31885_v26 = vadd.f32 %v31884_v19, %v31883_v39  ;;  %v31886_v9 = vpop.f32.mrb[54].mxu1  ;;  %v31865_v10 = vpop.f32.mrb[83].mxu0  ;;  %v5384_v39 = vld [vmem:[%s40109_s7 + $0x858] sm:$0xff] }
 0xd8d   : > { %v5236_v27 = vadd.f32 %v31863_v1, %v5196_v5  ;;  %v31887_v11 = vpop.f32.mrb[55].mxu1  ;;  %v5383_v5 = vld [vmem:[%s40109_s7 + $0x850] sm:$0xff]  ;;  %v30884_v7 = vcombine.high %v5373_v6, %v5384_v39  ;;  %v5363_v9 = vld [vmem:[%s40109_s7 + $0x2e0] sm:$0xff]  ;;  %v5353_v10 = vld [vmem:[%s40109_s7 + $0x28] sm:$0xff] }
 0xd8e   : > { %v30882_v19 = vcombine.high %v5372_v31, %v5383_v5  ;;  %v30881_v11 = vcombine.low %v5372_v31, %v5383_v5 }
 0xd8f   : > { %v5276_v13 = vadd.f32 %v31885_v26, %v5236_v27  ;;  %v5352_v26 = vld [vmem:[%s40109_s7 + $0x20] sm:$0xff]  ;;  %v5364_v27 = vld [vmem:[%s40109_s7 + $0x2e8] sm:$0xff] }
 0xd90   : > { %v30865_v20 = vcombine.low %v5353_v10, %v5364_v27 }
 0xd91   : > { %v5281_v15 = vadd.f32 %v5276_v13, %v34068_v4  ;;  %v5349_v4 = vld [vmem:[%s40109_s7 + $0x8] sm:$0xff]  ;;  %v30883_v13 = vcombine.low %v5373_v6, %v5384_v39  ;;  %v5358_v39 = vld [vmem:[%s40109_s7 + $0x50] sm:$0xff] }
 0xd92   : > { %v30857_v56 = vcombine.low %v5349_v4, %v5360_v21  ;;  %v30858_v58 = vcombine.high %v5349_v4, %v5360_v21  ;;  %v5365_v21 = vld [vmem:[%s40109_s7 + $0x2f0] sm:$0xff] }
 0xd93   : > { %v5286_v16 = vsel %vm1172_vm4, %v5281_v15, 0.0  ;;  %v30868_v25 = vcombine.high %v5354_v32, %v5365_v21 }
 0xd94   : > { %5287 = vadd.xlane.f32.xlu0 %v5286_v16  ;;  %5780 = vmatprep.subr.bf16.mxu1 %v30858_v58  ;;  %v30866_v16 = vcombine.high %v5353_v10, %v5364_v27 }
 0xd95   : > { %5781 = vmatpush1.bf16.msra.mxu1 %v30857_v56  ;;  %v5366_v56 = vld [vmem:[%s40109_s7 + $0x2f8] sm:$0xff] }
 0xd96   : > { %5782 = vmatprep.subr.bf16.mxu1 %v30880_v35  ;;  %v30870_v28 = vcombine.high %v5355_v22, %v5366_v56  ;;  %v30867_v35 = vcombine.low %v5354_v32, %v5365_v21  ;;  %v30869_v36 = vcombine.low %v5355_v22, %v5366_v56 }
 0xd99   : > { %5783 = vmatpush1.bf16.msra.mxu1 %v30879_v34  ;;  %v5388_v34 = vld [vmem:[%s40109_s7 + $0x878] sm:$0xff] }
 0xd9a   : > { %5862 = vmatprep.subr.bf16.mxu1 %v30862_v17  ;;  %v30892_v37 = vcombine.high %v5377_v33, %v5388_v34  ;;  %v30889_v17 = vcombine.low %v5376_v48, %v5387_v12 }
 0xe21   : > { %v5288_v24 = vpop.xlane.xlu0 %5287 }
 0xe22   : > { %v5289_v2 = vmul.f32 0.03125, %v5288_v24  ;;  %v5374_v24 = vld [vmem:[%s40109_s7 + $0x5a0] sm:$0xff] }
 0xe24   : > { %v5290_v3 = vsub.f32 %v5281_v15, %v5289_v2  ;;  %v30864_v15 = vcombine.high %v5352_v26, %v5363_v9  ;;  %v5385_v2 = vld [vmem:[%s40109_s7 + $0x860] sm:$0xff] }
 0xe25   : > { %v30886_v53 = vcombine.high %v5374_v24, %v5385_v2  ;;  %v30885_v58 = vcombine.low %v5374_v24, %v5385_v2 }
 0xe26   : > { %v5291_v30 = vmul.f32 %v5290_v3, %v5290_v3 }
 0xe28   : > { %v5292_v18 = vsel %vm1172_vm4, %v5291_v30, 0.0  ;;  %v5386_v30 = vld [vmem:[%s40109_s7 + $0x868] sm:$0xff] }
 0xe29   : > { %5293 = vadd.xlane.f32.xlu1 %v5292_v18  ;;  %v30863_v18 = vcombine.low %v5352_v26, %v5363_v9 }
 0xeb6   : > { %v5294_v41 = vpop.xlane.xlu1 %5293 }
 0xeb7   : > { %v5295_v50 = vmul.f32 0.03125, %v5294_v41  ;;  %v30891_v41 = vcombine.low %v5377_v33, %v5388_v34 }
 0xeb9   : > { %v5296_v51 = vadd.f32 1e-05, %v5295_v50 }
 0xebb   : > { %32722 = vrsqrt.f32 %v5296_v51 }
 0xec5   : > { %v32723_v59 = vpop.eup %32722 }
 0xec6   : > { %v5298_v63 = vmul.f32 %v32723_v59, %v5290_v3  ;;  %v5375_v3 = vld [vmem:[%s40109_s7 + $0x5a8] sm:$0xff]  ;;  %v5378_v59 = vld [vmem:[%s40109_s7 + $0x5c0] sm:$0xff] }
 0xec7   : > { %v30888_v4 = vcombine.high %v5375_v3, %v5386_v30  ;;  %v30887_v23 = vcombine.low %v5375_v3, %v5386_v30 }
 0xec8   : > { %v5299_v8 = vmul.f32 %v30853_v61, %v5298_v63  ;;  %v5389_v61 = vld [vmem:[%s40109_s7 + $0x880] sm:$0xff]  ;;  %v5379_v63 = vld [vmem:[%s40109_s7 + $0x5c8] sm:$0xff] }
 0xec9   : > { %v30894_v5 = vcombine.high %v5378_v59, %v5389_v61  ;;  %v30893_v26 = vcombine.low %v5378_v59, %v5389_v61 }
 0xeca   : > { %v5300_v54 = vadd.f32 %v30854_v0, %v5299_v8  ;;  %v5390_v0 = vld [vmem:[%s40109_s7 + $0x888] sm:$0xff] }
 0xecb   : > { %v30896_v6 = vcombine.high %v5379_v63, %v5390_v0  ;;  %v30895_v9 = vcombine.low %v5379_v63, %v5390_v0 }
 0xecc   : > { %v34602_v1 = vpack.c.bf16 %v5300_v54, %v5300_v54  ;;  %v5369_v54 = vld [vmem:[%s40109_s7 + $0x310] sm:$0xff] }
 0xecd   : > { %v30876_v10 = vcombine.high %v5358_v39, %v5369_v54  ;;  %v30875_v24 = vcombine.low %v5358_v39, %v5369_v54 }
 0xece   : > { %30899 = vmatmul.mubr.msk.bf16.vlgmr.msra.gmra.mrb[84].mxu0 %vm855_vm1, %v34602_v1  ;;  %30900 = vmatmul.mubr.msk.bf16.vlgmr.msra.gmra.mrb[56].mxu1 %vm855_vm1, %v34602_v1 }
 0xecf   : > { %5822 = vmatpush1.bf16.msra.mxu0 %v30859_v38  ;;  %5863 = vmatpush1.bf16.msra.mxu1 %v30861_v52  ;;  %v5356_v38 = vld [vmem:[%s40109_s7 + $0x40] sm:$0xff]  ;;  %v5368_v52 = vld [vmem:[%s40109_s7 + $0x308] sm:$0xff] }
 0xed0   : > { %5823 = vmatprep.subr.bf16.mxu0 %v30882_v19  ;;  %5864 = vmatprep.subr.bf16.mxu1 %v30884_v7  ;;  %v30872_v50 = vcombine.high %v5356_v38, %v5367_v40  ;;  %v30874_v51 = vcombine.high %v5357_v49, %v5368_v52  ;;  %v30871_v8 = vcombine.low %v5356_v38, %v5367_v40  ;;  %v6388_v19 = vld [vmem:[%s40109_s7 + $0x58] sm:$0xff] }
 0xed1   : > { %5853 = vmatprep.mubr.bf16.mxu0 %v40000_v14  ;;  %5894 = vmatprep.mubr.bf16.mxu1 %v40000_v14  ;;  %v30873_v31 = vcombine.low %v5357_v49, %v5368_v52  ;;  %v6399_v7 = vld [vmem:[%s40109_s7 + $0x318] sm:$0xff] }
 0xed2   : > { %v30911_v27 = vcombine.high %v6388_v19, %v6399_v7  ;;  %v30910_v2 = vcombine.low %v6388_v19, %v6399_v7 }
 0xed3   : > { %5824 = vmatpush1.bf16.msra.mxu0 %v30881_v11  ;;  %5865 = vmatpush1.bf16.msra.mxu1 %v30883_v13  ;;  %v5380_v11 = vld [vmem:[%s40109_s7 + $0x5d0] sm:$0xff] }
 0xed4   : > { %5903 = vmatprep.subr.bf16.mxu0 %v30864_v15  ;;  %5944 = vmatprep.subr.bf16.mxu1 %v30866_v16  ;;  %v5391_v13 = vld [vmem:[%s40109_s7 + $0x890] sm:$0xff]  ;;  %v6410_v15 = vld [vmem:[%s40109_s7 + $0x5d8] sm:$0xff] }
 0xed5   : > { %v6421_v16 = vld [vmem:[%s40109_s7 + $0x898] sm:$0xff]  ;;  %v30898_v3 = vcombine.high %v5380_v11, %v5391_v13  ;;  %v30897_v32 = vcombine.low %v5380_v11, %v5391_v13 }
 0xed6   : > { %30901 = vmatmul.mubr.msk.bf16.vlgmr.msra.gmra.mrb[88].mxu0 %vm855_vm1, %v34602_v1  ;;  %30902 = vmatmul.mubr.msk.bf16.vlgmr.msra.gmra.mrb[60].mxu1 %vm855_vm1, %v34602_v1  ;;  %v30933_v30 = vcombine.high %v6410_v15, %v6421_v16  ;;  %v30932_v21 = vcombine.low %v6410_v15, %v6421_v16 }
 0xed7   : > { %5904 = vmatpush1.bf16.msra.mxu0 %v30863_v18  ;;  %5945 = vmatpush1.bf16.msra.mxu1 %v30865_v20  ;;  %v6389_v18 = vld [vmem:[%s40109_s7 + $0x60] sm:$0xff] }
 0xed8   : > { %5905 = vmatprep.subr.bf16.mxu0 %v30886_v53  ;;  %5946 = vmatprep.subr.bf16.mxu1 %v30888_v4  ;;  %v6400_v20 = vld [vmem:[%s40109_s7 + $0x320] sm:$0xff]  ;;  %v6390_v53 = vld [vmem:[%s40109_s7 + $0x68] sm:$0xff] }
 0xed9   : > { %5935 = vmatprep.mubr.bf16.mxu0 %v40000_v14  ;;  %5976 = vmatprep.mubr.bf16.mxu1 %v40000_v14  ;;  %v6401_v4 = vld [vmem:[%s40109_s7 + $0x328] sm:$0xff]  ;;  %v30913_v22 = vcombine.high %v6389_v18, %v6400_v20  ;;  %v30912_v48 = vcombine.low %v6389_v18, %v6400_v20 }
 0xeda   : > { %v30915_v56 = vcombine.high %v6390_v53, %v6401_v4  ;;  %v30914_v12 = vcombine.low %v6390_v53, %v6401_v4 }
 0xedb   : > { %5906 = vmatpush1.bf16.msra.mxu0 %v30885_v58  ;;  %5947 = vmatpush1.bf16.msra.mxu1 %v30887_v23  ;;  %v6411_v58 = vld [vmem:[%s40109_s7 + $0x5e0] sm:$0xff] }
 0xedc   : > { %5985 = vmatprep.subr.bf16.mxu0 %v30868_v25  ;;  %6026 = vmatprep.subr.bf16.mxu1 %v30870_v28  ;;  %v6422_v23 = vld [vmem:[%s40109_s7 + $0x8a0] sm:$0xff]  ;;  %v6412_v25 = vld [vmem:[%s40109_s7 + $0x5e8] sm:$0xff] }
 0xedd   : > { %v6423_v28 = vld [vmem:[%s40109_s7 + $0x8a8] sm:$0xff]  ;;  %v30935_v33 = vcombine.high %v6411_v58, %v6422_v23  ;;  %v30934_v38 = vcombine.low %v6411_v58, %v6422_v23 }
 0xede   : > { %30903 = vmatmul.mubr.msk.bf16.vlgmr.msra.gmra.mrb[92].mxu0 %vm855_vm1, %v34602_v1  ;;  %30904 = vmatmul.mubr.msk.bf16.vlgmr.msra.gmra.mrb[64].mxu1 %vm855_vm1, %v34602_v1  ;;  %v30937_v34 = vcombine.high %v6412_v25, %v6423_v28  ;;  %v30936_v40 = vcombine.low %v6412_v25, %v6423_v28 }
 0xedf   : > { %5986 = vmatpush1.bf16.msra.mxu0 %v30867_v35  ;;  %6027 = vmatpush1.bf16.msra.mxu1 %v30869_v36  ;;  %v6391_v35 = vld [vmem:[%s40109_s7 + $0x70] sm:$0xff] }
 0xee0   : > { %5987 = vmatprep.subr.bf16.mxu0 %v30890_v45  ;;  %6028 = vmatprep.subr.bf16.mxu1 %v30892_v37  ;;  %v6402_v36 = vld [vmem:[%s40109_s7 + $0x330] sm:$0xff]  ;;  %v6392_v45 = vld [vmem:[%s40109_s7 + $0x78] sm:$0xff] }
 0xee1   : > { %6017 = vmatprep.mubr.bf16.mxu0 %v40000_v14  ;;  %6058 = vmatprep.mubr.bf16.mxu1 %v40000_v14  ;;  %v6403_v37 = vld [vmem:[%s40109_s7 + $0x338] sm:$0xff]  ;;  %v30917_v49 = vcombine.high %v6391_v35, %v6402_v36  ;;  %v30916_v59 = vcombine.low %v6391_v35, %v6402_v36 }
 0xee2   : > { %v30919_v52 = vcombine.high %v6392_v45, %v6403_v37  ;;  %v30918_v61 = vcombine.low %v6392_v45, %v6403_v37 }
 0xee3   : > { %5988 = vmatpush1.bf16.msra.mxu0 %v30889_v17  ;;  %6029 = vmatpush1.bf16.msra.mxu1 %v30891_v41  ;;  %v6413_v17 = vld [vmem:[%s40109_s7 + $0x5f0] sm:$0xff] }
 0xee4   : > { %6067 = vmatprep.subr.bf16.mxu0 %v30872_v50  ;;  %6108 = vmatprep.subr.bf16.mxu1 %v30874_v51  ;;  %v6424_v41 = vld [vmem:[%s40109_s7 + $0x8b0] sm:$0xff]  ;;  %v6414_v50 = vld [vmem:[%s40109_s7 + $0x5f8] sm:$0xff] }
 0xee5   : > { %v6425_v51 = vld [vmem:[%s40109_s7 + $0x8b8] sm:$0xff]  ;;  %v30939_v63 = vcombine.high %v6413_v17, %v6424_v41  ;;  %v30938_v39 = vcombine.low %v6413_v17, %v6424_v41 }
 0xee6   : > { %30905 = vmatmul.mubr.msk.bf16.vlgmr.msra.gmra.mrb[96].mxu0 %vm855_vm1, %v34602_v1  ;;  %30906 = vmatmul.mubr.msk.bf16.vlgmr.msra.gmra.mrb[68].mxu1 %vm855_vm1, %v34602_v1  ;;  %v30941_v0 = vcombine.high %v6414_v50, %v6425_v51  ;;  %v30940_v54 = vcombine.low %v6414_v50, %v6425_v51 }
 0xee7   : > { %6068 = vmatpush1.bf16.msra.mxu0 %v30871_v8  ;;  %6109 = vmatpush1.bf16.msra.mxu1 %v30873_v31  ;;  %v6393_v8 = vld [vmem:[%s40109_s7 + $0x80] sm:$0xff] }
 0xee8   : > { %6069 = vmatprep.subr.bf16.mxu0 %v30894_v5  ;;  %6110 = vmatprep.subr.bf16.mxu1 %v30896_v6  ;;  %v6404_v31 = vld [vmem:[%s40109_s7 + $0x340] sm:$0xff]  ;;  %v6394_v5 = vld [vmem:[%s40109_s7 + $0x88] sm:$0xff] }
 0xee9   : > { %6099 = vmatprep.mubr.bf16.mxu0 %v40000_v14  ;;  %6140 = vmatprep.mubr.bf16.mxu1 %v40000_v14  ;;  %v6405_v6 = vld [vmem:[%s40109_s7 + $0x348] sm:$0xff]  ;;  %v30921_v19 = vcombine.high %v6393_v8, %v6404_v31  ;;  %v30920_v11 = vcombine.low %v6393_v8, %v6404_v31 }
 0xeea   : > { %v30923_v7 = vcombine.high %v6394_v5, %v6405_v6  ;;  %v30922_v13 = vcombine.low %v6394_v5, %v6405_v6 }
 0xeeb   : > { %6070 = vmatpush1.bf16.msra.mxu0 %v30893_v26  ;;  %6111 = vmatpush1.bf16.msra.mxu1 %v30895_v9  ;;  %v6415_v26 = vld [vmem:[%s40109_s7 + $0x600] sm:$0xff] }
 0xeec   : > { %6149 = vmatprep.subr.bf16.mxu0 %v30876_v10  ;;  %6777 = vmatprep.subr.bf16.mxu1 %v30911_v27  ;;  %v6426_v9 = vld [vmem:[%s40109_s7 + $0x8c0] sm:$0xff]  ;;  %v6416_v10 = vld [vmem:[%s40109_s7 + $0x608] sm:$0xff] }
 0xeed   : > { %v6427_v27 = vld [vmem:[%s40109_s7 + $0x8c8] sm:$0xff]  ;;  %v30943_v15 = vcombine.high %v6415_v26, %v6426_v9  ;;  %v30942_v18 = vcombine.low %v6415_v26, %v6426_v9 }
 0xeee   : > { %30907 = vmatmul.mubr.msk.bf16.vlgmr.msra.gmra.mrb[100].mxu0 %vm855_vm1, %v34602_v1  ;;  %30908 = vmatmul.mubr.msk.bf16.vlgmr.msra.gmra.mrb[72].mxu1 %vm855_vm1, %v34602_v1  ;;  %v30945_v16 = vcombine.high %v6416_v10, %v6427_v27  ;;  %v30944_v20 = vcombine.low %v6416_v10, %v6427_v27 }
 0xeef   : > { %6150 = vmatpush1.bf16.msra.mxu0 %v30875_v24  ;;  %6778 = vmatpush1.bf16.msra.mxu1 %v30910_v2  ;;  %v6395_v24 = vld [vmem:[%s40109_s7 + $0x90] sm:$0xff] }
 0xef0   : > { %6151 = vmatprep.subr.bf16.mxu0 %v30898_v3  ;;  %6779 = vmatprep.subr.bf16.mxu1 %v30933_v30  ;;  %v6406_v2 = vld [vmem:[%s40109_s7 + $0x350] sm:$0xff]  ;;  %v6396_v3 = vld [vmem:[%s40109_s7 + $0x98] sm:$0xff] }
 0xef1   : > { %6181 = vmatprep.mubr.bf16.mxu0 %v40000_v14  ;;  %6809 = vmatprep.mubr.bf16.mxu1 %v40000_v14  ;;  %v6407_v30 = vld [vmem:[%s40109_s7 + $0x358] sm:$0xff]  ;;  %v30925_v53 = vcombine.high %v6395_v24, %v6406_v2  ;;  %v30924_v58 = vcombine.low %v6395_v24, %v6406_v2 }
 0xef2   : > { %v30927_v4 = vcombine.high %v6396_v3, %v6407_v30  ;;  %v30926_v23 = vcombine.low %v6396_v3, %v6407_v30 }
 0xef3   : > { %6152 = vmatpush1.bf16.msra.mxu0 %v30897_v32  ;;  %6780 = vmatpush1.bf16.msra.mxu1 %v30932_v21  ;;  %v6417_v32 = vld [vmem:[%s40109_s7 + $0x610] sm:$0xff] }
 0xef4   : > { %6818 = vmatprep.subr.bf16.mxu0 %v30913_v22  ;;  %6859 = vmatprep.subr.bf16.mxu1 %v30915_v56  ;;  %v6428_v21 = vld [vmem:[%s40109_s7 + $0x8d0] sm:$0xff]  ;;  %v6418_v22 = vld [vmem:[%s40109_s7 + $0x618] sm:$0xff] }
 0xef5   : > { %v6429_v56 = vld [vmem:[%s40109_s7 + $0x8d8] sm:$0xff]  ;;  %v30947_v25 = vcombine.high %v6417_v32, %v6428_v21  ;;  %v30946_v35 = vcombine.low %v6417_v32, %v6428_v21 }
 0xef6   : > { %30909 = vmatmul.mubr.msk.bf16.vlgmr.msra.gmra.mrb[104].mxu0 %vm855_vm1, %v34602_v1  ;;  %30954 = vmatmul.mubr.msk.bf16.vlgmr.msra.gmra.mrb[76].mxu1 %vm855_vm1, %v34602_v1  ;;  %v30949_v28 = vcombine.high %v6418_v22, %v6429_v56  ;;  %v30948_v36 = vcombine.low %v6418_v22, %v6429_v56 }
 0xef7   : > { %6819 = vmatpush1.bf16.msra.mxu0 %v30912_v48  ;;  %6860 = vmatpush1.bf16.msra.mxu1 %v30914_v12  ;;  %v6397_v48 = vld [vmem:[%s40109_s7 + $0xa0] sm:$0xff] }
 0xef8   : > { %6820 = vmatprep.subr.bf16.mxu0 %v30935_v33  ;;  %6861 = vmatprep.subr.bf16.mxu1 %v30937_v34  ;;  %v6408_v12 = vld [vmem:[%s40109_s7 + $0x360] sm:$0xff]  ;;  %v6398_v33 = vld [vmem:[%s40109_s7 + $0xa8] sm:$0xff] }
 0xef9   : > { %6850 = vmatprep.mubr.bf16.mxu0 %v40000_v14  ;;  %6891 = vmatprep.mubr.bf16.mxu1 %v40000_v14  ;;  %v6409_v34 = vld [vmem:[%s40109_s7 + $0x368] sm:$0xff]  ;;  %v30929_v45 = vcombine.high %v6397_v48, %v6408_v12  ;;  %v30928_v17 = vcombine.low %v6397_v48, %v6408_v12 }
 0xefa   : > { %v30931_v37 = vcombine.high %v6398_v33, %v6409_v34  ;;  %v30930_v41 = vcombine.low %v6398_v33, %v6409_v34 }
 0xefb   : > { %6821 = vmatpush1.bf16.msra.mxu0 %v30934_v38  ;;  %6862 = vmatpush1.bf16.msra.mxu1 %v30936_v40  ;;  %v6419_v38 = vld [vmem:[%s40109_s7 + $0x620] sm:$0xff] }
 0xefc   : > { %6900 = vmatprep.subr.bf16.mxu0 %v30917_v49  ;;  %6941 = vmatprep.subr.bf16.mxu1 %v30919_v52  ;;  %v6430_v40 = vld [vmem:[%s40109_s7 + $0x8e0] sm:$0xff]  ;;  %v6420_v49 = vld [vmem:[%s40109_s7 + $0x628] sm:$0xff] }
 0xefd   : > { %v6431_v52 = vld [vmem:[%s40109_s7 + $0x8e8] sm:$0xff]  ;;  %v30951_v50 = vcombine.high %v6419_v38, %v6430_v40  ;;  %v30950_v8 = vcombine.low %v6419_v38, %v6430_v40 }
 0xefe   : > { %30955 = vmatmul.mubr.msk.bf16.vlgmr.msra.gmra.mrb[108].mxu0 %vm855_vm1, %v34602_v1  ;;  %30956 = vmatmul.mubr.msk.bf16.vlgmr.msra.gmra.mrb[80].mxu1 %vm855_vm1, %v34602_v1  ;;  %v30953_v51 = vcombine.high %v6420_v49, %v6431_v52  ;;  %v30952_v31 = vcombine.low %v6420_v49, %v6431_v52 }
 0xeff   : > { %6901 = vmatpush1.bf16.msra.mxu0 %v30916_v59  ;;  %6942 = vmatpush1.bf16.msra.mxu1 %v30918_v61  ;;  %v7422_v59 = vld [vmem:[%s40109_s7 + $0xb0] sm:$0xff] }
 0xf00   : > { %6902 = vmatprep.subr.bf16.mxu0 %v30939_v63  ;;  %6943 = vmatprep.subr.bf16.mxu1 %v30941_v0  ;;  %v7433_v61 = vld [vmem:[%s40109_s7 + $0x370] sm:$0xff]  ;;  %v7423_v63 = vld [vmem:[%s40109_s7 + $0xb8] sm:$0xff] }
 0xf01   : > { %6932 = vmatprep.mubr.bf16.mxu0 %v40000_v14  ;;  %6973 = vmatprep.mubr.bf16.mxu1 %v40000_v14  ;;  %v7434_v0 = vld [vmem:[%s40109_s7 + $0x378] sm:$0xff]  ;;  %v30966_v5 = vcombine.high %v7422_v59, %v7433_v61  ;;  %v30965_v26 = vcombine.low %v7422_v59, %v7433_v61 }
 0xf02   : > { %v30968_v6 = vcombine.high %v7423_v63, %v7434_v0  ;;  %v30967_v9 = vcombine.low %v7423_v63, %v7434_v0 }
 0xf03   : > { %6903 = vmatpush1.bf16.msra.mxu0 %v30938_v39  ;;  %6944 = vmatpush1.bf16.msra.mxu1 %v30940_v54  ;;  %v7444_v39 = vld [vmem:[%s40109_s7 + $0x630] sm:$0xff] }
 0xf04   : > { %6982 = vmatprep.subr.bf16.mxu0 %v30921_v19  ;;  %7023 = vmatprep.subr.bf16.mxu1 %v30923_v7  ;;  %v7455_v54 = vld [vmem:[%s40109_s7 + $0x8f0] sm:$0xff]  ;;  %v7445_v19 = vld [vmem:[%s40109_s7 + $0x638] sm:$0xff] }
 0xf05   : > { %v7456_v7 = vld [vmem:[%s40109_s7 + $0x8f8] sm:$0xff]  ;;  %v30988_v10 = vcombine.high %v7444_v39, %v7455_v54  ;;  %v30987_v24 = vcombine.low %v7444_v39, %v7455_v54 }
 0xf06   : > { %30957 = vmatmul.mubr.msk.bf16.vlgmr.msra.gmra.mrb[112].mxu0 %vm855_vm1, %v34602_v1  ;;  %30958 = vmatmul.mubr.msk.bf16.vlgmr.msra.gmra.mrb[84].mxu1 %vm855_vm1, %v34602_v1  ;;  %v30990_v27 = vcombine.high %v7445_v19, %v7456_v7  ;;  %v30989_v2 = vcombine.low %v7445_v19, %v7456_v7 }
 0xf07   : > { %6983 = vmatpush1.bf16.msra.mxu0 %v30920_v11  ;;  %7024 = vmatpush1.bf16.msra.mxu1 %v30922_v13  ;;  %v7424_v11 = vld [vmem:[%s40109_s7 + $0xc0] sm:$0xff] }
 0xf08   : > { %6984 = vmatprep.subr.bf16.mxu0 %v30943_v15  ;;  %7025 = vmatprep.subr.bf16.mxu1 %v30945_v16  ;;  %v7435_v13 = vld [vmem:[%s40109_s7 + $0x380] sm:$0xff]  ;;  %v7425_v15 = vld [vmem:[%s40109_s7 + $0xc8] sm:$0xff] }
 0xf09   : > { %7014 = vmatprep.mubr.bf16.mxu0 %v40000_v14  ;;  %7055 = vmatprep.mubr.bf16.mxu1 %v40000_v14  ;;  %v7436_v16 = vld [vmem:[%s40109_s7 + $0x388] sm:$0xff]  ;;  %v30970_v3 = vcombine.high %v7424_v11, %v7435_v13  ;;  %v30969_v32 = vcombine.low %v7424_v11, %v7435_v13 }
 0xf0a   : > { %v30972_v30 = vcombine.high %v7425_v15, %v7436_v16  ;;  %v30971_v21 = vcombine.low %v7425_v15, %v7436_v16 }
 0xf0b   : > { %6985 = vmatpush1.bf16.msra.mxu0 %v30942_v18  ;;  %7026 = vmatpush1.bf16.msra.mxu1 %v30944_v20  ;;  %v7446_v18 = vld [vmem:[%s40109_s7 + $0x640] sm:$0xff] }
 0xf0c   : > { %7064 = vmatprep.subr.bf16.mxu0 %v30925_v53  ;;  %7105 = vmatprep.subr.bf16.mxu1 %v30927_v4  ;;  %v7457_v20 = vld [vmem:[%s40109_s7 + $0x900] sm:$0xff]  ;;  %v7447_v53 = vld [vmem:[%s40109_s7 + $0x648] sm:$0xff] }
 0xf0d   : > { %v7458_v4 = vld [vmem:[%s40109_s7 + $0x908] sm:$0xff]  ;;  %v30992_v22 = vcombine.high %v7446_v18, %v7457_v20  ;;  %v30991_v48 = vcombine.low %v7446_v18, %v7457_v20 }
 0xf0e   : > { %30959 = vmatmul.mubr.msk.bf16.vlgmr.msra.gmra.mrb[116].mxu0 %vm855_vm1, %v34602_v1  ;;  %30960 = vmatmul.mubr.msk.bf16.vlgmr.msra.gmra.mrb[88].mxu1 %vm855_vm1, %v34602_v1  ;;  %v30994_v56 = vcombine.high %v7447_v53, %v7458_v4  ;;  %v30993_v12 = vcombine.low %v7447_v53, %v7458_v4 }
 0xf0f   : > { %7065 = vmatpush1.bf16.msra.mxu0 %v30924_v58  ;;  %7106 = vmatpush1.bf16.msra.mxu1 %v30926_v23  ;;  %v7426_v58 = vld [vmem:[%s40109_s7 + $0xd0] sm:$0xff] }
 0xf10   : > { %7066 = vmatprep.subr.bf16.mxu0 %v30947_v25  ;;  %7107 = vmatprep.subr.bf16.mxu1 %v30949_v28  ;;  %v7437_v23 = vld [vmem:[%s40109_s7 + $0x390] sm:$0xff]  ;;  %v7427_v25 = vld [vmem:[%s40109_s7 + $0xd8] sm:$0xff] }
 0xf11   : > { %7096 = vmatprep.mubr.bf16.mxu0 %v40000_v14  ;;  %7137 = vmatprep.mubr.bf16.mxu1 %v40000_v14  ;;  %v7438_v28 = vld [vmem:[%s40109_s7 + $0x398] sm:$0xff]  ;;  %v30974_v33 = vcombine.high %v7426_v58, %v7437_v23  ;;  %v30973_v38 = vcombine.low %v7426_v58, %v7437_v23 }
 0xf12   : > { %v30976_v34 = vcombine.high %v7427_v25, %v7438_v28  ;;  %v30975_v40 = vcombine.low %v7427_v25, %v7438_v28 }
 0xf13   : > { %7067 = vmatpush1.bf16.msra.mxu0 %v30946_v35  ;;  %7108 = vmatpush1.bf16.msra.mxu1 %v30948_v36  ;;  %v7448_v35 = vld [vmem:[%s40109_s7 + $0x650] sm:$0xff] }
 0xf14   : > { %7146 = vmatprep.subr.bf16.mxu0 %v30929_v45  ;;  %7187 = vmatprep.subr.bf16.mxu1 %v30931_v37  ;;  %v7459_v36 = vld [vmem:[%s40109_s7 + $0x910] sm:$0xff]  ;;  %v7449_v45 = vld [vmem:[%s40109_s7 + $0x658] sm:$0xff] }
 0xf15   : > { %v7460_v37 = vld [vmem:[%s40109_s7 + $0x918] sm:$0xff]  ;;  %v30996_v49 = vcombine.high %v7448_v35, %v7459_v36  ;;  %v30995_v59 = vcombine.low %v7448_v35, %v7459_v36 }
 0xf16   : > { %30961 = vmatmul.mubr.msk.bf16.vlgmr.msra.gmra.mrb[120].mxu0 %vm855_vm1, %v34602_v1  ;;  %30962 = vmatmul.mubr.msk.bf16.vlgmr.msra.gmra.mrb[92].mxu1 %vm855_vm1, %v34602_v1  ;;  %v30998_v52 = vcombine.high %v7449_v45, %v7460_v37  ;;  %v30997_v61 = vcombine.low %v7449_v45, %v7460_v37 }
 0xf17   : > { %7147 = vmatpush1.bf16.msra.mxu0 %v30928_v17  ;;  %7188 = vmatpush1.bf16.msra.mxu1 %v30930_v41  ;;  %v7428_v17 = vld [vmem:[%s40109_s7 + $0xe0] sm:$0xff] }
 0xf18   : > { %7148 = vmatprep.subr.bf16.mxu0 %v30951_v50  ;;  %7189 = vmatprep.subr.bf16.mxu1 %v30953_v51  ;;  %v7439_v41 = vld [vmem:[%s40109_s7 + $0x3a0] sm:$0xff]  ;;  %v7429_v50 = vld [vmem:[%s40109_s7 + $0xe8] sm:$0xff] }
 0xf19   : > { %7178 = vmatprep.mubr.bf16.mxu0 %v40000_v14  ;;  %7219 = vmatprep.mubr.bf16.mxu1 %v40000_v14  ;;  %v7440_v51 = vld [vmem:[%s40109_s7 + $0x3a8] sm:$0xff]  ;;  %v30978_v63 = vcombine.high %v7428_v17, %v7439_v41  ;;  %v30977_v39 = vcombine.low %v7428_v17, %v7439_v41 }
 0xf1a   : > { %v30980_v0 = vcombine.high %v7429_v50, %v7440_v51  ;;  %v30979_v54 = vcombine.low %v7429_v50, %v7440_v51 }
 0xf1b   : > { %7149 = vmatpush1.bf16.msra.mxu0 %v30950_v8  ;;  %7190 = vmatpush1.bf16.msra.mxu1 %v30952_v31  ;;  %v7450_v8 = vld [vmem:[%s40109_s7 + $0x660] sm:$0xff] }
 0xf1c   : > { %7811 = vmatprep.subr.bf16.mxu0 %v30966_v5  ;;  %7852 = vmatprep.subr.bf16.mxu1 %v30968_v6  ;;  %v7461_v31 = vld [vmem:[%s40109_s7 + $0x920] sm:$0xff]  ;;  %v7451_v5 = vld [vmem:[%s40109_s7 + $0x668] sm:$0xff] }
 0xf1d   : > { %v7462_v6 = vld [vmem:[%s40109_s7 + $0x928] sm:$0xff]  ;;  %v31000_v19 = vcombine.high %v7450_v8, %v7461_v31  ;;  %v30999_v11 = vcombine.low %v7450_v8, %v7461_v31 }
 0xf1e   : > { %30963 = vmatmul.mubr.msk.bf16.vlgmr.msra.gmra.mrb[124].mxu0 %vm855_vm1, %v34602_v1  ;;  %30964 = vmatmul.mubr.msk.bf16.vlgmr.msra.gmra.mrb[96].mxu1 %vm855_vm1, %v34602_v1  ;;  %v31002_v7 = vcombine.high %v7451_v5, %v7462_v6  ;;  %v31001_v13 = vcombine.low %v7451_v5, %v7462_v6 }
 0xf1f   : > { %7812 = vmatpush1.bf16.msra.mxu0 %v30965_v26  ;;  %7853 = vmatpush1.bf16.msra.mxu1 %v30967_v9  ;;  %v7430_v26 = vld [vmem:[%s40109_s7 + $0xf0] sm:$0xff] }
 0xf20   : > { %7813 = vmatprep.subr.bf16.mxu0 %v30988_v10  ;;  %7854 = vmatprep.subr.bf16.mxu1 %v30990_v27  ;;  %v7441_v9 = vld [vmem:[%s40109_s7 + $0x3b0] sm:$0xff]  ;;  %v7431_v10 = vld [vmem:[%s40109_s7 + $0xf8] sm:$0xff] }
 0xf21   : > { %7843 = vmatprep.mubr.bf16.mxu0 %v40000_v14  ;;  %7884 = vmatprep.mubr.bf16.mxu1 %v40000_v14  ;;  %v7442_v27 = vld [vmem:[%s40109_s7 + $0x3b8] sm:$0xff]  ;;  %v30982_v15 = vcombine.high %v7430_v26, %v7441_v9  ;;  %v30981_v18 = vcombine.low %v7430_v26, %v7441_v9 }
 0xf22   : > { %v30984_v16 = vcombine.high %v7431_v10, %v7442_v27  ;;  %v30983_v20 = vcombine.low %v7431_v10, %v7442_v27 }
 0xf23   : > { %7814 = vmatpush1.bf16.msra.mxu0 %v30987_v24  ;;  %7855 = vmatpush1.bf16.msra.mxu1 %v30989_v2  ;;  %v7452_v24 = vld [vmem:[%s40109_s7 + $0x670] sm:$0xff] }
 0xf24   : > { %7893 = vmatprep.subr.bf16.mxu0 %v30970_v3  ;;  %7934 = vmatprep.subr.bf16.mxu1 %v30972_v30  ;;  %v7463_v2 = vld [vmem:[%s40109_s7 + $0x930] sm:$0xff]  ;;  %v7453_v3 = vld [vmem:[%s40109_s7 + $0x678] sm:$0xff] }
 0xf25   : > { %v7464_v30 = vld [vmem:[%s40109_s7 + $0x938] sm:$0xff]  ;;  %v31004_v53 = vcombine.high %v7452_v24, %v7463_v2  ;;  %v31003_v58 = vcombine.low %v7452_v24, %v7463_v2 }
 0xf26   : > { %31009 = vmatmul.mubr.msk.bf16.vlgmr.msra.gmra.mrb[128].mxu0 %vm855_vm1, %v34602_v1  ;;  %31010 = vmatmul.mubr.msk.bf16.vlgmr.msra.gmra.mrb[100].mxu1 %vm855_vm1, %v34602_v1  ;;  %v31006_v4 = vcombine.high %v7453_v3, %v7464_v30  ;;  %v31005_v23 = vcombine.low %v7453_v3, %v7464_v30 }
 0xf27   : > { %7894 = vmatpush1.bf16.msra.mxu0 %v30969_v32  ;;  %7935 = vmatpush1.bf16.msra.mxu1 %v30971_v21  ;;  %v7432_v32 = vld [vmem:[%s40109_s7 + $0x100] sm:$0xff] }
 0xf28   : > { %7895 = vmatprep.subr.bf16.mxu0 %v30992_v22  ;;  %7936 = vmatprep.subr.bf16.mxu1 %v30994_v56  ;;  %v7443_v21 = vld [vmem:[%s40109_s7 + $0x3c0] sm:$0xff]  ;;  %v8456_v22 = vld [vmem:[%s40109_s7 + $0x108] sm:$0xff] }
 0xf29   : > { %7925 = vmatprep.mubr.bf16.mxu0 %v40000_v14  ;;  %7966 = vmatprep.mubr.bf16.mxu1 %v40000_v14  ;;  %v8467_v56 = vld [vmem:[%s40109_s7 + $0x3c8] sm:$0xff]  ;;  %v30986_v25 = vcombine.high %v7432_v32, %v7443_v21  ;;  %v30985_v35 = vcombine.low %v7432_v32, %v7443_v21 }
 0xf2a   : > { %v31021_v28 = vcombine.high %v8456_v22, %v8467_v56  ;;  %v31020_v36 = vcombine.low %v8456_v22, %v8467_v56 }
 0xf2b   : > { %7896 = vmatpush1.bf16.msra.mxu0 %v30991_v48  ;;  %7937 = vmatpush1.bf16.msra.mxu1 %v30993_v12  ;;  %v7454_v48 = vld [vmem:[%s40109_s7 + $0x680] sm:$0xff] }
 0xf2c   : > { %7975 = vmatprep.subr.bf16.mxu0 %v30974_v33  ;;  %8016 = vmatprep.subr.bf16.mxu1 %v30976_v34  ;;  %v7465_v12 = vld [vmem:[%s40109_s7 + $0x940] sm:$0xff]  ;;  %v8478_v33 = vld [vmem:[%s40109_s7 + $0x688] sm:$0xff] }
 0xf2d   : > { %v8489_v34 = vld [vmem:[%s40109_s7 + $0x948] sm:$0xff]  ;;  %v31008_v45 = vcombine.high %v7454_v48, %v7465_v12  ;;  %v31007_v17 = vcombine.low %v7454_v48, %v7465_v12 }
 0xf2e   : > { %31011 = vmatmul.mubr.msk.bf16.vlgmr.msra.gmra.mrb[132].mxu0 %vm855_vm1, %v34602_v1  ;;  %31012 = vmatmul.mubr.msk.bf16.vlgmr.msra.gmra.mrb[104].mxu1 %vm855_vm1, %v34602_v1  ;;  %v31043_v37 = vcombine.high %v8478_v33, %v8489_v34  ;;  %v31042_v41 = vcombine.low %v8478_v33, %v8489_v34 }
 0xf2f   : > { %7976 = vmatpush1.bf16.msra.mxu0 %v30973_v38  ;;  %8017 = vmatpush1.bf16.msra.mxu1 %v30975_v40  ;;  %v8457_v38 = vld [vmem:[%s40109_s7 + $0x110] sm:$0xff] }
 0xf30   : > { %7977 = vmatprep.subr.bf16.mxu0 %v30996_v49  ;;  %8018 = vmatprep.subr.bf16.mxu1 %v30998_v52  ;;  %v8468_v40 = vld [vmem:[%s40109_s7 + $0x3d0] sm:$0xff]  ;;  %v8458_v49 = vld [vmem:[%s40109_s7 + $0x118] sm:$0xff] }
 0xf31   : > { %8007 = vmatprep.mubr.bf16.mxu0 %v40000_v14  ;;  %8048 = vmatprep.mubr.bf16.mxu1 %v40000_v14  ;;  %v8469_v52 = vld [vmem:[%s40109_s7 + $0x3d8] sm:$0xff]  ;;  %v31023_v50 = vcombine.high %v8457_v38, %v8468_v40  ;;  %v31022_v8 = vcombine.low %v8457_v38, %v8468_v40 }
 0xf32   : > { %v31025_v51 = vcombine.high %v8458_v49, %v8469_v52  ;;  %v31024_v31 = vcombine.low %v8458_v49, %v8469_v52 }
 0xf33   : > { %7978 = vmatpush1.bf16.msra.mxu0 %v30995_v59  ;;  %8019 = vmatpush1.bf16.msra.mxu1 %v30997_v61  ;;  %v8479_v59 = vld [vmem:[%s40109_s7 + $0x690] sm:$0xff] }
 0xf34   : > { %8057 = vmatprep.subr.bf16.mxu0 %v30978_v63  ;;  %8098 = vmatprep.subr.bf16.mxu1 %v30980_v0  ;;  %v8490_v61 = vld [vmem:[%s40109_s7 + $0x950] sm:$0xff]  ;;  %v8480_v63 = vld [vmem:[%s40109_s7 + $0x698] sm:$0xff] }
 0xf35   : > { %v8491_v0 = vld [vmem:[%s40109_s7 + $0x958] sm:$0xff]  ;;  %v31045_v5 = vcombine.high %v8479_v59, %v8490_v61  ;;  %v31044_v26 = vcombine.low %v8479_v59, %v8490_v61 }
 0xf36   : > { %31013 = vmatmul.mubr.msk.bf16.vlgmr.msra.gmra.mrb[136].mxu0 %vm855_vm1, %v34602_v1  ;;  %31014 = vmatmul.mubr.msk.bf16.vlgmr.msra.gmra.mrb[108].mxu1 %vm855_vm1, %v34602_v1  ;;  %v31047_v6 = vcombine.high %v8480_v63, %v8491_v0  ;;  %v31046_v9 = vcombine.low %v8480_v63, %v8491_v0 }
 0xf37   : > { %8058 = vmatpush1.bf16.msra.mxu0 %v30977_v39  ;;  %8099 = vmatpush1.bf16.msra.mxu1 %v30979_v54  ;;  %v8459_v39 = vld [vmem:[%s40109_s7 + $0x120] sm:$0xff] }
 0xf38   : > { %8059 = vmatprep.subr.bf16.mxu0 %v31000_v19  ;;  %8100 = vmatprep.subr.bf16.mxu1 %v31002_v7  ;;  %v8470_v54 = vld [vmem:[%s40109_s7 + $0x3e0] sm:$0xff]  ;;  %v8460_v19 = vld [vmem:[%s40109_s7 + $0x128] sm:$0xff] }
 0xf39   : > { %8089 = vmatprep.mubr.bf16.mxu0 %v40000_v14  ;;  %8130 = vmatprep.mubr.bf16.mxu1 %v40000_v14  ;;  %v8471_v7 = vld [vmem:[%s40109_s7 + $0x3e8] sm:$0xff]  ;;  %v31027_v10 = vcombine.high %v8459_v39, %v8470_v54  ;;  %v31026_v24 = vcombine.low %v8459_v39, %v8470_v54 }
 0xf3a   : > { %v31029_v27 = vcombine.high %v8460_v19, %v8471_v7  ;;  %v31028_v2 = vcombine.low %v8460_v19, %v8471_v7 }
 0xf3b   : > { %8060 = vmatpush1.bf16.msra.mxu0 %v30999_v11  ;;  %8101 = vmatpush1.bf16.msra.mxu1 %v31001_v13  ;;  %v8481_v11 = vld [vmem:[%s40109_s7 + $0x6a0] sm:$0xff] }
 0xf3c   : > { %8139 = vmatprep.subr.bf16.mxu0 %v30982_v15  ;;  %8180 = vmatprep.subr.bf16.mxu1 %v30984_v16  ;;  %v8492_v13 = vld [vmem:[%s40109_s7 + $0x960] sm:$0xff]  ;;  %v8482_v15 = vld [vmem:[%s40109_s7 + $0x6a8] sm:$0xff] }
 0xf3d   : > { %v8493_v16 = vld [vmem:[%s40109_s7 + $0x968] sm:$0xff]  ;;  %v31049_v3 = vcombine.high %v8481_v11, %v8492_v13  ;;  %v31048_v32 = vcombine.low %v8481_v11, %v8492_v13 }
 0xf3e   : > { %31015 = vmatmul.mubr.msk.bf16.vlgmr.msra.gmra.mrb[140].mxu0 %vm855_vm1, %v34602_v1  ;;  %31016 = vmatmul.mubr.msk.bf16.vlgmr.msra.gmra.mrb[112].mxu1 %vm855_vm1, %v34602_v1  ;;  %v31051_v30 = vcombine.high %v8482_v15, %v8493_v16  ;;  %v31050_v21 = vcombine.low %v8482_v15, %v8493_v16 }
 0xf3f   : > { %8140 = vmatpush1.bf16.msra.mxu0 %v30981_v18  ;;  %8181 = vmatpush1.bf16.msra.mxu1 %v30983_v20  ;;  %v8461_v18 = vld [vmem:[%s40109_s7 + $0x130] sm:$0xff] }
 0xf40   : > { %8141 = vmatprep.subr.bf16.mxu0 %v31004_v53  ;;  %8182 = vmatprep.subr.bf16.mxu1 %v31006_v4  ;;  %v8472_v20 = vld [vmem:[%s40109_s7 + $0x3f0] sm:$0xff]  ;;  %v8462_v53 = vld [vmem:[%s40109_s7 + $0x138] sm:$0xff] }
 0xf41   : > { %8171 = vmatprep.mubr.bf16.mxu0 %v40000_v14  ;;  %8212 = vmatprep.mubr.bf16.mxu1 %v40000_v14  ;;  %v8473_v4 = vld [vmem:[%s40109_s7 + $0x3f8] sm:$0xff]  ;;  %v31031_v22 = vcombine.high %v8461_v18, %v8472_v20  ;;  %v31030_v48 = vcombine.low %v8461_v18, %v8472_v20 }
 0xf42   : > { %v31033_v56 = vcombine.high %v8462_v53, %v8473_v4  ;;  %v31032_v12 = vcombine.low %v8462_v53, %v8473_v4 }
 0xf43   : > { %8142 = vmatpush1.bf16.msra.mxu0 %v31003_v58  ;;  %8183 = vmatpush1.bf16.msra.mxu1 %v31005_v23  ;;  %v8483_v58 = vld [vmem:[%s40109_s7 + $0x6b0] sm:$0xff] }
 0xf44   : > { %8221 = vmatprep.subr.bf16.mxu0 %v30986_v25  ;;  %8845 = vmatprep.subr.bf16.mxu1 %v31021_v28  ;;  %v8494_v23 = vld [vmem:[%s40109_s7 + $0x970] sm:$0xff]  ;;  %v8484_v25 = vld [vmem:[%s40109_s7 + $0x6b8] sm:$0xff] }
 0xf45   : > { %v8495_v28 = vld [vmem:[%s40109_s7 + $0x978] sm:$0xff]  ;;  %v31053_v33 = vcombine.high %v8483_v58, %v8494_v23  ;;  %v31052_v38 = vcombine.low %v8483_v58, %v8494_v23 }
 0xf46   : > { %31017 = vmatmul.mubr.msk.bf16.vlgmr.msra.gmra.mrb[144].mxu0 %vm855_vm1, %v34602_v1  ;;  %31018 = vmatmul.mubr.msk.bf16.vlgmr.msra.gmra.mrb[116].mxu1 %vm855_vm1, %v34602_v1  ;;  %v31055_v34 = vcombine.high %v8484_v25, %v8495_v28  ;;  %v31054_v40 = vcombine.low %v8484_v25, %v8495_v28 }
 0xf47   : > { %8222 = vmatpush1.bf16.msra.mxu0 %v30985_v35  ;;  %8846 = vmatpush1.bf16.msra.mxu1 %v31020_v36  ;;  %v8463_v35 = vld [vmem:[%s40109_s7 + $0x140] sm:$0xff] }
 0xf48   : > { %8223 = vmatprep.subr.bf16.mxu0 %v31008_v45  ;;  %8847 = vmatprep.subr.bf16.mxu1 %v31043_v37  ;;  %v8474_v36 = vld [vmem:[%s40109_s7 + $0x400] sm:$0xff]  ;;  %v8464_v45 = vld [vmem:[%s40109_s7 + $0x148] sm:$0xff] }
 0xf49   : > { %8253 = vmatprep.mubr.bf16.mxu0 %v40000_v14  ;;  %8877 = vmatprep.mubr.bf16.mxu1 %v40000_v14  ;;  %v8475_v37 = vld [vmem:[%s40109_s7 + $0x408] sm:$0xff]  ;;  %v31035_v49 = vcombine.high %v8463_v35, %v8474_v36  ;;  %v31034_v59 = vcombine.low %v8463_v35, %v8474_v36 }
 0xf4a   : > { %v31037_v52 = vcombine.high %v8464_v45, %v8475_v37  ;;  %v31036_v61 = vcombine.low %v8464_v45, %v8475_v37 }
 0xf4b   : > { %8224 = vmatpush1.bf16.msra.mxu0 %v31007_v17  ;;  %8848 = vmatpush1.bf16.msra.mxu1 %v31042_v41  ;;  %v8485_v17 = vld [vmem:[%s40109_s7 + $0x6c0] sm:$0xff] }
 0xf4c   : > { %8886 = vmatprep.subr.bf16.mxu0 %v31023_v50  ;;  %8927 = vmatprep.subr.bf16.mxu1 %v31025_v51  ;;  %v8496_v41 = vld [vmem:[%s40109_s7 + $0x980] sm:$0xff]  ;;  %v8486_v50 = vld [vmem:[%s40109_s7 + $0x6c8] sm:$0xff] }
 0xf4d   : > { %v8497_v51 = vld [vmem:[%s40109_s7 + $0x988] sm:$0xff]  ;;  %v31057_v63 = vcombine.high %v8485_v17, %v8496_v41  ;;  %v31056_v39 = vcombine.low %v8485_v17, %v8496_v41 }
 0xf4e   : > { %31019 = vmatmul.mubr.msk.bf16.vlgmr.msra.gmra.mrb[148].mxu0 %vm855_vm1, %v34602_v1  ;;  %31064 = vmatmul.mubr.msk.bf16.vlgmr.msra.gmra.mrb[120].mxu1 %vm855_vm1, %v34602_v1  ;;  %v31059_v0 = vcombine.high %v8486_v50, %v8497_v51  ;;  %v31058_v54 = vcombine.low %v8486_v50, %v8497_v51 }
 0xf4f   : > { %8887 = vmatpush1.bf16.msra.mxu0 %v31022_v8  ;;  %8928 = vmatpush1.bf16.msra.mxu1 %v31024_v31  ;;  %v8465_v8 = vld [vmem:[%s40109_s7 + $0x150] sm:$0xff] }
 0xf50   : > { %8888 = vmatprep.subr.bf16.mxu0 %v31045_v5  ;;  %8929 = vmatprep.subr.bf16.mxu1 %v31047_v6  ;;  %v8476_v31 = vld [vmem:[%s40109_s7 + $0x410] sm:$0xff]  ;;  %v8466_v5 = vld [vmem:[%s40109_s7 + $0x158] sm:$0xff] }
 0xf51   : > { %8918 = vmatprep.mubr.bf16.mxu0 %v40000_v14  ;;  %8959 = vmatprep.mubr.bf16.mxu1 %v40000_v14  ;;  %v8477_v6 = vld [vmem:[%s40109_s7 + $0x418] sm:$0xff]  ;;  %v31039_v19 = vcombine.high %v8465_v8, %v8476_v31  ;;  %v31038_v11 = vcombine.low %v8465_v8, %v8476_v31 }
 0xf52   : > { %v31041_v7 = vcombine.high %v8466_v5, %v8477_v6  ;;  %v31040_v13 = vcombine.low %v8466_v5, %v8477_v6 }
 0xf53   : > { %8889 = vmatpush1.bf16.msra.mxu0 %v31044_v26  ;;  %8930 = vmatpush1.bf16.msra.mxu1 %v31046_v9  ;;  %v8487_v26 = vld [vmem:[%s40109_s7 + $0x6d0] sm:$0xff] }
 0xf54   : > { %8968 = vmatprep.subr.bf16.mxu0 %v31027_v10  ;;  %9009 = vmatprep.subr.bf16.mxu1 %v31029_v27  ;;  %v8498_v9 = vld [vmem:[%s40109_s7 + $0x990] sm:$0xff]  ;;  %v8488_v10 = vld [vmem:[%s40109_s7 + $0x6d8] sm:$0xff] }
 0xf55   : > { %v8499_v27 = vld [vmem:[%s40109_s7 + $0x998] sm:$0xff]  ;;  %v31061_v15 = vcombine.high %v8487_v26, %v8498_v9  ;;  %v31060_v18 = vcombine.low %v8487_v26, %v8498_v9 }
 0xf56   : > { %31065 = vmatmul.mubr.msk.bf16.vlgmr.msra.gmra.mrb[152].mxu0 %vm855_vm1, %v34602_v1  ;;  %31066 = vmatmul.mubr.msk.bf16.vlgmr.msra.gmra.mrb[124].mxu1 %vm855_vm1, %v34602_v1  ;;  %v31063_v16 = vcombine.high %v8488_v10, %v8499_v27  ;;  %v31062_v20 = vcombine.low %v8488_v10, %v8499_v27 }
 0xf57   : > { %8969 = vmatpush1.bf16.msra.mxu0 %v31026_v24  ;;  %9010 = vmatpush1.bf16.msra.mxu1 %v31028_v2  ;;  %v9490_v24 = vld [vmem:[%s40109_s7 + $0x160] sm:$0xff] }
 0xf58   : > { %8970 = vmatprep.subr.bf16.mxu0 %v31049_v3  ;;  %9011 = vmatprep.subr.bf16.mxu1 %v31051_v30  ;;  %v9501_v2 = vld [vmem:[%s40109_s7 + $0x420] sm:$0xff]  ;;  %v9491_v3 = vld [vmem:[%s40109_s7 + $0x168] sm:$0xff] }
 0xf59   : > { %9000 = vmatprep.mubr.bf16.mxu0 %v40000_v14  ;;  %9041 = vmatprep.mubr.bf16.mxu1 %v40000_v14  ;;  %v9502_v30 = vld [vmem:[%s40109_s7 + $0x428] sm:$0xff]  ;;  %v31076_v53 = vcombine.high %v9490_v24, %v9501_v2  ;;  %v31075_v58 = vcombine.low %v9490_v24, %v9501_v2 }
 0xf5a   : > { %v31078_v4 = vcombine.high %v9491_v3, %v9502_v30  ;;  %v31077_v23 = vcombine.low %v9491_v3, %v9502_v30 }
 0xf5b   : > { %8971 = vmatpush1.bf16.msra.mxu0 %v31048_v32  ;;  %9012 = vmatpush1.bf16.msra.mxu1 %v31050_v21  ;;  %v9512_v32 = vld [vmem:[%s40109_s7 + $0x6e0] sm:$0xff] }
 0xf5c   : > { %9050 = vmatprep.subr.bf16.mxu0 %v31031_v22  ;;  %9091 = vmatprep.subr.bf16.mxu1 %v31033_v56  ;;  %v9523_v21 = vld [vmem:[%s40109_s7 + $0x9a0] sm:$0xff]  ;;  %v9513_v22 = vld [vmem:[%s40109_s7 + $0x6e8] sm:$0xff] }
 0xf5d   : > { %v9524_v56 = vld [vmem:[%s40109_s7 + $0x9a8] sm:$0xff]  ;;  %v31098_v25 = vcombine.high %v9512_v32, %v9523_v21  ;;  %v31097_v35 = vcombine.low %v9512_v32, %v9523_v21 }
 0xf5e   : > { %31067 = vmatmul.mubr.msk.bf16.vlgmr.msra.gmra.mrb[156].mxu0 %vm855_vm1, %v34602_v1  ;;  %31068 = vmatmul.mubr.msk.bf16.vlgmr.msra.gmra.mrb[128].mxu1 %vm855_vm1, %v34602_v1  ;;  %v31100_v28 = vcombine.high %v9513_v22, %v9524_v56  ;;  %v31099_v36 = vcombine.low %v9513_v22, %v9524_v56 }
 0xf5f   : > { %9051 = vmatpush1.bf16.msra.mxu0 %v31030_v48  ;;  %9092 = vmatpush1.bf16.msra.mxu1 %v31032_v12  ;;  %v9492_v48 = vld [vmem:[%s40109_s7 + $0x170] sm:$0xff] }
 0xf60   : > { %9052 = vmatprep.subr.bf16.mxu0 %v31053_v33  ;;  %9093 = vmatprep.subr.bf16.mxu1 %v31055_v34  ;;  %v9503_v12 = vld [vmem:[%s40109_s7 + $0x430] sm:$0xff]  ;;  %v9493_v33 = vld [vmem:[%s40109_s7 + $0x178] sm:$0xff] }
 0xf61   : > { %9082 = vmatprep.mubr.bf16.mxu0 %v40000_v14  ;;  %9123 = vmatprep.mubr.bf16.mxu1 %v40000_v14  ;;  %v9504_v34 = vld [vmem:[%s40109_s7 + $0x438] sm:$0xff]  ;;  %v31080_v45 = vcombine.high %v9492_v48, %v9503_v12  ;;  %v31079_v17 = vcombine.low %v9492_v48, %v9503_v12 }
 0xf62   : > { %v31082_v37 = vcombine.high %v9493_v33, %v9504_v34  ;;  %v31081_v41 = vcombine.low %v9493_v33, %v9504_v34 }
 0xf63   : > { %9053 = vmatpush1.bf16.msra.mxu0 %v31052_v38  ;;  %9094 = vmatpush1.bf16.msra.mxu1 %v31054_v40  ;;  %v9514_v38 = vld [vmem:[%s40109_s7 + $0x6f0] sm:$0xff] }
 0xf64   : > { %9132 = vmatprep.subr.bf16.mxu0 %v31035_v49  ;;  %9173 = vmatprep.subr.bf16.mxu1 %v31037_v52  ;;  %v9525_v40 = vld [vmem:[%s40109_s7 + $0x9b0] sm:$0xff]  ;;  %v9515_v49 = vld [vmem:[%s40109_s7 + $0x6f8] sm:$0xff] }
 0xf65   : > { %v9526_v52 = vld [vmem:[%s40109_s7 + $0x9b8] sm:$0xff]  ;;  %v31102_v50 = vcombine.high %v9514_v38, %v9525_v40  ;;  %v31101_v8 = vcombine.low %v9514_v38, %v9525_v40 }
 0xf66   : > { %31069 = vmatmul.mubr.msk.bf16.vlgmr.msra.gmra.mrb[160].mxu0 %vm855_vm1, %v34602_v1  ;;  %31070 = vmatmul.mubr.msk.bf16.vlgmr.msra.gmra.mrb[132].mxu1 %vm855_vm1, %v34602_v1  ;;  %v31104_v51 = vcombine.high %v9515_v49, %v9526_v52  ;;  %v31103_v31 = vcombine.low %v9515_v49, %v9526_v52 }
 0xf67   : > { %9133 = vmatpush1.bf16.msra.mxu0 %v31034_v59  ;;  %9174 = vmatpush1.bf16.msra.mxu1 %v31036_v61  ;;  %v9494_v59 = vld [vmem:[%s40109_s7 + $0x180] sm:$0xff] }
 0xf68   : > { %9134 = vmatprep.subr.bf16.mxu0 %v31057_v63  ;;  %9175 = vmatprep.subr.bf16.mxu1 %v31059_v0  ;;  %v9505_v61 = vld [vmem:[%s40109_s7 + $0x440] sm:$0xff]  ;;  %v9495_v63 = vld [vmem:[%s40109_s7 + $0x188] sm:$0xff] }
 0xf69   : > { %9164 = vmatprep.mubr.bf16.mxu0 %v40000_v14  ;;  %9205 = vmatprep.mubr.bf16.mxu1 %v40000_v14  ;;  %v9506_v0 = vld [vmem:[%s40109_s7 + $0x448] sm:$0xff]  ;;  %v31084_v5 = vcombine.high %v9494_v59, %v9505_v61  ;;  %v31083_v26 = vcombine.low %v9494_v59, %v9505_v61 }
 0xf6a   : > { %v31086_v6 = vcombine.high %v9495_v63, %v9506_v0  ;;  %v31085_v9 = vcombine.low %v9495_v63, %v9506_v0  ;;  %v5392_v63 = vld [vmem:[#allocation16] ss:$8 sm:$0xf] }
 0xf6b   : > { %9135 = vmatpush1.bf16.msra.mxu0 %v31056_v39  ;;  %9176 = vmatpush1.bf16.msra.mxu1 %v31058_v54  ;;  %v9516_v39 = vld [vmem:[%s40109_s7 + $0x700] sm:$0xff] }
 0xf6c   : > { %9214 = vmatprep.subr.bf16.mxu0 %v31039_v19  ;;  %9255 = vmatprep.subr.bf16.mxu1 %v31041_v7  ;;  %v9527_v54 = vld [vmem:[%s40109_s7 + $0x9c0] sm:$0xff]  ;;  %v9517_v19 = vld [vmem:[%s40109_s7 + $0x708] sm:$0xff] }
 0xf6d   : > { %v9528_v7 = vld [vmem:[%s40109_s7 + $0x9c8] sm:$0xff]  ;;  %v31106_v10 = vcombine.high %v9516_v39, %v9527_v54  ;;  %v31105_v24 = vcombine.low %v9516_v39, %v9527_v54  ;;  %v9533_v54 = vld [vmem:[%s40109_s7 + $0x9f0] sm:$0xff] }
 0xf6e   : > { %31071 = vmatmul.mubr.msk.bf16.vlgmr.msra.gmra.mrb[164].mxu0 %vm855_vm1, %v34602_v1  ;;  %31072 = vmatmul.mubr.msk.bf16.vlgmr.msra.gmra.mrb[136].mxu1 %vm855_vm1, %v34602_v1  ;;  %v31108_v27 = vcombine.high %v9517_v19, %v9528_v7  ;;  %v31107_v2 = vcombine.low %v9517_v19, %v9528_v7  ;;  %v5393_v0 = vld [vmem:[#allocation16] ss:$8 sm:$0xf0] }
 0xf6f   : > { %9215 = vmatpush1.bf16.msra.mxu0 %v31038_v11  ;;  %9256 = vmatpush1.bf16.msra.mxu1 %v31040_v13  ;;  %v9496_v11 = vld [vmem:[%s40109_s7 + $0x190] sm:$0xff]  ;;  %v10546_v19 = vld [vmem:[%s40109_s7 + $0x738] sm:$0xff] }
 0xf70   : > { %9216 = vmatprep.subr.bf16.mxu0 %v31061_v15  ;;  %9257 = vmatprep.subr.bf16.mxu1 %v31063_v16  ;;  %v9507_v13 = vld [vmem:[%s40109_s7 + $0x450] sm:$0xff]  ;;  %v9497_v15 = vld [vmem:[%s40109_s7 + $0x198] sm:$0xff] }
 0xf71   : > { %9246 = vmatprep.mubr.bf16.mxu0 %v40000_v14  ;;  %9287 = vmatprep.mubr.bf16.mxu1 %v40000_v14  ;;  %v9508_v16 = vld [vmem:[%s40109_s7 + $0x458] sm:$0xff]  ;;  %v31088_v3 = vcombine.high %v9496_v11, %v9507_v13  ;;  %v31087_v32 = vcombine.low %v9496_v11, %v9507_v13  ;;  %v35389_v13 = vld [vmem:[%s40109_s7 + $0x1c0] sm:$0xff] }
 0xf72   : > { %v31090_v30 = vcombine.high %v9497_v15, %v9508_v16  ;;  %v31089_v21 = vcombine.low %v9497_v15, %v9508_v16  ;;  %v10557_v7 = vld [vmem:[%s40109_s7 + $0x9f8] sm:$0xff]  ;;  %v35394_v16 = vld [vmem:[%s40109_s7 + $0x480] sm:$0xff] }
 0xf73   : > { %9217 = vmatpush1.bf16.msra.mxu0 %v31060_v18  ;;  %9258 = vmatpush1.bf16.msra.mxu1 %v31062_v20  ;;  %v9518_v18 = vld [vmem:[%s40109_s7 + $0x710] sm:$0xff]  ;;  %v31153_v11 = vcombine.high %v10546_v19, %v10557_v7 }
 0xf74   : > { %9879 = vmatprep.subr.bf16.mxu0 %v31076_v53  ;;  %9920 = vmatprep.subr.bf16.mxu1 %v31078_v4  ;;  %v9529_v20 = vld [vmem:[%s40109_s7 + $0x9d0] sm:$0xff]  ;;  %v9519_v53 = vld [vmem:[%s40109_s7 + $0x718] sm:$0xff] }
 0xf75   : > { %v9530_v4 = vld [vmem:[%s40109_s7 + $0x9d8] sm:$0xff]  ;;  %v31110_v22 = vcombine.high %v9518_v18, %v9529_v20  ;;  %v31109_v48 = vcombine.low %v9518_v18, %v9529_v20 }
 0xf76   : > { %31073 = vmatmul.mubr.msk.bf16.vlgmr.msra.gmra.mrb[168].mxu0 %vm855_vm1, %v34602_v1  ;;  %31074 = vmatmul.mubr.msk.bf16.vlgmr.msra.gmra.mrb[140].mxu1 %vm855_vm1, %v34602_v1  ;;  %v31112_v56 = vcombine.high %v9519_v53, %v9530_v4  ;;  %v31111_v12 = vcombine.low %v9519_v53, %v9530_v4  ;;  %v31152_v4 = vcombine.low %v10546_v19, %v10557_v7  ;;  %v35479_v19 = vld [vmem:[%s40109_s7 + $0x498] sm:$0xff] }
 0xf77   : > { %9880 = vmatpush1.bf16.msra.mxu0 %v31075_v58  ;;  %9921 = vmatpush1.bf16.msra.mxu1 %v31077_v23  ;;  %v9498_v58 = vld [vmem:[%s40109_s7 + $0x1a0] sm:$0xff] }
 0xf78   : > { %9881 = vmatprep.subr.bf16.mxu0 %v31098_v25  ;;  %9922 = vmatprep.subr.bf16.mxu1 %v31100_v28  ;;  %v9509_v23 = vld [vmem:[%s40109_s7 + $0x460] sm:$0xff]  ;;  %v9499_v25 = vld [vmem:[%s40109_s7 + $0x1a8] sm:$0xff] }
 0xf79   : > { %9911 = vmatprep.mubr.bf16.mxu0 %v40000_v14  ;;  %9952 = vmatprep.mubr.bf16.mxu1 %v40000_v14  ;;  %v9510_v28 = vld [vmem:[%s40109_s7 + $0x468] sm:$0xff]  ;;  %v31092_v33 = vcombine.high %v9498_v58, %v9509_v23  ;;  %v31091_v38 = vcombine.low %v9498_v58, %v9509_v23 }
 0xf7a   : > { %v31094_v34 = vcombine.high %v9499_v25, %v9510_v28  ;;  %v31093_v40 = vcombine.low %v9499_v25, %v9510_v28  ;;  %v35435_v25 = vld [vmem:[%s40109_s7 + $0xa00] sm:$0xff]  ;;  %v35440_v28 = vld [vmem:[%s40109_s7 + $0x748] sm:$0xff] }
 0xf7b   : > { %9882 = vmatpush1.bf16.msra.mxu0 %v31097_v35  ;;  %9923 = vmatpush1.bf16.msra.mxu1 %v31099_v36  ;;  %v9520_v35 = vld [vmem:[%s40109_s7 + $0x720] sm:$0xff] }
 0xf7c   : > { %9961 = vmatprep.subr.bf16.mxu0 %v31080_v45  ;;  %10002 = vmatprep.subr.bf16.mxu1 %v31082_v37  ;;  %v9531_v36 = vld [vmem:[%s40109_s7 + $0x9e0] sm:$0xff]  ;;  %v9521_v45 = vld [vmem:[%s40109_s7 + $0x728] sm:$0xff] }
 0xf7d   : > { %v9532_v37 = vld [vmem:[%s40109_s7 + $0x9e8] sm:$0xff]  ;;  %v31114_v49 = vcombine.high %v9520_v35, %v9531_v36  ;;  %v31113_v59 = vcombine.low %v9520_v35, %v9531_v36  ;;  %v31132_v35 = vcombine.low %v35389_v13, %v35394_v16 }
 0xf7e   : > { %31119 = vmatmul.mubr.msk.bf16.vlgmr.msra.gmra.mrb[172].mxu0 %vm855_vm1, %v34602_v1  ;;  %31120 = vmatmul.mubr.msk.bf16.vlgmr.msra.gmra.mrb[144].mxu1 %vm855_vm1, %v34602_v1  ;;  %v31116_v52 = vcombine.high %v9521_v45, %v9532_v37  ;;  %v31115_v61 = vcombine.low %v9521_v45, %v9532_v37  ;;  %v5396_v45 = vld [vmem:[#allocation16 + $0x40] ss:$8 sm:$0xf] }
 0xf7f   : > { %9962 = vmatpush1.bf16.msra.mxu0 %v31079_v17  ;;  %10003 = vmatpush1.bf16.msra.mxu1 %v31081_v41  ;;  %v9500_v17 = vld [vmem:[%s40109_s7 + $0x1b0] sm:$0xff] }
 0xf80   : > { %9963 = vmatprep.subr.bf16.mxu0 %v31102_v50  ;;  %10004 = vmatprep.subr.bf16.mxu1 %v31104_v51  ;;  %v9511_v41 = vld [vmem:[%s40109_s7 + $0x470] sm:$0xff]  ;;  %v10524_v50 = vld [vmem:[%s40109_s7 + $0x1b8] sm:$0xff] }
 0xf81   : > { %9993 = vmatprep.mubr.bf16.mxu0 %v40000_v14  ;;  %10034 = vmatprep.mubr.bf16.mxu1 %v40000_v14  ;;  %v10535_v51 = vld [vmem:[%s40109_s7 + $0x478] sm:$0xff] }
 0xf83   : > { %9964 = vmatpush1.bf16.msra.mxu0 %v31101_v8  ;;  %10005 = vmatpush1.bf16.msra.mxu1 %v31103_v31  ;;  %v31096_v8 = vcombine.high %v9500_v17, %v9511_v41  ;;  %v31131_v31 = vcombine.high %v10524_v50, %v10535_v51 }
 0xf84   : > { %10043 = vmatprep.subr.bf16.mxu0 %v31084_v5  ;;  %10084 = vmatprep.subr.bf16.mxu1 %v31086_v6  ;;  %v9522_v5 = vld [vmem:[%s40109_s7 + $0x730] sm:$0xff]  ;;  %v33066_v6 = vmov 1966171168  }
 0xf85   : > { %v6239_v39 = vunpack.c.l.s4 %v33066_v6  ;;  %v31117_v53 = vcombine.low %v9522_v5, %v9533_v54 }
 0xf86   : > { %31121 = vmatmul.mubr.msk.bf16.vlgmr.msra.gmra.mrb[176].mxu0 %vm855_vm1, %v34602_v1  ;;  %31122 = vmatmul.mubr.msk.bf16.vlgmr.msra.gmra.mrb[148].mxu1 %vm855_vm1, %v34602_v1 }
 0xf87   : > { %10044 = vmatpush1.bf16.msra.mxu0 %v31083_v26  ;;  %10085 = vmatpush1.bf16.msra.mxu1 %v31085_v9  ;;  %v35384_v26 = vor.u32 %v5393_v0, %v5392_v63  ;;  %v31095_v9 = vcombine.low %v9500_v17, %v9511_v41  ;;  %v6240_v15 = vunpack.c.0.s8 %v6239_v39  ;;  %v5397_v17 = vld [vmem:[#allocation16 + $0x40] ss:$8 sm:$0xf0] }
 0xf88   : > { %10045 = vmatprep.subr.bf16.mxu0 %v31106_v10  ;;  %10086 = vmatprep.subr.bf16.mxu1 %v31108_v27  ;;  %v31130_v10 = vcombine.low %v10524_v50, %v10535_v51  ;;  %v31118_v27 = vcombine.high %v9522_v5, %v9533_v54  ;;  %v35460_v0 = vld [vmem:[%s40109_s7 + $0x1d0] sm:$0xff]  ;;  %v35474_v54 = vld [vmem:[%s40109_s7 + $0x1d8] sm:$0xff] }
 0xf89   : > { %10075 = vmatprep.mubr.bf16.mxu0 %v40000_v14  ;;  %10116 = vmatprep.mubr.bf16.mxu1 %v40000_v14  ;;  %v5633_v18 = vrot.slane %v35384_v26, %v33680_v46  ;;  %v5641_v20 = vrot.slane %v35384_v26, %v33683_v47  ;;  %v5653_v5 = vrot.slane %v35384_v26, %v33697_v57  ;;  %v35469_v39 = vld [vmem:[%s40109_s7 + $0x490] sm:$0xff] }
 0xf8a   : > { %v5649_v6 = vrot.slane %v35384_v26, %v33756_v60  ;;  %v5657_v7 = vrot.slane %v35384_v26, %v33700_v62 }
 0xf8b   : > { %10046 = vmatpush1.bf16.msra.mxu0 %v31105_v24  ;;  %10087 = vmatpush1.bf16.msra.mxu1 %v31107_v2  ;;  %v35399_v24 = vld [vmem:[%s40109_s7 + $0x1c8] sm:$0xff] }
 0xf8c   : > { %10125 = vmatprep.subr.bf16.mxu0 %v31088_v3  ;;  %10166 = vmatprep.subr.bf16.mxu1 %v31090_v30  ;;  %v35404_v2 = vld [vmem:[%s40109_s7 + $0x488] sm:$0xff]  ;;  %v5629_v3 = vrot.slane %v35384_v26, %v33675_v44  ;;  %v5637_v30 = vrot.slane %v35384_v26, %v33729_v29 }
 0xf8d   : > { %v31134_v36 = vcombine.low %v35399_v24, %v35404_v2 }
 0xf8e   : > { %31123 = vmatmul.mubr.msk.bf16.vlgmr.msra.gmra.mrb[180].mxu0 %vm855_vm1, %v34602_v1  ;;  %31124 = vmatmul.mubr.msk.bf16.vlgmr.msra.gmra.mrb[152].mxu1 %vm855_vm1, %v34602_v1 }
 0xf8f   : > { %10126 = vmatpush1.bf16.msra.mxu0 %v31087_v32  ;;  %10167 = vmatpush1.bf16.msra.mxu1 %v31089_v21  ;;  %v31133_v32 = vcombine.high %v35389_v13, %v35394_v16  ;;  %v31135_v21 = vcombine.high %v35399_v24, %v35404_v2  ;;  %v31139_v16 = vcombine.high %v35474_v54, %v35479_v19  ;;  %v35502_v24 = vld [vmem:[%s40109_s7 + $0x750] sm:$0xff] }
 0xf90   : > { %10127 = vmatprep.subr.bf16.mxu0 %v31110_v22  ;;  %10168 = vmatprep.subr.bf16.mxu1 %v31112_v56  ;;  %v35425_v22 = vld [vmem:[%s40109_s7 + $0x740] sm:$0xff]  ;;  %v35428_v56 = vsub.s32 %v6240_v15, %v33672_v43  ;;  %v35445_v43 = vld [vmem:[%s40109_s7 + $0xa08] sm:$0xff]  ;;  %v31136_v15 = vcombine.low %v35460_v0, %v35469_v39 }
 0xf91   : > { %10157 = vmatprep.mubr.bf16.mxu0 %v40000_v14  ;;  %10198 = vmatprep.mubr.bf16.mxu1 %v40000_v14  ;;  %v31157_v63 = vcombine.high %v35440_v28, %v35445_v43  ;;  %v31156_v13 = vcombine.low %v35440_v28, %v35445_v43 }
 0xf92   : > { %40110 = vst [vmem:[#allocation31_spill] sm:$0xff] %v35428_v56 }
 0xf93   : > { %10128 = vmatpush1.bf16.msra.mxu0 %v31109_v48  ;;  %10169 = vmatpush1.bf16.msra.mxu1 %v31111_v12 }
 0xf94   : > { %10207 = vmatprep.subr.bf16.mxu0 %v31092_v33  ;;  %10248 = vmatprep.subr.bf16.mxu1 %v31094_v34 }
 0xf96   : > { %31125 = vmatmul.mubr.msk.bf16.vlgmr.msra.gmra.mrb[184].mxu0 %vm855_vm1, %v34602_v1  ;;  %31126 = vmatmul.mubr.msk.bf16.vlgmr.msra.gmra.mrb[156].mxu1 %vm855_vm1, %v34602_v1 }
 0xf97   : > { %10208 = vmatpush1.bf16.msra.mxu0 %v31091_v38  ;;  %10249 = vmatpush1.bf16.msra.mxu1 %v31093_v40 }
 0xf98   : > { %10209 = vmatprep.subr.bf16.mxu0 %v31114_v49  ;;  %10250 = vmatprep.subr.bf16.mxu1 %v31116_v52  ;;  %v5645_v52 = vrot.slane %v35384_v26, %v33694_v55  ;;  %v31137_v26 = vcombine.high %v35460_v0, %v35469_v39  ;;  %v35574_v39 = vld [vmem:[%s40109_s7 + $0x760] sm:$0xff] }
 0xf99   : > { %10239 = vmatprep.mubr.bf16.mxu0 %v40000_v14  ;;  %10280 = vmatprep.mubr.bf16.mxu1 %v40000_v14 }
 0xf9b   : > { %10210 = vmatpush1.bf16.msra.mxu0 %v31113_v59  ;;  %10251 = vmatpush1.bf16.msra.mxu1 %v31115_v61  ;;  %v31155_v61 = vcombine.high %v35425_v22, %v35435_v25 }
 0xf9c   : > { %10289 = vmatprep.subr.bf16.mxu0 %v31096_v8  ;;  %10913 = vmatprep.subr.bf16.mxu1 %v31131_v31 }
 0xf9e   : > { %31127 = vmatmul.mubr.msk.bf16.vlgmr.msra.gmra.mrb[188].mxu0 %vm855_vm1, %v34602_v1  ;;  %31128 = vmatmul.mubr.msk.bf16.vlgmr.msra.gmra.mrb[160].mxu1 %vm855_vm1, %v34602_v1 }
 0xf9f   : > { %10290 = vmatpush1.bf16.msra.mxu0 %v31095_v9  ;;  %10914 = vmatpush1.bf16.msra.mxu1 %v31130_v10  ;;  %v31154_v9 = vcombine.low %v35425_v22, %v35435_v25  ;;  %v35489_v10 = vor.u32 %v5397_v17, %v5396_v45 }
 0xfa0   : > { %10291 = vmatprep.subr.bf16.mxu0 %v31118_v27  ;;  %10915 = vmatprep.subr.bf16.mxu1 %v31153_v11 }
 0xfa1   : > { %v5773_v58 = vpop.f32.mrb[84].mxu0  ;;  %v5814_v23 = vpop.f32.mrb[56].mxu1  ;;  %10321 = vmatprep.mubr.bf16.mxu0 %v40000_v14  ;;  %10945 = vmatprep.mubr.bf16.mxu1 %v40000_v14  ;;  %v5661_v25 = vrot.slane %v35489_v10, %v33675_v44  ;;  %v5669_v28 = vrot.slane %v35489_v10, %v33729_v29 }
 0xfa2   : > { %v5774_v48 = vadd.f32 %v5773_v58, %v5629_v3  ;;  %v5815_v12 = vadd.f32 %v5814_v23, %v5637_v30  ;;  %v5775_v33 = vpop.f32.mrb[85].mxu0  ;;  %v5816_v34 = vpop.f32.mrb[57].mxu1 }
 0xfa3   : > { %v5776_v37 = vadd.f32 %v5775_v33, %v5633_v18  ;;  %v5817_v38 = vadd.f32 %v5816_v34, %v5641_v20  ;;  %v5777_v40 = vpop.f32.mrb[86].mxu0  ;;  %v5818_v49 = vpop.f32.mrb[58].mxu1  ;;  %10292 = vmatpush1.bf16.msra.mxu0 %v31117_v53  ;;  %10916 = vmatpush1.bf16.msra.mxu1 %v31152_v4  ;;  %v31138_v20 = vcombine.low %v35474_v54, %v35479_v19  ;;  %v35513_v53 = vld [vmem:[%s40109_s7 + $0xa10] sm:$0xff]  ;;  %v35518_v4 = vld [vmem:[%s40109_s7 + $0x758] sm:$0xff]  ;;  %v35579_v54 = vld [vmem:[%s40109_s7 + $0xa20] sm:$0xff] }
 0xfa4   : > { %v6190_v41 = vmax.f32 %v5774_v48, 0.0  ;;  %v6192_v50 = vmax.f32 %v5815_v12, 0.0  ;;  %v5778_v51 = vpop.f32.mrb[87].mxu0  ;;  %v5819_v59 = vpop.f32.mrb[59].mxu1  ;;  %10954 = vmatprep.subr.bf16.mxu0 %v31133_v32  ;;  %10995 = vmatprep.subr.bf16.mxu1 %v31135_v21  ;;  %v35523_v32 = vld [vmem:[%s40109_s7 + $0xa18] sm:$0xff]  ;;  %v31159_v49 = vcombine.high %v35502_v24, %v35513_v53 }
 0xfa5   : > { %v6191_v8 = vmax.f32 %v5776_v37, 0.0  ;;  %v6193_v31 = vmax.f32 %v5817_v38, 0.0  ;;  %v5673_v51 = vrot.slane %v35489_v10, %v33683_v47  ;;  %v35552_v59 = vld [vmem:[%s40109_s7 + $0x1e8] sm:$0xff]  ;;  %v31160_v0 = vcombine.low %v35518_v4, %v35523_v32 }
 0xfa6   : > { %31129 = vmatmul.mubr.msk.bf16.vlgmr.msra.gmra.mrb[192].mxu0 %vm855_vm1, %v34602_v1  ;;  %31174 = vmatmul.mubr.msk.bf16.vlgmr.msra.gmra.mrb[164].mxu1 %vm855_vm1, %v34602_v1 }
 0xfa7   : > { %v6234_v27 = vcombine.low %v6190_v41, %v6191_v8  ;;  %v6235_v11 = vcombine.low %v6192_v50, %v6193_v31  ;;  %10955 = vmatpush1.bf16.msra.mxu0 %v31132_v35  ;;  %10996 = vmatpush1.bf16.msra.mxu1 %v31134_v36  ;;  %v35534_v35 = vld [vmem:[%s40109_s7 + $0x1e0] sm:$0xff]  ;;  %v5665_v50 = vrot.slane %v35489_v10, %v33680_v46 }
 0xfa8   : > { %10956 = vmatprep.subr.bf16.mxu0 %v31155_v61  ;;  %10997 = vmatprep.subr.bf16.mxu1 %v31157_v63  ;;  %v35539_v36 = vld [vmem:[%s40109_s7 + $0x4a0] sm:$0xff]  ;;  %v35557_v61 = vld [vmem:[%s40109_s7 + $0x4a8] sm:$0xff]  ;;  %v31158_v63 = vcombine.low %v35502_v24, %v35513_v53  ;;  %v31163_v53 = vcombine.high %v35574_v39, %v35579_v54 }
 0xfa9   : > { %v6244_v2 = vrot.slane %v6234_v27, %v35428_v56  ;;  %v6251_v3 = vrot.slane %v6235_v11, %v35428_v56  ;;  %v5855_v30 = vpop.f32.mrb[88].mxu0  ;;  %v5896_v18 = vpop.f32.mrb[60].mxu1  ;;  %10986 = vmatprep.mubr.bf16.mxu0 %v40000_v14  ;;  %11027 = vmatprep.mubr.bf16.mxu1 %v40000_v14  ;;  %v31141_v8 = vcombine.high %v35534_v35, %v35539_v36  ;;  %v35601_v24 = vld [vmem:[%s40109_s7 + $0xa28] sm:$0xff] }
 0xfaa   : > { %v5856_v21 = vadd.f32 %v5855_v30, %v5645_v52  ;;  %v5897_v22 = vadd.f32 %v5896_v18, %v5653_v5  ;;  %v5857_v58 = vpop.f32.mrb[89].mxu0  ;;  %v5898_v23 = vpop.f32.mrb[61].mxu1  ;;  %v31161_v52 = vcombine.high %v35518_v4, %v35523_v32  ;;  %v31142_v19 = vcombine.low %v35552_v59, %v35557_v61  ;;  %v5400_v4 = vld [vmem:[#allocation16 + $0x80] ss:$8 sm:$0xf] }
 0xfab   : > { %v35529_v43 = vcombine.low %v6244_v2, %v6251_v3  ;;  %v5858_v48 = vadd.f32 %v5857_v58, %v5649_v6  ;;  %v5899_v12 = vadd.f32 %v5898_v23, %v5657_v7  ;;  %v5859_v33 = vpop.f32.mrb[90].mxu0  ;;  %v5900_v34 = vpop.f32.mrb[62].mxu1  ;;  %10957 = vmatpush1.bf16.msra.mxu0 %v31154_v9  ;;  %10998 = vmatpush1.bf16.msra.mxu1 %v31156_v13 }
 0xfac   : > { %v6194_v45 = vmax.f32 %v5856_v21, 0.0  ;;  %v6196_v37 = vmax.f32 %v5897_v22, 0.0  ;;  %v5860_v38 = vpop.f32.mrb[91].mxu0  ;;  %v5901_v40 = vpop.f32.mrb[63].mxu1  ;;  %11036 = vmatprep.subr.bf16.mxu0 %v31137_v26  ;;  %11077 = vmatprep.subr.bf16.mxu1 %v31139_v16  ;;  %v31140_v6 = vcombine.low %v35534_v35, %v35539_v36  ;;  %v31143_v7 = vcombine.high %v35552_v59, %v35557_v61  ;;  %v35596_v16 = vld [vmem:[%s40109_s7 + $0x768] sm:$0xff]  ;;  %v35614_v36 = vld [vmem:[%s40109_s7 + $0x1f0] sm:$0xff] }
 0xfad   : > { %v6195_v17 = vmax.f32 %v5858_v48, 0.0  ;;  %v6197_v41 = vmax.f32 %v5899_v12, 0.0  ;;  %v5677_v9 = vrot.slane %v35489_v10, %v33694_v55  ;;  %v5685_v26 = vrot.slane %v35489_v10, %v33697_v57  ;;  %v5401_v48 = vld [vmem:[#allocation16 + $0x80] ss:$8 sm:$0x30] }
 0xfae   : > { %31175 = vmatmul.mubr.msk.bf16.vlgmr.msra.gmra.mrb[196].mxu0 %vm855_vm1, %v34602_v1  ;;  %31176 = vmatmul.mubr.msk.bf16.vlgmr.msra.gmra.mrb[168].mxu1 %vm855_vm1, %v34602_v1  ;;  %v5689_v34 = vrot.slane %v35489_v10, %v33700_v62  ;;  %v31165_v35 = vcombine.high %v35596_v16, %v35601_v24 }
 0xfaf   : > { %v6236_v31 = vcombine.low %v6194_v45, %v6195_v17  ;;  %v6237_v5 = vcombine.low %v6196_v37, %v6197_v41  ;;  %11037 = vmatpush1.bf16.msra.mxu0 %v31136_v15  ;;  %11078 = vmatpush1.bf16.msra.mxu1 %v31138_v20  ;;  %v5681_v20 = vrot.slane %v35489_v10, %v33756_v60  ;;  %v35632_v17 = vld [vmem:[%s40109_s7 + $0x4b8] sm:$0xff]  ;;  %v35698_v10 = vld [vmem:[%s40109_s7 + $0x200] sm:$0xff] }
 0xfb0   : > { %11038 = vmatprep.subr.bf16.mxu0 %v31159_v49  ;;  %11079 = vmatprep.subr.bf16.mxu1 %v31161_v52  ;;  %v6274_v45 = vrot.slane %v35529_v43, %v35428_v56  ;;  %v35622_v49 = vld [vmem:[%s40109_s7 + $0x4b0] sm:$0xff]  ;;  %v35627_v52 = vld [vmem:[%s40109_s7 + $0x1f8] sm:$0xff]  ;;  %v31162_v43 = vcombine.low %v35574_v39, %v35579_v54  ;;  %v31164_v41 = vcombine.low %v35596_v16, %v35601_v24 }
 0xfb1   : > { %v6258_v27 = vrot.slane %v6236_v31, %v35428_v56  ;;  %v6265_v11 = vrot.slane %v6237_v5, %v35428_v56  ;;  %v5937_v13 = vpop.f32.mrb[92].mxu0  ;;  %v5978_v15 = vpop.f32.mrb[64].mxu1  ;;  %11068 = vmatprep.mubr.bf16.mxu0 %v40000_v14  ;;  %11109 = vmatprep.mubr.bf16.mxu1 %v40000_v14  ;;  %v35653_v31 = vld [vmem:[%s40109_s7 + $0x770] sm:$0xff] }
 0xfb2   : > { %v5938_v2 = vadd.f32 %v5937_v13, %v5661_v25  ;;  %v5979_v3 = vadd.f32 %v5978_v15, %v5669_v28  ;;  %v5939_v30 = vpop.f32.mrb[93].mxu0  ;;  %v5980_v18 = vpop.f32.mrb[65].mxu1 }
 0xfb3   : > { %v6267_v32 = vcombine.low %v6258_v27, %v6265_v11  ;;  %v5940_v21 = vadd.f32 %v5939_v30, %v5665_v50  ;;  %v5981_v22 = vadd.f32 %v5980_v18, %v5673_v51  ;;  %v5941_v58 = vpop.f32.mrb[94].mxu0  ;;  %v5982_v23 = vpop.f32.mrb[66].mxu1  ;;  %11039 = vmatpush1.bf16.msra.mxu0 %v31158_v63  ;;  %11080 = vmatpush1.bf16.msra.mxu1 %v31160_v0  ;;  %v35669_v27 = vld [vmem:[%s40109_s7 + $0x778] sm:$0xff] }
 0xfb4   : > { %v6198_v12 = vmax.f32 %v5938_v2, 0.0  ;;  %v6200_v25 = vmax.f32 %v5979_v3, 0.0  ;;  %v5942_v28 = vpop.f32.mrb[95].mxu0  ;;  %v5983_v33 = vpop.f32.mrb[67].mxu1  ;;  %11118 = vmatprep.subr.bf16.mxu0 %v31141_v8  ;;  %11159 = vmatprep.subr.bf16.mxu1 %v31143_v7  ;;  %v35642_v50 = vor.u32 %v5401_v48, %v5400_v4  ;;  %v31144_v63 = vcombine.low %v35614_v36, %v35622_v49  ;;  %v35664_v7 = vld [vmem:[%s40109_s7 + $0xa30] sm:$0xff]  ;;  %v35674_v11 = vld [vmem:[%s40109_s7 + $0xa38] sm:$0xff] }
 0xfb5   : > { %v6281_v37 = vrot.slane %v6267_v32, %v35428_v56  ;;  %v6199_v38 = vmax.f32 %v5940_v21, 0.0  ;;  %v6201_v40 = vmax.f32 %v5981_v22, 0.0  ;;  %v31145_v0 = vcombine.high %v35614_v36, %v35622_v49  ;;  %v6433_v30 = vld [vmem:[#allocation16 + $0x1] ss:$8 sm:$0xf] }
 0xfb6   : > { %31177 = vmatmul.mubr.msk.bf16.vlgmr.msra.gmra.mrb[200].mxu0 %vm855_vm1, %v34602_v1  ;;  %31178 = vmatmul.mubr.msk.bf16.vlgmr.msra.gmra.mrb[172].mxu1 %vm855_vm1, %v34602_v1  ;;  %v31147_v8 = vcombine.high %v35627_v52, %v35632_v17  ;;  %v5693_v2 = vrot.slane %v35642_v50, %v33675_v44  ;;  %v5701_v3 = vrot.slane %v35642_v50, %v33729_v29  ;;  %v35717_v36 = vld [vmem:[%s40109_s7 + $0x4c8] sm:$0xff] }
 0xfb7   : > { %v6282_v51 = vcombine.low %v6274_v45, %v6281_v37  ;;  %v6283_v59 = vcombine.low %v6198_v12, %v6199_v38  ;;  %v6284_v61 = vcombine.low %v6200_v25, %v6201_v40  ;;  %11119 = vmatpush1.bf16.msra.mxu0 %v31140_v6  ;;  %11160 = vmatpush1.bf16.msra.mxu1 %v31142_v19 }
 0xfb8   : > { %11120 = vmatprep.subr.bf16.mxu0 %v31163_v53  ;;  %11161 = vmatprep.subr.bf16.mxu1 %v31165_v35  ;;  %v31146_v19 = vcombine.low %v35627_v52, %v35632_v17  ;;  %v31167_v48 = vcombine.high %v35653_v31, %v35664_v7  ;;  %v31169_v12 = vcombine.high %v35669_v27, %v35674_v11  ;;  %v35712_v35 = vld [vmem:[%s40109_s7 + $0x208] sm:$0xff]  ;;  %v35734_v17 = vld [vmem:[%s40109_s7 + $0x780] sm:$0xff] }
 0xfb9   : > { %6376 = vst [vmem:[#allocation2 + $0x8] ss:$8 sm:$0xf] %v6282_v51  ;;  %6377 = vst [vmem:[#allocation2 + $0x8] ss:$8 sm:$0xf0] %v6282_v51  ;;  %v6293_v5 = vrot.slane %v6283_v59, %v35428_v56  ;;  %v6300_v6 = vrot.slane %v6284_v61, %v35428_v56  ;;  %11150 = vmatprep.mubr.bf16.mxu0 %v40000_v14  ;;  %11191 = vmatprep.mubr.bf16.mxu1 %v40000_v14 }
 0xfba   : > { %v6019_v39 = vpop.f32.mrb[96].mxu0  ;;  %v6060_v54 = vpop.f32.mrb[68].mxu1  ;;  %v5697_v33 = vrot.slane %v35642_v50, %v33680_v46  ;;  %v31166_v45 = vcombine.low %v35653_v31, %v35664_v7  ;;  %v31168_v37 = vcombine.low %v35669_v27, %v35674_v11  ;;  %v31150_v51 = vcombine.low %v35712_v35, %v35717_v36 }
 0xfbb   : > { %v6020_v13 = vadd.f32 %v6019_v39, %v5677_v9  ;;  %v6061_v15 = vadd.f32 %v6060_v54, %v5685_v26  ;;  %v6021_v16 = vpop.f32.mrb[97].mxu0  ;;  %v6062_v24 = vpop.f32.mrb[69].mxu1  ;;  %v35686_v18 = vcombine.low %v6293_v5, %v6300_v6  ;;  %11121 = vmatpush1.bf16.msra.mxu0 %v31162_v43  ;;  %11162 = vmatpush1.bf16.msra.mxu1 %v31164_v41  ;;  %v6434_v26 = vld [vmem:[#allocation16 + $0x1] ss:$8 sm:$0xf0] }
 0xfbc   : > { %v6022_v53 = vadd.f32 %v6021_v16, %v5681_v20  ;;  %v6063_v9 = vadd.f32 %v6062_v24, %v5689_v34  ;;  %v6023_v4 = vpop.f32.mrb[98].mxu0  ;;  %v6064_v32 = vpop.f32.mrb[70].mxu1  ;;  %11200 = vmatprep.subr.bf16.mxu0 %v31145_v0  ;;  %11241 = vmatprep.subr.bf16.mxu1 %v31147_v8  ;;  %v35703_v20 = vld [vmem:[%s40109_s7 + $0x4c0] sm:$0xff]  ;;  %v5705_v34 = vrot.slane %v35642_v50, %v33683_v47  ;;  %v35756_v5 = vld [vmem:[%s40109_s7 + $0x788] sm:$0xff] }
 0xfbd   : > { %v6202_v21 = vmax.f32 %v6020_v13, 0.0  ;;  %v6204_v22 = vmax.f32 %v6061_v15, 0.0  ;;  %v6024_v58 = vpop.f32.mrb[99].mxu0  ;;  %v6065_v23 = vpop.f32.mrb[71].mxu1  ;;  %v35727_v38 = vor.u32 %v6434_v26, %v6433_v30  ;;  %v31149_v52 = vcombine.high %v35698_v10, %v35703_v20  ;;  %v35739_v43 = vld [vmem:[%s40109_s7 + $0xa40] sm:$0xff]  ;;  %v35761_v6 = vld [vmem:[%s40109_s7 + $0xa48] sm:$0xff] }
 0xfbe   : > { %v6203_v25 = vmax.f32 %v6022_v53, 0.0  ;;  %v6205_v28 = vmax.f32 %v6063_v9, 0.0  ;;  %31179 = vmatmul.mubr.msk.bf16.vlgmr.msra.gmra.mrb[204].mxu0 %vm855_vm1, %v34602_v1  ;;  %31180 = vmatmul.mubr.msk.bf16.vlgmr.msra.gmra.mrb[176].mxu1 %vm855_vm1, %v34602_v1  ;;  %v31148_v41 = vcombine.low %v35698_v10, %v35703_v20  ;;  %v31151_v59 = vcombine.high %v35712_v35, %v35717_v36  ;;  %v35774_v26 = vld [vmem:[%s40109_s7 + $0x210] sm:$0xff] }
 0xfbf   : > { %11201 = vmatpush1.bf16.msra.mxu0 %v31144_v63  ;;  %11242 = vmatpush1.bf16.msra.mxu1 %v31146_v19  ;;  %v5709_v31 = vrot.slane %v35642_v50, %v33694_v55  ;;  %v6670_v27 = vrot.slane %v35727_v38, %v33675_v44  ;;  %v31171_v11 = vcombine.high %v35734_v17, %v35739_v43  ;;  %v35811_v36 = vld [vmem:[%s40109_s7 + $0x790] sm:$0xff] }
 0xfc0   : > { %v6285_v40 = vcombine.low %v6202_v21, %v6203_v25  ;;  %v6286_v49 = vcombine.low %v6204_v22, %v6205_v28  ;;  %11202 = vmatprep.subr.bf16.mxu0 %v31167_v48  ;;  %11243 = vmatprep.subr.bf16.mxu1 %v31169_v12  ;;  %v31173_v32 = vcombine.high %v35756_v5, %v35761_v6  ;;  %v35782_v48 = vld [vmem:[%s40109_s7 + $0x4d0] sm:$0xff]  ;;  %v35792_v12 = vld [vmem:[%s40109_s7 + $0x4d8] sm:$0xff] }
 0xfc1   : > { %v6101_v0 = vpop.f32.mrb[100].mxu0  ;;  %v6142_v8 = vpop.f32.mrb[72].mxu1  ;;  %11232 = vmatprep.mubr.bf16.mxu0 %v40000_v14  ;;  %11273 = vmatprep.mubr.bf16.mxu1 %v40000_v14  ;;  %v6323_v21 = vrot.slane %v35686_v18, %v35428_v56  ;;  %v6674_v18 = vrot.slane %v35727_v38, %v33680_v46  ;;  %v31170_v10 = vcombine.low %v35734_v17, %v35739_v43  ;;  %v35825_v17 = vld [vmem:[%s40109_s7 + $0x798] sm:$0xff] }
 0xfc2   : > { %v6307_v61 = vrot.slane %v6285_v40, %v35428_v56  ;;  %v6314_v63 = vrot.slane %v6286_v49, %v35428_v56  ;;  %v6102_v39 = vadd.f32 %v6101_v0, %v5693_v2  ;;  %v6143_v54 = vadd.f32 %v6142_v8, %v5701_v3  ;;  %v6103_v19 = vpop.f32.mrb[101].mxu0  ;;  %v6144_v7 = vpop.f32.mrb[73].mxu1  ;;  %v35830_v43 = vld [vmem:[%s40109_s7 + $0xa58] sm:$0xff] }
 0xfc3   : > { %v6104_v15 = vadd.f32 %v6103_v19, %v5697_v33  ;;  %v6145_v16 = vadd.f32 %v6144_v7, %v5705_v34  ;;  %v6105_v24 = vpop.f32.mrb[102].mxu0  ;;  %v6146_v30 = vpop.f32.mrb[74].mxu1  ;;  %11203 = vmatpush1.bf16.msra.mxu0 %v31166_v45  ;;  %11244 = vmatpush1.bf16.msra.mxu1 %v31168_v37  ;;  %v5713_v3 = vrot.slane %v35642_v50, %v33756_v60  ;;  %v35787_v50 = vld [vmem:[%s40109_s7 + $0x218] sm:$0xff] }
 0xfc4   : > { %v6316_v13 = vcombine.low %v6307_v61, %v6314_v63  ;;  %v6206_v53 = vmax.f32 %v6102_v39, 0.0  ;;  %v6208_v9 = vmax.f32 %v6143_v54, 0.0  ;;  %v6106_v4 = vpop.f32.mrb[103].mxu0  ;;  %v6147_v2 = vpop.f32.mrb[75].mxu1  ;;  %11282 = vmatprep.subr.bf16.mxu0 %v31149_v52  ;;  %11323 = vmatprep.subr.bf16.mxu1 %v31151_v59  ;;  %v31172_v20 = vcombine.low %v35756_v5, %v35761_v6  ;;  %v35820_v52 = vld [vmem:[%s40109_s7 + $0xa50] sm:$0xff] }
 0xfc5   : > { %v6207_v58 = vmax.f32 %v6104_v15, 0.0  ;;  %v6209_v23 = vmax.f32 %v6145_v16, 0.0  ;;  %v31186_v34 = vcombine.high %v35774_v26, %v35782_v48  ;;  %v31188_v35 = vcombine.high %v35787_v50, %v35792_v12  ;;  %v35845_v15 = vld [vmem:[%s40109_s7 + $0x220] sm:$0xff]  ;;  %v35859_v4 = vld [vmem:[%s40109_s7 + $0x228] sm:$0xff] }
 0xfc6   : > { %v6330_v22 = vrot.slane %v6316_v13, %v35428_v56  ;;  %31181 = vmatmul.mubr.msk.bf16.vlgmr.msra.gmra.mrb[208].mxu0 %vm855_vm1, %v34602_v1  ;;  %31182 = vmatmul.mubr.msk.bf16.vlgmr.msra.gmra.mrb[180].mxu1 %vm855_vm1, %v34602_v1  ;;  %v31185_v63 = vcombine.low %v35774_v26, %v35782_v48  ;;  %v31187_v0 = vcombine.low %v35787_v50, %v35792_v12  ;;  %v35864_v2 = vld [vmem:[%s40109_s7 + $0x4e8] sm:$0xff] }
 0xfc7   : > { %v6332_v28 = vcombine.low %v6206_v53, %v6207_v58  ;;  %v6333_v33 = vcombine.low %v6208_v9, %v6209_v23  ;;  %11283 = vmatpush1.bf16.msra.mxu0 %v31148_v41  ;;  %11324 = vmatpush1.bf16.msra.mxu1 %v31150_v51  ;;  %v31210_v13 = vcombine.high %v35825_v17, %v35830_v43  ;;  %v35854_v9 = vld [vmem:[%s40109_s7 + $0x4e0] sm:$0xff] }
 0xfc8   : > { %v6331_v25 = vcombine.low %v6323_v21, %v6330_v22  ;;  %11284 = vmatprep.subr.bf16.mxu0 %v31171_v11  ;;  %11325 = vmatprep.subr.bf16.mxu1 %v31173_v32  ;;  %v31208_v11 = vcombine.high %v35811_v36, %v35820_v52  ;;  %v6678_v30 = vrot.slane %v35727_v38, %v33729_v29  ;;  %v6437_v21 = vld [vmem:[#allocation16 + $0x41] ss:$8 sm:$0xf] }
 0xfc9   : > { %v6341_v45 = vrot.slane %v6332_v28, %v35428_v56  ;;  %v6348_v37 = vrot.slane %v6333_v33, %v35428_v56  ;;  %v6183_v40 = vpop.f32.mrb[104].mxu0  ;;  %v6811_v49 = vpop.f32.mrb[76].mxu1  ;;  %11314 = vmatprep.mubr.bf16.mxu0 %v40000_v14  ;;  %11355 = vmatprep.mubr.bf16.mxu1 %v40000_v14  ;;  %v6686_v53 = vrot.slane %v35727_v38, %v33694_v55  ;;  %v6438_v22 = vld [vmem:[#allocation16 + $0x41] ss:$8 sm:$0xf0] }
 0xfca   : > { %6379 = vst [vmem:[#allocation2 + $0x48] ss:$8 sm:$0xf] %v6331_v25  ;;  %6380 = vst [vmem:[#allocation2 + $0x48] ss:$8 sm:$0xf0] %v6331_v25  ;;  %v6184_v41 = vadd.f32 %v6183_v40, %v5709_v31  ;;  %v6812_v51 = vadd.f32 %v6811_v49, %v6670_v27  ;;  %v6690_v32 = vrot.slane %v35727_v38, %v33756_v60 }
 0xfcb   : > { %v6185_v59 = vpop.f32.mrb[105].mxu0  ;;  %v6813_v61 = vpop.f32.mrb[77].mxu1  ;;  %v35836_v8 = vcombine.low %v6341_v45, %v6348_v37  ;;  %11285 = vmatpush1.bf16.msra.mxu0 %v31170_v10  ;;  %11326 = vmatpush1.bf16.msra.mxu1 %v31172_v20  ;;  %v31207_v26 = vcombine.low %v35811_v36, %v35820_v52  ;;  %v31209_v48 = vcombine.low %v35825_v17, %v35830_v43  ;;  %v35889_v10 = vld [vmem:[%s40109_s7 + $0x7a0] sm:$0xff]  ;;  %v35906_v36 = vld [vmem:[%s40109_s7 + $0x7a8] sm:$0xff] }
 0xfcc   : > { %v6186_v5 = vadd.f32 %v6185_v59, %v5713_v3  ;;  %v6814_v6 = vadd.f32 %v6813_v61, %v6674_v18  ;;  %v6187_v39 = vpop.f32.mrb[106].mxu0  ;;  %v6815_v54 = vpop.f32.mrb[78].mxu1  ;;  %v6210_v19 = vmax.f32 %v6184_v41, 0.0  ;;  %v7228_v7 = vmax.f32 %v6812_v51, 0.0  ;;  %11947 = vmatprep.subr.bf16.mxu0 %v31186_v34  ;;  %11988 = vmatprep.subr.bf16.mxu1 %v31188_v35  ;;  %v35901_v35 = vld [vmem:[%s40109_s7 + $0xa60] sm:$0xff]  ;;  %v35911_v45 = vld [vmem:[%s40109_s7 + $0xa68] sm:$0xff] }
 0xfcd   : > { %v6188_v31 = vpop.f32.mrb[107].mxu0  ;;  %v6816_v27 = vpop.f32.mrb[79].mxu1  ;;  %v6682_v3 = vrot.slane %v35727_v38, %v33683_v47  ;;  %v31189_v50 = vcombine.low %v35845_v15, %v35854_v9  ;;  %v31190_v12 = vcombine.high %v35845_v15, %v35854_v9  ;;  %v31192_v18 = vcombine.high %v35859_v4, %v35864_v2  ;;  %v35937_v15 = vld [vmem:[%s40109_s7 + $0x4f0] sm:$0xff] }
 0xfce   : > { %v6211_v16 = vmax.f32 %v6186_v5, 0.0  ;;  %v7229_v24 = vmax.f32 %v6814_v6, 0.0  ;;  %31183 = vmatmul.mubr.msk.bf16.vlgmr.msra.gmra.mrb[212].mxu0 %vm855_vm1, %v34602_v1  ;;  %31184 = vmatmul.mubr.msk.bf16.vlgmr.msra.gmra.mrb[184].mxu1 %vm855_vm1, %v34602_v1  ;;  %v31191_v33 = vcombine.low %v35859_v4, %v35864_v2  ;;  %v35896_v34 = vor.u32 %v6438_v22, %v6437_v21  ;;  %v35976_v21 = vld [vmem:[%s40109_s7 + $0x7b0] sm:$0xff] }
 0xfcf   : > { %11948 = vmatpush1.bf16.msra.mxu0 %v31185_v63  ;;  %11989 = vmatpush1.bf16.msra.mxu1 %v31187_v0  ;;  %v6363_v37 = vrot.slane %v35836_v8, %v35428_v56  ;;  %v6694_v43 = vrot.slane %v35727_v38, %v33697_v57  ;;  %v31212_v54 = vcombine.high %v35889_v10, %v35901_v35 }
 0xfd0   : > { %v6334_v58 = vcombine.low %v6210_v19, %v6211_v16  ;;  %v35876_v23 = vcombine.low %v7228_v7, %v7229_v24  ;;  %11949 = vmatprep.subr.bf16.mxu0 %v31208_v11  ;;  %11990 = vmatprep.subr.bf16.mxu1 %v31210_v13  ;;  %v31214_v19 = vcombine.high %v35906_v36, %v35911_v45  ;;  %v35930_v7 = vld [vmem:[%s40109_s7 + $0x230] sm:$0xff]  ;;  %v35942_v16 = vld [vmem:[%s40109_s7 + $0x238] sm:$0xff] }
 0xfd1   : > { %v6852_v25 = vpop.f32.mrb[108].mxu0  ;;  %v6893_v28 = vpop.f32.mrb[80].mxu1  ;;  %11979 = vmatprep.mubr.bf16.mxu0 %v40000_v14  ;;  %12020 = vmatprep.mubr.bf16.mxu1 %v40000_v14  ;;  %v6702_v13 = vrot.slane %v35896_v34, %v33675_v44  ;;  %v35947_v24 = vld [vmem:[%s40109_s7 + $0x4f8] sm:$0xff]  ;;  %v31211_v9 = vcombine.low %v35889_v10, %v35901_v35  ;;  %v6710_v35 = vrot.slane %v35896_v34, %v33729_v29 }
 0xfd2   : > { %v6355_v20 = vrot.slane %v6334_v58, %v35428_v56  ;;  %v6853_v40 = vadd.f32 %v6852_v25, %v6678_v30  ;;  %v6894_v49 = vadd.f32 %v6893_v28, %v6686_v53  ;;  %v6854_v52 = vpop.f32.mrb[109].mxu0  ;;  %v6895_v17 = vpop.f32.mrb[81].mxu1  ;;  %v6698_v30 = vrot.slane %v35727_v38, %v33700_v62  ;;  %v35998_v10 = vld [vmem:[%s40109_s7 + $0xa78] sm:$0xff] }
 0xfd3   : > { %v6855_v59 = vadd.f32 %v6854_v52, %v6682_v3  ;;  %v6896_v61 = vadd.f32 %v6895_v17, %v6690_v32  ;;  %v6856_v63 = vpop.f32.mrb[110].mxu0  ;;  %v6897_v0 = vpop.f32.mrb[82].mxu1  ;;  %11950 = vmatpush1.bf16.msra.mxu0 %v31207_v26  ;;  %11991 = vmatpush1.bf16.msra.mxu1 %v31209_v48  ;;  %v6706_v53 = vrot.slane %v35896_v34, %v33680_v46 }
 0xfd4   : > { %v6370_v41 = vrot.slane %v6355_v20, %v35428_v56  ;;  %v7230_v8 = vmax.f32 %v6853_v40, 0.0  ;;  %v7232_v5 = vmax.f32 %v6894_v49, 0.0  ;;  %v6857_v6 = vpop.f32.mrb[111].mxu0  ;;  %v6898_v39 = vpop.f32.mrb[83].mxu1  ;;  %12029 = vmatprep.subr.bf16.mxu0 %v31190_v12  ;;  %12070 = vmatprep.subr.bf16.mxu1 %v31192_v18  ;;  %v31213_v38 = vcombine.low %v35906_v36, %v35911_v45  ;;  %v35988_v18 = vld [vmem:[%s40109_s7 + $0xa70] sm:$0xff] }
 0xfd5   : > { %v7231_v27 = vmax.f32 %v6855_v59, 0.0  ;;  %v7233_v11 = vmax.f32 %v6896_v61, 0.0  ;;  %v31193_v3 = vcombine.low %v35930_v7, %v35937_v15  ;;  %v31194_v32 = vcombine.high %v35930_v7, %v35937_v15  ;;  %v6441_v45 = vld [vmem:[#allocation16 + $0x81] ss:$8 sm:$0xf] }
 0xfd6   : > { %v6371_v31 = vcombine.low %v6363_v37, %v6370_v41  ;;  %31229 = vmatmul.mubr.msk.bf16.vlgmr.msra.gmra.mrb[216].mxu0 %vm855_vm1, %v34602_v1  ;;  %31230 = vmatmul.mubr.msk.bf16.vlgmr.msra.gmra.mrb[188].mxu1 %vm855_vm1, %v34602_v1  ;;  %v31196_v26 = vcombine.high %v35942_v16, %v35947_v24  ;;  %v7282_v22 = vrot.slane %v35876_v23, %v35428_v56  ;;  %v35993_v23 = vld [vmem:[%s40109_s7 + $0x7b8] sm:$0xff]  ;;  %v6442_v41 = vld [vmem:[#allocation16 + $0x81] ss:$8 sm:$0x30] }
 0xfd7   : > { %v7273_v4 = vcombine.low %v7230_v8, %v7231_v27  ;;  %v35963_v2 = vcombine.low %v7232_v5, %v7233_v11  ;;  %12030 = vmatpush1.bf16.msra.mxu0 %v31189_v50  ;;  %12071 = vmatpush1.bf16.msra.mxu1 %v31191_v33  ;;  %v31195_v12 = vcombine.low %v35942_v16, %v35947_v24  ;;  %v36013_v5 = vld [vmem:[%s40109_s7 + $0x240] sm:$0xff]  ;;  %v36032_v27 = vld [vmem:[%s40109_s7 + $0x508] sm:$0xff] }
 0xfd8   : > { %6386 = vst.msk [vmem:[#allocation2 + $0x88] ss:$8 sm:$0xf] %vm35919_vm5, %v6371_v31  ;;  %6387 = vst.msk [vmem:[#allocation2 + $0x88] ss:$8 sm:$0x30] %vm35919_vm5, %v6371_v31  ;;  %12031 = vmatprep.subr.bf16.mxu0 %v31212_v54  ;;  %12072 = vmatprep.subr.bf16.mxu1 %v31214_v19  ;;  %v6718_v36 = vrot.slane %v35896_v34, %v33694_v55  ;;  %v31216_v0 = vcombine.high %v35976_v21, %v35988_v18 }
 0xfd9   : > { %v7289_v58 = vrot.slane %v7273_v4, %v35428_v56  ;;  %v6934_v48 = vpop.f32.mrb[112].mxu0  ;;  %v6975_v50 = vpop.f32.mrb[84].mxu1  ;;  %12061 = vmatprep.mubr.bf16.mxu0 %v40000_v14  ;;  %12102 = vmatprep.mubr.bf16.mxu1 %v40000_v14  ;;  %v31218_v8 = vcombine.high %v35993_v23, %v35998_v10  ;;  %v36018_v6 = vld [vmem:[%s40109_s7 + $0x500] sm:$0xff]  ;;  %v6714_v19 = vrot.slane %v35896_v34, %v33683_v47  ;;  %v36027_v31 = vld [vmem:[%s40109_s7 + $0x248] sm:$0xff] }
 0xfda   : > { %v6935_v20 = vadd.f32 %v6934_v48, %v6694_v43  ;;  %v6976_v25 = vadd.f32 %v6975_v50, %v6702_v13  ;;  %v6936_v28 = vpop.f32.mrb[113].mxu0  ;;  %v6977_v33 = vpop.f32.mrb[85].mxu1  ;;  %v6722_v7 = vrot.slane %v35896_v34, %v33756_v60  ;;  %v31215_v11 = vcombine.low %v35976_v21, %v35988_v18  ;;  %v36074_v48 = vld [vmem:[%s40109_s7 + $0x7c8] sm:$0xff] }
 0xfdb   : > { %v36004_v37 = vcombine.low %v7282_v22, %v7289_v58  ;;  %v6937_v40 = vadd.f32 %v6936_v28, %v6698_v30  ;;  %v6978_v49 = vadd.f32 %v6977_v33, %v6706_v53  ;;  %v6938_v52 = vpop.f32.mrb[114].mxu0  ;;  %v6979_v17 = vpop.f32.mrb[86].mxu1  ;;  %12032 = vmatpush1.bf16.msra.mxu0 %v31211_v9  ;;  %12073 = vmatpush1.bf16.msra.mxu1 %v31213_v38  ;;  %v36051_v53 = vld [vmem:[%s40109_s7 + $0x7c0] sm:$0xff] }
 0xfdc   : > { %v7234_v43 = vmax.f32 %v6935_v20, 0.0  ;;  %v7236_v59 = vmax.f32 %v6976_v25, 0.0  ;;  %v6939_v61 = vpop.f32.mrb[115].mxu0  ;;  %v6980_v63 = vpop.f32.mrb[87].mxu1  ;;  %12111 = vmatprep.subr.bf16.mxu0 %v31194_v32  ;;  %12152 = vmatprep.subr.bf16.mxu1 %v31196_v26  ;;  %v31217_v13 = vcombine.low %v35993_v23, %v35998_v10  ;;  %v36042_v15 = vor.u32 %v6442_v41, %v6441_v45  ;;  %v36056_v9 = vld [vmem:[%s40109_s7 + $0xa80] sm:$0xff] }
 0xfdd   : > { %v7235_v39 = vmax.f32 %v6937_v40, 0.0  ;;  %v7237_v54 = vmax.f32 %v6978_v49, 0.0  ;;  %v31198_v30 = vcombine.high %v36013_v5, %v36018_v6  ;;  %v31197_v4 = vcombine.low %v36013_v5, %v36018_v6  ;;  %v36110_v5 = vld [vmem:[%s40109_s7 + $0x518] sm:$0xff] }
 0xfde   : > { %31231 = vmatmul.mubr.msk.bf16.vlgmr.msra.gmra.mrb[220].mxu0 %vm855_vm1, %v34602_v1  ;;  %31232 = vmatmul.mubr.msk.bf16.vlgmr.msra.gmra.mrb[192].mxu1 %vm855_vm1, %v34602_v1  ;;  %v31199_v38 = vcombine.low %v36027_v31, %v36032_v27  ;;  %v7296_v32 = vrot.slane %v35963_v2, %v35428_v56  ;;  %v6726_v58 = vrot.slane %v35896_v34, %v33697_v57  ;;  %v36079_v2 = vld [vmem:[%s40109_s7 + $0xa88] sm:$0xff] }
 0xfdf   : > { %v7275_v16 = vcombine.low %v7234_v43, %v7235_v39  ;;  %v36044_v24 = vcombine.low %v7236_v59, %v7237_v54  ;;  %12112 = vmatpush1.bf16.msra.mxu0 %v31193_v3  ;;  %12153 = vmatpush1.bf16.msra.mxu1 %v31195_v12  ;;  %v31200_v3 = vcombine.high %v36027_v31, %v36032_v27  ;;  %v36092_v43 = vld [vmem:[%s40109_s7 + $0x250] sm:$0xff] }
 0xfe0   : > { %12113 = vmatprep.subr.bf16.mxu0 %v31216_v0  ;;  %12154 = vmatprep.subr.bf16.mxu1 %v31218_v8  ;;  %v6734_v10 = vrot.slane %v36042_v15, %v33675_v44  ;;  %v31220_v20 = vcombine.high %v36051_v53, %v36056_v9  ;;  %v31222_v41 = vcombine.high %v36074_v48, %v36079_v2  ;;  %v36100_v8 = vld [vmem:[%s40109_s7 + $0x510] sm:$0xff] }
 0xfe1   : > { %v7303_v26 = vrot.slane %v7275_v16, %v35428_v56  ;;  %v7016_v21 = vpop.f32.mrb[116].mxu0  ;;  %v7057_v22 = vpop.f32.mrb[88].mxu1  ;;  %12143 = vmatprep.mubr.bf16.mxu0 %v40000_v14  ;;  %12184 = vmatprep.mubr.bf16.mxu1 %v40000_v14  ;;  %v7312_v59 = vrot.slane %v36004_v37, %v35428_v56  ;;  %v6738_v37 = vrot.slane %v36042_v15, %v33680_v46 }
 0xfe2   : > { %v7017_v50 = vadd.f32 %v7016_v21, %v6710_v35  ;;  %v7058_v12 = vadd.f32 %v7057_v22, %v6718_v36  ;;  %v7018_v18 = vpop.f32.mrb[117].mxu0  ;;  %v7059_v23 = vpop.f32.mrb[89].mxu1  ;;  %v6730_v36 = vrot.slane %v35896_v34, %v33700_v62  ;;  %v36105_v34 = vld [vmem:[%s40109_s7 + $0x258] sm:$0xff]  ;;  %v31219_v6 = vcombine.low %v36051_v53, %v36056_v9 }
 0xfe3   : > { %v7305_v25 = vcombine.low %v7296_v32, %v7303_v26  ;;  %v7019_v28 = vadd.f32 %v7018_v18, %v6714_v19  ;;  %v7060_v33 = vadd.f32 %v7059_v23, %v6722_v7  ;;  %v7020_v45 = vpop.f32.mrb[118].mxu0  ;;  %v7061_v40 = vpop.f32.mrb[90].mxu1  ;;  %12114 = vmatpush1.bf16.msra.mxu0 %v31215_v11  ;;  %12155 = vmatpush1.bf16.msra.mxu1 %v31217_v13  ;;  %v36131_v11 = vld [vmem:[%s40109_s7 + $0x7d0] sm:$0xff] }
 0xfe4   : > { %v7238_v49 = vmax.f32 %v7017_v50, 0.0  ;;  %v7240_v52 = vmax.f32 %v7058_v12, 0.0  ;;  %v7021_v17 = vpop.f32.mrb[119].mxu0  ;;  %v7062_v35 = vpop.f32.mrb[91].mxu1  ;;  %12193 = vmatprep.subr.bf16.mxu0 %v31198_v30  ;;  %12234 = vmatprep.subr.bf16.mxu1 %v31200_v3  ;;  %v31221_v39 = vcombine.low %v36074_v48, %v36079_v2  ;;  %v31202_v31 = vcombine.high %v36092_v43, %v36100_v8 }
 0xfe5   : > { %v7319_v61 = vrot.slane %v7305_v25, %v35428_v56  ;;  %v7239_v63 = vmax.f32 %v7019_v28, 0.0  ;;  %v7241_v0 = vmax.f32 %v7060_v33, 0.0  ;;  %v31204_v27 = vcombine.high %v36105_v34, %v36110_v5  ;;  %v7467_v2 = vld [vmem:[#allocation16 + $0x2] ss:$8 sm:$0xf] }
 0xfe6   : > { %31233 = vmatmul.mubr.msk.bf16.vlgmr.msra.gmra.mrb[224].mxu0 %vm855_vm1, %v34602_v1  ;;  %31234 = vmatmul.mubr.msk.bf16.vlgmr.msra.gmra.mrb[196].mxu1 %vm855_vm1, %v34602_v1  ;;  %v7331_v13 = vrot.slane %v36044_v24, %v35428_v56  ;;  %v31201_v9 = vcombine.low %v36092_v43, %v36100_v8  ;;  %v36148_v24 = vld [vmem:[%s40109_s7 + $0x7d8] sm:$0xff]  ;;  %v31203_v22 = vcombine.low %v36105_v34, %v36110_v5  ;;  %v36182_v43 = vld [vmem:[%s40109_s7 + $0x268] sm:$0xff] }
 0xfe7   : > { %v7320_v54 = vcombine.low %v7312_v59, %v7319_v61  ;;  %v7322_v19 = vcombine.low %v7238_v49, %v7239_v63  ;;  %v36122_v7 = vcombine.low %v7240_v52, %v7241_v0  ;;  %12194 = vmatpush1.bf16.msra.mxu0 %v31197_v4  ;;  %12235 = vmatpush1.bf16.msra.mxu1 %v31199_v38  ;;  %v36143_v4 = vld [vmem:[%s40109_s7 + $0xa90] sm:$0xff]  ;;  %v36153_v38 = vld [vmem:[%s40109_s7 + $0xa98] sm:$0xff]  ;;  %v36168_v49 = vld [vmem:[%s40109_s7 + $0x260] sm:$0xff] }
 0xfe8   : > { %12195 = vmatprep.subr.bf16.mxu0 %v31220_v20  ;;  %12236 = vmatprep.subr.bf16.mxu1 %v31222_v41  ;;  %v6742_v48 = vrot.slane %v36042_v15, %v33729_v29  ;;  %v7468_v25 = vld [vmem:[#allocation16 + $0x2] ss:$8 sm:$0xf0]  ;;  %v31224_v45 = vcombine.high %v36131_v11, %v36143_v4  ;;  %v31226_v40 = vcombine.high %v36148_v24, %v36153_v38 }
 0xfe9   : > { %7414 = vst [vmem:[#allocation2 + $0x9] ss:$8 sm:$0xf] %v7320_v54  ;;  %7415 = vst [vmem:[#allocation2 + $0x9] ss:$8 sm:$0xf0] %v7320_v54  ;;  %v7338_v16 = vrot.slane %v7322_v19, %v35428_v56  ;;  %12225 = vmatprep.mubr.bf16.mxu0 %v40000_v14  ;;  %12266 = vmatprep.mubr.bf16.mxu1 %v40000_v14  ;;  %v6750_v35 = vrot.slane %v36042_v15, %v33694_v55 }
 0xfea   : > { %v7098_v30 = vpop.f32.mrb[120].mxu0  ;;  %v7139_v53 = vpop.f32.mrb[92].mxu1  ;;  %v36177_v41 = vld [vmem:[%s40109_s7 + $0x520] sm:$0xff]  ;;  %v36187_v59 = vld [vmem:[%s40109_s7 + $0x528] sm:$0xff]  ;;  %v6754_v61 = vrot.slane %v36042_v15, %v33756_v60  ;;  %v31223_v63 = vcombine.low %v36131_v11, %v36143_v4  ;;  %v36197_v0 = vor.u32 %v7468_v25, %v7467_v2  ;;  %v31225_v5 = vcombine.low %v36148_v24, %v36153_v38  ;;  %v36247_v25 = vld [vmem:[%s40109_s7 + $0x270] sm:$0xff] }
 0xfeb   : > { %v7099_v3 = vadd.f32 %v7098_v30, %v6726_v58  ;;  %v7140_v32 = vadd.f32 %v7139_v53, %v6734_v10  ;;  %v7100_v26 = vpop.f32.mrb[121].mxu0  ;;  %v7141_v21 = vpop.f32.mrb[93].mxu1  ;;  %v36159_v50 = vcombine.low %v7331_v13, %v7338_v16  ;;  %12196 = vmatpush1.bf16.msra.mxu0 %v31219_v6  ;;  %12237 = vmatpush1.bf16.msra.mxu1 %v31221_v39  ;;  %v36212_v39 = vld [vmem:[%s40109_s7 + $0x7e0] sm:$0xff]  ;;  %v36234_v16 = vld [vmem:[%s40109_s7 + $0xaa8] sm:$0xff] }
 0xfec   : > { %v7101_v12 = vadd.f32 %v7100_v26, %v6730_v36  ;;  %v7142_v18 = vadd.f32 %v7141_v21, %v6738_v37  ;;  %v7102_v23 = vpop.f32.mrb[122].mxu0  ;;  %v7143_v20 = vpop.f32.mrb[94].mxu1  ;;  %12275 = vmatprep.subr.bf16.mxu0 %v31202_v31  ;;  %12316 = vmatprep.subr.bf16.mxu1 %v31204_v27  ;;  %v6746_v36 = vrot.slane %v36042_v15, %v33683_v47  ;;  %v36224_v13 = vld [vmem:[%s40109_s7 + $0xaa0] sm:$0xff] }
 0xfed   : > { %v7242_v58 = vmax.f32 %v7099_v3, 0.0  ;;  %v7244_v10 = vmax.f32 %v7140_v32, 0.0  ;;  %v7103_v28 = vpop.f32.mrb[123].mxu0  ;;  %v7144_v33 = vpop.f32.mrb[95].mxu1  ;;  %v31205_v37 = vcombine.low %v36168_v49, %v36177_v41  ;;  %v31206_v15 = vcombine.high %v36168_v49, %v36177_v41  ;;  %v36265_v49 = vld [vmem:[%s40109_s7 + $0x538] sm:$0xff] }
 0xfee   : > { %v7243_v52 = vmax.f32 %v7101_v12, 0.0  ;;  %v7245_v17 = vmax.f32 %v7142_v18, 0.0  ;;  %31235 = vmatmul.mubr.msk.bf16.vlgmr.msra.gmra.mrb[228].mxu0 %vm855_vm1, %v34602_v1  ;;  %31236 = vmatmul.mubr.msk.bf16.vlgmr.msra.gmra.mrb[200].mxu1 %vm855_vm1, %v34602_v1  ;;  %v31241_v6 = vcombine.high %v36182_v43, %v36187_v59  ;;  %v7345_v54 = vrot.slane %v36122_v7, %v35428_v56  ;;  %v36229_v7 = vld [vmem:[%s40109_s7 + $0x7e8] sm:$0xff] }
 0xfef   : > { %12276 = vmatpush1.bf16.msra.mxu0 %v31201_v9  ;;  %12317 = vmatpush1.bf16.msra.mxu1 %v31203_v22  ;;  %v31240_v11 = vcombine.low %v36182_v43, %v36187_v59  ;;  %v7704_v24 = vrot.slane %v36197_v0, %v33675_v44  ;;  %v7712_v38 = vrot.slane %v36197_v0, %v33729_v29 }
 0xff0   : > { %v7324_v8 = vcombine.low %v7242_v58, %v7243_v52  ;;  %v36199_v34 = vcombine.low %v7244_v10, %v7245_v17  ;;  %12277 = vmatprep.subr.bf16.mxu0 %v31224_v45  ;;  %12318 = vmatprep.subr.bf16.mxu1 %v31226_v40  ;;  %v31228_v23 = vcombine.high %v36212_v39, %v36224_v13  ;;  %v36255_v45 = vld [vmem:[%s40109_s7 + $0x530] sm:$0xff]  ;;  %v36260_v40 = vld [vmem:[%s40109_s7 + $0x278] sm:$0xff] }
 0xff1   : > { %v7180_v31 = vpop.f32.mrb[124].mxu0  ;;  %v7221_v27 = vpop.f32.mrb[96].mxu1  ;;  %12307 = vmatprep.mubr.bf16.mxu0 %v40000_v14  ;;  %12348 = vmatprep.mubr.bf16.mxu1 %v40000_v14  ;;  %v31263_v20 = vcombine.high %v36229_v7, %v36234_v16  ;;  %v7361_v58 = vrot.slane %v36159_v50, %v35428_v56  ;;  %v7708_v50 = vrot.slane %v36197_v0, %v33680_v46 }
 0xff2   : > { %v7352_v19 = vrot.slane %v7324_v8, %v35428_v56  ;;  %v7181_v30 = vadd.f32 %v7180_v31, %v6742_v48  ;;  %v7222_v53 = vadd.f32 %v7221_v27, %v6750_v35  ;;  %v7182_v9 = vpop.f32.mrb[125].mxu0  ;;  %v7223_v4 = vpop.f32.mrb[97].mxu1  ;;  %v7716_v52 = vrot.slane %v36197_v0, %v33683_v47 }
 0xff3   : > { %v7183_v32 = vadd.f32 %v7182_v9, %v6746_v36  ;;  %v7224_v26 = vadd.f32 %v7223_v4, %v6754_v61  ;;  %v7184_v21 = vpop.f32.mrb[126].mxu0  ;;  %v7225_v22 = vpop.f32.mrb[98].mxu1  ;;  %12278 = vmatpush1.bf16.msra.mxu0 %v31223_v63  ;;  %12319 = vmatpush1.bf16.msra.mxu1 %v31225_v5  ;;  %v31227_v17 = vcombine.low %v36212_v39, %v36224_v13  ;;  %v36286_v63 = vld [vmem:[%s40109_s7 + $0x7f0] sm:$0xff] }
 0xff4   : > { %v7354_v3 = vcombine.low %v7345_v54, %v7352_v19  ;;  %v7246_v2 = vmax.f32 %v7181_v30, 0.0  ;;  %v7248_v12 = vmax.f32 %v7222_v53, 0.0  ;;  %v7185_v18 = vpop.f32.mrb[127].mxu0  ;;  %v7226_v48 = vpop.f32.mrb[99].mxu1  ;;  %12357 = vmatprep.subr.bf16.mxu0 %v31206_v15  ;;  %12981 = vmatprep.subr.bf16.mxu1 %v31241_v6  ;;  %v31262_v43 = vcombine.low %v36229_v7, %v36234_v16  ;;  %v36297_v39 = vld [vmem:[%s40109_s7 + $0xab0] sm:$0xff]  ;;  %v36302_v54 = vld [vmem:[%s40109_s7 + $0x7f8] sm:$0xff] }
 0xff5   : > { %v7247_v28 = vmax.f32 %v7183_v32, 0.0  ;;  %v7249_v33 = vmax.f32 %v7224_v26, 0.0  ;;  %v31243_v59 = vcombine.high %v36247_v25, %v36255_v45  ;;  %v31245_v61 = vcombine.high %v36260_v40, %v36265_v49 }
 0xff6   : > { %v7368_v10 = vrot.slane %v7354_v3, %v35428_v56  ;;  %31237 = vmatmul.mubr.msk.bf16.vlgmr.msra.gmra.mrb[232].mxu0 %vm855_vm1, %v34602_v1  ;;  %31238 = vmatmul.mubr.msk.bf16.vlgmr.msra.gmra.mrb[204].mxu1 %vm855_vm1, %v34602_v1  ;;  %v7379_v8 = vrot.slane %v36199_v34, %v35428_v56  ;;  %v36307_v34 = vld [vmem:[%s40109_s7 + $0xab8] sm:$0xff]  ;;  %v31242_v13 = vcombine.low %v36247_v25, %v36255_v45  ;;  %v36349_v45 = vld [vmem:[%s40109_s7 + $0x548] sm:$0xff] }
 0xff7   : > { %v7371_v36 = vcombine.low %v7246_v2, %v7247_v28  ;;  %v7372_v41 = vcombine.low %v7248_v12, %v7249_v33  ;;  %12358 = vmatpush1.bf16.msra.mxu0 %v31205_v37  ;;  %12982 = vmatpush1.bf16.msra.mxu1 %v31240_v11  ;;  %v31244_v7 = vcombine.low %v36260_v40, %v36265_v49  ;;  %v36344_v33 = vld [vmem:[%s40109_s7 + $0x288] sm:$0xff] }
 0xff8   : > { %v7369_v35 = vcombine.low %v7361_v58, %v7368_v10  ;;  %12359 = vmatprep.subr.bf16.mxu0 %v31228_v23  ;;  %12983 = vmatprep.subr.bf16.mxu1 %v31263_v20  ;;  %v7720_v3 = vrot.slane %v36197_v0, %v33694_v55  ;;  %v31265_v21 = vcombine.high %v36286_v63, %v36297_v39  ;;  %v36324_v23 = vld [vmem:[%s40109_s7 + $0x280] sm:$0xff] }
 0xff9   : > { %v7386_v5 = vrot.slane %v7371_v36, %v35428_v56  ;;  %v7393_v37 = vrot.slane %v7372_v41, %v35428_v56  ;;  %v7845_v15 = vpop.f32.mrb[128].mxu0  ;;  %v7886_v6 = vpop.f32.mrb[100].mxu1  ;;  %12389 = vmatprep.mubr.bf16.mxu0 %v40000_v14  ;;  %13013 = vmatprep.mubr.bf16.mxu1 %v40000_v14  ;;  %v31267_v22 = vcombine.high %v36302_v54, %v36307_v34  ;;  %v36329_v20 = vld [vmem:[%s40109_s7 + $0x540] sm:$0xff] }
 0xffa   : > { %7417 = vst [vmem:[#allocation2 + $0x49] ss:$8 sm:$0xf] %v7369_v35  ;;  %7418 = vst [vmem:[#allocation2 + $0x49] ss:$8 sm:$0xf0] %v7369_v35  ;;  %v7846_v19 = vadd.f32 %v7845_v15, %v7704_v24  ;;  %v7887_v31 = vadd.f32 %v7886_v6, %v7712_v38  ;;  %v7728_v25 = vrot.slane %v36197_v0, %v33697_v57 }
 0xffb   : > { %v7847_v27 = vpop.f32.mrb[129].mxu0  ;;  %v7888_v11 = vpop.f32.mrb[101].mxu1  ;;  %v7394_v16 = vcombine.low %v7379_v8, %v7386_v5  ;;  %12360 = vmatpush1.bf16.msra.mxu0 %v31227_v17  ;;  %12984 = vmatpush1.bf16.msra.mxu1 %v31262_v43  ;;  %v7408_v12 = vrot.slane %v7393_v37, %v35428_v56  ;;  %v7724_v58 = vrot.slane %v36197_v0, %v33756_v60  ;;  %v36374_v8 = vld [vmem:[%s40109_s7 + $0xac0] sm:$0xff] }
 0xffc   : > { %v7848_v30 = vadd.f32 %v7847_v27, %v7708_v50  ;;  %v7889_v53 = vadd.f32 %v7888_v11, %v7716_v52  ;;  %v7849_v9 = vpop.f32.mrb[130].mxu0  ;;  %v7890_v4 = vpop.f32.mrb[102].mxu1  ;;  %v8262_v32 = vmax.f32 %v7846_v19, 0.0  ;;  %v8264_v24 = vmax.f32 %v7887_v31, 0.0  ;;  %13022 = vmatprep.subr.bf16.mxu0 %v31243_v59  ;;  %13063 = vmatprep.subr.bf16.mxu1 %v31245_v61 }
 0xffd   : > { %v7850_v38 = vpop.f32.mrb[131].mxu0  ;;  %v7891_v26 = vpop.f32.mrb[103].mxu1  ;;  %v7401_v2 = vrot.slane %v7394_v16, %v35428_v56  ;;  %v7732_v10 = vrot.slane %v36197_v0, %v33700_v62  ;;  %v31264_v28 = vcombine.low %v36286_v63, %v36297_v39  ;;  %v7471_v0 = vld [vmem:[#allocation16 + $0x42] ss:$8 sm:$0xf]  ;;  %v31266_v17 = vcombine.low %v36302_v54, %v36307_v34 }
 0xffe   : > { %v8263_v18 = vmax.f32 %v7848_v30, 0.0  ;;  %v8265_v48 = vmax.f32 %v7889_v53, 0.0  ;;  %31239 = vmatmul.mubr.msk.bf16.vlgmr.msra.gmra.mrb[236].mxu0 %vm855_vm1, %v34602_v1  ;;  %31284 = vmatmul.mubr.msk.bf16.vlgmr.msra.gmra.mrb[208].mxu1 %vm855_vm1, %v34602_v1  ;;  %v7472_v52 = vld [vmem:[#allocation16 + $0x42] ss:$8 sm:$0xf0]  ;;  %v31247_v35 = vcombine.high %v36324_v23, %v36329_v20  ;;  %v31249_v61 = vcombine.high %v36344_v33, %v36349_v45 }
 0xfff   : > { %v7409_v40 = vcombine.low %v7401_v2, %v7408_v12  ;;  %13023 = vmatpush1.bf16.msra.mxu0 %v31242_v13  ;;  %13064 = vmatpush1.bf16.msra.mxu1 %v31244_v7  ;;  %v36369_v63 = vld [vmem:[%s40109_s7 + $0x800] sm:$0xff]  ;;  %v36377_v39 = vor.u32 %v7472_v52, %v7471_v0  ;;  %v36382_v54 = vld [vmem:[%s40109_s7 + $0x808] sm:$0xff]  ;;  %v31246_v7 = vcombine.low %v36324_v23, %v36329_v20  ;;  %v36402_v26 = vld [vmem:[%s40109_s7 + $0x290] sm:$0xff] }
0x1000   : > { %v8306_v49 = vcombine.low %v8262_v32, %v8263_v18  ;;  %v8307_v50 = vcombine.low %v8264_v24, %v8265_v48  ;;  %13024 = vmatprep.subr.bf16.mxu0 %v31265_v21  ;;  %13065 = vmatprep.subr.bf16.mxu1 %v31267_v22  ;;  %v36387_v34 = vld [vmem:[%s40109_s7 + $0xac8] sm:$0xff]  ;;  %v31248_v4 = vcombine.low %v36344_v33, %v36349_v45  ;;  %v36407_v21 = vld [vmem:[%s40109_s7 + $0x550] sm:$0xff]  ;;  %v36422_v48 = vld [vmem:[%s40109_s7 + $0x298] sm:$0xff] }
0x1001   : > { %7420 = vst.msk [vmem:[#allocation2 + $0x89] ss:$8 sm:$0xf] %vm35919_vm5, %v7409_v40  ;;  %7421 = vst.msk [vmem:[#allocation2 + $0x89] ss:$8 sm:$0x30] %vm35919_vm5, %v7409_v40  ;;  %13054 = vmatprep.mubr.bf16.mxu0 %v40000_v14  ;;  %13095 = vmatprep.mubr.bf16.mxu1 %v40000_v14  ;;  %v31271_v38 = vcombine.high %v36382_v54, %v36387_v34  ;;  %v7736_v22 = vrot.slane %v36377_v39, %v33675_v44 }
0x1002   : > { %v8316_v36 = vrot.slane %v8306_v49, %v35428_v56  ;;  %v8323_v41 = vrot.slane %v8307_v50, %v35428_v56  ;;  %v7927_v43 = vpop.f32.mrb[132].mxu0  ;;  %v7968_v59 = vpop.f32.mrb[104].mxu1  ;;  %v7744_v2 = vrot.slane %v36377_v39, %v33729_v29  ;;  %v7740_v12 = vrot.slane %v36377_v39, %v33680_v46  ;;  %v36427_v23 = vld [vmem:[%s40109_s7 + $0x558] sm:$0xff]  ;;  %v36440_v33 = vld [vmem:[%s40109_s7 + $0x810] sm:$0xff] }
0x1003   : > { %v7928_v5 = vadd.f32 %v7927_v43, %v7720_v3  ;;  %v7969_v37 = vadd.f32 %v7968_v59, %v7728_v25  ;;  %v7929_v15 = vpop.f32.mrb[133].mxu0  ;;  %v7970_v6 = vpop.f32.mrb[105].mxu1  ;;  %13025 = vmatpush1.bf16.msra.mxu0 %v31264_v28  ;;  %13066 = vmatpush1.bf16.msra.mxu1 %v31266_v17  ;;  %v31269_v3 = vcombine.high %v36369_v63, %v36374_v8  ;;  %v36450_v52 = vld [vmem:[%s40109_s7 + $0xad0] sm:$0xff]  ;;  %v36455_v17 = vld [vmem:[%s40109_s7 + $0x818] sm:$0xff] }
0x1004   : > { %v36389_v19 = vcombine.low %v8316_v36, %v8323_v41  ;;  %v7930_v31 = vadd.f32 %v7929_v15, %v7724_v58  ;;  %v7971_v27 = vadd.f32 %v7970_v6, %v7732_v10  ;;  %v7931_v11 = vpop.f32.mrb[134].mxu0  ;;  %v7972_v13 = vpop.f32.mrb[106].mxu1  ;;  %13104 = vmatprep.subr.bf16.mxu0 %v31247_v35  ;;  %13145 = vmatprep.subr.bf16.mxu1 %v31249_v61  ;;  %v36460_v35 = vld [vmem:[%s40109_s7 + $0xad8] sm:$0xff] }
0x1005   : > { %v8266_v16 = vmax.f32 %v7928_v5, 0.0  ;;  %v8268_v30 = vmax.f32 %v7969_v37, 0.0  ;;  %v7932_v53 = vpop.f32.mrb[135].mxu0  ;;  %v7973_v9 = vpop.f32.mrb[107].mxu1  ;;  %v7748_v18 = vrot.slane %v36377_v39, %v33683_v47  ;;  %v31268_v58 = vcombine.low %v36369_v63, %v36374_v8 }
0x1006   : > { %v8267_v32 = vmax.f32 %v7930_v31, 0.0  ;;  %v8269_v24 = vmax.f32 %v7971_v27, 0.0  ;;  %31285 = vmatmul.mubr.msk.bf16.vlgmr.msra.gmra.mrb[240].mxu0 %vm855_vm1, %v34602_v1  ;;  %31286 = vmatmul.mubr.msk.bf16.vlgmr.msra.gmra.mrb[212].mxu1 %vm855_vm1, %v34602_v1  ;;  %v31270_v10 = vcombine.low %v36382_v54, %v36387_v34  ;;  %v31251_v28 = vcombine.high %v36402_v26, %v36407_v21 }
0x1007   : > { %13105 = vmatpush1.bf16.msra.mxu0 %v31246_v7  ;;  %13146 = vmatpush1.bf16.msra.mxu1 %v31248_v4  ;;  %v31253_v0 = vcombine.high %v36422_v48, %v36427_v23  ;;  %v31250_v61 = vcombine.low %v36402_v26, %v36407_v21  ;;  %v31252_v63 = vcombine.low %v36422_v48, %v36427_v23  ;;  %v36479_v4 = vld [vmem:[%s40109_s7 + $0x2a0] sm:$0xff]  ;;  %v36499_v26 = vld [vmem:[%s40109_s7 + $0x2a8] sm:$0xff] }
0x1008   : > { %v8308_v20 = vcombine.low %v8266_v16, %v8267_v32  ;;  %v8309_v25 = vcombine.low %v8268_v30, %v8269_v24  ;;  %13106 = vmatprep.subr.bf16.mxu0 %v31269_v3  ;;  %13147 = vmatprep.subr.bf16.mxu1 %v31271_v38  ;;  %v7752_v54 = vrot.slane %v36377_v39, %v33694_v55  ;;  %v36484_v3 = vld [vmem:[%s40109_s7 + $0x560] sm:$0xff]  ;;  %v36504_v21 = vld [vmem:[%s40109_s7 + $0x568] sm:$0xff] }
0x1009   : > { %v8009_v49 = vpop.f32.mrb[136].mxu0  ;;  %v8050_v50 = vpop.f32.mrb[108].mxu1  ;;  %13136 = vmatprep.mubr.bf16.mxu0 %v40000_v14  ;;  %13177 = vmatprep.mubr.bf16.mxu1 %v40000_v14  ;;  %v31273_v13 = vcombine.high %v36440_v33, %v36450_v52  ;;  %v31275_v7 = vcombine.high %v36455_v17, %v36460_v35  ;;  %v8346_v16 = vrot.slane %v36389_v19, %v35428_v56 }
0x100a   : > { %v8330_v45 = vrot.slane %v8308_v20, %v35428_v56  ;;  %v8337_v40 = vrot.slane %v8309_v25, %v35428_v56  ;;  %v8010_v36 = vadd.f32 %v8009_v49, %v7736_v22  ;;  %v8051_v41 = vadd.f32 %v8050_v50, %v7744_v2  ;;  %v8011_v43 = vpop.f32.mrb[137].mxu0  ;;  %v8052_v59 = vpop.f32.mrb[109].mxu1 }
0x100b   : > { %v8012_v5 = vadd.f32 %v8011_v43, %v7740_v12  ;;  %v8053_v37 = vadd.f32 %v8052_v59, %v7748_v18  ;;  %v8013_v15 = vpop.f32.mrb[138].mxu0  ;;  %v8054_v6 = vpop.f32.mrb[110].mxu1  ;;  %13107 = vmatpush1.bf16.msra.mxu0 %v31268_v58  ;;  %13148 = vmatpush1.bf16.msra.mxu1 %v31270_v10  ;;  %v7760_v19 = vrot.slane %v36377_v39, %v33697_v57  ;;  %v7476_v18 = vld [vmem:[#allocation16 + $0x82] ss:$8 sm:$0x30] }
0x100c   : > { %v8339_v8 = vcombine.low %v8330_v45, %v8337_v40  ;;  %v8270_v34 = vmax.f32 %v8010_v36, 0.0  ;;  %v8272_v31 = vmax.f32 %v8051_v41, 0.0  ;;  %v8014_v27 = vpop.f32.mrb[139].mxu0  ;;  %v8055_v11 = vpop.f32.mrb[111].mxu1  ;;  %13186 = vmatprep.subr.bf16.mxu0 %v31251_v28  ;;  %13227 = vmatprep.subr.bf16.mxu1 %v31253_v0  ;;  %v7756_v32 = vrot.slane %v36377_v39, %v33756_v60  ;;  %v36525_v45 = vld [vmem:[%s40109_s7 + $0xae0] sm:$0xff] }
0x100d   : > { %v8271_v53 = vmax.f32 %v8012_v5, 0.0  ;;  %v8273_v9 = vmax.f32 %v8053_v37, 0.0  ;;  %v7764_v24 = vrot.slane %v36377_v39, %v33700_v62  ;;  %v31272_v38 = vcombine.low %v36440_v33, %v36450_v52  ;;  %v7475_v39 = vld [vmem:[#allocation16 + $0x82] ss:$8 sm:$0xf] }
0x100e   : > { %v8353_v30 = vrot.slane %v8339_v8, %v35428_v56  ;;  %31287 = vmatmul.mubr.msk.bf16.vlgmr.msra.gmra.mrb[244].mxu0 %vm855_vm1, %v34602_v1  ;;  %31288 = vmatmul.mubr.msk.bf16.vlgmr.msra.gmra.mrb[216].mxu1 %vm855_vm1, %v34602_v1  ;;  %v31274_v48 = vcombine.low %v36455_v17, %v36460_v35  ;;  %v31255_v23 = vcombine.high %v36479_v4, %v36484_v3  ;;  %v36520_v33 = vld [vmem:[%s40109_s7 + $0x820] sm:$0xff]  ;;  %v36533_v17 = vld [vmem:[%s40109_s7 + $0x828] sm:$0xff]  ;;  %v36553_v11 = vld [vmem:[%s40109_s7 + $0x2b0] sm:$0xff] }
0x100f   : > { %v8355_v2 = vcombine.low %v8270_v34, %v8271_v53  ;;  %v8356_v12 = vcombine.low %v8272_v31, %v8273_v9  ;;  %13187 = vmatpush1.bf16.msra.mxu0 %v31250_v61  ;;  %13228 = vmatpush1.bf16.msra.mxu1 %v31252_v63  ;;  %v31257_v28 = vcombine.high %v36499_v26, %v36504_v21  ;;  %v36538_v35 = vld [vmem:[%s40109_s7 + $0xae8] sm:$0xff]  ;;  %v12602_v9 = vld [vmem:[%s40109_s7 + $0x2b8] sm:$0xff] }
0x1010   : > { %v8354_v22 = vcombine.low %v8346_v16, %v8353_v30  ;;  %13188 = vmatprep.subr.bf16.mxu0 %v31273_v13  ;;  %13229 = vmatprep.subr.bf16.mxu1 %v31275_v7  ;;  %v36528_v52 = vor.u32 %v7476_v18, %v7475_v39  ;;  %v31254_v63 = vcombine.low %v36479_v4, %v36484_v3  ;;  %v36558_v13 = vld [vmem:[%s40109_s7 + $0x570] sm:$0xff]  ;;  %v12613_v4 = vld [vmem:[%s40109_s7 + $0x578] sm:$0xff] }
0x1011   : > { %v8365_v20 = vrot.slane %v8355_v2, %v35428_v56  ;;  %v8372_v25 = vrot.slane %v8356_v12, %v35428_v56  ;;  %v8091_v58 = vpop.f32.mrb[140].mxu0  ;;  %v8132_v10 = vpop.f32.mrb[112].mxu1  ;;  %13218 = vmatprep.mubr.bf16.mxu0 %v40000_v14  ;;  %13259 = vmatprep.mubr.bf16.mxu1 %v40000_v14  ;;  %v31256_v6 = vcombine.low %v36499_v26, %v36504_v21  ;;  %v36589_v2 = vld [vmem:[%s40109_s7 + $0x830] sm:$0xff] }
0x1012   : > { %8448 = vst [vmem:[#allocation2 + $0xa] ss:$8 sm:$0xf] %v8354_v22  ;;  %8449 = vst [vmem:[#allocation2 + $0xa] ss:$8 sm:$0xf0] %v8354_v22  ;;  %v8092_v40 = vadd.f32 %v8091_v58, %v7752_v54  ;;  %v8133_v49 = vadd.f32 %v8132_v10, %v7760_v19  ;;  %v31277_v54 = vcombine.high %v36520_v33, %v36525_v45 }
0x1013   : > { %v8093_v50 = vpop.f32.mrb[141].mxu0  ;;  %v8134_v0 = vpop.f32.mrb[113].mxu1  ;;  %v36540_v36 = vcombine.low %v8365_v20, %v8372_v25  ;;  %13189 = vmatpush1.bf16.msra.mxu0 %v31272_v38  ;;  %13230 = vmatpush1.bf16.msra.mxu1 %v31274_v48  ;;  %v31279_v27 = vcombine.high %v36533_v17, %v36538_v35  ;;  %v7768_v7 = vrot.slane %v36528_v52, %v33675_v44  ;;  %v8502_v38 = vld [vmem:[#allocation16 + $0x3] ss:$8 sm:$0xf0] }
0x1014   : > { %v8094_v41 = vadd.f32 %v8093_v50, %v7756_v32  ;;  %v8135_v43 = vadd.f32 %v8134_v0, %v7764_v24  ;;  %v8095_v59 = vpop.f32.mrb[142].mxu0  ;;  %v8136_v61 = vpop.f32.mrb[114].mxu1  ;;  %v8274_v8 = vmax.f32 %v8092_v40, 0.0  ;;  %v8276_v5 = vmax.f32 %v8133_v49, 0.0  ;;  %13268 = vmatprep.subr.bf16.mxu0 %v31255_v23  ;;  %13309 = vmatprep.subr.bf16.mxu1 %v31257_v28  ;;  %v12634_v20 = vld [vmem:[%s40109_s7 + $0xaf0] sm:$0xff]  ;;  %v36600_v25 = vld [vmem:[%s40109_s7 + $0x838] sm:$0xff] }
0x1015   : > { %v8096_v37 = vpop.f32.mrb[143].mxu0  ;;  %v8137_v15 = vpop.f32.mrb[115].mxu1  ;;  %v7776_v16 = vrot.slane %v36528_v52, %v33729_v29  ;;  %v7772_v30 = vrot.slane %v36528_v52, %v33680_v46  ;;  %v7780_v53 = vrot.slane %v36528_v52, %v33683_v47  ;;  %v31276_v32 = vcombine.low %v36520_v33, %v36525_v45  ;;  %v8501_v24 = vld [vmem:[#allocation16 + $0x3] ss:$8 sm:$0xf] }
0x1016   : > { %v8275_v34 = vmax.f32 %v8094_v41, 0.0  ;;  %v8277_v31 = vmax.f32 %v8135_v43, 0.0  ;;  %31289 = vmatmul.mubr.msk.bf16.vlgmr.msra.gmra.mrb[248].mxu0 %vm855_vm1, %v34602_v1  ;;  %31290 = vmatmul.mubr.msk.bf16.vlgmr.msra.gmra.mrb[220].mxu1 %vm855_vm1, %v34602_v1  ;;  %v31278_v26 = vcombine.low %v36533_v17, %v36538_v35  ;;  %v31258_v21 = vcombine.low %v36553_v11, %v36558_v13  ;;  %v12635_v58 = vld [vmem:[%s40109_s7 + $0xaf8] sm:$0xff] }
0x1017   : > { %13269 = vmatpush1.bf16.msra.mxu0 %v31254_v63  ;;  %13310 = vmatpush1.bf16.msra.mxu1 %v31256_v6  ;;  %v31259_v22 = vcombine.high %v36553_v11, %v36558_v13  ;;  %v31261_v23 = vcombine.high %v12602_v9, %v12613_v4  ;;  %v31260_v40 = vcombine.low %v12602_v9, %v12613_v4 }
0x1018   : > { %v8357_v3 = vcombine.low %v8274_v8, %v8275_v34  ;;  %v8358_v19 = vcombine.low %v8276_v5, %v8277_v31  ;;  %13270 = vmatprep.subr.bf16.mxu0 %v31277_v54  ;;  %13311 = vmatprep.subr.bf16.mxu1 %v31279_v27  ;;  %v36606_v49 = vor.u32 %v8502_v38, %v8501_v24 }
0x1019   : > { %v8173_v18 = vpop.f32.mrb[144].mxu0  ;;  %v8214_v48 = vpop.f32.mrb[116].mxu1  ;;  %13300 = vmatprep.mubr.bf16.mxu0 %v40000_v14  ;;  %13341 = vmatprep.mubr.bf16.mxu1 %v40000_v14  ;;  %v7784_v43 = vrot.slane %v36528_v52, %v33694_v55  ;;  %v31281_v5 = vcombine.high %v36589_v2, %v12634_v20  ;;  %v31283_v37 = vcombine.high %v36600_v25, %v12635_v58 }
0x101a   : > { %v8379_v12 = vrot.slane %v8357_v3, %v35428_v56  ;;  %v8386_v39 = vrot.slane %v8358_v19, %v35428_v56  ;;  %v8174_v10 = vadd.f32 %v8173_v18, %v7768_v7  ;;  %v8215_v28 = vadd.f32 %v8214_v48, %v7776_v16  ;;  %v8175_v33 = vpop.f32.mrb[145].mxu0  ;;  %v8216_v45 = vpop.f32.mrb[117].mxu1 }
0x101b   : > { %v8176_v0 = vadd.f32 %v8175_v33, %v7772_v30  ;;  %v8217_v17 = vadd.f32 %v8216_v45, %v7780_v53  ;;  %v8177_v35 = vpop.f32.mrb[146].mxu0  ;;  %v8218_v41 = vpop.f32.mrb[118].mxu1  ;;  %13271 = vmatpush1.bf16.msra.mxu0 %v31276_v32  ;;  %13312 = vmatpush1.bf16.msra.mxu1 %v31278_v26  ;;  %v8395_v15 = vrot.slane %v36540_v36, %v35428_v56 }
0x101c   : > { %v8388_v50 = vcombine.low %v8379_v12, %v8386_v39  ;;  %v8278_v59 = vmax.f32 %v8174_v10, 0.0  ;;  %v8280_v61 = vmax.f32 %v8215_v28, 0.0  ;;  %v8178_v63 = vpop.f32.mrb[147].mxu0  ;;  %v8219_v8 = vpop.f32.mrb[119].mxu1  ;;  %13350 = vmatprep.subr.bf16.mxu0 %v31259_v22  ;;  %13391 = vmatprep.subr.bf16.mxu1 %v31261_v23  ;;  %v8738_v31 = vrot.slane %v36606_v49, %v33675_v44 }
0x101d   : > { %v8279_v54 = vmax.f32 %v8176_v0, 0.0  ;;  %v8281_v34 = vmax.f32 %v8217_v17, 0.0  ;;  %v7788_v27 = vrot.slane %v36528_v52, %v33756_v60  ;;  %v8742_v11 = vrot.slane %v36606_v49, %v33680_v46  ;;  %v36643_v0 = vld [vmem:[#allocation2] sm:$0xff] }
0x101e   : > { %v8402_v6 = vrot.slane %v8388_v50, %v35428_v56  ;;  %31291 = vmatmul.mubr.msk.bf16.vlgmr.msra.gmra.mrb[252].mxu0 %vm855_vm1, %v34602_v1  ;;  %v31280_v13 = vcombine.low %v36589_v2, %v12634_v20  ;;  %31292 = vmatmul.mubr.msk.bf16.vlgmr.msra.gmra.mrb[224].mxu1 %vm855_vm1, %v34602_v1  ;;  %v31282_v30 = vcombine.low %v36600_v25, %v12635_v58  ;;  %v8506_v50 = vld [vmem:[#allocation16 + $0x43] ss:$8 sm:$0xf0] }
0x101f   : > { %v8404_v7 = vcombine.low %v8278_v59, %v8279_v54  ;;  %v8405_v16 = vcombine.low %v8280_v61, %v8281_v34  ;;  %13351 = vmatpush1.bf16.msra.mxu0 %v31258_v21  ;;  %13392 = vmatpush1.bf16.msra.mxu1 %v31260_v40  ;;  %v8746_v25 = vrot.slane %v36606_v49, %v33729_v29  ;;  %v8505_v40 = vld [vmem:[#allocation16 + $0x43] ss:$8 sm:$0xf] }
0x1020   : > { %v8403_v36 = vcombine.low %v8395_v15, %v8402_v6  ;;  %13352 = vmatprep.subr.bf16.mxu0 %v31281_v5  ;;  %13393 = vmatprep.subr.bf16.mxu1 %v31283_v37  ;;  %v8754_v58 = vrot.slane %v36606_v49, %v33694_v55  ;;  %v8750_v10 = vrot.slane %v36606_v49, %v33683_v47 }
0x1021   : > { %v8413_v52 = vrot.slane %v8404_v7, %v35428_v56  ;;  %v8420_v53 = vrot.slane %v8405_v16, %v35428_v56  ;;  %v8255_v9 = vpop.f32.mrb[148].mxu0  ;;  %v8879_v4 = vpop.f32.mrb[120].mxu1  ;;  %13382 = vmatprep.mubr.bf16.mxu0 %v40000_v14  ;;  %13423 = vmatprep.mubr.bf16.mxu1 %v40000_v14  ;;  %v8758_v45 = vrot.slane %v36606_v49, %v33756_v60 }
0x1022   : > { %8451 = vst [vmem:[#allocation2 + $0x4a] ss:$8 sm:$0xf] %v8403_v36  ;;  %8452 = vst [vmem:[#allocation2 + $0x4a] ss:$8 sm:$0xf0] %v8403_v36  ;;  %v8256_v3 = vadd.f32 %v8255_v9, %v7784_v43  ;;  %v8880_v19 = vadd.f32 %v8879_v4, %v8738_v31  ;;  %v8762_v16 = vrot.slane %v36606_v49, %v33697_v57  ;;  %13680 = vrot.lane.b32.xlu1 %v36643_v0, %s33067_s23 }
0x1023   : > { %v8257_v32 = vpop.f32.mrb[149].mxu0  ;;  %v8881_v24 = vpop.f32.mrb[121].mxu1  ;;  %v8428_v38 = vcombine.low %v8413_v52, %v8420_v53  ;;  %13353 = vmatpush1.bf16.msra.mxu0 %v31280_v13  ;;  %13394 = vmatpush1.bf16.msra.mxu1 %v31282_v30  ;;  %v8766_v9 = vrot.slane %v36606_v49, %v33700_v62 }
0x1024   : > { %v8258_v26 = vadd.f32 %v8257_v32, %v7788_v27  ;;  %v8882_v21 = vadd.f32 %v8881_v24, %v8742_v11  ;;  %v8259_v22 = vpop.f32.mrb[150].mxu0  ;;  %v8883_v2 = vpop.f32.mrb[122].mxu1  ;;  %v8282_v12 = vmax.f32 %v8256_v3, 0.0  ;;  %v9296_v39 = vmax.f32 %v8880_v19, 0.0  ;;  %16368 = vrot.lane.b32.xlu0 %v36643_v0, %s33069_s24 }
0x1025   : > { %v8260_v18 = vpop.f32.mrb[151].mxu0  ;;  %v8884_v48 = vpop.f32.mrb[123].mxu1  ;;  %v8435_v8 = vrot.slane %v8428_v38, %v35428_v56 }
0x1026   : > { %v8283_v23 = vmax.f32 %v8258_v26, 0.0  ;;  %v9297_v20 = vmax.f32 %v8882_v21, 0.0  ;;  %31293 = vmatmul.mubr.msk.bf16.vlgmr.msra.gmra.mrb[0].mxu0 %vm855_vm1, %v34602_v1  ;;  %31294 = vmatmul.mubr.msk.bf16.vlgmr.msra.gmra.mrb[228].mxu1 %vm855_vm1, %v34602_v1  ;;  %v36648_v1 = vor.u32 %v8506_v50, %v8505_v40 }
0x1027   : > { %13835 = vmatprep.mubr.f32.mxu0 %v36643_v0  ;;  %13977 = vmatprep.mubr.f32.mxu1 %v36643_v0 }
0x1028   : > { %v8406_v28 = vcombine.low %v8282_v12, %v8283_v23  ;;  %v9340_v33 = vcombine.low %v9296_v39, %v9297_v20  ;;  %v8770_v30 = vrot.slane %v36648_v1, %v33675_v44  ;;  %v8774_v4 = vrot.slane %v36648_v1, %v33680_v46  ;;  %14552 = vrot.lane.b32.xlu1 %v36643_v0, %s33068_s2 }
0x1029   : > { %v8920_v35 = vpop.f32.mrb[152].mxu0  ;;  %v8961_v41 = vpop.f32.mrb[124].mxu1  ;;  %v8782_v50 = vrot.slane %v36648_v1, %v33683_v47 }
0x102a   : > { %v8427_v17 = vrot.slane %v8406_v28, %v35428_v56  ;;  %v8921_v43 = vadd.f32 %v8920_v35, %v8746_v25  ;;  %v8962_v59 = vadd.f32 %v8961_v41, %v8754_v58  ;;  %v8922_v61 = vpop.f32.mrb[153].mxu0  ;;  %v8963_v63 = vpop.f32.mrb[125].mxu1  ;;  %v9350_v3 = vrot.slane %v9340_v33, %v35428_v56  ;;  %v8509_v35 = vld [vmem:[#allocation16 + $0x83] ss:$8 sm:$0xf] }
0x102b   : > { %v8923_v37 = vadd.f32 %v8922_v61, %v8750_v10  ;;  %v8964_v15 = vadd.f32 %v8963_v63, %v8758_v45  ;;  %v8924_v6 = vpop.f32.mrb[154].mxu0  ;;  %v8965_v54 = vpop.f32.mrb[126].mxu1  ;;  %v8778_v28 = vrot.slane %v36648_v1, %v33729_v29  ;;  %v8786_v33 = vrot.slane %v36648_v1, %v33694_v55  ;;  %v8510_v41 = vld [vmem:[#allocation16 + $0x83] ss:$8 sm:$0x30] }
0x102c   : > { %v8442_v5 = vrot.slane %v8427_v17, %v35428_v56  ;;  %v9298_v34 = vmax.f32 %v8921_v43, 0.0  ;;  %v9300_v31 = vmax.f32 %v8962_v59, 0.0  ;;  %v8925_v27 = vpop.f32.mrb[155].mxu0  ;;  %v8966_v11 = vpop.f32.mrb[127].mxu1  ;;  %v8790_v17 = vrot.slane %v36648_v1, %v33756_v60  ;;  %15426 = vrot.lane.b32.xlu1 %v36643_v0, %s33070_s22 }
0x102d   : > { %v9299_v36 = vmax.f32 %v8923_v37, 0.0  ;;  %v9301_v7 = vmax.f32 %v8964_v15, 0.0  ;;  %v8511_v6 = vor.u32 %v8510_v41, %v8509_v35 }
0x102e   : > { %v8443_v13 = vcombine.low %v8435_v8, %v8442_v5 }
0x102f   : > { %v9341_v52 = vcombine.low %v9298_v34, %v9299_v36  ;;  %v9342_v53 = vcombine.low %v9300_v31, %v9301_v7  ;;  %v8818_v35 = vrot.slane %v8511_v6, %v33694_v55 }
0x1030   : > { %8454 = vst.msk [vmem:[#allocation2 + $0x8a] ss:$8 sm:$0xf] %vm35919_vm5, %v8443_v13  ;;  %8455 = vst.msk [vmem:[#allocation2 + $0x8a] ss:$8 sm:$0x30] %vm35919_vm5, %v8443_v13 }
0x1031   : > { %v9357_v19 = vrot.slane %v9341_v52, %v35428_v56  ;;  %v9002_v32 = vpop.f32.mrb[156].mxu0  ;;  %v9043_v24 = vpop.f32.mrb[128].mxu1  ;;  %v9364_v43 = vrot.slane %v9342_v53, %v35428_v56 }
0x1032   : > { %v9003_v38 = vadd.f32 %v9002_v32, %v8762_v16  ;;  %v9044_v26 = vadd.f32 %v9043_v24, %v8770_v30  ;;  %v9004_v21 = vpop.f32.mrb[157].mxu0  ;;  %v9045_v22 = vpop.f32.mrb[129].mxu1 }
0x1033   : > { %v9372_v2 = vcombine.low %v9350_v3, %v9357_v19  ;;  %v9005_v12 = vadd.f32 %v9004_v21, %v8766_v9  ;;  %v9046_v39 = vadd.f32 %v9045_v22, %v8774_v4  ;;  %v9006_v18 = vpop.f32.mrb[158].mxu0  ;;  %v9047_v48 = vpop.f32.mrb[130].mxu1  ;;  %v8794_v4 = vrot.slane %v36648_v1, %v33697_v57 }
0x1034   : > { %v9302_v23 = vmax.f32 %v9003_v38, 0.0  ;;  %v9304_v49 = vmax.f32 %v9044_v26, 0.0  ;;  %v9007_v20 = vpop.f32.mrb[159].mxu0  ;;  %v9048_v25 = vpop.f32.mrb[131].mxu1  ;;  %v8802_v3 = vrot.slane %v8511_v6, %v33675_v44  ;;  %v8798_v19 = vrot.slane %v36648_v1, %v33700_v62 }
0x1035   : > { %v9303_v58 = vmax.f32 %v9005_v12, 0.0  ;;  %v9305_v10 = vmax.f32 %v9046_v39, 0.0  ;;  %v9380_v30 = vrot.slane %v9372_v2, %v35428_v56  ;;  %v8806_v26 = vrot.slane %v8511_v6, %v33680_v46 }
0x1037   : > { %v9343_v45 = vcombine.low %v9302_v23, %v9303_v58  ;;  %v9389_v40 = vcombine.low %v9304_v49, %v9305_v10 }
0x1039   : > { %v9371_v59 = vrot.slane %v9343_v45, %v35428_v56  ;;  %v9084_v61 = vpop.f32.mrb[160].mxu0  ;;  %v9125_v63 = vpop.f32.mrb[132].mxu1  ;;  %v9399_v21 = vrot.slane %v9389_v40, %v35428_v56  ;;  %v8810_v40 = vrot.slane %v8511_v6, %v33729_v29 }
0x103a   : > { %v9085_v8 = vadd.f32 %v9084_v61, %v8778_v28  ;;  %v9126_v5 = vadd.f32 %v9125_v63, %v8786_v33  ;;  %v9086_v37 = vpop.f32.mrb[161].mxu0  ;;  %v9127_v15 = vpop.f32.mrb[133].mxu1  ;;  %v8822_v61 = vrot.slane %v8511_v6, %v33756_v60  ;;  %v9535_v63 = vld [vmem:[#allocation16 + $0x4] ss:$8 sm:$0xf] }
0x103b   : > { %v9373_v54 = vcombine.low %v9364_v43, %v9371_v59  ;;  %v9087_v34 = vadd.f32 %v9086_v37, %v8782_v50  ;;  %v9128_v31 = vadd.f32 %v9127_v15, %v8790_v17  ;;  %v9088_v27 = vpop.f32.mrb[162].mxu0  ;;  %v9129_v11 = vpop.f32.mrb[134].mxu1  ;;  %v8814_v59 = vrot.slane %v8511_v6, %v33683_v47 }
0x103c   : > { %v9306_v13 = vmax.f32 %v9085_v8, 0.0  ;;  %v9308_v36 = vmax.f32 %v9126_v5, 0.0  ;;  %v9089_v7 = vpop.f32.mrb[163].mxu0  ;;  %v9130_v16 = vpop.f32.mrb[135].mxu1 }
0x103d   : > { %v9387_v52 = vrot.slane %v9373_v54, %v35428_v56  ;;  %v9307_v53 = vmax.f32 %v9087_v34, 0.0  ;;  %v9309_v9 = vmax.f32 %v9128_v31, 0.0  ;;  %v9536_v8 = vld [vmem:[#allocation16 + $0x4] ss:$8 sm:$0xf0] }
0x103f   : > { %v9388_v32 = vcombine.low %v9380_v30, %v9387_v52  ;;  %v9390_v24 = vcombine.low %v9306_v13, %v9307_v53  ;;  %v9391_v38 = vcombine.low %v9308_v36, %v9309_v9  ;;  %v36692_v13 = vor.u32 %v9536_v8, %v9535_v63 }
0x1041   : > { %9482 = vst [vmem:[#allocation2 + $0xb] ss:$8 sm:$0xf] %v9388_v32  ;;  %9483 = vst [vmem:[#allocation2 + $0xb] ss:$8 sm:$0xf0] %v9388_v32  ;;  %v9406_v22 = vrot.slane %v9390_v24, %v35428_v56  ;;  %v9413_v5 = vrot.slane %v9391_v38, %v35428_v56  ;;  %v9772_v38 = vrot.slane %v36692_v13, %v33675_v44 }
0x1042   : > { %v9166_v2 = vpop.f32.mrb[164].mxu0  ;;  %v9207_v12 = vpop.f32.mrb[136].mxu1 }
0x1043   : > { %v9167_v39 = vadd.f32 %v9166_v2, %v8794_v4  ;;  %v9208_v18 = vadd.f32 %v9207_v12, %v8802_v3  ;;  %v9168_v48 = vpop.f32.mrb[165].mxu0  ;;  %v9209_v23 = vpop.f32.mrb[137].mxu1  ;;  %v9421_v49 = vcombine.low %v9399_v21, %v9406_v22  ;;  %v9776_v21 = vrot.slane %v36692_v13, %v33680_v46 }
0x1044   : > { %v9169_v20 = vadd.f32 %v9168_v48, %v8798_v19  ;;  %v9210_v1 = vadd.f32 %v9209_v23, %v8806_v26  ;;  %v9170_v25 = vpop.f32.mrb[166].mxu0  ;;  %v9211_v58 = vpop.f32.mrb[138].mxu1  ;;  %v9780_v26 = vrot.slane %v36692_v13, %v33729_v29 }
0x1045   : > { %v9310_v10 = vmax.f32 %v9167_v39, 0.0  ;;  %v9312_v28 = vmax.f32 %v9208_v18, 0.0  ;;  %v9171_v33 = vpop.f32.mrb[167].mxu0  ;;  %v9212_v45 = vpop.f32.mrb[139].mxu1  ;;  %v9429_v3 = vrot.slane %v9421_v49, %v35428_v56  ;;  %v9784_v39 = vrot.slane %v36692_v13, %v33683_v47 }
0x1046   : > { %v9311_v50 = vmax.f32 %v9169_v20, 0.0  ;;  %v9313_v17 = vmax.f32 %v9210_v1, 0.0 }
0x1048   : > { %v9392_v41 = vcombine.low %v9310_v10, %v9311_v50  ;;  %v9438_v43 = vcombine.low %v9312_v28, %v9313_v17 }
0x1049   : > { %v9248_v15 = vpop.f32.mrb[168].mxu0  ;;  %v9289_v54 = vpop.f32.mrb[140].mxu1 }
0x104a   : > { %v9420_v37 = vrot.slane %v9392_v41, %v35428_v56  ;;  %v9249_v34 = vadd.f32 %v9248_v15, %v8810_v40  ;;  %v9290_v31 = vadd.f32 %v9289_v54, %v8818_v35  ;;  %v9250_v27 = vpop.f32.mrb[169].mxu0  ;;  %v9291_v11 = vpop.f32.mrb[141].mxu1  ;;  %v9447_v18 = vrot.slane %v9438_v43, %v35428_v56 }
0x104b   : > { %v9251_v7 = vadd.f32 %v9250_v27, %v8814_v59  ;;  %v9292_v16 = vadd.f32 %v9291_v11, %v8822_v61  ;;  %v9252_v30 = vpop.f32.mrb[170].mxu0  ;;  %v9293_v52 = vpop.f32.mrb[142].mxu1  ;;  %v9792_v15 = vrot.slane %v36692_v13, %v33756_v60  ;;  %v9800_v27 = vrot.slane %v36692_v13, %v33700_v62  ;;  %v9539_v11 = vld [vmem:[#allocation16 + $0x44] ss:$8 sm:$0xf] }
0x104c   : > { %v9422_v36 = vcombine.low %v9413_v5, %v9420_v37  ;;  %v9314_v6 = vmax.f32 %v9249_v34, 0.0  ;;  %v9316_v53 = vmax.f32 %v9290_v31, 0.0  ;;  %v9253_v9 = vpop.f32.mrb[171].mxu0  ;;  %v9294_v4 = vpop.f32.mrb[143].mxu1  ;;  %v9788_v5 = vrot.slane %v36692_v13, %v33694_v55 }
0x104d   : > { %v9315_v32 = vmax.f32 %v9251_v7, 0.0  ;;  %v9317_v24 = vmax.f32 %v9292_v16, 0.0  ;;  %v9796_v37 = vrot.slane %v36692_v13, %v33697_v57 }
0x104e   : > { %v9436_v19 = vrot.slane %v9422_v36, %v35428_v56  ;;  %v9540_v36 = vld [vmem:[#allocation16 + $0x44] ss:$8 sm:$0xf0] }
0x104f   : > { %v9439_v2 = vcombine.low %v9314_v6, %v9315_v32  ;;  %v9440_v12 = vcombine.low %v9316_v53, %v9317_v24 }
0x1050   : > { %v9437_v22 = vcombine.low %v9429_v3, %v9436_v19  ;;  %v9541_v3 = vor.u32 %v9540_v36, %v9539_v11 }
0x1051   : > { %v9454_v48 = vrot.slane %v9439_v2, %v35428_v56  ;;  %v9461_v23 = vrot.slane %v9440_v12, %v35428_v56  ;;  %v9913_v49 = vpop.f32.mrb[172].mxu0  ;;  %v9954_v20 = vpop.f32.mrb[144].mxu1 }
0x1052   : > { %9485 = vst [vmem:[#allocation2 + $0x4b] ss:$8 sm:$0xf] %v9437_v22  ;;  %9486 = vst [vmem:[#allocation2 + $0x4b] ss:$8 sm:$0xf0] %v9437_v22  ;;  %v9914_v1 = vadd.f32 %v9913_v49, %v9772_v38  ;;  %v9955_v25 = vadd.f32 %v9954_v20, %v9780_v26  ;;  %v9808_v20 = vrot.slane %v9541_v3, %v33680_v46 }
0x1053   : > { %v9915_v58 = vpop.f32.mrb[173].mxu0  ;;  %v9956_v10 = vpop.f32.mrb[145].mxu1  ;;  %v9462_v28 = vcombine.low %v9447_v18, %v9454_v48  ;;  %v9476_v61 = vrot.slane %v9461_v23, %v35428_v56  ;;  %v9804_v18 = vrot.slane %v9541_v3, %v33675_v44  ;;  %v9812_v48 = vrot.slane %v9541_v3, %v33729_v29 }
0x1054   : > { %v9916_v33 = vadd.f32 %v9915_v58, %v9776_v21  ;;  %v9957_v45 = vadd.f32 %v9956_v10, %v9784_v39  ;;  %v9917_v50 = vpop.f32.mrb[174].mxu0  ;;  %v9958_v17 = vpop.f32.mrb[146].mxu1  ;;  %v10330_v40 = vmax.f32 %v9914_v1, 0.0  ;;  %v10332_v35 = vmax.f32 %v9955_v25, 0.0 }
0x1055   : > { %v9918_v41 = vpop.f32.mrb[175].mxu0  ;;  %v9959_v59 = vpop.f32.mrb[147].mxu1  ;;  %v9469_v43 = vrot.slane %v9462_v28, %v35428_v56  ;;  %v9816_v1 = vrot.slane %v9541_v3, %v33683_v47  ;;  %v9824_v11 = vrot.slane %v9541_v3, %v33756_v60 }
0x1056   : > { %v10331_v63 = vmax.f32 %v9916_v33, 0.0  ;;  %v10333_v8 = vmax.f32 %v9957_v45, 0.0 }
0x1057   : > { %v9477_v54 = vcombine.low %v9469_v43, %v9476_v61 }
0x1058   : > { %v10374_v34 = vcombine.low %v10330_v40, %v10331_v63  ;;  %v10375_v31 = vcombine.low %v10332_v35, %v10333_v8 }
0x1059   : > { %9488 = vst.msk [vmem:[#allocation2 + $0x8b] ss:$8 sm:$0xf] %vm35919_vm5, %v9477_v54  ;;  %9489 = vst.msk [vmem:[#allocation2 + $0x8b] ss:$8 sm:$0x30] %vm35919_vm5, %v9477_v54 }
0x105a   : > { %v10384_v7 = vrot.slane %v10374_v34, %v35428_v56  ;;  %v10391_v16 = vrot.slane %v10375_v31, %v35428_v56  ;;  %v9995_v30 = vpop.f32.mrb[176].mxu0  ;;  %v10036_v52 = vpop.f32.mrb[148].mxu1  ;;  %v9820_v31 = vrot.slane %v9541_v3, %v33694_v55 }
0x105b   : > { %v9996_v6 = vadd.f32 %v9995_v30, %v9788_v5  ;;  %v10037_v53 = vadd.f32 %v10036_v52, %v9796_v37  ;;  %v9997_v9 = vpop.f32.mrb[177].mxu0  ;;  %v10038_v4 = vpop.f32.mrb[149].mxu1  ;;  %v9832_v30 = vrot.slane %v9541_v3, %v33700_v62  ;;  %v9543_v52 = vld [vmem:[#allocation16 + $0x84] ss:$8 sm:$0xf] }
0x105c   : > { %v10406_v13 = vcombine.low %v10384_v7, %v10391_v16  ;;  %v9998_v19 = vadd.f32 %v9997_v9, %v9792_v15  ;;  %v10039_v32 = vadd.f32 %v10038_v4, %v9800_v27  ;;  %v9999_v24 = vpop.f32.mrb[178].mxu0  ;;  %v10040_v38 = vpop.f32.mrb[150].mxu1  ;;  %v9828_v27 = vrot.slane %v9541_v3, %v33697_v57 }
0x105d   : > { %v10334_v26 = vmax.f32 %v9996_v6, 0.0  ;;  %v10336_v21 = vmax.f32 %v10037_v53, 0.0  ;;  %v10000_v22 = vpop.f32.mrb[179].mxu0  ;;  %v10041_v2 = vpop.f32.mrb[151].mxu1 }
0x105e   : > { %v10335_v12 = vmax.f32 %v9998_v19, 0.0  ;;  %v10337_v39 = vmax.f32 %v10039_v32, 0.0  ;;  %v10414_v37 = vrot.slane %v10406_v13, %v35428_v56  ;;  %v9544_v6 = vld [vmem:[#allocation16 + $0x84] ss:$8 sm:$0x30] }
0x1060   : > { %v10376_v23 = vcombine.low %v10334_v26, %v10335_v12  ;;  %v10377_v49 = vcombine.low %v10336_v21, %v10337_v39  ;;  %v36737_v26 = vor.u32 %v9544_v6, %v9543_v52 }
0x1061   : > { %v10077_v10 = vpop.f32.mrb[180].mxu0  ;;  %v10118_v28 = vpop.f32.mrb[152].mxu1 }
0x1062   : > { %v10398_v25 = vrot.slane %v10376_v23, %v35428_v56  ;;  %v10405_v58 = vrot.slane %v10377_v49, %v35428_v56  ;;  %v10078_v33 = vadd.f32 %v10077_v10, %v9804_v18  ;;  %v10119_v45 = vadd.f32 %v10118_v28, %v9812_v48  ;;  %v10079_v50 = vpop.f32.mrb[181].mxu0  ;;  %v10120_v17 = vpop.f32.mrb[153].mxu1 }
0x1063   : > { %v10080_v35 = vadd.f32 %v10079_v50, %v9808_v20  ;;  %v10121_v41 = vadd.f32 %v10120_v17, %v9816_v1  ;;  %v10081_v59 = vpop.f32.mrb[182].mxu0  ;;  %v10122_v43 = vpop.f32.mrb[154].mxu1  ;;  %v9836_v1 = vrot.slane %v36737_v26, %v33675_v44  ;;  %v9840_v28 = vrot.slane %v36737_v26, %v33680_v46  ;;  %v10570_v50 = vld [vmem:[#allocation16 + $0x5] ss:$8 sm:$0xf0] }
0x1064   : > { %v10407_v40 = vcombine.low %v10398_v25, %v10405_v58  ;;  %v10338_v61 = vmax.f32 %v10078_v33, 0.0  ;;  %v10340_v63 = vmax.f32 %v10119_v45, 0.0  ;;  %v10082_v8 = vpop.f32.mrb[183].mxu0  ;;  %v10123_v5 = vpop.f32.mrb[155].mxu1  ;;  %v9844_v25 = vrot.slane %v36737_v26, %v33729_v29 }
0x1065   : > { %v10339_v54 = vmax.f32 %v10080_v35, 0.0  ;;  %v10341_v34 = vmax.f32 %v10121_v41, 0.0  ;;  %v9848_v33 = vrot.slane %v36737_v26, %v33683_v47  ;;  %v10569_v45 = vld [vmem:[#allocation16 + $0x5] ss:$8 sm:$0xf]  ;;  %v9852_v6 = vrot.slane %v36737_v26, %v33694_v55 }
0x1066   : > { %v10421_v15 = vrot.slane %v10407_v40, %v35428_v56  ;;  %v36751_v8 = vor.u32 %v10570_v50, %v10569_v45 }
0x1067   : > { %v10423_v7 = vcombine.low %v10338_v61, %v10339_v54  ;;  %v10424_v16 = vcombine.low %v10340_v63, %v10341_v34 }
0x1068   : > { %v10422_v36 = vcombine.low %v10414_v37, %v10421_v15 }
0x1069   : > { %v10433_v53 = vrot.slane %v10423_v7, %v35428_v56  ;;  %v10440_v9 = vrot.slane %v10424_v16, %v35428_v56  ;;  %v10159_v4 = vpop.f32.mrb[184].mxu0  ;;  %v10200_v13 = vpop.f32.mrb[156].mxu1 }
0x106a   : > { %10516 = vst [vmem:[#allocation2 + $0xc] ss:$8 sm:$0xf] %v10422_v36  ;;  %10517 = vst [vmem:[#allocation2 + $0xc] ss:$8 sm:$0xf0] %v10422_v36  ;;  %v10160_v19 = vadd.f32 %v10159_v4, %v9820_v31  ;;  %v10201_v32 = vadd.f32 %v10200_v13, %v9828_v27  ;;  %v10810_v4 = vrot.slane %v36751_v8, %v33680_v46 }
0x106b   : > { %v10161_v24 = vpop.f32.mrb[185].mxu0  ;;  %v10202_v38 = vpop.f32.mrb[157].mxu1  ;;  %v10455_v21 = vcombine.low %v10433_v53, %v10440_v9  ;;  %v10806_v53 = vrot.slane %v36751_v8, %v33675_v44  ;;  %v9856_v9 = vrot.slane %v36737_v26, %v33756_v60 }
0x106c   : > { %v10162_v22 = vadd.f32 %v10161_v24, %v9824_v11  ;;  %v10203_v2 = vadd.f32 %v10202_v38, %v9832_v30  ;;  %v10163_v3 = vpop.f32.mrb[186].mxu0  ;;  %v10204_v12 = vpop.f32.mrb[158].mxu1  ;;  %v10342_v39 = vmax.f32 %v10160_v19, 0.0  ;;  %v10344_v18 = vmax.f32 %v10201_v32, 0.0 }
0x106d   : > { %v10164_v48 = vpop.f32.mrb[187].mxu0  ;;  %v10205_v23 = vpop.f32.mrb[159].mxu1  ;;  %v10463_v7 = vrot.slane %v10455_v21, %v35428_v56 }
0x106e   : > { %v10343_v49 = vmax.f32 %v10162_v22, 0.0  ;;  %v10345_v20 = vmax.f32 %v10203_v2, 0.0 }
0x1070   : > { %v10425_v58 = vcombine.low %v10342_v39, %v10343_v49  ;;  %v10426_v10 = vcombine.low %v10344_v18, %v10345_v20 }
0x1071   : > { %v10241_v35 = vpop.f32.mrb[188].mxu0  ;;  %v10282_v41 = vpop.f32.mrb[160].mxu1 }
0x1072   : > { %v10447_v17 = vrot.slane %v10425_v58, %v35428_v56  ;;  %v10454_v40 = vrot.slane %v10426_v10, %v35428_v56  ;;  %v10242_v59 = vadd.f32 %v10241_v35, %v9836_v1  ;;  %v10283_v43 = vadd.f32 %v10282_v41, %v9844_v25  ;;  %v10243_v61 = vpop.f32.mrb[189].mxu0  ;;  %v10284_v63 = vpop.f32.mrb[161].mxu1  ;;  %v10573_v35 = vld [vmem:[#allocation16 + $0x45] ss:$8 sm:$0xf] }
0x1073   : > { %v10244_v37 = vadd.f32 %v10243_v61, %v9840_v28  ;;  %v10285_v15 = vadd.f32 %v10284_v63, %v9848_v33  ;;  %v10245_v54 = vpop.f32.mrb[190].mxu0  ;;  %v10286_v34 = vpop.f32.mrb[162].mxu1  ;;  %v10814_v28 = vrot.slane %v36751_v8, %v33729_v29  ;;  %v10822_v33 = vrot.slane %v36751_v8, %v33694_v55  ;;  %v10574_v41 = vld [vmem:[#allocation16 + $0x45] ss:$8 sm:$0xf0] }
0x1074   : > { %v10456_v5 = vcombine.low %v10447_v17, %v10454_v40  ;;  %v10346_v31 = vmax.f32 %v10242_v59, 0.0  ;;  %v10348_v27 = vmax.f32 %v10283_v43, 0.0  ;;  %v10246_v11 = vpop.f32.mrb[191].mxu0  ;;  %v10287_v36 = vpop.f32.mrb[163].mxu1  ;;  %v10818_v17 = vrot.slane %v36751_v8, %v33683_v47 }
0x1075   : > { %v10347_v30 = vmax.f32 %v10244_v37, 0.0  ;;  %v10349_v52 = vmax.f32 %v10285_v15, 0.0  ;;  %v10826_v40 = vrot.slane %v36751_v8, %v33756_v60  ;;  %v36780_v54 = vor.u32 %v10574_v41, %v10573_v35 }
0x1076   : > { %v10470_v16 = vrot.slane %v10456_v5, %v35428_v56 }
0x1077   : > { %v10472_v19 = vcombine.low %v10346_v31, %v10347_v30  ;;  %v10473_v32 = vcombine.low %v10348_v27, %v10349_v52  ;;  %v10850_v35 = vrot.slane %v36780_v54, %v33683_v47  ;;  %v10858_v41 = vrot.slane %v36780_v54, %v33756_v60 }
0x1078   : > { %v10471_v13 = vcombine.low %v10463_v7, %v10470_v16 }
0x1079   : > { %v10481_v24 = vrot.slane %v10472_v19, %v35428_v56  ;;  %v10488_v38 = vrot.slane %v10473_v32, %v35428_v56  ;;  %v10323_v26 = vpop.f32.mrb[192].mxu0  ;;  %v10947_v21 = vpop.f32.mrb[164].mxu1  ;;  %v10838_v19 = vrot.slane %v36780_v54, %v33675_v44 }
0x107a   : > { %10519 = vst [vmem:[#allocation2 + $0x4c] ss:$8 sm:$0xf] %v10471_v13  ;;  %10520 = vst [vmem:[#allocation2 + $0x4c] ss:$8 sm:$0xf0] %v10471_v13  ;;  %v10324_v22 = vadd.f32 %v10323_v26, %v9852_v6  ;;  %v10948_v2 = vadd.f32 %v10947_v21, %v10806_v53  ;;  %v10830_v13 = vrot.slane %v36751_v8, %v33697_v57 }
0x107b   : > { %v10325_v3 = vpop.f32.mrb[193].mxu0  ;;  %v10949_v12 = vpop.f32.mrb[165].mxu1  ;;  %v10496_v39 = vcombine.low %v10481_v24, %v10488_v38  ;;  %v10834_v38 = vrot.slane %v36751_v8, %v33700_v62  ;;  %v10842_v26 = vrot.slane %v36780_v54, %v33680_v46 }
0x107c   : > { %v10326_v18 = vadd.f32 %v10325_v3, %v9856_v9  ;;  %v10950_v48 = vadd.f32 %v10949_v12, %v10810_v4  ;;  %v10327_v23 = vpop.f32.mrb[194].mxu0  ;;  %v10951_v49 = vpop.f32.mrb[166].mxu1  ;;  %v10350_v20 = vmax.f32 %v10324_v22, 0.0  ;;  %v11364_v1 = vmax.f32 %v10948_v2, 0.0 }
0x107d   : > { %v10328_v0 = vpop.f32.mrb[195].mxu0  ;;  %v10952_v25 = vpop.f32.mrb[167].mxu1  ;;  %v10503_v34 = vrot.slane %v10496_v39, %v35428_v56 }
0x107e   : > { %v10351_v58 = vmax.f32 %v10326_v18, 0.0  ;;  %v11365_v10 = vmax.f32 %v10950_v48, 0.0 }
0x1080   : > { %v10474_v45 = vcombine.low %v10350_v20, %v10351_v58  ;;  %v11408_v50 = vcombine.low %v11364_v1, %v11365_v10 }
0x1081   : > { %v10988_v43 = vpop.f32.mrb[196].mxu0  ;;  %v11029_v61 = vpop.f32.mrb[168].mxu1 }
0x1082   : > { %v10495_v59 = vrot.slane %v10474_v45, %v35428_v56  ;;  %v10989_v63 = vadd.f32 %v10988_v43, %v10814_v28  ;;  %v11030_v5 = vadd.f32 %v11029_v61, %v10822_v33  ;;  %v10990_v37 = vpop.f32.mrb[197].mxu0  ;;  %v11031_v15 = vpop.f32.mrb[169].mxu1  ;;  %v11418_v21 = vrot.slane %v11408_v50, %v35428_v56  ;;  %v10578_v43 = vld [vmem:[#allocation16 + $0x85] ss:$8 sm:$0x30] }
0x1083   : > { %v10991_v27 = vadd.f32 %v10990_v37, %v10818_v17  ;;  %v11032_v11 = vadd.f32 %v11031_v15, %v10826_v40  ;;  %v10992_v36 = vpop.f32.mrb[198].mxu0  ;;  %v11033_v7 = vpop.f32.mrb[170].mxu1  ;;  %v10846_v45 = vrot.slane %v36780_v54, %v33729_v29  ;;  %v10854_v50 = vrot.slane %v36780_v54, %v33694_v55 }
0x1084   : > { %v10510_v31 = vrot.slane %v10495_v59, %v35428_v56  ;;  %v11366_v16 = vmax.f32 %v10989_v63, 0.0  ;;  %v11368_v30 = vmax.f32 %v11030_v5, 0.0  ;;  %v10993_v52 = vpop.f32.mrb[199].mxu0  ;;  %v11034_v6 = vpop.f32.mrb[171].mxu1 }
0x1085   : > { %v11367_v9 = vmax.f32 %v10991_v27, 0.0  ;;  %v11369_v4 = vmax.f32 %v11032_v11, 0.0  ;;  %v10577_v59 = vld [vmem:[#allocation16 + $0x85] ss:$8 sm:$0xf] }
0x1086   : > { %v10511_v53 = vcombine.low %v10503_v34, %v10510_v31  ;;  %v10579_v11 = vor.u32 %v10578_v43, %v10577_v59 }
0x1087   : > { %v11409_v32 = vcombine.low %v11366_v16, %v11367_v9  ;;  %v11410_v24 = vcombine.low %v11368_v30, %v11369_v4 }
0x1088   : > { %10522 = vst.msk [vmem:[#allocation2 + $0x8c] ss:$8 sm:$0xf] %vm35919_vm5, %v10511_v53  ;;  %10523 = vst.msk [vmem:[#allocation2 + $0x8c] ss:$8 sm:$0x30] %vm35919_vm5, %v10511_v53 }
0x1089   : > { %v11425_v22 = vrot.slane %v11409_v32, %v35428_v56  ;;  %v11070_v2 = vpop.f32.mrb[200].mxu0  ;;  %v11111_v3 = vpop.f32.mrb[172].mxu1  ;;  %v11432_v61 = vrot.slane %v11410_v24, %v35428_v56 }
0x108a   : > { %v11071_v12 = vadd.f32 %v11070_v2, %v10830_v13  ;;  %v11112_v39 = vadd.f32 %v11111_v3, %v10838_v19  ;;  %v11072_v18 = vpop.f32.mrb[201].mxu0  ;;  %v11113_v48 = vpop.f32.mrb[173].mxu1 }
0x108b   : > { %v11440_v23 = vcombine.low %v11418_v21, %v11425_v22  ;;  %v11073_v49 = vadd.f32 %v11072_v18, %v10834_v38  ;;  %v11114_v20 = vadd.f32 %v11113_v48, %v10842_v26  ;;  %v11074_v1 = vpop.f32.mrb[202].mxu0  ;;  %v11115_v0 = vpop.f32.mrb[174].mxu1  ;;  %v10862_v38 = vrot.slane %v36780_v54, %v33697_v57 }
0x108c   : > { %v11370_v25 = vmax.f32 %v11071_v12, 0.0  ;;  %v11372_v8 = vmax.f32 %v11112_v39, 0.0  ;;  %v11075_v58 = vpop.f32.mrb[203].mxu0  ;;  %v11116_v10 = vpop.f32.mrb[175].mxu1  ;;  %v10870_v26 = vrot.slane %v10579_v11, %v33675_v44  ;;  %v10866_v21 = vrot.slane %v36780_v54, %v33700_v62 }
0x108d   : > { %v11371_v28 = vmax.f32 %v11073_v49, 0.0  ;;  %v11373_v33 = vmax.f32 %v11114_v20, 0.0  ;;  %v11448_v13 = vrot.slane %v11440_v23, %v35428_v56  ;;  %v10874_v12 = vrot.slane %v10579_v11, %v33680_v46 }
0x108f   : > { %v11411_v17 = vcombine.low %v11370_v25, %v11371_v28  ;;  %v11457_v40 = vcombine.low %v11372_v8, %v11373_v33 }
0x1091   : > { %v11439_v63 = vrot.slane %v11411_v17, %v35428_v56  ;;  %v11152_v5 = vpop.f32.mrb[204].mxu0  ;;  %v11193_v37 = vpop.f32.mrb[176].mxu1  ;;  %v11467_v39 = vrot.slane %v11457_v40, %v35428_v56  ;;  %v10878_v40 = vrot.slane %v10579_v11, %v33729_v29 }
0x1092   : > { %v11153_v15 = vadd.f32 %v11152_v5, %v10846_v45  ;;  %v11194_v34 = vadd.f32 %v11193_v37, %v10854_v50  ;;  %v11154_v31 = vpop.f32.mrb[205].mxu0  ;;  %v11195_v27 = vpop.f32.mrb[177].mxu1  ;;  %v11603_v5 = vld [vmem:[#allocation16 + $0x6] ss:$8 sm:$0xf] }
0x1093   : > { %v11441_v36 = vcombine.low %v11432_v61, %v11439_v63  ;;  %v11155_v7 = vadd.f32 %v11154_v31, %v10850_v35  ;;  %v11196_v16 = vadd.f32 %v11195_v27, %v10858_v41  ;;  %v11156_v30 = vpop.f32.mrb[206].mxu0  ;;  %v11197_v52 = vpop.f32.mrb[178].mxu1  ;;  %v10886_v41 = vrot.slane %v10579_v11, %v33694_v55  ;;  %v11604_v37 = vld [vmem:[#allocation16 + $0x6] ss:$8 sm:$0xf0] }
0x1094   : > { %v11374_v6 = vmax.f32 %v11153_v15, 0.0  ;;  %v11376_v53 = vmax.f32 %v11194_v34, 0.0  ;;  %v11157_v9 = vpop.f32.mrb[207].mxu0  ;;  %v11198_v4 = vpop.f32.mrb[179].mxu1  ;;  %v10882_v61 = vrot.slane %v10579_v11, %v33683_v47  ;;  %v10890_v63 = vrot.slane %v10579_v11, %v33756_v60 }
0x1095   : > { %v11455_v19 = vrot.slane %v11441_v36, %v35428_v56  ;;  %v11375_v32 = vmax.f32 %v11155_v7, 0.0  ;;  %v11377_v24 = vmax.f32 %v11196_v16, 0.0  ;;  %v36824_v52 = vor.u32 %v11604_v37, %v11603_v5 }
0x1097   : > { %v11456_v22 = vcombine.low %v11448_v13, %v11455_v19  ;;  %v11458_v2 = vcombine.low %v11374_v6, %v11375_v32  ;;  %v11459_v3 = vcombine.low %v11376_v53, %v11377_v24  ;;  %v11856_v37 = vrot.slane %v36824_v52, %v33694_v55 }
0x1099   : > { %11550 = vst [vmem:[#allocation2 + $0xd] ss:$8 sm:$0xf] %v11456_v22  ;;  %11551 = vst [vmem:[#allocation2 + $0xd] ss:$8 sm:$0xf0] %v11456_v22  ;;  %v11474_v18 = vrot.slane %v11458_v2, %v35428_v56  ;;  %v11481_v15 = vrot.slane %v11459_v3, %v35428_v56  ;;  %v11840_v2 = vrot.slane %v36824_v52, %v33675_v44 }
0x109a   : > { %v11234_v48 = vpop.f32.mrb[208].mxu0  ;;  %v11275_v23 = vpop.f32.mrb[180].mxu1  ;;  %v11848_v3 = vrot.slane %v36824_v52, %v33729_v29 }
0x109b   : > { %v11235_v49 = vadd.f32 %v11234_v48, %v10862_v38  ;;  %v11276_v20 = vadd.f32 %v11275_v23, %v10870_v26  ;;  %v11236_v1 = vpop.f32.mrb[209].mxu0  ;;  %v11277_v0 = vpop.f32.mrb[181].mxu1  ;;  %v11489_v25 = vcombine.low %v11467_v39, %v11474_v18  ;;  %v11852_v23 = vrot.slane %v36824_v52, %v33683_v47 }
0x109c   : > { %v11237_v8 = vadd.f32 %v11236_v1, %v10866_v21  ;;  %v11278_v54 = vadd.f32 %v11277_v0, %v10874_v12  ;;  %v11238_v58 = vpop.f32.mrb[210].mxu0  ;;  %v11279_v10 = vpop.f32.mrb[182].mxu1  ;;  %v11844_v12 = vrot.slane %v36824_v52, %v33680_v46 }
0x109d   : > { %v11378_v28 = vmax.f32 %v11235_v49, 0.0  ;;  %v11380_v33 = vmax.f32 %v11276_v20, 0.0  ;;  %v11239_v45 = vpop.f32.mrb[211].mxu0  ;;  %v11280_v50 = vpop.f32.mrb[183].mxu1  ;;  %v11497_v38 = vrot.slane %v11489_v25, %v35428_v56 }
0x109e   : > { %v11379_v17 = vmax.f32 %v11237_v8, 0.0  ;;  %v11381_v35 = vmax.f32 %v11278_v54, 0.0 }
0x10a0   : > { %v11460_v59 = vcombine.low %v11378_v28, %v11379_v17  ;;  %v11506_v43 = vcombine.low %v11380_v33, %v11381_v35 }
0x10a1   : > { %v11316_v31 = vpop.f32.mrb[212].mxu0  ;;  %v11357_v27 = vpop.f32.mrb[184].mxu1 }
0x10a2   : > { %v11488_v34 = vrot.slane %v11460_v59, %v35428_v56  ;;  %v11317_v36 = vadd.f32 %v11316_v31, %v10878_v40  ;;  %v11358_v7 = vadd.f32 %v11357_v27, %v10886_v41  ;;  %v11318_v16 = vpop.f32.mrb[213].mxu0  ;;  %v11359_v30 = vpop.f32.mrb[185].mxu1  ;;  %v11515_v49 = vrot.slane %v11506_v43, %v35428_v56 }
0x10a3   : > { %v11319_v53 = vadd.f32 %v11318_v16, %v10882_v61  ;;  %v11360_v9 = vadd.f32 %v11359_v30, %v10890_v63  ;;  %v11320_v4 = vpop.f32.mrb[214].mxu0  ;;  %v11361_v13 = vpop.f32.mrb[186].mxu1  ;;  %v11607_v16 = vld [vmem:[#allocation16 + $0x46] ss:$8 sm:$0xf] }
0x10a4   : > { %v11490_v6 = vcombine.low %v11481_v15, %v11488_v34  ;;  %v11382_v11 = vmax.f32 %v11317_v36, 0.0  ;;  %v11384_v19 = vmax.f32 %v11358_v7, 0.0  ;;  %v11321_v32 = vpop.f32.mrb[215].mxu0  ;;  %v11362_v24 = vpop.f32.mrb[187].mxu1  ;;  %v11864_v15 = vrot.slane %v36824_v52, %v33697_v57 }
0x10a5   : > { %v11383_v21 = vmax.f32 %v11319_v53, 0.0  ;;  %v11385_v22 = vmax.f32 %v11360_v9, 0.0  ;;  %v11860_v34 = vrot.slane %v36824_v52, %v33756_v60  ;;  %v11868_v7 = vrot.slane %v36824_v52, %v33700_v62  ;;  %v11608_v30 = vld [vmem:[#allocation16 + $0x46] ss:$8 sm:$0xf0] }
0x10a6   : > { %v11504_v26 = vrot.slane %v11490_v6, %v35428_v56  ;;  %v11609_v24 = vor.u32 %v11608_v30, %v11607_v16 }
0x10a7   : > { %v11507_v18 = vcombine.low %v11382_v11, %v11383_v21  ;;  %v11508_v48 = vcombine.low %v11384_v19, %v11385_v22 }
0x10a8   : > { %v11505_v39 = vcombine.low %v11497_v38, %v11504_v26 }
0x10a9   : > { %v11522_v20 = vrot.slane %v11507_v18, %v35428_v56  ;;  %v11529_v1 = vrot.slane %v11508_v48, %v35428_v56  ;;  %v11981_v0 = vpop.f32.mrb[216].mxu0  ;;  %v12022_v25 = vpop.f32.mrb[188].mxu1 }
0x10aa   : > { %11553 = vst [vmem:[#allocation2 + $0x4d] ss:$8 sm:$0xf] %v11505_v39  ;;  %11554 = vst [vmem:[#allocation2 + $0x4d] ss:$8 sm:$0xf0] %v11505_v39  ;;  %v11982_v8 = vadd.f32 %v11981_v0, %v11840_v2  ;;  %v12023_v54 = vadd.f32 %v12022_v25, %v11848_v3  ;;  %v11876_v0 = vrot.slane %v11609_v24, %v33680_v46 }
0x10ab   : > { %v11983_v58 = vpop.f32.mrb[217].mxu0  ;;  %v12024_v10 = vpop.f32.mrb[189].mxu1  ;;  %v11530_v28 = vcombine.low %v11515_v49, %v11522_v20  ;;  %v11544_v61 = vrot.slane %v11529_v1, %v35428_v56  ;;  %v11880_v49 = vrot.slane %v11609_v24, %v33729_v29  ;;  %v11884_v25 = vrot.slane %v11609_v24, %v33683_v47 }
0x10ac   : > { %v11984_v33 = vadd.f32 %v11983_v58, %v11844_v12  ;;  %v12025_v45 = vadd.f32 %v12024_v10, %v11852_v23  ;;  %v11985_v50 = vpop.f32.mrb[218].mxu0  ;;  %v12026_v17 = vpop.f32.mrb[190].mxu1  ;;  %v12398_v35 = vmax.f32 %v11982_v8, 0.0  ;;  %v12400_v40 = vmax.f32 %v12023_v54, 0.0 }
0x10ad   : > { %v11986_v41 = vpop.f32.mrb[219].mxu0  ;;  %v12027_v59 = vpop.f32.mrb[191].mxu1  ;;  %v11537_v43 = vrot.slane %v11530_v28, %v35428_v56  ;;  %v11872_v23 = vrot.slane %v11609_v24, %v33675_v44 }
0x10ae   : > { %v12399_v63 = vmax.f32 %v11984_v33, 0.0  ;;  %v12401_v5 = vmax.f32 %v12025_v45, 0.0 }
0x10af   : > { %v11545_v31 = vcombine.low %v11537_v43, %v11544_v61 }
0x10b0   : > { %v12442_v27 = vcombine.low %v12398_v35, %v12399_v63  ;;  %v12443_v36 = vcombine.low %v12400_v40, %v12401_v5 }
0x10b1   : > { %11556 = vst.msk [vmem:[#allocation2 + $0x8d] ss:$8 sm:$0xf] %vm35919_vm5, %v11545_v31  ;;  %11557 = vst.msk [vmem:[#allocation2 + $0x8d] ss:$8 sm:$0x30] %vm35919_vm5, %v11545_v31 }
0x10b2   : > { %v12452_v6 = vrot.slane %v12442_v27, %v35428_v56  ;;  %v12459_v53 = vrot.slane %v12443_v36, %v35428_v56  ;;  %v12063_v9 = vpop.f32.mrb[220].mxu0  ;;  %v12104_v4 = vpop.f32.mrb[192].mxu1  ;;  %v11888_v27 = vrot.slane %v11609_v24, %v33694_v55  ;;  %v11896_v36 = vrot.slane %v11609_v24, %v33697_v57 }
0x10b3   : > { %v12064_v13 = vadd.f32 %v12063_v9, %v11856_v37  ;;  %v12105_v11 = vadd.f32 %v12104_v4, %v11864_v15  ;;  %v12065_v19 = vpop.f32.mrb[221].mxu0  ;;  %v12106_v32 = vpop.f32.mrb[193].mxu1  ;;  %v11611_v9 = vld [vmem:[#allocation16 + $0x86] ss:$8 sm:$0xf] }
0x10b4   : > { %v12474_v52 = vcombine.low %v12452_v6, %v12459_v53  ;;  %v12066_v38 = vadd.f32 %v12065_v19, %v11860_v34  ;;  %v12107_v26 = vadd.f32 %v12106_v32, %v11868_v7  ;;  %v12067_v21 = vpop.f32.mrb[222].mxu0  ;;  %v12108_v22 = vpop.f32.mrb[194].mxu1  ;;  %v11892_v7 = vrot.slane %v11609_v24, %v33756_v60  ;;  %v11612_v4 = vld [vmem:[#allocation16 + $0x86] ss:$8 sm:$0x30] }
0x10b5   : > { %v12402_v2 = vmax.f32 %v12064_v13, 0.0  ;;  %v12404_v3 = vmax.f32 %v12105_v11, 0.0  ;;  %v12068_v12 = vpop.f32.mrb[223].mxu0  ;;  %v12109_v39 = vpop.f32.mrb[195].mxu1  ;;  %v11900_v53 = vrot.slane %v11609_v24, %v33700_v62  ;;  %v11613_v22 = vor.u32 %v11612_v4, %v11611_v9 }
0x10b6   : > { %v12403_v18 = vmax.f32 %v12066_v38, 0.0  ;;  %v12405_v48 = vmax.f32 %v12107_v26, 0.0  ;;  %v12482_v37 = vrot.slane %v12474_v52, %v35428_v56 }
0x10b7   : > { %v11920_v9 = vrot.slane %v11613_v22, %v33694_v55 }
0x10b8   : > { %v12444_v20 = vcombine.low %v12402_v2, %v12403_v18  ;;  %v12445_v1 = vcombine.low %v12404_v3, %v12405_v48 }
0x10b9   : > { %v12145_v58 = vpop.f32.mrb[224].mxu0  ;;  %v12186_v10 = vpop.f32.mrb[196].mxu1 }
0x10ba   : > { %v12466_v8 = vrot.slane %v12444_v20, %v35428_v56  ;;  %v12473_v54 = vrot.slane %v12445_v1, %v35428_v56  ;;  %v12146_v28 = vadd.f32 %v12145_v58, %v11872_v23  ;;  %v12187_v33 = vadd.f32 %v12186_v10, %v11880_v49  ;;  %v12147_v45 = vpop.f32.mrb[225].mxu0  ;;  %v12188_v50 = vpop.f32.mrb[197].mxu1 }
0x10bb   : > { %v12148_v35 = vadd.f32 %v12147_v45, %v11876_v0  ;;  %v12189_v40 = vadd.f32 %v12188_v50, %v11884_v25  ;;  %v12149_v41 = vpop.f32.mrb[226].mxu0  ;;  %v12190_v59 = vpop.f32.mrb[198].mxu1  ;;  %v11904_v0 = vrot.slane %v11613_v22, %v33675_v44  ;;  %v11912_v25 = vrot.slane %v11613_v22, %v33729_v29 }
0x10bc   : > { %v12475_v17 = vcombine.low %v12466_v8, %v12473_v54  ;;  %v12406_v43 = vmax.f32 %v12146_v28, 0.0  ;;  %v12408_v61 = vmax.f32 %v12187_v33, 0.0  ;;  %v12150_v63 = vpop.f32.mrb[227].mxu0  ;;  %v12191_v5 = vpop.f32.mrb[199].mxu1  ;;  %v11908_v58 = vrot.slane %v11613_v22, %v33680_v46 }
0x10bd   : > { %v12407_v34 = vmax.f32 %v12148_v35, 0.0  ;;  %v12409_v31 = vmax.f32 %v12189_v40, 0.0  ;;  %v11916_v10 = vrot.slane %v11613_v22, %v33683_v47  ;;  %v12637_v28 = vld [vmem:[#allocation16 + $0x7] ss:$8 sm:$0xf] }
0x10be   : > { %v12489_v15 = vrot.slane %v12475_v17, %v35428_v56  ;;  %v12638_v33 = vld [vmem:[#allocation16 + $0x7] ss:$8 sm:$0xf0] }
0x10bf   : > { %v12491_v30 = vcombine.low %v12406_v43, %v12407_v34  ;;  %v12492_v6 = vcombine.low %v12408_v61, %v12409_v31  ;;  %v36875_v61 = vor.u32 %v12638_v33, %v12637_v28 }
0x10c0   : > { %v12490_v16 = vcombine.low %v12482_v37, %v12489_v15 }
0x10c1   : > { %v12501_v13 = vrot.slane %v12491_v30, %v35428_v56  ;;  %v12508_v11 = vrot.slane %v12492_v6, %v35428_v56  ;;  %v12227_v19 = vpop.f32.mrb[228].mxu0  ;;  %v12268_v32 = vpop.f32.mrb[200].mxu1  ;;  %v12874_v4 = vrot.slane %v36875_v61, %v33675_v44  ;;  %v12890_v28 = vrot.slane %v36875_v61, %v33694_v55 }
0x10c2   : > { %12584 = vst [vmem:[#allocation2 + $0xe] ss:$8 sm:$0xf] %v12490_v16  ;;  %12585 = vst [vmem:[#allocation2 + $0xe] ss:$8 sm:$0xf0] %v12490_v16  ;;  %v12228_v52 = vadd.f32 %v12227_v19, %v11888_v27  ;;  %v12269_v38 = vadd.f32 %v12268_v32, %v11896_v36  ;;  %v11924_v32 = vrot.slane %v11613_v22, %v33756_v60 }
0x10c3   : > { %v12229_v26 = vpop.f32.mrb[229].mxu0  ;;  %v12270_v21 = vpop.f32.mrb[201].mxu1  ;;  %v12523_v2 = vcombine.low %v12501_v13, %v12508_v11  ;;  %v12886_v33 = vrot.slane %v36875_v61, %v33683_v47 }
0x10c4   : > { %v12230_v3 = vadd.f32 %v12229_v26, %v11892_v7  ;;  %v12271_v12 = vadd.f32 %v12270_v21, %v11900_v53  ;;  %v12231_v39 = vpop.f32.mrb[230].mxu0  ;;  %v12272_v24 = vpop.f32.mrb[202].mxu1  ;;  %v12410_v18 = vmax.f32 %v12228_v52, 0.0  ;;  %v12412_v48 = vmax.f32 %v12269_v38, 0.0 }
0x10c5   : > { %v12232_v23 = vpop.f32.mrb[231].mxu0  ;;  %v12273_v49 = vpop.f32.mrb[203].mxu1  ;;  %v12531_v16 = vrot.slane %v12523_v2, %v35428_v56  ;;  %v12878_v52 = vrot.slane %v36875_v61, %v33680_v46 }
0x10c6   : > { %v12411_v20 = vmax.f32 %v12230_v3, 0.0  ;;  %v12413_v1 = vmax.f32 %v12271_v12, 0.0 }
0x10c8   : > { %v12493_v8 = vcombine.low %v12410_v18, %v12411_v20  ;;  %v12494_v54 = vcombine.low %v12412_v48, %v12413_v1 }
0x10c9   : > { %v12309_v17 = vpop.f32.mrb[232].mxu0  ;;  %v12350_v35 = vpop.f32.mrb[204].mxu1 }
0x10ca   : > { %v12515_v45 = vrot.slane %v12493_v8, %v35428_v56  ;;  %v12522_v50 = vrot.slane %v12494_v54, %v35428_v56  ;;  %v12310_v40 = vadd.f32 %v12309_v17, %v11904_v0  ;;  %v12351_v41 = vadd.f32 %v12350_v35, %v11912_v25  ;;  %v12311_v59 = vpop.f32.mrb[233].mxu0  ;;  %v12352_v43 = vpop.f32.mrb[205].mxu1 }
0x10cb   : > { %v12312_v5 = vadd.f32 %v12311_v59, %v11908_v58  ;;  %v12353_v37 = vadd.f32 %v12352_v43, %v11916_v10  ;;  %v12313_v15 = vpop.f32.mrb[234].mxu0  ;;  %v12354_v34 = vpop.f32.mrb[206].mxu1  ;;  %v12882_v58 = vrot.slane %v36875_v61, %v33729_v29  ;;  %v12894_v35 = vrot.slane %v36875_v61, %v33756_v60 }
0x10cc   : > { %v12524_v63 = vcombine.low %v12515_v45, %v12522_v50  ;;  %v12414_v31 = vmax.f32 %v12310_v40, 0.0  ;;  %v12416_v27 = vmax.f32 %v12351_v41, 0.0  ;;  %v12314_v36 = vpop.f32.mrb[235].mxu0  ;;  %v12355_v7 = vpop.f32.mrb[207].mxu1 }
0x10cd   : > { %v12415_v6 = vmax.f32 %v12312_v5, 0.0  ;;  %v12417_v53 = vmax.f32 %v12353_v37, 0.0  ;;  %v12641_v45 = vld [vmem:[#allocation16 + $0x47] ss:$8 sm:$0xf] }
0x10ce   : > { %v12538_v30 = vrot.slane %v12524_v63, %v35428_v56  ;;  %v12642_v50 = vld [vmem:[#allocation16 + $0x47] ss:$8 sm:$0xf0] }
0x10cf   : > { %v12540_v11 = vcombine.low %v12414_v31, %v12415_v6  ;;  %v12541_v19 = vcombine.low %v12416_v27, %v12417_v53  ;;  %v36896_v5 = vor.u32 %v12642_v50, %v12641_v45 }
0x10d0   : > { %v12539_v13 = vcombine.low %v12531_v16, %v12538_v30 }
0x10d1   : > { %v12549_v38 = vrot.slane %v12540_v11, %v35428_v56  ;;  %v12556_v26 = vrot.slane %v12541_v19, %v35428_v56  ;;  %v12391_v21 = vpop.f32.mrb[236].mxu0  ;;  %v13015_v3 = vpop.f32.mrb[208].mxu1  ;;  %v12898_v19 = vrot.slane %v36875_v61, %v33697_v57  ;;  %v12922_v45 = vrot.slane %v36896_v5, %v33694_v55 }
0x10d2   : > { %12587 = vst [vmem:[#allocation2 + $0x4e] ss:$8 sm:$0xf] %v12539_v13  ;;  %12588 = vst [vmem:[#allocation2 + $0x4e] ss:$8 sm:$0xf0] %v12539_v13  ;;  %v12392_v2 = vadd.f32 %v12391_v21, %v11920_v9  ;;  %v13016_v24 = vadd.f32 %v13015_v3, %v12874_v4  ;;  %v12910_v21 = vrot.slane %v36896_v5, %v33680_v46 }
0x10d3   : > { %v12393_v12 = vpop.f32.mrb[237].mxu0  ;;  %v12564_v39 = vcombine.low %v12549_v38, %v12556_v26  ;;  %v13017_v48 = vpop.f32.mrb[209].mxu1  ;;  %v12902_v38 = vrot.slane %v36875_v61, %v33700_v62  ;;  %v12918_v50 = vrot.slane %v36896_v5, %v33683_v47 }
0x10d4   : > { %v12394_v18 = vadd.f32 %v12393_v12, %v11924_v32  ;;  %v12395_v23 = vpop.f32.mrb[238].mxu0  ;;  %v12418_v49 = vmax.f32 %v12392_v2, 0.0  ;;  %v13018_v22 = vadd.f32 %v13017_v48, %v12878_v52  ;;  %v13019_v20 = vpop.f32.mrb[210].mxu1  ;;  %v13432_v0 = vmax.f32 %v13016_v24, 0.0 }
0x10d5   : > { %v12396_v1 = vpop.f32.mrb[239].mxu0  ;;  %v13020_v8 = vpop.f32.mrb[211].mxu1  ;;  %v12571_v37 = vrot.slane %v12564_v39, %v35428_v56  ;;  %v12906_v52 = vrot.slane %v36896_v5, %v33675_v44 }
0x10d6   : > { %v12419_v25 = vmax.f32 %v12394_v18, 0.0  ;;  %v13433_v54 = vmax.f32 %v13018_v22, 0.0 }
0x10d8   : > { %v12542_v10 = vcombine.low %v12418_v49, %v12419_v25  ;;  %v13476_v17 = vcombine.low %v13432_v0, %v13433_v54 }
0x10d9   : > { %v13056_v41 = vpop.f32.mrb[240].mxu0  ;;  %v13097_v43 = vpop.f32.mrb[212].mxu1 }
0x10da   : > { %v12563_v40 = vrot.slane %v12542_v10, %v35428_v56  ;;  %v13057_v59 = vadd.f32 %v13056_v41, %v12882_v58  ;;  %v13058_v63 = vpop.f32.mrb[241].mxu0  ;;  %v13098_v34 = vadd.f32 %v13097_v43, %v12890_v28  ;;  %v13099_v27 = vpop.f32.mrb[213].mxu1  ;;  %v13486_v2 = vrot.slane %v13476_v17, %v35428_v56  ;;  %v12646_v41 = vld [vmem:[#allocation16 + $0x87] ss:$8 sm:$0x30] }
0x10db   : > { %v13059_v31 = vadd.f32 %v13058_v63, %v12886_v33  ;;  %v13060_v36 = vpop.f32.mrb[242].mxu0  ;;  %v13100_v16 = vadd.f32 %v13099_v27, %v12894_v35  ;;  %v13101_v30 = vpop.f32.mrb[214].mxu1  ;;  %v12914_v28 = vrot.slane %v36896_v5, %v33729_v29  ;;  %v12926_v35 = vrot.slane %v36896_v5, %v33756_v60 }
0x10dc   : > { %v12578_v15 = vrot.slane %v12563_v40, %v35428_v56  ;;  %v13434_v7 = vmax.f32 %v13057_v59, 0.0  ;;  %v13061_v6 = vpop.f32.mrb[243].mxu0  ;;  %v13436_v9 = vmax.f32 %v13098_v34, 0.0  ;;  %v13102_v13 = vpop.f32.mrb[215].mxu1 }
0x10dd   : > { %v13435_v4 = vmax.f32 %v13059_v31, 0.0  ;;  %v13437_v11 = vmax.f32 %v13100_v16, 0.0  ;;  %v12645_v40 = vld [vmem:[#allocation16 + $0x87] ss:$8 sm:$0xf] }
0x10de   : > { %v12579_v53 = vcombine.low %v12571_v37, %v12578_v15  ;;  %v12647_v30 = vor.u32 %v12646_v41, %v12645_v40 }
0x10df   : > { %v13477_v32 = vcombine.low %v13434_v7, %v13435_v4  ;;  %v13478_v26 = vcombine.low %v13436_v9, %v13437_v11 }
0x10e0   : > { %12590 = vst.msk [vmem:[#allocation2 + $0x8e] ss:$8 sm:$0xf] %vm35919_vm5, %v12579_v53  ;;  %12591 = vst.msk [vmem:[#allocation2 + $0x8e] ss:$8 sm:$0x30] %vm35919_vm5, %v12579_v53  ;;  %v12954_v40 = vrot.slane %v12647_v30, %v33694_v55  ;;  %v12950_v41 = vrot.slane %v12647_v30, %v33683_v47 }
0x10e1   : > { %v13493_v3 = vrot.slane %v13477_v32, %v35428_v56  ;;  %v13138_v12 = vpop.f32.mrb[244].mxu0  ;;  %v13179_v24 = vpop.f32.mrb[216].mxu1  ;;  %v13500_v59 = vrot.slane %v13478_v26, %v35428_v56  ;;  %v12930_v26 = vrot.slane %v36896_v5, %v33697_v57 }
0x10e2   : > { %v13139_v39 = vadd.f32 %v13138_v12, %v12898_v19  ;;  %v13140_v18 = vpop.f32.mrb[245].mxu0  ;;  %v13180_v23 = vadd.f32 %v13179_v24, %v12906_v52  ;;  %v13181_v22 = vpop.f32.mrb[217].mxu1  ;;  %v12934_v12 = vrot.slane %v36896_v5, %v33700_v62  ;;  %v12942_v24 = vrot.slane %v12647_v30, %v33680_v46 }
0x10e3   : > { %v13508_v48 = vcombine.low %v13486_v2, %v13493_v3  ;;  %v13141_v49 = vadd.f32 %v13140_v18, %v12902_v38  ;;  %v13142_v20 = vpop.f32.mrb[246].mxu0  ;;  %v13182_v0 = vadd.f32 %v13181_v22, %v12910_v21  ;;  %v13183_v61 = vpop.f32.mrb[218].mxu1  ;;  %v12938_v3 = vrot.slane %v12647_v30, %v33675_v44 }
0x10e4   : > { %v13438_v1 = vmax.f32 %v13139_v39, 0.0  ;;  %v13143_v25 = vpop.f32.mrb[247].mxu0  ;;  %v13440_v8 = vmax.f32 %v13180_v23, 0.0  ;;  %v13184_v58 = vpop.f32.mrb[219].mxu1 }
0x10e5   : > { %v13439_v54 = vmax.f32 %v13141_v49, 0.0  ;;  %v13441_v10 = vmax.f32 %v13182_v0, 0.0  ;;  %v13516_v13 = vrot.slane %v13508_v48, %v35428_v56 }
0x10e7   : > { %v13479_v33 = vcombine.low %v13438_v1, %v13439_v54  ;;  %v13525_v17 = vcombine.low %v13440_v8, %v13441_v10 }
0x10e9   : > { %v13507_v43 = vrot.slane %v13479_v33, %v35428_v56  ;;  %v13220_v63 = vpop.f32.mrb[248].mxu0  ;;  %v13261_v15 = vpop.f32.mrb[220].mxu1  ;;  %v13535_v18 = vrot.slane %v13525_v17, %v35428_v56  ;;  %v12946_v17 = vrot.slane %v12647_v30, %v33729_v29 }
0x10ea   : > { %v13221_v37 = vadd.f32 %v13220_v63, %v12914_v28  ;;  %v13222_v34 = vpop.f32.mrb[249].mxu0  ;;  %v13262_v27 = vadd.f32 %v13261_v15, %v12922_v45  ;;  %v13263_v7 = vpop.f32.mrb[221].mxu1 }
0x10eb   : > { %v13509_v31 = vcombine.low %v13500_v59, %v13507_v43  ;;  %v13223_v36 = vadd.f32 %v13222_v34, %v12918_v50  ;;  %v13224_v16 = vpop.f32.mrb[250].mxu0  ;;  %v13264_v53 = vadd.f32 %v13263_v7, %v12926_v35  ;;  %v13265_v9 = vpop.f32.mrb[222].mxu1 }
0x10ec   : > { %v13442_v6 = vmax.f32 %v13221_v37, 0.0  ;;  %v13225_v4 = vpop.f32.mrb[251].mxu0  ;;  %v13444_v19 = vmax.f32 %v13262_v27, 0.0  ;;  %v13266_v52 = vpop.f32.mrb[223].mxu1  ;;  %v12958_v37 = vrot.slane %v12647_v30, %v33756_v60 }
0x10ed   : > { %v13523_v11 = vrot.slane %v13509_v31, %v35428_v56  ;;  %v13443_v32 = vmax.f32 %v13223_v36, 0.0  ;;  %v13445_v38 = vmax.f32 %v13264_v53, 0.0 }
0x10ef   : > { %v13524_v21 = vcombine.low %v13516_v13, %v13523_v11  ;;  %v13526_v2 = vcombine.low %v13442_v6, %v13443_v32  ;;  %v13527_v39 = vcombine.low %v13444_v19, %v13445_v38 }
0x10f1   : > { %13618 = vst [vmem:[#allocation2 + $0xf] ss:$8 sm:$0xf] %v13524_v21  ;;  %13619 = vst [vmem:[#allocation2 + $0xf] ss:$8 sm:$0xf0] %v13524_v21  ;;  %v13542_v48 = vrot.slane %v13526_v2, %v35428_v56  ;;  %v13549_v15 = vrot.slane %v13527_v39, %v35428_v56 }
0x10f2   : > { %v13302_v23 = vpop.f32.mrb[252].mxu0  ;;  %v13343_v22 = vpop.f32.mrb[224].mxu1 }
0x10f3   : > { %v13303_v49 = vadd.f32 %v13302_v23, %v12930_v26  ;;  %v13304_v20 = vpop.f32.mrb[253].mxu0  ;;  %v13557_v1 = vcombine.low %v13535_v18, %v13542_v48  ;;  %v13344_v0 = vadd.f32 %v13343_v22, %v12938_v3  ;;  %v13345_v25 = vpop.f32.mrb[225].mxu1 }
0x10f4   : > { %v13305_v61 = vadd.f32 %v13304_v20, %v12934_v12  ;;  %v13306_v8 = vpop.f32.mrb[254].mxu0  ;;  %v13346_v5 = vadd.f32 %v13345_v25, %v12942_v24  ;;  %v13347_v58 = vpop.f32.mrb[226].mxu1 }
0x10f5   : > { %v13446_v54 = vmax.f32 %v13303_v49, 0.0  ;;  %v13307_v10 = vpop.f32.mrb[255].mxu0  ;;  %v13448_v28 = vmax.f32 %v13344_v0, 0.0  ;;  %v13348_v45 = vpop.f32.mrb[227].mxu1  ;;  %v13565_v38 = vrot.slane %v13557_v1, %v35428_v56 }
0x10f6   : > { %v13447_v33 = vmax.f32 %v13305_v61, 0.0  ;;  %v13449_v50 = vmax.f32 %v13346_v5, 0.0 }
0x10f8   : > { %v13528_v35 = vcombine.low %v13446_v54, %v13447_v33  ;;  %v13574_v59 = vcombine.low %v13448_v28, %v13449_v50  ;;  %v36937_v43 = vld [vmem:[#allocation2 + $0x10] sm:$0xff]  ;;  %v36939_v63 = vld [vmem:[#allocation2 + $0x8] sm:$0xff]  ;;  %v36948_v32 = vld [vmem:[#allocation2 + $0x18] sm:$0xff] }
0x10f9   : > { %v13384_v31 = vpop.f32.mrb[0].mxu0  ;;  %13684 = vrot.lane.b32.xlu1 %v36937_v43, %s33067_s23  ;;  %13682 = vrot.lane.b32.xlu0 %v36939_v63, %s33067_s23  ;;  %v13425_v36 = vpop.f32.mrb[228].mxu1  ;;  %v36950_v52 = vld [vmem:[#allocation2 + $0x20] sm:$0xff]  ;;  %v36958_v48 = vld [vmem:[#allocation2 + $0x38] sm:$0xff]  ;;  %v36969_v0 = vld [vmem:[#allocation2 + $0x30] sm:$0xff] }
0x10fa   : > { %v13556_v34 = vrot.slane %v13528_v35, %v35428_v56  ;;  %v13385_v27 = vadd.f32 %v13384_v31, %v12946_v17  ;;  %v13386_v7 = vpop.f32.mrb[1].mxu0  ;;  %v13426_v6 = vadd.f32 %v13425_v36, %v12954_v40  ;;  %v13427_v9 = vpop.f32.mrb[229].mxu1  ;;  %v36960_v23 = vld [vmem:[#allocation2 + $0x40] sm:$0xff]  ;;  %v13583_v49 = vrot.slane %v13574_v59, %v35428_v56  ;;  %v36993_v51 = vld [vmem:[#allocation2 + $0x28] sm:$0xff] }
0x10fb   : > { %v13387_v53 = vadd.f32 %v13386_v7, %v12950_v41  ;;  %v13388_v4 = vpop.f32.mrb[2].mxu0  ;;  %v13428_v13 = vadd.f32 %v13427_v9, %v12958_v37  ;;  %v13429_v11 = vpop.f32.mrb[230].mxu1  ;;  %40113 = vst [vmem:[#allocation32_spill] sm:$0xff] %v36993_v51  ;;  %v37114_v31 = vld [vmem:[%s40116_s15 + $0x8] sm:$0xff] }
0x10fc   : > { %v13558_v16 = vcombine.low %v13549_v15, %v13556_v34  ;;  %v13450_v30 = vmax.f32 %v13385_v27, 0.0  ;;  %v13389_v19 = vpop.f32.mrb[3].mxu0  ;;  %v13452_v21 = vmax.f32 %v13426_v6, 0.0  ;;  %v13430_v3 = vpop.f32.mrb[231].mxu1  ;;  %v37124_v6 = vld [vmem:[#allocation2] sm:$0xff] }
0x10fd   : > { %v13451_v2 = vmax.f32 %v13387_v53, 0.0  ;;  %13686 = vrot.lane.b32.xlu1 %v36948_v32, %s33067_s23  ;;  %13688 = vrot.lane.b32.xlu0 %v36950_v52, %s33067_s23  ;;  %v13453_v12 = vmax.f32 %v13428_v13, 0.0  ;;  %v13681_v17 = vpop.permute.xlu1 %13680  ;;  %v37099_v41 = vpop.permute.xlu0 %16368 }
0x10fe   : > { %v13572_v26 = vrot.slane %v13558_v16, %v35428_v56 }
0x10ff   : > { %v13575_v24 = vcombine.low %v13450_v30, %v13451_v2  ;;  %v13576_v18 = vcombine.low %v13452_v21, %v13453_v12 }
0x1100   : > { %v13573_v39 = vcombine.low %v13565_v38, %v13572_v26 }
0x1101   : > { %v13590_v22 = vrot.slane %v13575_v24, %v35428_v56  ;;  %13694 = vrot.lane.b32.xlu1 %v36958_v48, %s33067_s23  ;;  %13696 = vrot.lane.b32.xlu0 %v36960_v23, %s33067_s23  ;;  %v13597_v20 = vrot.slane %v13576_v18, %v35428_v56  ;;  %v37087_v35 = vpop.permute.xlu1 %14552 }
0x1102   : > { %13621 = vst [vmem:[#allocation2 + $0x4f] ss:$8 sm:$0xf] %v13573_v39  ;;  %13622 = vst [vmem:[#allocation2 + $0x4f] ss:$8 sm:$0xf0] %v13573_v39 }
0x1103   : > { %v13598_v1 = vcombine.low %v13583_v49, %v13590_v22  ;;  %v13612_v25 = vrot.slane %v13597_v20, %v35428_v56 }
0x1105   : > { %v13605_v61 = vrot.slane %v13598_v1, %v35428_v56  ;;  %13692 = vrot.lane.b32.xlu1 %v36969_v0, %s33067_s23  ;;  %14556 = vrot.lane.b32.xlu0 %v36937_v43, %s33068_s2  ;;  %v37097_v40 = vpop.permute.xlu1 %15426 }
0x1107   : > { %v13613_v8 = vcombine.low %v13605_v61, %v13612_v25 }
0x1109   : > { %13624 = vst.msk [vmem:[#allocation2 + $0x8f] ss:$8 sm:$0xf] %vm35919_vm5, %v13613_v8  ;;  %13625 = vst.msk [vmem:[#allocation2 + $0x8f] ss:$8 sm:$0x30] %vm35919_vm5, %v13613_v8  ;;  %14554 = vrot.lane.b32.xlu1 %v36939_v63, %s33068_s2  ;;  %14558 = vrot.lane.b32.xlu0 %v36948_v32, %s33068_s2 }
0x110a   : > { %v37035_v54 = vld [vmem:[#allocation2 + $0x60] sm:$0xff]  ;;  %v37037_v5 = vld [vmem:[#allocation2 + $0x58] sm:$0xff]  ;;  %v37045_v10 = vld [vmem:[#allocation2 + $0x50] sm:$0xff] }
0x110b   : > { %40114 = vst [vmem:[#allocation33_spill] sm:$0xff] %v37035_v54  ;;  %v37043_v58 = vld [vmem:[#allocation2 + $0x78] sm:$0xff]  ;;  %v37051_v28 = vld [vmem:[#allocation2 + $0x70] sm:$0xff]  ;;  %v37053_v33 = vld [vmem:[#allocation2 + $0x80] sm:$0xff] }
0x110c   : > { %v37067_v45 = vld [vmem:[#allocation2 + $0x48] sm:$0xff] }
0x110d   : > { %14560 = vrot.lane.b32.xlu1 %v36950_v52, %s33068_s2  ;;  %14566 = vrot.lane.b32.xlu0 %v36958_v48, %s33068_s2  ;;  %40115 = vst [vmem:[#allocation34_spill] sm:$0xff] %v37067_v45  ;;  %v37073_v50 = vld [vmem:[#allocation2 + $0x68] sm:$0xff] }
0x1110   : > { %v37151_v26 = vld [vmem:[#allocation2 + $0xa0] sm:$0xff]  ;;  %v37153_v21 = vld [vmem:[#allocation2 + $0x98] sm:$0xff]  ;;  %v37164_v12 = vld [vmem:[#allocation2 + $0x90] sm:$0xff] }
0x1111   : > { %14568 = vrot.lane.b32.xlu1 %v36960_v23, %s33068_s2  ;;  %14564 = vrot.lane.b32.xlu0 %v36969_v0, %s33068_s2 }
0x1115   : > { %15428 = vrot.lane.b32.xlu1 %v36939_v63, %s33070_s22  ;;  %13690 = vrot.lane.b32.xlu0 %v36993_v51, %s33067_s23 }
0x1119   : > { %15432 = vrot.lane.b32.xlu1 %v36948_v32, %s33070_s22  ;;  %15430 = vrot.lane.b32.xlu0 %v36937_v43, %s33070_s22 }
0x111d   : > { %15440 = vrot.lane.b32.xlu1 %v36958_v48, %s33070_s22  ;;  %15434 = vrot.lane.b32.xlu0 %v36950_v52, %s33070_s22 }
0x1121   : > { %14562 = vrot.lane.b32.xlu1 %v36993_v51, %s33068_s2  ;;  %15442 = vrot.lane.b32.xlu0 %v36960_v23, %s33070_s22 }
0x1125   : > { %16372 = vrot.lane.b32.xlu1 %v36937_v43, %s33069_s24  ;;  %15438 = vrot.lane.b32.xlu0 %v36969_v0, %s33070_s22 }
0x1129   : > { %16374 = vrot.lane.b32.xlu1 %v36948_v32, %s33069_s24  ;;  %16370 = vrot.lane.b32.xlu0 %v36939_v63, %s33069_s24 }
0x112d   : > { %16382 = vrot.lane.b32.xlu1 %v36958_v48, %s33069_s24  ;;  %16376 = vrot.lane.b32.xlu0 %v36950_v52, %s33069_s24 }
0x1131   : > { %16380 = vrot.lane.b32.xlu1 %v36969_v0, %s33069_s24  ;;  %15436 = vrot.lane.b32.xlu0 %v36993_v51, %s33070_s22 }
0x1135   : > { %16378 = vrot.lane.b32.xlu1 %v36993_v51, %s33069_s24  ;;  %16384 = vrot.lane.b32.xlu0 %v36960_v23, %s33069_s24 }
0x1139   : > { %18077 = vrot.lane.b32.xlu1 %v36937_v43, %s33071_s5  ;;  %18079 = vrot.lane.b32.xlu0 %v36948_v32, %s33071_s5 }
0x113d   : > { %13704 = vrot.lane.b32.xlu1 %v37035_v54, %s33067_s23  ;;  %13702 = vrot.lane.b32.xlu0 %v37037_v5, %s33067_s23 }
0x1141   : > { %13710 = vrot.lane.b32.xlu1 %v37043_v58, %s33067_s23  ;;  %13700 = vrot.lane.b32.xlu0 %v37045_v10, %s33067_s23 }
0x1145   : > { %13708 = vrot.lane.b32.xlu1 %v37051_v28, %s33067_s23  ;;  %13712 = vrot.lane.b32.xlu0 %v37053_v33, %s33067_s23 }
0x1149   : > { %14574 = vrot.lane.b32.xlu1 %v37037_v5, %s33068_s2  ;;  %14576 = vrot.lane.b32.xlu0 %v37035_v54, %s33068_s2 }
0x114d   : > { %14572 = vrot.lane.b32.xlu1 %v37045_v10, %s33068_s2  ;;  %14584 = vrot.lane.b32.xlu0 %v37053_v33, %s33068_s2 }
0x1151   : > { %14582 = vrot.lane.b32.xlu1 %v37043_v58, %s33068_s2  ;;  %13698 = vrot.lane.b32.xlu0 %v37067_v45, %s33067_s23 }
0x1155   : > { %14580 = vrot.lane.b32.xlu1 %v37051_v28, %s33068_s2  ;;  %13706 = vrot.lane.b32.xlu0 %v37073_v50, %s33067_s23 }
0x1159   : > { %15450 = vrot.lane.b32.xlu1 %v37035_v54, %s33070_s22  ;;  %15448 = vrot.lane.b32.xlu0 %v37037_v5, %s33070_s22 }
0x115d   : > { %14570 = vrot.lane.b32.xlu1 %v37067_v45, %s33068_s2  ;;  %15446 = vrot.lane.b32.xlu0 %v37045_v10, %s33070_s22 }
0x1161   : > { %15458 = vrot.lane.b32.xlu1 %v37053_v33, %s33070_s22  ;;  %15456 = vrot.lane.b32.xlu0 %v37043_v58, %s33070_s22 }
0x1165   : > { %14578 = vrot.lane.b32.xlu1 %v37073_v50, %s33068_s2  ;;  %15454 = vrot.lane.b32.xlu0 %v37051_v28, %s33070_s22 }
0x1169   : > { %16390 = vrot.lane.b32.xlu1 %v37037_v5, %s33069_s24  ;;  %15444 = vrot.lane.b32.xlu0 %v37067_v45, %s33070_s22 }
0x116b   : > { %v13685_v59 = vpop.permute.xlu1 %13684  ;;  %v13683_v37 = vpop.permute.xlu0 %13682 }
0x116c   : > { %v13726_v15 = vsel %vm13724_vm6, %v13683_v37, %v13685_v59  ;;  %v13725_v34 = vsel %vm13724_vm6, %v13681_v17, %v13683_v37 }
0x116d   : > { %16388 = vrot.lane.b32.xlu1 %v37045_v10, %s33069_s24  ;;  %16392 = vrot.lane.b32.xlu0 %v37035_v54, %s33069_s24 }
0x116e   : > { %13771 = vmatprep.subr.mxu0 %v13726_v15 }
0x116f   : > { %13772 = vmatpush1.msra.mxu0 %v13725_v34  ;;  %v13687_v27 = vpop.permute.xlu1 %13686  ;;  %v13689_v36 = vpop.permute.xlu0 %13688 }
0x1170   : > { %v13728_v7 = vsel %vm13724_vm6, %v13687_v27, %v13689_v36  ;;  %31296 = vmatmul.mubr.msk.f32.vlgmr.msra.gmra.mrb[6].mxu0 %vm1016_vm3, %v37114_v31  ;;  %v13727_v16 = vsel %vm13724_vm6, %v13685_v59, %v13687_v27 }
0x1171   : > { %16398 = vrot.lane.b32.xlu1 %v37043_v58, %s33069_s24  ;;  %15452 = vrot.lane.b32.xlu0 %v37073_v50, %s33070_s22 }
0x1172   : > { %13842 = vmatprep.subr.mxu0 %v13728_v7  ;;  %13906 = vmatprep.mubr.f32.mxu0 %v37124_v6 }
0x1173   : > { %13843 = vmatpush1.msra.mxu0 %v13727_v16  ;;  %v13695_v53 = vpop.permute.xlu1 %13694  ;;  %v37127_v9 = vpop.permute.xlu0 %13696 }
0x1174   : > { %v13732_v4 = vsel %vm13724_vm6, %v13695_v53, %v37127_v9  ;;  %31297 = vmatmul.mubr.msk.f32.vlgmr.msra.gmra.mrb[4].mxu0 %vm1016_vm3, %v37114_v31 }
0x1175   : > { %16396 = vrot.lane.b32.xlu1 %v37051_v28, %s33069_s24  ;;  %16400 = vrot.lane.b32.xlu0 %v37053_v33, %s33069_s24 }
0x1176   : > { %13984 = vmatprep.subr.mxu0 %v13732_v4  ;;  %14048 = vmatprep.mubr.f32.mxu0 %v37124_v6 }
0x1177   : > { %v13693_v30 = vpop.permute.xlu1 %13692  ;;  %v37138_v13 = vpop.permute.xlu0 %14556 }
0x1178   : > { %v13731_v11 = vsel %vm13724_vm6, %v13693_v30, %v13695_v53 }
0x1179   : > { %16394 = vrot.lane.b32.xlu1 %v37073_v50, %s33069_s24  ;;  %16386 = vrot.lane.b32.xlu0 %v37067_v45, %s33069_s24 }
0x117a   : > { %13985 = vmatpush1.msra.mxu0 %v13731_v11 }
0x117b   : > { %v37145_v19 = vpop.permute.xlu1 %14554  ;;  %v37147_v38 = vpop.permute.xlu0 %14558  ;;  %31299 = vmatmul.mubr.msk.f32.vlgmr.msra.gmra.mrb[8].mxu0 %vm1016_vm3, %v37114_v31 }
0x117c   : > { %14190 = vmatprep.mubr.f32.mxu0 %v37124_v6 }
0x117d   : > { %13720 = vrot.lane.b32.xlu1 %v37151_v26, %s33067_s23  ;;  %13718 = vrot.lane.b32.xlu0 %v37153_v21, %s33067_s23 }
0x117f   : > { %v37160_v2 = vpop.permute.xlu1 %14560  ;;  %v37162_v3 = vpop.permute.xlu0 %14566 }
0x1181   : > { %18075 = vrot.lane.b32.xlu1 %v36939_v63, %s33071_s5  ;;  %13716 = vrot.lane.b32.xlu0 %v37164_v12, %s33067_s23 }
0x1183   : > { %v37170_v39 = vpop.permute.xlu1 %14568  ;;  %v37172_v24 = vpop.permute.xlu0 %14564 }
0x1185   : > { %18083 = vrot.lane.b32.xlu1 %v36993_v51, %s33071_s5  ;;  %18081 = vrot.lane.b32.xlu0 %v36950_v52, %s33071_s5 }
0x1187   : > { %v37178_v18 = vpop.permute.xlu1 %15428  ;;  %v13691_v49 = vpop.permute.xlu0 %13690 }
0x1188   : > { %v13730_v22 = vsel %vm13724_vm6, %v13691_v49, %v13693_v30  ;;  %v13729_v20 = vsel %vm13724_vm6, %v13689_v36, %v13691_v49  ;;  %v37225_v36 = vld [vmem:[#allocation2 + $0x88] sm:$0xff] }
0x1189   : > { %18091 = vrot.lane.b32.xlu1 %v37067_v45, %s33071_s5  ;;  %18089 = vrot.lane.b32.xlu0 %v36960_v23, %s33071_s5  ;;  %v37243_v30 = vld [vmem:[#allocation2 + $0xa8] sm:$0xff] }
0x118a   : > { %13913 = vmatprep.subr.mxu1 %v13730_v22 }
0x118b   : > { %13914 = vmatpush1.msra.mxu1 %v13729_v20  ;;  %v37186_v1 = vpop.permute.xlu1 %15432  ;;  %v37188_v61 = vpop.permute.xlu0 %15430 }
0x118c   : > { %31298 = vmatmul.mubr.msk.f32.vlgmr.msra.gmra.mrb[232].mxu1 %vm1016_vm3, %v37114_v31 }
0x118d   : > { %18097 = vrot.lane.b32.xlu1 %v37035_v54, %s33071_s5  ;;  %18087 = vrot.lane.b32.xlu0 %v36958_v48, %s33071_s5 }
0x118e   : > { %14119 = vmatprep.mubr.f32.mxu1 %v37124_v6 }
0x118f   : > { %v37197_v25 = vpop.permute.xlu1 %15440  ;;  %v37199_v8 = vpop.permute.xlu0 %15434 }
0x1191   : > { %18095 = vrot.lane.b32.xlu1 %v37037_v5, %s33071_s5  ;;  %18099 = vrot.lane.b32.xlu0 %v37073_v50, %s33071_s5 }
0x1193   : > { %v37205_v17 = vpop.permute.xlu1 %14562  ;;  %v37207_v59 = vpop.permute.xlu0 %15442 }
0x1195   : > { %14590 = vrot.lane.b32.xlu1 %v37153_v21, %s33068_s2  ;;  %14592 = vrot.lane.b32.xlu0 %v37151_v26, %s33068_s2 }
0x1197   : > { %v37213_v37 = vpop.permute.xlu1 %16372  ;;  %v37215_v15 = vpop.permute.xlu0 %15438 }
0x1199   : > { %14588 = vrot.lane.b32.xlu1 %v37164_v12, %s33068_s2  ;;  %18105 = vrot.lane.b32.xlu0 %v37053_v33, %s33071_s5 }
0x119b   : > { %v37221_v34 = vpop.permute.xlu1 %16374  ;;  %v37223_v27 = vpop.permute.xlu0 %16370 }
0x119c   : > { %40117 = vst [vmem:[#allocation35_spill] sm:$0xff] %v37221_v34 }
0x119d   : > { %18085 = vrot.lane.b32.xlu1 %v36969_v0, %s33071_s5  ;;  %13714 = vrot.lane.b32.xlu0 %v37225_v36, %s33067_s23 }
0x119f   : > { %v37231_v7 = vpop.permute.xlu1 %16382  ;;  %v37233_v16 = vpop.permute.xlu0 %16376 }
0x11a0   : > { %40118 = vst [vmem:[#allocation36_spill] sm:$0xff] %v37231_v7  ;;  %40119 = vst [vmem:[#allocation37_spill] sm:$0xff] %v37233_v16  ;;  %v37365_v7 = vld [vmem:[#allocation2 + $0xb0] sm:$0xff] }
0x11a1   : > { %18093 = vrot.lane.b32.xlu1 %v37045_v10, %s33071_s5  ;;  %18103 = vrot.lane.b32.xlu0 %v37043_v58, %s33071_s5 }
0x11a3   : > { %v37239_v53 = vpop.permute.xlu1 %16380  ;;  %v37241_v4 = vpop.permute.xlu0 %15436 }
0x11a4   : > { %40120 = vst [vmem:[#allocation38_spill] sm:$0xff] %v37239_v53  ;;  %40121 = vst [vmem:[#allocation39_spill] sm:$0xff] %v37241_v4 }
0x11a5   : > { %13722 = vrot.lane.b32.xlu1 %v37243_v30, %s33067_s23  ;;  %18973 = vrot.lane.b32.xlu0 %v36937_v43, %s40052_s27 }
0x11a7   : > { %v37249_v11 = vpop.permute.xlu1 %16378  ;;  %v37251_v49 = vpop.permute.xlu0 %16384 }
0x11a8   : > { %40122 = vst [vmem:[#allocation40_spill] sm:$0xff] %v37249_v11  ;;  %40123 = vst [vmem:[#allocation41_spill] sm:$0xff] %v37251_v49 }
0x11a9   : > { %18975 = vrot.lane.b32.xlu1 %v36948_v32, %s40052_s27  ;;  %18971 = vrot.lane.b32.xlu0 %v36939_v63, %s40052_s27 }
0x11ab   : > { %v37257_v22 = vpop.permute.xlu1 %18077  ;;  %v37259_v20 = vpop.permute.xlu0 %18079 }
0x11ac   : > { %40124 = vst [vmem:[#allocation42_spill] sm:$0xff] %v37257_v22  ;;  %40125 = vst [vmem:[#allocation43_spill] sm:$0xff] %v37259_v20 }
0x11ad   : > { %15466 = vrot.lane.b32.xlu1 %v37151_v26, %s33070_s22  ;;  %15464 = vrot.lane.b32.xlu0 %v37153_v21, %s33070_s22 }
0x11af   : > { %v13705_v42 = vpop.permute.xlu1 %13704  ;;  %v13703_v14 = vpop.permute.xlu0 %13702 }
0x11b0   : > { %v13736_v56 = vsel %vm13724_vm6, %v13703_v14, %v13705_v42 }
0x11b1   : > { %15462 = vrot.lane.b32.xlu0 %v37164_v12, %s33070_s22  ;;  %14586 = vrot.lane.b32.xlu1 %v37225_v36, %s33068_s2 }
0x11b2   : > { %14126 = vmatprep.subr.mxu0 %v13736_v56 }
0x11b3   : > { %v13711_v62 = vpop.permute.xlu1 %13710  ;;  %v13701_v57 = vpop.permute.xlu0 %13700 }
0x11b4   : > { %v13735_v60 = vsel %vm13724_vm6, %v13701_v57, %v13703_v14 }
0x11b5   : > { %18977 = vrot.lane.b32.xlu0 %v36950_v52, %s40052_s27  ;;  %18101 = vrot.lane.b32.xlu1 %v37051_v28, %s33071_s5 }
0x11b6   : > { %14127 = vmatpush1.msra.mxu0 %v13735_v60 }
0x11b7   : > { %v13709_v55 = vpop.permute.xlu1 %13708  ;;  %v37275_v47 = vpop.permute.xlu0 %13712  ;;  %31301 = vmatmul.mubr.msk.f32.vlgmr.msra.gmra.mrb[10].mxu0 %vm1016_vm3, %v37114_v31 }
0x11b8   : > { %v13740_v56 = vsel %vm13724_vm6, %v13711_v62, %v37275_v47  ;;  %v13739_v29 = vsel %vm13724_vm6, %v13709_v55, %v13711_v62  ;;  %14332 = vmatprep.mubr.f32.mxu0 %v37124_v6 }
0x11b9   : > { %14594 = vrot.lane.b32.xlu1 %v37243_v30, %s33068_s2  ;;  %18987 = vrot.lane.b32.xlu0 %v37067_v45, %s40052_s27 }
0x11ba   : > { %14268 = vmatprep.subr.mxu0 %v13740_v56 }
0x11bb   : > { %14269 = vmatpush1.msra.mxu0 %v13739_v29  ;;  %v37287_v14 = vpop.permute.xlu1 %14574  ;;  %v37289_v60 = vpop.permute.xlu0 %14576 }
0x11bc   : > { %31303 = vmatmul.mubr.msk.f32.vlgmr.msra.gmra.mrb[12].mxu0 %vm1016_vm3, %v37114_v31 }
0x11bd   : > { %18979 = vrot.lane.b32.xlu1 %v36993_v51, %s40052_s27  ;;  %15460 = vrot.lane.b32.xlu0 %v37225_v36, %s33070_s22 }
0x11be   : > { %14474 = vmatprep.mubr.f32.mxu0 %v37124_v6 }
0x11bf   : > { %v37298_v62 = vpop.permute.xlu1 %14572  ;;  %v37300_v46 = vpop.permute.xlu0 %14584 }
0x11c1   : > { %18985 = vrot.lane.b32.xlu1 %v36960_v23, %s40052_s27  ;;  %16408 = vrot.lane.b32.xlu0 %v37151_v26, %s33069_s24 }
0x11c3   : > { %v37306_v29 = vpop.permute.xlu1 %14582  ;;  %v13699_v56 = vpop.permute.xlu0 %13698 }
0x11c4   : > { %v13734_v44 = vsel %vm13724_vm6, %v13699_v56, %v13701_v57  ;;  %v13733_v22 = vsel %vm13724_vm6, %v37127_v9, %v13699_v56 }
0x11c5   : > { %16406 = vrot.lane.b32.xlu1 %v37153_v21, %s33069_s24  ;;  %18993 = vrot.lane.b32.xlu0 %v37035_v54, %s40052_s27 }
0x11c6   : > { %14055 = vmatprep.subr.mxu1 %v13734_v44 }
0x11c7   : > { %14056 = vmatpush1.msra.mxu1 %v13733_v22  ;;  %v37315_v20 = vpop.permute.xlu1 %14580  ;;  %v13707_v11 = vpop.permute.xlu0 %13706 }
0x11c8   : > { %v13738_v53 = vsel %vm13724_vm6, %v13707_v11, %v13709_v55  ;;  %31300 = vmatmul.mubr.msk.f32.vlgmr.msra.gmra.mrb[234].mxu1 %vm1016_vm3, %v37114_v31  ;;  %v13737_v57 = vsel %vm13724_vm6, %v13705_v42, %v13707_v11 }
0x11c9   : > { %16404 = vrot.lane.b32.xlu1 %v37164_v12, %s33069_s24  ;;  %18981 = vrot.lane.b32.xlu0 %v36969_v0, %s40052_s27 }
0x11ca   : > { %14197 = vmatprep.subr.mxu1 %v13738_v53  ;;  %14261 = vmatprep.mubr.f32.mxu1 %v37124_v6 }
0x11cb   : > { %14198 = vmatpush1.msra.mxu1 %v13737_v57  ;;  %v37326_v44 = vpop.permute.xlu1 %15450  ;;  %v37328_v9 = vpop.permute.xlu0 %15448 }
0x11cc   : > { %31302 = vmatmul.mubr.msk.f32.vlgmr.msra.gmra.mrb[236].mxu1 %vm1016_vm3, %v37114_v31 }
0x11cd   : > { %18983 = vrot.lane.b32.xlu1 %v36958_v48, %s40052_s27  ;;  %15468 = vrot.lane.b32.xlu0 %v37243_v30, %s33070_s22 }
0x11ce   : > { %14403 = vmatprep.mubr.f32.mxu1 %v37124_v6 }
0x11cf   : > { %v37337_v42 = vpop.permute.xlu1 %14570  ;;  %v37339_v55 = vpop.permute.xlu0 %15446 }
0x11d1   : > { %18995 = vrot.lane.b32.xlu1 %v37073_v50, %s40052_s27  ;;  %16402 = vrot.lane.b32.xlu0 %v37225_v36, %s33069_s24 }
0x11d3   : > { %v37345_v53 = vpop.permute.xlu1 %15458  ;;  %v37347_v11 = vpop.permute.xlu0 %15456 }
0x11d5   : > { %18991 = vrot.lane.b32.xlu1 %v37037_v5, %s40052_s27  ;;  %18989 = vrot.lane.b32.xlu0 %v37045_v10, %s40052_s27 }
0x11d7   : > { %v37353_v22 = vpop.permute.xlu1 %14578  ;;  %v37355_v56 = vpop.permute.xlu0 %15454 }
0x11d9   : > { %19001 = vrot.lane.b32.xlu1 %v37053_v33, %s40052_s27  ;;  %18997 = vrot.lane.b32.xlu0 %v37051_v28, %s40052_s27 }
0x11db   : > { %v37361_v57 = vpop.permute.xlu1 %16390  ;;  %v37363_v4 = vpop.permute.xlu0 %15444 }
0x11dc   : > { %40126 = vst [vmem:[#allocation44_spill] sm:$0xff] %v37361_v57  ;;  %40127 = vst [vmem:[#allocation45_spill] sm:$0xff] %v37363_v4 }
0x11dd   : > { %16410 = vrot.lane.b32.xlu1 %v37243_v30, %s33069_s24  ;;  %16412 = vrot.lane.b32.xlu0 %v37365_v7, %s33069_s24 }
0x11df   : > { %v37371_v49 = vpop.permute.xlu1 %16388  ;;  %v37373_v34 = vpop.permute.xlu0 %16392 }
0x11e0   : > { %40128 = vst [vmem:[#allocation46_spill] sm:$0xff] %v37371_v49  ;;  %40129 = vst [vmem:[#allocation47_spill] sm:$0xff] %v37373_v34 }
0x11e1   : > { %18999 = vrot.lane.b32.xlu1 %v37043_v58, %s40052_s27  ;;  %19871 = vrot.lane.b32.xlu0 %v36948_v32, %s40050_s4 }
0x11e3   : > { %v37379_v4 = vpop.permute.xlu1 %16398  ;;  %v37381_v57 = vpop.permute.xlu0 %15452 }
0x11e4   : > { %40130 = vst [vmem:[#allocation48_spill] sm:$0xff] %v37379_v4  ;;  %40131 = vst [vmem:[#allocation49_spill] sm:$0xff] %v37381_v57 }
0x11e5   : > { %19869 = vrot.lane.b32.xlu1 %v36937_v43, %s40050_s4  ;;  %19875 = vrot.lane.b32.xlu0 %v36993_v51, %s40050_s4  ;;  %v14598_v51 = vsel %vm14596_vm7, %v37145_v19, %v37138_v13 }
0x11e7   : > { %v37387_v49 = vpop.permute.xlu1 %16396  ;;  %v37389_v34 = vpop.permute.xlu0 %16400 }
0x11e8   : > { %40132 = vst [vmem:[#allocation50_spill] sm:$0xff] %v37387_v49  ;;  %40133 = vst [vmem:[#allocation51_spill] sm:$0xff] %v37389_v34 }
0x11e9   : > { %19867 = vrot.lane.b32.xlu1 %v36939_v63, %s40050_s4  ;;  %18113 = vrot.lane.b32.xlu0 %v37151_v26, %s33071_s5 }
0x11eb   : > { %v37395_v16 = vpop.permute.xlu1 %16394  ;;  %v37397_v4 = vpop.permute.xlu0 %16386 }
0x11ec   : > { %40134 = vst [vmem:[#allocation52_spill] sm:$0xff] %v37395_v16  ;;  %40135 = vst [vmem:[#allocation53_spill] sm:$0xff] %v37397_v4 }
0x11ed   : > { %19873 = vrot.lane.b32.xlu1 %v36950_v52, %s40050_s4  ;;  %19883 = vrot.lane.b32.xlu0 %v37067_v45, %s40050_s4 }
0x11ef   : > { %v37403_v57 = vpop.permute.xlu1 %13720  ;;  %v13719_v49 = vpop.permute.xlu0 %13718 }
0x11f0   : > { %v13744_v34 = vsel %vm13724_vm6, %v13719_v49, %v37403_v57 }
0x11f1   : > { %18107 = vrot.lane.b32.xlu1 %v37225_v36, %s33071_s5  ;;  %19879 = vrot.lane.b32.xlu0 %v36958_v48, %s40050_s4 }
0x11f2   : > { %14410 = vmatprep.subr.mxu0 %v13744_v34 }
0x11f3   : > { %v37411_v16 = vpop.permute.xlu1 %18075  ;;  %v37413_v4 = vpop.permute.xlu0 %13716 }
0x11f4   : > { %40136 = vst [vmem:[#allocation54_spill] sm:$0xff] %v37411_v16  ;;  %v13743_v45 = vsel %vm13724_vm6, %v37413_v4, %v13719_v49  ;;  %v14597_v49 = vsel %vm14596_vm7, %v37087_v35, %v37145_v19 }
0x11f5   : > { %18115 = vrot.lane.b32.xlu1 %v37243_v30, %s33071_s5  ;;  %19889 = vrot.lane.b32.xlu0 %v37035_v54, %s40050_s4  ;;  %v37440_v54 = vld [vmem:[%s40116_s15] sm:$0xff] }
0x11f6   : > { %14411 = vmatpush1.msra.mxu0 %v13743_v45  ;;  %v14600_v45 = vsel %vm14596_vm7, %v37147_v38, %v37160_v2 }
0x11f7   : > { %31305 = vmatmul.mubr.msk.f32.vlgmr.msra.gmra.mrb[14].mxu0 %vm1016_vm3, %v37114_v31  ;;  %14643 = vmatprep.subr.mxu0 %v14598_v51  ;;  %v37426_v34 = vpop.permute.xlu1 %18083  ;;  %v37431_v16 = vpop.permute.xlu0 %18081  ;;  %v14599_v51 = vsel %vm14596_vm7, %v37138_v13, %v37147_v38  ;;  %v14603_v13 = vsel %vm14596_vm7, %v37172_v24, %v37162_v3 }
0x11f8   : > { %14644 = vmatpush1.msra.mxu0 %v14597_v49  ;;  %14707 = vmatprep.mubr.f32.mxu0 %v37124_v6  ;;  %v14604_v49 = vsel %vm14596_vm7, %v37162_v3, %v37170_v39  ;;  %v14607_v3 = vsel %vm14596_vm7, %v37298_v62, %v37287_v14 }
0x11f9   : > { %14714 = vmatprep.subr.mxu0 %v14600_v45  ;;  %19881 = vrot.lane.b32.xlu1 %v36960_v23, %s40050_s4 }
0x11fa   : > { %18111 = vrot.lane.b32.xlu0 %v37153_v21, %s33071_s5 }
0x11fb   : > { %31307 = vmatmul.mubr.msk.f32.vlgmr.msra.gmra.mrb[6].mxu0 %vm1016_vm3, %v37440_v54  ;;  %v37451_v35 = vpop.permute.xlu1 %18091  ;;  %v37453_v19 = vpop.permute.xlu0 %18089 }
0x11fc   : > { %14715 = vmatpush1.msra.mxu0 %v14599_v51  ;;  %14778 = vmatprep.mubr.f32.mxu0 %v37124_v6  ;;  %v14608_v51 = vsel %vm14596_vm7, %v37287_v14, %v37289_v60  ;;  %v14611_v14 = vsel %vm14596_vm7, %v37315_v20, %v37306_v29 }
0x11fd   : > { %14856 = vmatprep.subr.mxu0 %v14604_v49  ;;  %19877 = vrot.lane.b32.xlu1 %v36969_v0, %s40050_s4 }
0x11fe   : > { %19887 = vrot.lane.b32.xlu0 %v37037_v5, %s40050_s4 }
0x11ff   : > { %31308 = vmatmul.mubr.msk.f32.vlgmr.msra.gmra.mrb[4].mxu0 %vm1016_vm3, %v37440_v54  ;;  %v37468_v38 = vpop.permute.xlu1 %18097  ;;  %v37470_v45 = vpop.permute.xlu0 %18087 }
0x1200   : > { %40137 = vst [vmem:[#allocation55_spill] sm:$0xff] %v37468_v38  ;;  %40138 = vst [vmem:[#allocation56_spill] sm:$0xff] %v37470_v45  ;;  %14857 = vmatpush1.msra.mxu0 %v14603_v13  ;;  %14920 = vmatprep.mubr.f32.mxu0 %v37124_v6 }
0x1201   : > { %14998 = vmatprep.subr.mxu0 %v14608_v51  ;;  %19891 = vrot.lane.b32.xlu1 %v37073_v50, %s40050_s4  ;;  %v14612_v51 = vsel %vm14596_vm7, %v37306_v29, %v37300_v46 }
0x1202   : > { %18109 = vrot.lane.b32.xlu0 %v37164_v12, %s33071_s5 }
0x1203   : > { %31310 = vmatmul.mubr.msk.f32.vlgmr.msra.gmra.mrb[8].mxu0 %vm1016_vm3, %v37440_v54  ;;  %v37485_v49 = vpop.permute.xlu1 %18095  ;;  %v37487_v13 = vpop.permute.xlu0 %18099 }
0x1204   : > { %40139 = vst [vmem:[#allocation57_spill] sm:$0xff] %v37485_v49  ;;  %40140 = vst [vmem:[#allocation58_spill] sm:$0xff] %v37487_v13  ;;  %14999 = vmatpush1.msra.mxu0 %v14607_v3  ;;  %15062 = vmatprep.mubr.f32.mxu0 %v37124_v6 }
0x1205   : > { %15140 = vmatprep.subr.mxu0 %v14612_v51  ;;  %19885 = vrot.lane.b32.xlu1 %v37045_v10, %s40050_s4 }
0x1206   : > { %18117 = vrot.lane.b32.xlu0 %v37365_v7, %s33071_s5 }
0x1207   : > { %31312 = vmatmul.mubr.msk.f32.vlgmr.msra.gmra.mrb[10].mxu0 %vm1016_vm3, %v37440_v54  ;;  %v14591_v3 = vpop.permute.xlu1 %14590  ;;  %v37502_v49 = vpop.permute.xlu0 %14592 }
0x1208   : > { %15141 = vmatpush1.msra.mxu0 %v14611_v14  ;;  %15204 = vmatprep.mubr.f32.mxu0 %v37124_v6  ;;  %v14616_v51 = vsel %vm14596_vm7, %v14591_v3, %v37502_v49 }
0x1209   : > { %19009 = vrot.lane.b32.xlu1 %v37151_v26, %s40052_s27  ;;  %15282 = vmatprep.subr.mxu0 %v14616_v51  ;;  %v15472_v51 = vsel %vm15470_vm8, %v37178_v18, %v37188_v61 }
0x120a   : > { %19003 = vrot.lane.b32.xlu0 %v37225_v36, %s40052_s27 }
0x120b   : > { %31314 = vmatmul.mubr.msk.f32.vlgmr.msra.gmra.mrb[12].mxu0 %vm1016_vm3, %v37440_v54  ;;  %v37513_v29 = vpop.permute.xlu1 %14588  ;;  %v37515_v38 = vpop.permute.xlu0 %18105 }
0x120c   : > { %40141 = vst [vmem:[#allocation59_spill] sm:$0xff] %v37515_v38  ;;  %v14615_v14 = vsel %vm14596_vm7, %v37513_v29, %v14591_v3  ;;  %15346 = vmatprep.mubr.f32.mxu0 %v37124_v6  ;;  %v15471_v3 = vsel %vm15470_vm8, %v37097_v40, %v37178_v18 }
0x120d   : > { %19007 = vrot.lane.b32.xlu1 %v37153_v21, %s40052_s27  ;;  %15283 = vmatpush1.msra.mxu0 %v14615_v14  ;;  %v15474_v14 = vsel %vm15470_vm8, %v37186_v1, %v37199_v8 }
0x120e   : > { %19011 = vrot.lane.b32.xlu0 %v37243_v30, %s40052_s27  ;;  %15517 = vmatprep.subr.mxu0 %v15472_v51 }
0x120f   : > { %31316 = vmatmul.mubr.msk.f32.vlgmr.msra.gmra.mrb[14].mxu0 %vm1016_vm3, %v37440_v54  ;;  %v37529_v38 = vpop.permute.xlu1 %18085  ;;  %v13715_v13 = vpop.permute.xlu0 %13714 }
0x1210   : > { %40142 = vst [vmem:[#allocation60_spill] sm:$0xff] %v37529_v38  ;;  %15518 = vmatpush1.msra.mxu0 %v15471_v3  ;;  %v13742_v45 = vsel %vm13724_vm6, %v13715_v13, %v37413_v4  ;;  %15581 = vmatprep.mubr.f32.mxu0 %v37124_v6  ;;  %v13741_v51 = vsel %vm13724_vm6, %v37275_v47, %v13715_v13  ;;  %v37545_v38 = vld [vmem:[%s40116_s15 + $0x10] sm:$0xff] }
0x1211   : > { %15588 = vmatprep.subr.mxu0 %v15474_v14  ;;  %19893 = vrot.lane.b32.xlu1 %v37051_v28, %s40050_s4  ;;  %v15473_v47 = vsel %vm15470_vm8, %v37188_v61, %v37186_v1  ;;  %v15478_v4 = vsel %vm15470_vm8, %v37197_v25, %v37207_v59  ;;  %v14606_v3 = vsel %vm14596_vm7, %v37337_v42, %v37298_v62 }
0x1212   : > { %19897 = vrot.lane.b32.xlu0 %v37053_v33, %s40050_s4  ;;  %14339 = vmatprep.subr.mxu1 %v13742_v45  ;;  %v15477_v33 = vsel %vm15470_vm8, %v37215_v15, %v37197_v25  ;;  %v14602_v25 = vsel %vm14596_vm7, %v37205_v17, %v37172_v24  ;;  %v15486_v24 = vsel %vm15470_vm8, %v37347_v11, %v37345_v53 }
0x1213   : > { %14340 = vmatpush1.msra.mxu1 %v13741_v51  ;;  %31319 = vmatmul.mubr.msk.f32.vlgmr.msra.gmra.mrb[6].mxu0 %vm1016_vm3, %v37545_v38  ;;  %v37556_v40 = vpop.permute.xlu1 %18093  ;;  %v37558_v18 = vpop.permute.xlu0 %18103  ;;  %v14610_v62 = vsel %vm14596_vm7, %v37353_v22, %v37315_v20  ;;  %v14609_v20 = vsel %vm14596_vm7, %v37289_v60, %v37353_v22  ;;  %v16416_v22 = vsel %vm16414_vm9, %v37223_v27, %v37213_v37 }
0x1214   : > { %15589 = vmatpush1.msra.mxu0 %v15473_v47  ;;  %15652 = vmatprep.mubr.f32.mxu0 %v37124_v6 }
0x1215   : > { %15730 = vmatprep.subr.mxu0 %v15478_v4  ;;  %20767 = vrot.lane.b32.xlu1 %v36948_v32, %s40048_s1  ;;  %v15482_v32 = vsel %vm15470_vm8, %v37328_v9, %v37326_v44 }
0x1216   : > { %19005 = vrot.lane.b32.xlu0 %v37164_v12, %s40052_s27  ;;  %31304 = vmatmul.mubr.msk.f32.vlgmr.msra.gmra.mrb[238].mxu1 %vm1016_vm3, %v37114_v31 }
0x1217   : > { %31320 = vmatmul.mubr.msk.f32.vlgmr.msra.gmra.mrb[4].mxu0 %vm1016_vm3, %v37545_v38  ;;  %v13723_v1 = vpop.permute.xlu1 %13722  ;;  %v37575_v61 = vpop.permute.xlu0 %18973  ;;  %14545 = vmatprep.mubr.f32.mxu1 %v37124_v6 }
0x1218   : > { %15731 = vmatpush1.msra.mxu0 %v15477_v33  ;;  %14481 = vmatprep.subr.mxu1 %v13723_v1  ;;  %v13745_v45 = vsel %vm13724_vm6, %v37403_v57, %v13723_v1  ;;  %v40143_v33 = vld [vmem:[#allocation37_spill] sm:$0xff]  ;;  %v40144_v1 = vld [vmem:[#allocation35_spill] sm:$0xff] }
0x1219   : > { %15872 = vmatprep.subr.mxu0 %v15482_v32  ;;  %20769 = vrot.lane.b32.xlu1 %v36950_v52, %s40048_s1  ;;  %v15481_v52 = vsel %vm15470_vm8, %v37339_v55, %v37328_v9  ;;  %v16418_v32 = vsel %vm16414_vm9, %v40144_v1, %v40143_v33 }
0x121a   : > { %19895 = vrot.lane.b32.xlu0 %v37043_v58, %s40050_s4  ;;  %14482 = vmatpush1.msra.mxu1 %v13745_v45  ;;  %v37687_v45 = vld [vmem:[%s40116_s15 + $0x18] sm:$0xff] }
0x121b   : > { %15794 = vmatprep.mubr.f32.mxu0 %v37124_v6  ;;  %31306 = vmatmul.mubr.msk.f32.vlgmr.msra.gmra.mrb[240].mxu1 %vm1016_vm3, %v37114_v31  ;;  %v37593_v13 = vpop.permute.xlu1 %18975  ;;  %v37595_v57 = vpop.permute.xlu0 %18971  ;;  %v14601_v31 = vsel %vm14596_vm7, %v37160_v2, %v37205_v17  ;;  %v14605_v17 = vsel %vm14596_vm7, %v37170_v39, %v37337_v42 }
0x121c   : > { %14785 = vmatprep.subr.mxu1 %v14602_v25  ;;  %31322 = vmatmul.mubr.msk.f32.vlgmr.msra.gmra.mrb[8].mxu0 %vm1016_vm3, %v37545_v38  ;;  %v16417_v25 = vsel %vm16414_vm9, %v37213_v37, %v40144_v1  ;;  %v40156_v1 = vld [vmem:[#allocation48_spill] sm:$0xff] }
0x121d   : > { %15873 = vmatpush1.msra.mxu0 %v15481_v52  ;;  %14786 = vmatpush1.msra.mxu1 %v14601_v31  ;;  %v40145_v31 = vld [vmem:[#allocation41_spill] sm:$0xff] }
0x121e   : > { %16014 = vmatprep.subr.mxu0 %v15486_v24  ;;  %14927 = vmatprep.subr.mxu1 %v14606_v3  ;;  %v40146_v24 = vld [vmem:[#allocation36_spill] sm:$0xff] }
0x121f   : > { %19013 = vrot.lane.b32.xlu1 %v37365_v7, %s40052_s27  ;;  %20765 = vrot.lane.b32.xlu0 %v36937_v43, %s40048_s1  ;;  %v37615_v9 = vpop.permute.xlu1 %15466  ;;  %v15465_v2 = vpop.permute.xlu0 %15464  ;;  %v15485_v43 = vsel %vm15470_vm8, %v37355_v56, %v37347_v11  ;;  %v16422_v3 = vsel %vm16414_vm9, %v40146_v24, %v40145_v31  ;;  %s40205_s27 = sld [smem:[#allocation76_spill]] }
0x1220   : > { %14849 = vmatprep.mubr.f32.mxu1 %v37124_v6  ;;  %15936 = vmatprep.mubr.f32.mxu0 %v37124_v6  ;;  %v15490_v14 = vsel %vm15470_vm8, %v15465_v2, %v37615_v9 }
0x1221   : > { %31309 = vmatmul.mubr.msk.f32.vlgmr.msra.gmra.mrb[232].mxu1 %vm1016_vm3, %v37440_v54  ;;  %31324 = vmatmul.mubr.msk.f32.vlgmr.msra.gmra.mrb[10].mxu0 %vm1016_vm3, %v37545_v38 }
0x1222   : > { %14928 = vmatpush1.msra.mxu1 %v14605_v17  ;;  %16015 = vmatpush1.msra.mxu0 %v15485_v43  ;;  %v40149_v43 = vld [vmem:[#allocation38_spill] sm:$0xff] }
0x1223   : > { %15069 = vmatprep.subr.mxu1 %v14610_v62  ;;  %19899 = vrot.lane.b32.xlu1 %v37225_v36, %s40050_s4  ;;  %v14587_v39 = vpop.permute.xlu1 %14586  ;;  %v37636_v42 = vpop.permute.xlu0 %15462  ;;  %v16421_v62 = vsel %vm16414_vm9, %v40149_v43, %v40146_v24  ;;  %v40158_v24 = vld [vmem:[#allocation50_spill] sm:$0xff] }
0x1224   : > { %20763 = vrot.lane.b32.xlu0 %v36939_v63, %s40048_s1  ;;  %14991 = vmatprep.mubr.f32.mxu1 %v37124_v6  ;;  %v14614_v11 = vsel %vm14596_vm7, %v14587_v39, %v37513_v29  ;;  %v15489_v63 = vsel %vm15470_vm8, %v37636_v42, %v15465_v2  ;;  %v14613_v60 = vsel %vm14596_vm7, %v37300_v46, %v14587_v39  ;;  %v40147_v2 = vld [vmem:[#allocation32_spill] sm:$0xff]  ;;  %v40150_v39 = vld [vmem:[#allocation47_spill] sm:$0xff] }
0x1225   : > { %16078 = vmatprep.mubr.f32.mxu0 %v37124_v6  ;;  %16156 = vmatprep.subr.mxu0 %v15490_v14  ;;  %v16415_v46 = vsel %vm16414_vm9, %v37099_v41, %v37223_v27 }
0x1226   : > { %31311 = vmatmul.mubr.msk.f32.vlgmr.msra.gmra.mrb[234].mxu1 %vm1016_vm3, %v37440_v54  ;;  %31326 = vmatmul.mubr.msk.f32.vlgmr.msra.gmra.mrb[12].mxu0 %vm1016_vm3, %v37545_v38 }
0x1227   : > { %15070 = vmatpush1.msra.mxu1 %v14609_v20  ;;  %19907 = vrot.lane.b32.xlu1 %v37243_v30, %s40050_s4  ;;  %v37655_v51 = vpop.permute.xlu1 %18101  ;;  %v37657_v47 = vpop.permute.xlu0 %18977 }
0x1228   : > { %19905 = vrot.lane.b32.xlu0 %v37151_v26, %s40050_s4  ;;  %15133 = vmatprep.mubr.f32.mxu1 %v37124_v6 }
0x1229   : > { %15211 = vmatprep.subr.mxu1 %v14614_v11  ;;  %16157 = vmatpush1.msra.mxu0 %v15489_v63 }
0x122a   : > { %16220 = vmatprep.mubr.f32.mxu0 %v37124_v6  ;;  %31313 = vmatmul.mubr.msk.f32.vlgmr.msra.gmra.mrb[236].mxu1 %vm1016_vm3, %v37440_v54 }
0x122b   : > { %15212 = vmatpush1.msra.mxu1 %v14613_v60  ;;  %31328 = vmatmul.mubr.msk.f32.vlgmr.msra.gmra.mrb[14].mxu0 %vm1016_vm3, %v37545_v38  ;;  %v14595_v29 = vpop.permute.xlu1 %14594  ;;  %v37672_v4 = vpop.permute.xlu0 %18987 }
0x122c   : > { %16462 = vmatprep.subr.mxu0 %v16416_v22  ;;  %19901 = vrot.lane.b32.xlu1 %v37164_v12, %s40050_s4  ;;  %v14617_v52 = vsel %vm14596_vm7, %v37502_v49, %v14595_v29  ;;  %v40148_v49 = vld [vmem:[#allocation39_spill] sm:$0xff] }
0x122d   : > { %16463 = vmatpush1.msra.mxu0 %v16415_v46  ;;  %19903 = vrot.lane.b32.xlu0 %v37153_v21, %s40050_s4  ;;  %v15475_v14 = vsel %vm15470_vm8, %v37199_v8, %v40148_v49  ;;  %v40155_v46 = vld [vmem:[#allocation51_spill] sm:$0xff] }
0x122e   : > { %16533 = vmatprep.subr.mxu0 %v16418_v32  ;;  %15275 = vmatprep.mubr.f32.mxu1 %v37124_v6  ;;  %v16430_v32 = vsel %vm16414_vm9, %v40156_v1, %v40155_v46 }
0x122f   : > { %16526 = vmatprep.mubr.f32.mxu0 %v37124_v6  ;;  %31315 = vmatmul.mubr.msk.f32.vlgmr.msra.gmra.mrb[238].mxu1 %vm1016_vm3, %v37440_v54  ;;  %v37693_v41 = vpop.permute.xlu1 %18979  ;;  %v37695_v27 = vpop.permute.xlu0 %15460 }
0x1230   : > { %31331 = vmatmul.mubr.msk.f32.vlgmr.msra.gmra.mrb[6].mxu0 %vm1016_vm3, %v37687_v45  ;;  %15353 = vmatprep.subr.mxu1 %v14595_v29 }
0x1231   : > { %16534 = vmatpush1.msra.mxu0 %v16417_v25  ;;  %20775 = vrot.lane.b32.xlu1 %v36958_v48, %s40048_s1  ;;  %v15476_v48 = vsel %vm15470_vm8, %v40148_v49, %v37215_v15  ;;  %v40152_v15 = vld [vmem:[#allocation45_spill] sm:$0xff]  ;;  %v15488_v49 = vsel %vm15470_vm8, %v37695_v27, %v37636_v42  ;;  %v15487_v42 = vsel %vm15470_vm8, %v37345_v53, %v37695_v27  ;;  %v32727_v27 = vld [vmem:[#allocation2 + $0x10] sm:$0xff] }
0x1232   : > { %16675 = vmatprep.subr.mxu0 %v16422_v3  ;;  %20771 = vrot.lane.b32.xlu0 %v40147_v2, %s40048_s1  ;;  %v15480_v11 = vsel %vm15470_vm8, %v40152_v15, %v37339_v55  ;;  %v15479_v8 = vsel %vm15470_vm8, %v37207_v59, %v40152_v15  ;;  %v40153_v55 = vld [vmem:[#allocation46_spill] sm:$0xff]  ;;  %v16429_v3 = vsel %vm16414_vm9, %v40158_v24, %v40156_v1 }
0x1233   : > { %15354 = vmatpush1.msra.mxu1 %v14617_v52  ;;  %15417 = vmatprep.mubr.f32.mxu1 %v37124_v6  ;;  %v37712_v37 = vpop.permute.xlu1 %18985  ;;  %v37714_v17 = vpop.permute.xlu0 %16408  ;;  %v40157_v52 = vld [vmem:[#allocation34_spill] sm:$0xff] }
0x1234   : > { %16597 = vmatprep.mubr.f32.mxu0 %v37124_v6  ;;  %31317 = vmatmul.mubr.msk.f32.vlgmr.msra.gmra.mrb[240].mxu1 %vm1016_vm3, %v37440_v54  ;;  %v40151_v54 = vld [vmem:[#allocation44_spill] sm:$0xff]  ;;  %v37829_v15 = vld [vmem:[%s40116_s15 + $0x20] sm:$0xff] }
0x1235   : > { %15659 = vmatprep.subr.mxu1 %v15476_v48  ;;  %31332 = vmatmul.mubr.msk.f32.vlgmr.msra.gmra.mrb[4].mxu0 %vm1016_vm3, %v37687_v45  ;;  %v16426_v20 = vsel %vm16414_vm9, %v40151_v54, %v40150_v39  ;;  %v16425_v22 = vsel %vm16414_vm9, %v40153_v55, %v40151_v54  ;;  %v32728_v54 = vld [vmem:[#allocation2 + $0x8] sm:$0xff]  ;;  %v32731_v1 = vld [vmem:[#allocation2 + $0x40] sm:$0xff] }
0x1236   : > { %16676 = vmatpush1.msra.mxu0 %v16421_v62  ;;  %15660 = vmatpush1.msra.mxu1 %v15475_v14 }
0x1237   : > { %16817 = vmatprep.subr.mxu0 %v16426_v20  ;;  %15801 = vmatprep.subr.mxu1 %v15480_v11  ;;  %v16407_v63 = vpop.permute.xlu1 %16406  ;;  %v37736_v60 = vpop.permute.xlu0 %18993  ;;  %v32729_v20 = vld [vmem:[#allocation2 + $0x20] sm:$0xff] }
0x1238   : > { %19909 = vrot.lane.b32.xlu1 %v37365_v7, %s40050_s4  ;;  %20773 = vrot.lane.b32.xlu0 %v36969_v0, %s40048_s1  ;;  %v40154_v0 = vld [vmem:[#allocation49_spill] sm:$0xff]  ;;  %v16434_v48 = vsel %vm16414_vm9, %v16407_v63, %v37714_v17  ;;  %s40206_s4 = smov %s40205_s27 }
0x1239   : > { %15723 = vmatprep.mubr.f32.mxu1 %v37124_v6  ;;  %16739 = vmatprep.mubr.f32.mxu0 %v37124_v6  ;;  %v15484_v29 = vsel %vm15470_vm8, %v40154_v0, %v37355_v56  ;;  %v15483_v56 = vsel %vm15470_vm8, %v37326_v44, %v40154_v0 }
0x123a   : > { %31321 = vmatmul.mubr.msk.f32.vlgmr.msra.gmra.mrb[232].mxu1 %vm1016_vm3, %v37545_v38  ;;  %31334 = vmatmul.mubr.msk.f32.vlgmr.msra.gmra.mrb[8].mxu0 %vm1016_vm3, %v37687_v45 }
0x123b   : > { %15802 = vmatpush1.msra.mxu1 %v15479_v8  ;;  %16818 = vmatpush1.msra.mxu0 %v16425_v22  ;;  %v37760_v25 = vpop.permute.xlu1 %16404  ;;  %v37762_v59 = vpop.permute.xlu0 %18981  ;;  %v32730_v8 = vld [vmem:[#allocation2 + $0x18] sm:$0xff] }
0x123c   : > { %15943 = vmatprep.subr.mxu1 %v15484_v29  ;;  %16959 = vmatprep.subr.mxu0 %v16430_v32  ;;  %v40161_v22 = vld [vmem:[#allocation53_spill] sm:$0xff] }
0x123d   : > { %20779 = vrot.lane.b32.xlu1 %v40157_v52, %s40048_s1  ;;  %20777 = vrot.lane.b32.xlu0 %v36960_v23, %s40048_s1  ;;  %v16424_v0 = vsel %vm16414_vm9, %v40161_v22, %v40153_v55  ;;  %v32733_v52 = vld [vmem:[#allocation2 + $0x38] sm:$0xff] }
0x123e   : > { %15865 = vmatprep.mubr.f32.mxu1 %v37124_v6  ;;  %16881 = vmatprep.mubr.f32.mxu0 %v37124_v6 }
0x123f   : > { %31323 = vmatmul.mubr.msk.f32.vlgmr.msra.gmra.mrb[234].mxu1 %vm1016_vm3, %v37545_v38  ;;  %31336 = vmatmul.mubr.msk.f32.vlgmr.msra.gmra.mrb[10].mxu0 %vm1016_vm3, %v37687_v45  ;;  %v37780_v2 = vpop.permute.xlu1 %18983  ;;  %v15469_v23 = vpop.permute.xlu0 %15468 }
0x1240   : > { %15944 = vmatpush1.msra.mxu1 %v15483_v56  ;;  %16960 = vmatpush1.msra.mxu0 %v16429_v3  ;;  %v40162_v56 = vld [vmem:[#allocation52_spill] sm:$0xff] }
0x1241   : > { %16085 = vmatprep.subr.mxu1 %v15488_v49  ;;  %20783 = vrot.lane.b32.xlu1 %v37037_v5, %s40048_s1  ;;  %v16433_v5 = vsel %vm16414_vm9, %v37760_v25, %v16407_v63  ;;  %v16428_v3 = vsel %vm16414_vm9, %v40162_v56, %v40158_v24  ;;  %v16427_v24 = vsel %vm16414_vm9, %v40150_v39, %v40162_v56 }
0x1242   : > { %20781 = vrot.lane.b32.xlu0 %v37045_v10, %s40048_s1  ;;  %16007 = vmatprep.mubr.f32.mxu1 %v37124_v6  ;;  %v40159_v10 = vld [vmem:[#allocation33_spill] sm:$0xff] }
0x1243   : > { %17023 = vmatprep.mubr.f32.mxu0 %v37124_v6  ;;  %17101 = vmatprep.subr.mxu0 %v16434_v48  ;;  %v37793_v44 = vpop.permute.xlu1 %18995  ;;  %v37795_v62 = vpop.permute.xlu0 %16402  ;;  %v32735_v48 = vld [vmem:[#allocation2 + $0x58] sm:$0xff] }
0x1244   : > { %31325 = vmatmul.mubr.msk.f32.vlgmr.msra.gmra.mrb[236].mxu1 %vm1016_vm3, %v37545_v38  ;;  %31338 = vmatmul.mubr.msk.f32.vlgmr.msra.gmra.mrb[12].mxu0 %vm1016_vm3, %v37687_v45 }
0x1245   : > { %16086 = vmatpush1.msra.mxu1 %v15487_v42  ;;  %20787 = vrot.lane.b32.xlu1 %v37073_v50, %s40048_s1  ;;  %v15491_v50 = vsel %vm15470_vm8, %v37615_v9, %v15469_v23  ;;  %v16432_v42 = vsel %vm16414_vm9, %v37795_v62, %v37760_v25  ;;  %v16431_v25 = vsel %vm16414_vm9, %v40155_v46, %v37795_v62  ;;  %v37916_v46 = vld [vmem:[#allocation2] sm:$0xff] }
0x1246   : > { %20785 = vrot.lane.b32.xlu0 %v40159_v10, %s40048_s1  ;;  %16149 = vmatprep.mubr.f32.mxu1 %v37124_v6  ;;  %v32736_v10 = vld [vmem:[#allocation2 + $0x78] sm:$0xff]  ;;  %v40164_v62 = vld [vmem:[#allocation42_spill] sm:$0xff] }
0x1247   : > { %17102 = vmatpush1.msra.mxu0 %v16433_v5  ;;  %17165 = vmatprep.mubr.f32.mxu0 %v37124_v6  ;;  %v37812_v14 = vpop.permute.xlu1 %18991  ;;  %v37814_v53 = vpop.permute.xlu0 %18989 }
0x1248   : > { %31327 = vmatmul.mubr.msk.f32.vlgmr.msra.gmra.mrb[238].mxu1 %vm1016_vm3, %v37545_v38  ;;  %31340 = vmatmul.mubr.msk.f32.vlgmr.msra.gmra.mrb[14].mxu0 %vm1016_vm3, %v37687_v45 }
0x1249   : > { %17270 = vmatprep.subr.mxu0 %v32727_v27  ;;  %16227 = vmatprep.subr.mxu1 %v15469_v23  ;;  %v32734_v23 = vld [vmem:[#allocation2 + $0x60] sm:$0xff] }
0x124a   : > { %17271 = vmatpush1.msra.mxu0 %v32728_v54  ;;  %20791 = vrot.lane.b32.xlu1 %v37043_v58, %s40048_s1  ;;  %v40160_v58 = vld [vmem:[#allocation40_spill] sm:$0xff] }
0x124b   : > { %17341 = vmatprep.subr.mxu0 %v32729_v20  ;;  %20789 = vrot.lane.b32.xlu0 %v37051_v28, %s40048_s1  ;;  %v37831_v11 = vpop.permute.xlu1 %19001  ;;  %v37833_v63 = vpop.permute.xlu0 %18997  ;;  %v16420_v28 = vsel %vm16414_vm9, %v40160_v58, %v40149_v43  ;;  %v16419_v9 = vsel %vm16414_vm9, %v40143_v33, %v40160_v58  ;;  %v32732_v43 = vld [vmem:[#allocation2 + $0x80] sm:$0xff]  ;;  %v16423_v33 = vsel %vm16414_vm9, %v40145_v31, %v40161_v22 }
0x124c   : > { %16228 = vmatpush1.msra.mxu1 %v15491_v50  ;;  %16291 = vmatprep.mubr.f32.mxu1 %v37124_v6  ;;  %v18123_v22 = vsel %vm18119_vm10, %v37431_v16, %v37426_v34 }
0x124d   : > { %17334 = vmatprep.mubr.f32.mxu0 %v37124_v6  ;;  %31329 = vmatmul.mubr.msk.f32.vlgmr.msra.gmra.mrb[240].mxu1 %vm1016_vm3, %v37545_v38 }
0x124e   : > { %16604 = vmatprep.subr.mxu1 %v16420_v28  ;;  %31343 = vmatmul.mubr.msk.f32.vlgmr.msra.gmra.mrb[6].mxu0 %vm1016_vm3, %v37829_v15 }
0x124f   : > { %17342 = vmatpush1.msra.mxu0 %v32730_v8  ;;  %16605 = vmatpush1.msra.mxu1 %v16419_v9  ;;  %v16411_v38 = vpop.permute.xlu1 %16410  ;;  %v16413_v29 = vpop.permute.xlu0 %16412  ;;  %v32739_v9 = vld [vmem:[#allocation2 + $0x28] sm:$0xff]  ;;  %v32740_v8 = vld [vmem:[#allocation2 + $0x50] sm:$0xff] }
0x1250   : > { %17483 = vmatprep.subr.mxu0 %v32731_v1  ;;  %16746 = vmatprep.subr.mxu1 %v16424_v0 }
0x1251   : > { %20795 = vrot.lane.b32.xlu1 %v37225_v36, %s40048_s1  ;;  %20793 = vrot.lane.b32.xlu0 %v32732_v43, %s40048_s1 }
0x1252   : > { %16668 = vmatprep.mubr.f32.mxu1 %v37124_v6  ;;  %17405 = vmatprep.mubr.f32.mxu0 %v37124_v6 }
0x1253   : > { %31333 = vmatmul.mubr.msk.f32.vlgmr.msra.gmra.mrb[232].mxu1 %vm1016_vm3, %v37687_v45  ;;  %31344 = vmatmul.mubr.msk.f32.vlgmr.msra.gmra.mrb[4].mxu0 %vm1016_vm3, %v37829_v15  ;;  %v37862_v55 = vpop.permute.xlu1 %18999  ;;  %v37864_v32 = vpop.permute.xlu0 %19871 }
0x1254   : > { %16747 = vmatpush1.msra.mxu1 %v16423_v33  ;;  %17484 = vmatpush1.msra.mxu0 %v32733_v52  ;;  %v18127_v33 = vsel %vm18119_vm10, %v37453_v19, %v37451_v35 }
0x1255   : > { %16888 = vmatprep.subr.mxu1 %v16428_v3  ;;  %17625 = vmatprep.subr.mxu0 %v32734_v23  ;;  %v40166_v3 = vld [vmem:[#allocation56_spill] sm:$0xff] }
0x1256   : > { %20803 = vrot.lane.b32.xlu1 %v37243_v30, %s40048_s1  ;;  %20801 = vrot.lane.b32.xlu0 %v37151_v26, %s40048_s1  ;;  %v18126_v23 = vsel %vm18119_vm10, %v40166_v3, %v37453_v19  ;;  %v40169_v19 = vld [vmem:[#allocation57_spill] sm:$0xff] }
0x1257   : > { %16810 = vmatprep.mubr.f32.mxu1 %v37124_v6  ;;  %17547 = vmatprep.mubr.f32.mxu0 %v37124_v6  ;;  %v37875_v31 = vpop.permute.xlu1 %19869  ;;  %v37877_v49 = vpop.permute.xlu0 %19875 }
0x1258   : > { %31335 = vmatmul.mubr.msk.f32.vlgmr.msra.gmra.mrb[234].mxu1 %vm1016_vm3, %v37687_v45  ;;  %31346 = vmatmul.mubr.msk.f32.vlgmr.msra.gmra.mrb[8].mxu0 %vm1016_vm3, %v37829_v15 }
0x1259   : > { %16889 = vmatpush1.msra.mxu1 %v16427_v24  ;;  %17626 = vmatpush1.msra.mxu0 %v32735_v48  ;;  %v32744_v24 = vld [vmem:[#allocation2 + $0x90] sm:$0xff]  ;;  %v40167_v48 = vld [vmem:[#allocation58_spill] sm:$0xff] }
0x125a   : > { %17030 = vmatprep.subr.mxu1 %v16432_v42  ;;  %17767 = vmatprep.subr.mxu0 %v32732_v43  ;;  %v32742_v43 = vld [vmem:[#allocation2 + $0x70] sm:$0xff] }
0x125b   : > { %20799 = vrot.lane.b32.xlu1 %v37153_v21, %s40048_s1  ;;  %20797 = vrot.lane.b32.xlu0 %v37164_v12, %s40048_s1  ;;  %v37893_v5 = vpop.permute.xlu1 %19867  ;;  %v37895_v39 = vpop.permute.xlu0 %18113  ;;  %v16436_v12 = vsel %vm16414_vm9, %v16411_v38, %v16413_v29  ;;  %v32741_v29 = vld [vmem:[#allocation2 + $0x48] sm:$0xff] }
0x125c   : > { %16952 = vmatprep.mubr.f32.mxu1 %v37124_v6  ;;  %17689 = vmatprep.mubr.f32.mxu0 %v37124_v6  ;;  %v16435_v6 = vsel %vm16414_vm9, %v37714_v17, %v16411_v38  ;;  %v40163_v17 = vld [vmem:[#allocation43_spill] sm:$0xff] }
0x125d   : > { %31337 = vmatmul.mubr.msk.f32.vlgmr.msra.gmra.mrb[236].mxu1 %vm1016_vm3, %v37687_v45  ;;  %31348 = vmatmul.mubr.msk.f32.vlgmr.msra.gmra.mrb[10].mxu0 %vm1016_vm3, %v37829_v15  ;;  %v18121_v54 = vsel %vm18119_vm10, %v40164_v62, %v40163_v17  ;;  %v18122_v1 = vsel %vm18119_vm10, %v40163_v17, %v37431_v16  ;;  %v32743_v16 = vld [vmem:[#allocation2 + $0x68] sm:$0xff] }
0x125e   : > { %17031 = vmatpush1.msra.mxu1 %v16431_v25  ;;  %17768 = vmatpush1.msra.mxu0 %v32736_v10  ;;  %v40168_v42 = vld [vmem:[#allocation55_spill] sm:$0xff] }
0x125f   : > { %17909 = vmatprep.subr.mxu0 %v37151_v26  ;;  %20805 = vrot.lane.b32.xlu1 %v37365_v7, %s40048_s1  ;;  %v37912_v27 = vpop.permute.xlu1 %19873  ;;  %v37914_v50 = vpop.permute.xlu0 %19883  ;;  %v32738_v26 = vld [vmem:[#allocation2 + $0x30] sm:$0xff]  ;;  %v18131_v25 = vsel %vm18119_vm10, %v40168_v42, %v40167_v48  ;;  %s40172_s1 = sld [smem:[#allocation75_spill]] }
0x1260   : > { %17094 = vmatprep.mubr.f32.mxu1 %v37916_v46  ;;  %17172 = vmatprep.subr.mxu1 %v16436_v12 }
0x1261   : > { %17831 = vmatprep.mubr.f32.mxu0 %v37916_v46  ;;  %31339 = vmatmul.mubr.msk.f32.vlgmr.msra.gmra.mrb[238].mxu1 %vm1016_vm3, %v37687_v45 }
0x1262   : > { %17173 = vmatpush1.msra.mxu1 %v16435_v6  ;;  %31350 = vmatmul.mubr.msk.f32.vlgmr.msra.gmra.mrb[12].mxu0 %vm1016_vm3, %v37829_v15  ;;  %v18130_v6 = vsel %vm18119_vm10, %v40169_v19, %v40168_v42 }
0x1263   : > { %17910 = vmatpush1.msra.mxu0 %v37153_v21  ;;  %17412 = vmatprep.subr.mxu1 %v32738_v26  ;;  %v37928_v20 = vpop.permute.xlu1 %18107  ;;  %v37930_v58 = vpop.permute.xlu0 %19879  ;;  %v40165_v21 = vld [vmem:[#allocation54_spill] sm:$0xff]  ;;  %v40170_v26 = vld [vmem:[#allocation59_spill] sm:$0xff] }
0x1264   : > { %18166 = vmatprep.subr.mxu0 %v18121_v54  ;;  %17236 = vmatprep.mubr.f32.mxu1 %v37916_v46  ;;  %v18120_v28 = vsel %vm18119_vm10, %v40165_v21, %v40164_v62  ;;  %v18135_v17 = vsel %vm18119_vm10, %v40170_v26, %v37928_v20  ;;  %v40171_v54 = vld [vmem:[#allocation60_spill] sm:$0xff] }
0x1265   : > { %17973 = vmatprep.mubr.f32.mxu0 %v37916_v46  ;;  %31341 = vmatmul.mubr.msk.f32.vlgmr.msra.gmra.mrb[240].mxu1 %vm1016_vm3, %v37687_v45  ;;  %v37947_v45 = vld [vmem:[%s40116_s15 + $0x28] sm:$0xff]  ;;  %v18125_v21 = vsel %vm18119_vm10, %v40171_v54, %v40166_v3  ;;  %v19018_v3 = vsel %vm19015_vm11, %v37593_v13, %v37657_v47 }
0x1266   : > { %17413 = vmatpush1.msra.mxu1 %v32739_v9  ;;  %31352 = vmatmul.mubr.msk.f32.vlgmr.msra.gmra.mrb[14].mxu0 %vm1016_vm3, %v37829_v15 }
0x1267   : > { %18167 = vmatpush1.msra.mxu0 %v18120_v28  ;;  %17554 = vmatprep.subr.mxu1 %v32740_v8  ;;  %v37949_v0 = vpop.permute.xlu1 %18115  ;;  %v37951_v38 = vpop.permute.xlu0 %19889  ;;  %v18124_v8 = vsel %vm18119_vm10, %v37426_v34, %v40171_v54  ;;  %v19017_v34 = vsel %vm19015_vm11, %v37575_v61, %v37593_v13  ;;  %v19022_v13 = vsel %vm19015_vm11, %v37780_v2, %v37712_v37 }
0x1268   : > { %18237 = vmatprep.subr.mxu0 %v18123_v22  ;;  %17476 = vmatprep.mubr.f32.mxu1 %v37916_v46  ;;  %v18139_v28 = vsel %vm18119_vm10, %v37895_v39, %v37949_v0 }
0x1269   : > { %18230 = vmatprep.mubr.f32.mxu0 %v37916_v46  ;;  %31345 = vmatmul.mubr.msk.f32.vlgmr.msra.gmra.mrb[232].mxu1 %vm1016_vm3, %v37829_v15 }
0x126a   : > { %17555 = vmatpush1.msra.mxu1 %v32741_v29  ;;  %31355 = vmatmul.mubr.msk.f32.vlgmr.msra.gmra.mrb[6].mxu0 %vm1016_vm3, %v37947_v45  ;;  %v18129_v29 = vsel %vm18119_vm10, %v37556_v40, %v40169_v19 }
0x126b   : > { %18238 = vmatpush1.msra.mxu0 %v18122_v1  ;;  %17696 = vmatprep.subr.mxu1 %v32742_v43  ;;  %v37965_v52 = vpop.permute.xlu1 %19881  ;;  %v18128_v1 = vsel %vm18119_vm10, %v37451_v35, %v37556_v40  ;;  %v19016_v43 = vsel %vm19015_vm11, %v37595_v57, %v37575_v61  ;;  %v38062_v35 = vld [vmem:[%s40116_s15 + $0x30] sm:$0xff] }
0x126c   : > { %18379 = vmatprep.subr.mxu0 %v18127_v33  ;;  %17618 = vmatprep.mubr.f32.mxu1 %v37916_v46  ;;  %v37968_v56 = vpop.permute.xlu0 %18111  ;;  %v18133_v33 = vsel %vm18119_vm10, %v37655_v51, %v37558_v18 }
0x126d   : > { %18301 = vmatprep.mubr.f32.mxu0 %v37916_v46  ;;  %31347 = vmatmul.mubr.msk.f32.vlgmr.msra.gmra.mrb[234].mxu1 %vm1016_vm3, %v37829_v15  ;;  %v18138_v22 = vsel %vm18119_vm10, %v37968_v56, %v37895_v39 }
0x126e   : > { %17697 = vmatpush1.msra.mxu1 %v32743_v16  ;;  %31356 = vmatmul.mubr.msk.f32.vlgmr.msra.gmra.mrb[4].mxu0 %vm1016_vm3, %v37947_v45  ;;  %v19019_v16 = vsel %vm19015_vm11, %v37657_v47, %v37693_v41  ;;  %v19027_v47 = vsel %vm19015_vm11, %v37736_v60, %v37793_v44 }
0x126f   : > { %18380 = vmatpush1.msra.mxu0 %v18126_v23  ;;  %17838 = vmatprep.subr.mxu1 %v32744_v24  ;;  %v37981_v12 = vpop.permute.xlu1 %19877  ;;  %v19023_v23 = vsel %vm19015_vm11, %v37712_v37, %v37672_v4  ;;  %v19026_v37 = vsel %vm19015_vm11, %v37812_v14, %v37736_v60  ;;  %v19020_v60 = vsel %vm19015_vm11, %v37693_v41, %v37762_v59 }
0x1270   : > { %18521 = vmatprep.subr.mxu0 %v18131_v25  ;;  %17760 = vmatprep.mubr.f32.mxu1 %v37916_v46  ;;  %v37984_v10 = vpop.permute.xlu0 %19887 }
0x1271   : > { %18443 = vmatprep.mubr.f32.mxu0 %v37916_v46  ;;  %31349 = vmatmul.mubr.msk.f32.vlgmr.msra.gmra.mrb[236].mxu1 %vm1016_vm3, %v37829_v15 }
0x1272   : > { %17839 = vmatpush1.msra.mxu1 %v37225_v36  ;;  %31358 = vmatmul.mubr.msk.f32.vlgmr.msra.gmra.mrb[8].mxu0 %vm1016_vm3, %v37947_v45 }
0x1273   : > { %18522 = vmatpush1.msra.mxu0 %v18130_v6  ;;  %17980 = vmatprep.subr.mxu1 %v37365_v7  ;;  %v37999_v62 = vpop.permute.xlu1 %19891  ;;  %v18134_v7 = vsel %vm18119_vm10, %v37558_v18, %v40170_v26  ;;  %v18132_v18 = vsel %vm18119_vm10, %v40167_v48, %v37655_v51  ;;  %v19025_v26 = vsel %vm19015_vm11, %v37814_v53, %v37812_v14 }
0x1274   : > { %17902 = vmatprep.mubr.f32.mxu1 %v37916_v46  ;;  %18585 = vmatprep.mubr.f32.mxu0 %v37916_v46  ;;  %v18110_v36 = vpop.permute.xlu0 %18109 }
0x1275   : > { %18663 = vmatprep.subr.mxu0 %v18135_v17  ;;  %31351 = vmatmul.mubr.msk.f32.vlgmr.msra.gmra.mrb[238].mxu1 %vm1016_vm3, %v37829_v15  ;;  %v18137_v57 = vsel %vm18119_vm10, %v18110_v36, %v37968_v56  ;;  %v18136_v51 = vsel %vm18119_vm10, %v37928_v20, %v18110_v36  ;;  %v19029_v17 = vsel %vm19015_vm11, %v37833_v63, %v37862_v55 }
0x1276   : > { %17981 = vmatpush1.msra.mxu1 %v37243_v30  ;;  %31360 = vmatmul.mubr.msk.f32.vlgmr.msra.gmra.mrb[10].mxu0 %vm1016_vm3, %v37947_v45  ;;  %v19913_v36 = vsel %vm19911_vm12, %v37875_v31, %v37864_v32 }
0x1277   : > { %18664 = vmatpush1.msra.mxu0 %v18134_v7  ;;  %18308 = vmatprep.subr.mxu1 %v18125_v21  ;;  %v38017_v9 = vpop.permute.xlu1 %19885  ;;  %v19912_v7 = vsel %vm19911_vm12, %v37893_v5, %v37875_v31  ;;  %v38191_v31 = vld [vmem:[%s40116_s15 + $0x38] sm:$0xff]  ;;  %v19914_v21 = vsel %vm19911_vm12, %v37864_v32, %v37912_v27  ;;  %v19918_v32 = vsel %vm19911_vm12, %v37930_v58, %v37965_v52 }
0x1278   : > { %18044 = vmatprep.mubr.f32.mxu1 %v37916_v46  ;;  %18727 = vmatprep.mubr.f32.mxu0 %v37916_v46  ;;  %v18118_v30 = vpop.permute.xlu0 %18117 }
0x1279   : > { %18805 = vmatprep.subr.mxu0 %v18139_v28  ;;  %31353 = vmatmul.mubr.msk.f32.vlgmr.msra.gmra.mrb[240].mxu1 %vm1016_vm3, %v37829_v15  ;;  %v18140_v20 = vsel %vm18119_vm10, %v37949_v0, %v18118_v30  ;;  %v19021_v0 = vsel %vm19015_vm11, %v37762_v59, %v37780_v2  ;;  %v19030_v2 = vsel %vm19015_vm11, %v37862_v55, %v37831_v11 }
0x127a   : > { %18309 = vmatpush1.msra.mxu1 %v18124_v8  ;;  %31362 = vmatmul.mubr.msk.f32.vlgmr.msra.gmra.mrb[12].mxu0 %vm1016_vm3, %v37947_v45  ;;  %v19024_v59 = vsel %vm19015_vm11, %v37672_v4, %v37814_v53  ;;  %v19028_v4 = vsel %vm19015_vm11, %v37793_v44, %v37833_v63  ;;  %v19915_v44 = vsel %vm19911_vm12, %v37912_v27, %v37877_v49 }
0x127b   : > { %18450 = vmatprep.subr.mxu1 %v18129_v29  ;;  %18372 = vmatprep.mubr.f32.mxu1 %v37916_v46  ;;  %v38035_v15 = vpop.permute.xlu1 %19009 }
0x127c   : > { %18806 = vmatpush1.msra.mxu0 %v18138_v22  ;;  %18869 = vmatprep.mubr.f32.mxu0 %v37916_v46  ;;  %v38041_v39 = vpop.permute.xlu0 %19003  ;;  %v19923_v22 = vsel %vm19911_vm12, %v37951_v38, %v37999_v62 }
0x127d   : > { %31357 = vmatmul.mubr.msk.f32.vlgmr.msra.gmra.mrb[232].mxu1 %vm1016_vm3, %v37947_v45  ;;  %19062 = vmatprep.subr.mxu0 %v19017_v34  ;;  %v19031_v25 = vsel %vm19015_vm11, %v37831_v11, %v38041_v39  ;;  %v19922_v34 = vsel %vm19911_vm12, %v37984_v10, %v37951_v38  ;;  %v19920_v38 = vsel %vm19911_vm12, %v37914_v50, %v38017_v9 }
0x127e   : > { %18451 = vmatpush1.msra.mxu1 %v18128_v1  ;;  %31364 = vmatmul.mubr.msk.f32.vlgmr.msra.gmra.mrb[14].mxu0 %vm1016_vm3, %v37947_v45 }
0x127f   : > { %18592 = vmatprep.subr.mxu1 %v18133_v33  ;;  %19063 = vmatpush1.msra.mxu0 %v19016_v43  ;;  %v38064_v40 = vpop.permute.xlu1 %19007 }
0x1280   : > { %19133 = vmatprep.subr.mxu0 %v19019_v16  ;;  %18514 = vmatprep.mubr.f32.mxu1 %v37916_v46  ;;  %v38067_v61 = vpop.permute.xlu0 %19011  ;;  %v19034_v41 = vsel %vm19015_vm11, %v38064_v40, %v38035_v15 }
0x1281   : > { %19126 = vmatprep.mubr.f32.mxu0 %v37916_v46  ;;  %31359 = vmatmul.mubr.msk.f32.vlgmr.msra.gmra.mrb[234].mxu1 %vm1016_vm3, %v37947_v45 }
0x1282   : > { %18593 = vmatpush1.msra.mxu1 %v18132_v18  ;;  %31367 = vmatmul.mubr.msk.f32.vlgmr.msra.gmra.mrb[6].mxu0 %vm1016_vm3, %v38062_v35 }
0x1283   : > { %19134 = vmatpush1.msra.mxu0 %v19018_v3  ;;  %18656 = vmatprep.mubr.f32.mxu1 %v37916_v46  ;;  %v38088_v24 = vpop.permute.xlu1 %19893 }
0x1284   : > { %19275 = vmatprep.subr.mxu0 %v19023_v23  ;;  %18734 = vmatprep.subr.mxu1 %v18137_v57  ;;  %v38090_v56 = vpop.permute.xlu0 %19897  ;;  %v38289_v57 = vld [vmem:[%s40116_s15 + $0x40] sm:$0xff] }
0x1285   : > { %19197 = vmatprep.mubr.f32.mxu0 %v37916_v46  ;;  %31361 = vmatmul.mubr.msk.f32.vlgmr.msra.gmra.mrb[236].mxu1 %vm1016_vm3, %v37947_v45 }
0x1286   : > { %18735 = vmatpush1.msra.mxu1 %v18136_v51  ;;  %31368 = vmatmul.mubr.msk.f32.vlgmr.msra.gmra.mrb[4].mxu0 %vm1016_vm3, %v38062_v35 }
0x1287   : > { %19276 = vmatpush1.msra.mxu0 %v19022_v13  ;;  %18876 = vmatprep.subr.mxu1 %v18118_v30  ;;  %v38105_v48 = vpop.permute.xlu1 %20767  ;;  %v19919_v30 = vsel %vm19911_vm12, %v37965_v52, %v37914_v50  ;;  %v19916_v52 = vsel %vm19911_vm12, %v37877_v49, %v37981_v12 }
0x1288   : > { %19417 = vmatprep.subr.mxu0 %v19027_v47  ;;  %18798 = vmatprep.mubr.f32.mxu1 %v37916_v46  ;;  %v19006_v42 = vpop.permute.xlu0 %19005 }
0x1289   : > { %19339 = vmatprep.mubr.f32.mxu0 %v37916_v46  ;;  %31363 = vmatmul.mubr.msk.f32.vlgmr.msra.gmra.mrb[238].mxu1 %vm1016_vm3, %v37947_v45  ;;  %v19033_v53 = vsel %vm19015_vm11, %v19006_v42, %v38064_v40  ;;  %v19032_v63 = vsel %vm19015_vm11, %v38041_v39, %v19006_v42 }
0x128a   : > { %18877 = vmatpush1.msra.mxu1 %v18140_v20  ;;  %31370 = vmatmul.mubr.msk.f32.vlgmr.msra.gmra.mrb[8].mxu0 %vm1016_vm3, %v38062_v35 }
0x128b   : > { %19418 = vmatpush1.msra.mxu0 %v19026_v37  ;;  %19204 = vmatprep.subr.mxu1 %v19021_v0  ;;  %v38122_v19 = vpop.permute.xlu1 %20769  ;;  %v13632_v0 = vld [vmem:[%s40172_s1] sm:$0xff]  ;;  %s40208_s1 = smov 76  }
0x128c   : > { %18940 = vmatprep.mubr.f32.mxu1 %v37916_v46  ;;  %19481 = vmatprep.mubr.f32.mxu0 %v37916_v46  ;;  %v38126_v6 = vpop.permute.xlu0 %19895 }
0x128d   : > { %19559 = vmatprep.subr.mxu0 %v19031_v25  ;;  %31365 = vmatmul.mubr.msk.f32.vlgmr.msra.gmra.mrb[240].mxu1 %vm1016_vm3, %v37947_v45  ;;  %v19035_v45 = vsel %vm19015_vm11, %v38035_v15, %v38067_v61  ;;  %v19917_v15 = vsel %vm19911_vm12, %v37981_v12, %v37930_v58  ;;  %v19921_v58 = vsel %vm19911_vm12, %v38017_v9, %v37984_v10 }
0x128e   : > { %19205 = vmatpush1.msra.mxu1 %v19020_v60  ;;  %31372 = vmatmul.mubr.msk.f32.vlgmr.msra.gmra.mrb[10].mxu0 %vm1016_vm3, %v38062_v35  ;;  %v19926_v10 = vsel %vm19911_vm12, %v38126_v6, %v38090_v56  ;;  %v19925_v1 = vsel %vm19911_vm12, %v38088_v24, %v38126_v6  ;;  %v19924_v9 = vsel %vm19911_vm12, %v37999_v62, %v38088_v24 }
0x128f   : > { %19560 = vmatpush1.msra.mxu0 %v19030_v2  ;;  %19346 = vmatprep.subr.mxu1 %v19025_v26 }
0x1290   : > { %19268 = vmatprep.mubr.f32.mxu1 %v37916_v46  ;;  %19623 = vmatprep.mubr.f32.mxu0 %v37916_v46 }
0x1291   : > { %19701 = vmatprep.subr.mxu0 %v19035_v45  ;;  %31369 = vmatmul.mubr.msk.f32.vlgmr.msra.gmra.mrb[232].mxu1 %vm1016_vm3, %v38062_v35  ;;  %v19014_v14 = vpop.permute.xlu1 %19013  ;;  %v38154_v11 = vpop.permute.xlu0 %20765 }
0x1292   : > { %19347 = vmatpush1.msra.mxu1 %v19024_v59  ;;  %31374 = vmatmul.mubr.msk.f32.vlgmr.msra.gmra.mrb[12].mxu0 %vm1016_vm3, %v38062_v35  ;;  %v19036_v8 = vsel %vm19015_vm11, %v38067_v61, %v19014_v14  ;;  %v20809_v62 = vsel %vm20807_vm13, %v38154_v11, %v38105_v48 }
0x1293   : > { %19702 = vmatpush1.msra.mxu0 %v19034_v41  ;;  %19488 = vmatprep.subr.mxu1 %v19029_v17 }
0x1294   : > { %19958 = vmatprep.subr.mxu0 %v19913_v36  ;;  %19410 = vmatprep.mubr.f32.mxu1 %v37916_v46 }
0x1295   : > { %19765 = vmatprep.mubr.f32.mxu0 %v37916_v46  ;;  %31371 = vmatmul.mubr.msk.f32.vlgmr.msra.gmra.mrb[234].mxu1 %vm1016_vm3, %v38062_v35  ;;  %v38173_v55 = vpop.permute.xlu1 %19899 }
0x1296   : > { %19489 = vmatpush1.msra.mxu1 %v19028_v4  ;;  %31376 = vmatmul.mubr.msk.f32.vlgmr.msra.gmra.mrb[14].mxu0 %vm1016_vm3, %v38062_v35  ;;  %v38180_v54 = vpop.permute.xlu0 %20763  ;;  %v19927_v39 = vsel %vm19911_vm12, %v38090_v56, %v38173_v55  ;;  %v20810_v56 = vsel %vm20807_vm13, %v38105_v48, %v38122_v19 }
0x1297   : > { %19959 = vmatpush1.msra.mxu0 %v19912_v7  ;;  %19552 = vmatprep.mubr.f32.mxu1 %v37916_v46  ;;  %v20808_v18 = vsel %vm20807_vm13, %v38180_v54, %v38154_v11 }
0x1298   : > { %20029 = vmatprep.subr.mxu0 %v19915_v44  ;;  %19630 = vmatprep.subr.mxu1 %v19033_v53 }
0x1299   : > { %20022 = vmatprep.mubr.f32.mxu0 %v37916_v46  ;;  %31373 = vmatmul.mubr.msk.f32.vlgmr.msra.gmra.mrb[236].mxu1 %vm1016_vm3, %v38062_v35  ;;  %v38196_v5 = vpop.permute.xlu1 %19907 }
0x129a   : > { %19631 = vmatpush1.msra.mxu1 %v19032_v63  ;;  %31379 = vmatmul.mubr.msk.f32.vlgmr.msra.gmra.mrb[6].mxu0 %vm1016_vm3, %v38191_v31  ;;  %v19906_v28 = vpop.permute.xlu0 %19905 }
0x129b   : > { %20030 = vmatpush1.msra.mxu0 %v19914_v21  ;;  %19694 = vmatprep.mubr.f32.mxu1 %v37916_v46  ;;  %v19931_v43 = vsel %vm19911_vm12, %v19906_v28, %v38196_v5 }
0x129c   : > { %20171 = vmatprep.subr.mxu0 %v19919_v30  ;;  %20093 = vmatprep.mubr.f32.mxu0 %v37916_v46  ;;  %v40174_v30 = vmov 0  }
0x129d   : > { %31375 = vmatmul.mubr.msk.f32.vlgmr.msra.gmra.mrb[238].mxu1 %vm1016_vm3, %v38062_v35  ;;  %19772 = vmatprep.subr.mxu1 %v19014_v14 }
0x129e   : > { %31380 = vmatmul.mubr.msk.f32.vlgmr.msra.gmra.mrb[4].mxu0 %vm1016_vm3, %v38191_v31  ;;  %19773 = vmatpush1.msra.mxu1 %v19036_v8  ;;  %v19902_v27 = vpop.permute.xlu1 %19901 }
0x129f   : > { %20172 = vmatpush1.msra.mxu0 %v19918_v32  ;;  %19836 = vmatprep.mubr.f32.mxu1 %v37916_v46  ;;  %v19904_v29 = vpop.permute.xlu0 %19903  ;;  %v19928_v40 = vsel %vm19911_vm12, %v38173_v55, %v19902_v27  ;;  %v38372_v32 = vld [vmem:[%s40173_s21 + $0x8] sm:$0xff] }
0x12a0   : > { %20313 = vmatprep.subr.mxu0 %v19923_v22  ;;  %20235 = vmatprep.mubr.f32.mxu0 %v37916_v46  ;;  %v19929_v50 = vsel %vm19911_vm12, %v19902_v27, %v19904_v29  ;;  %v19930_v33 = vsel %vm19911_vm12, %v19904_v29, %v19906_v28  ;;  %v38363_v28 = vld [vmem:[%s40173_s21] sm:$0xff]  ;;  %v40175_v27 = vld [vmem:[#allocation23_spill] sm:$0xff]  ;;  %vm40054_vm15 = vcmp.gt.f32.partialorder %v38372_v32, 0.0 }
0x12a1   : > { %31377 = vmatmul.mubr.msk.f32.vlgmr.msra.gmra.mrb[240].mxu1 %vm1016_vm3, %v38062_v35  ;;  %20100 = vmatprep.subr.mxu1 %v19917_v15  ;;  %vm40055_vm14 = vcmp.gt.f32.partialorder %v38363_v28, 0.0 }
0x12a2   : > { %31382 = vmatmul.mubr.msk.f32.vlgmr.msra.gmra.mrb[8].mxu0 %vm1016_vm3, %v38191_v31  ;;  %20101 = vmatpush1.msra.mxu1 %v19916_v52  ;;  %v21706_v8 = vsel %vm40055_vm14, 1, %v40174_v30 }
0x12a3   : > { %20314 = vmatpush1.msra.mxu0 %v19922_v34  ;;  %20242 = vmatprep.subr.mxu1 %v19921_v58  ;;  %v20776_v49 = vpop.permute.xlu1 %20775  ;;  %v21712_v22 = vrot.slane %v21706_v8, %v40175_v27 }
0x12a4   : > { %20164 = vmatprep.mubr.f32.mxu1 %v37916_v46  ;;  %20377 = vmatprep.mubr.f32.mxu0 %v37916_v46  ;;  %v20772_v12 = vpop.permute.xlu0 %20771 }
0x12a5   : > { %20455 = vmatprep.subr.mxu0 %v19927_v39  ;;  %31381 = vmatmul.mubr.msk.f32.vlgmr.msra.gmra.mrb[232].mxu1 %vm1016_vm3, %v38191_v31  ;;  %v20811_v61 = vsel %vm20807_vm13, %v38122_v19, %v20772_v12  ;;  %vm38379_vm0 = vcmp.eq.s32.totalorder %v21712_v22, 1  ;;  %v40179_v39 = vld [vmem:[#allocation29_spill] sm:$0xff] }
0x12a6   : > { %20243 = vmatpush1.msra.mxu1 %v19920_v38  ;;  %31384 = vmatmul.mubr.msk.f32.vlgmr.msra.gmra.mrb[10].mxu0 %vm1016_vm3, %v38191_v31 }
0x12a7   : > { %20456 = vmatpush1.msra.mxu0 %v19926_v10  ;;  %20384 = vmatprep.subr.mxu1 %v19925_v1  ;;  %v40180_v10 = vld [vmem:[#allocation25_spill] sm:$0xff] }
0x12a8   : > { %20306 = vmatprep.mubr.f32.mxu1 %v37916_v46  ;;  %20519 = vmatprep.mubr.f32.mxu0 %v37916_v46  ;;  %v21724_v1 = vrot.slane %v21706_v8, %v40180_v10 }
0x12a9   : > { %20597 = vmatprep.subr.mxu0 %v19931_v43  ;;  %31383 = vmatmul.mubr.msk.f32.vlgmr.msra.gmra.mrb[234].mxu1 %vm1016_vm3, %v38191_v31  ;;  %v40181_v43 = vld [vmem:[#allocation26_spill] sm:$0xff] }
0x12aa   : > { %20385 = vmatpush1.msra.mxu1 %v19924_v9  ;;  %31386 = vmatmul.mubr.msk.f32.vlgmr.msra.gmra.mrb[12].mxu0 %vm1016_vm3, %v38191_v31  ;;  %v19910_v16 = vpop.permute.xlu1 %19909  ;;  %v20774_v35 = vpop.permute.xlu0 %20773  ;;  %v38391_v9 = vsel %vm40054_vm15, 1, %v40174_v30  ;;  %vm38410_vm4 = vcmp.eq.s32.totalorder %v21724_v1, 1 }
0x12ab   : > { %20448 = vmatprep.mubr.f32.mxu1 %v37916_v46  ;;  %20526 = vmatprep.subr.mxu1 %v19929_v50  ;;  %v19932_v3 = vsel %vm19911_vm12, %v38196_v5, %v19910_v16  ;;  %v20813_v24 = vsel %vm20807_vm13, %v20774_v35, %v20776_v49  ;;  %v20812_v37 = vsel %vm20807_vm13, %v20772_v12, %v20774_v35  ;;  %v40183_v35 = vld [vmem:[#allocation27_spill] sm:$0xff] }
0x12ac   : > { %20598 = vmatpush1.msra.mxu0 %v19930_v33  ;;  %20661 = vmatprep.mubr.f32.mxu0 %v37916_v46  ;;  %v21728_v50 = vrot.slane %v21706_v8, %v40181_v43  ;;  %v40182_v33 = vld [vmem:[#allocation30_spill] sm:$0xff] }
0x12ad   : > { %31385 = vmatmul.mubr.msk.f32.vlgmr.msra.gmra.mrb[236].mxu1 %vm1016_vm3, %v38191_v31  ;;  %20854 = vmatprep.subr.mxu0 %v20809_v62 }
0x12ae   : > { %20527 = vmatpush1.msra.mxu1 %v19928_v40  ;;  %31388 = vmatmul.mubr.msk.f32.vlgmr.msra.gmra.mrb[14].mxu0 %vm1016_vm3, %v38191_v31  ;;  %v21736_v40 = vrot.slane %v21706_v8, %v40183_v35  ;;  %vm38414_vm5 = vcmp.eq.s32.totalorder %v21728_v50, 1 }
0x12af   : > { %20855 = vmatpush1.msra.mxu0 %v20808_v18  ;;  %20590 = vmatprep.mubr.f32.mxu1 %v37916_v46  ;;  %v20780_v23 = vpop.permute.xlu1 %20779  ;;  %v20778_v51 = vpop.permute.xlu0 %20777 }
0x12b0   : > { %20918 = vmatprep.mubr.f32.mxu0 %v37916_v46  ;;  %20925 = vmatprep.subr.mxu0 %v20811_v61  ;;  %v20815_v13 = vsel %vm20807_vm13, %v20778_v51, %v20780_v23  ;;  %v20814_v20 = vsel %vm20807_vm13, %v20776_v49, %v20778_v51  ;;  %v21720_v49 = vrot.slane %v21706_v8, %v40179_v39 }
0x12b1   : > { %31387 = vmatmul.mubr.msk.f32.vlgmr.msra.gmra.mrb[238].mxu1 %vm1016_vm3, %v38191_v31  ;;  %20668 = vmatprep.subr.mxu1 %v19910_v16  ;;  %v21732_v16 = vrot.slane %v21706_v8, %v40182_v33 }
0x12b2   : > { %31391 = vmatmul.mubr.msk.f32.vlgmr.msra.gmra.mrb[6].mxu0 %vm1016_vm3, %v38289_v57  ;;  %20669 = vmatpush1.msra.mxu1 %v19932_v3  ;;  %vm38397_vm2 = vcmp.eq.s32.totalorder %v21720_v49, 1 }
0x12b3   : > { %20926 = vmatpush1.msra.mxu0 %v20810_v56  ;;  %20732 = vmatprep.mubr.f32.mxu1 %v37916_v46  ;;  %v20784_v47 = vpop.permute.xlu1 %20783  ;;  %v21744_v56 = vrot.slane %v38391_v9, %v40175_v27 }
0x12b4   : > { %20989 = vmatprep.mubr.f32.mxu0 %v37916_v46  ;;  %20996 = vmatprep.subr.mxu1 %v20813_v24  ;;  %v20782_v42 = vpop.permute.xlu0 %20781 }
0x12b5   : > { %31389 = vmatmul.mubr.msk.f32.vlgmr.msra.gmra.mrb[240].mxu1 %vm1016_vm3, %v38191_v31  ;;  %21067 = vmatprep.subr.mxu0 %v20815_v13  ;;  %v20817_v48 = vsel %vm20807_vm13, %v20782_v42, %v20784_v47  ;;  %v20816_v25 = vsel %vm20807_vm13, %v20780_v23, %v20782_v42  ;;  %vm38443_vm14 = vcmp.eq.s32.totalorder %v21744_v56, 1 }
0x12b6   : > { %31392 = vmatmul.mubr.msk.f32.vlgmr.msra.gmra.mrb[4].mxu0 %vm1016_vm3, %v38289_v57  ;;  %20997 = vmatpush1.msra.mxu1 %v20812_v37 }
0x12b7   : > { %21060 = vmatprep.mubr.f32.mxu1 %v37916_v46  ;;  %21068 = vmatpush1.msra.mxu0 %v20814_v20  ;;  %v20788_v19 = vpop.permute.xlu1 %20787 }
0x12b8   : > { %21131 = vmatprep.mubr.f32.mxu0 %v37916_v46  ;;  %21138 = vmatprep.subr.mxu1 %v20817_v48  ;;  %v20786_v6 = vpop.permute.xlu0 %20785 }
0x12b9   : > { %31393 = vmatmul.mubr.msk.f32.vlgmr.msra.gmra.mrb[232].mxu1 %vm1016_vm3, %v38289_v57  ;;  %v20819_v60 = vsel %vm20807_vm13, %v20786_v6, %v20788_v19  ;;  %v20818_v2 = vsel %vm20807_vm13, %v20784_v47, %v20786_v6  ;;  %21659 = vperm.xlu0 %32459, %v13632_v0  }
0x12ba   : > { %31394 = vmatmul.mubr.msk.f32.vlgmr.msra.gmra.mrb[8].mxu0 %vm1016_vm3, %v38289_v57  ;;  %21139 = vmatpush1.msra.mxu1 %v20816_v25 }
0x12bb   : > { %21202 = vmatprep.mubr.f32.mxu1 %v37916_v46  ;;  %21209 = vmatprep.subr.mxu0 %v20819_v60 }
0x12bc   : > { %21210 = vmatpush1.msra.mxu0 %v20818_v2  ;;  %21273 = vmatprep.mubr.f32.mxu0 %v37916_v46  ;;  %v20792_v26 = vpop.permute.xlu1 %20791 }
0x12bd   : > { %31395 = vmatmul.mubr.msk.f32.vlgmr.msra.gmra.mrb[234].mxu1 %vm1016_vm3, %v38289_v57  ;;  %v20790_v45 = vpop.permute.xlu0 %20789  ;;  %21912 = vrot.lane.b32.xlu1 %v37916_v46, %s33067_s23 }
0x12be   : > { %31396 = vmatmul.mubr.msk.f32.vlgmr.msra.gmra.mrb[10].mxu0 %vm1016_vm3, %v38289_v57  ;;  %v20821_v41 = vsel %vm20807_vm13, %v20790_v45, %v20792_v26  ;;  %v20820_v59 = vsel %vm20807_vm13, %v20788_v19, %v20790_v45  ;;  %21344 = vmatprep.mubr.f32.mxu1 %v37916_v46 }
0x12bf   : > { %21280 = vmatprep.subr.mxu1 %v20821_v41  ;;  %21415 = vmatprep.mubr.f32.mxu0 %v37916_v46 }
0x12c0   : > { %21281 = vmatpush1.msra.mxu1 %v20820_v59  ;;  %v21752_v59 = vrot.slane %v38391_v9, %v40179_v39 }
0x12c1   : > { %31397 = vmatmul.mubr.msk.f32.vlgmr.msra.gmra.mrb[236].mxu1 %vm1016_vm3, %v38289_v57  ;;  %22783 = vrot.lane.b32.xlu1 %v37916_v46, %s33068_s2 }
0x12c2   : > { %21486 = vmatprep.mubr.f32.mxu1 %v37916_v46 }
0x12c3   : > { %v20796_v14 = vpop.permute.xlu1 %20795  ;;  %v20794_v11 = vpop.permute.xlu0 %20793 }
0x12c4   : > { %v20823_v17 = vsel %vm20807_vm13, %v20794_v11, %v20796_v14  ;;  %v20822_v36 = vsel %vm20807_vm13, %v20792_v26, %v20794_v11 }
0x12c5   : > { %21351 = vmatprep.subr.mxu0 %v20823_v17 }
0x12c6   : > { %21352 = vmatpush1.msra.mxu0 %v20822_v36 }
0x12c7   : > { %31398 = vmatmul.mubr.msk.f32.vlgmr.msra.gmra.mrb[12].mxu0 %vm1016_vm3, %v38289_v57 }
0x12c8   : > { %v20804_v4 = vpop.permute.xlu1 %20803  ;;  %v20802_v53 = vpop.permute.xlu0 %20801  ;;  %21557 = vmatprep.mubr.f32.mxu0 %v37916_v46 }
0x12c9   : > { %v20827_v55 = vsel %vm20807_vm13, %v20802_v53, %v20804_v4 }
0x12ca   : > { %21493 = vmatprep.subr.mxu0 %v20827_v55 }
0x12cd   : > { %v20800_v7 = vpop.permute.xlu1 %20799  ;;  %v20798_v54 = vpop.permute.xlu0 %20797 }
0x12ce   : > { %v20825_v44 = vsel %vm20807_vm13, %v20798_v54, %v20800_v7  ;;  %v20826_v63 = vsel %vm20807_vm13, %v20800_v7, %v20802_v53  ;;  %v20824_v31 = vsel %vm20807_vm13, %v20796_v14, %v20798_v54  ;;  %v21756_v54 = vrot.slane %v38391_v9, %v40180_v10 }
0x12cf   : > { %21422 = vmatprep.subr.mxu1 %v20825_v44  ;;  %21494 = vmatpush1.msra.mxu0 %v20826_v63 }
0x12d0   : > { %21423 = vmatpush1.msra.mxu1 %v20824_v31  ;;  %31400 = vmatmul.mubr.msk.f32.vlgmr.msra.gmra.mrb[14].mxu0 %vm1016_vm3, %v38289_v57 }
0x12d1   : > { %v20806_v5 = vpop.permute.xlu1 %20805  ;;  %31399 = vmatmul.mubr.msk.f32.vlgmr.msra.gmra.mrb[238].mxu1 %vm1016_vm3, %v38289_v57  ;;  %22634 = vmatprep.mubr.f32.mxu0 %v37916_v46 }
0x12d2   : > { %21564 = vmatprep.subr.mxu1 %v20806_v5  ;;  %v20828_v21 = vsel %vm20807_vm13, %v20804_v4, %v20806_v5  ;;  %21628 = vmatprep.mubr.f32.mxu1 %v37916_v46 }
0x12d3   : > { %21565 = vmatpush1.msra.mxu1 %v20828_v21  ;;  %v21760_v21 = vrot.slane %v38391_v9, %v40181_v43 }
0x12d5   : > { %31401 = vmatmul.mubr.msk.f32.vlgmr.msra.gmra.mrb[240].mxu1 %vm1016_vm3, %v38289_v57  ;;  %v40184_v57 = vld [vmem:[#allocation28_spill] sm:$0xff] }
0x12d6   : > { %22066 = vmatprep.mubr.f32.mxu1 %v37916_v46  ;;  %v40176_v46 = vld [vmem:[#allocation24_spill] sm:$0xff]  ;;  %v21740_v3 = vrot.slane %v21706_v8, %v40184_v57 }
0x12d7   : > { %v21716_v15 = vrot.slane %v21706_v8, %v40176_v46  ;;  %v21748_v6 = vrot.slane %v38391_v9, %v40176_v46 }
0x12d8   : > { %vm38431_vm15 = vcmp.eq.s32.totalorder %v21740_v3, 1 }
0x12d9   : > { %vm21798_vm1 = vcmp.eq.s32.totalorder %v21716_v15, 1 }
0x1338   : > { %v38375_v29 = vpop.permute.xlu0 %21659 }
0x1385   : > { %v20920_v52 = vpop.f32.mrb[6].mxu0 }
0x1386   : > { %v20922_v34 = vpop.f32.mrb[7].mxu0  ;;  %v21662_v12 = vadd.f32 %v38375_v29, %v20920_v52 }
0x1387   : > { %v21663_v38 = vadd.f32 %v38375_v29, %v20922_v34 }
0x1388   : > { %v21684_v62 = vmax.f32 %v21662_v12, 0.0 }
0x1389   : > { %v21685_v61 = vmax.f32 %v21663_v38, 0.0  ;;  %v20991_v18 = vpop.f32.mrb[4].mxu0 }
0x138a   : > { %v21664_v23 = vadd.f32 %v38375_v29, %v20991_v18  ;;  %v20993_v24 = vpop.f32.mrb[5].mxu0  ;;  %v38405_v13 = vsel %vm38379_vm0, %v21684_v62, 0.0  ;;  %vm38420_vm0 = vcmp.eq.s32.totalorder %v21732_v16, 1 }
0x138b   : > { %v38407_v47 = vsel %vm21798_vm1, %v21685_v61, 0.0  ;;  %v21665_v20 = vadd.f32 %v38375_v29, %v20993_v24  ;;  %21841 = vst [vmem:[#allocation3 + $0x8] sm:$0xff] %v38405_v13  ;;  %vm38424_vm1 = vcmp.eq.s32.totalorder %v21736_v40, 1  ;;  %v21764_v61 = vrot.slane %v38391_v9, %v40182_v33 }
0x138c   : > { %21842 = vst [vmem:[#allocation3 + $0x10] sm:$0xff] %v38407_v47  ;;  %v21686_v48 = vmax.f32 %v21664_v23, 0.0  ;;  %v21062_v0 = vpop.f32.mrb[232].mxu1 }
0x138d   : > { %v21687_v60 = vmax.f32 %v21665_v20, 0.0  ;;  %v21666_v2 = vadd.f32 %v38375_v29, %v21062_v0  ;;  %v21064_v26 = vpop.f32.mrb[233].mxu1  ;;  %v21133_v45 = vpop.f32.mrb[8].mxu0 }
0x138e   : > { %v38439_v14 = vsel %vm38397_vm2, %v21686_v48, 0.0  ;;  %v21667_v11 = vadd.f32 %v38375_v29, %v21064_v26  ;;  %v21668_v17 = vadd.f32 %v38375_v29, %v21133_v45  ;;  %v21135_v36 = vpop.f32.mrb[9].mxu0  ;;  %vm38456_vm2 = vcmp.eq.s32.totalorder %v21748_v6, 1 }
0x138f   : > { %21843 = vst [vmem:[#allocation3 + $0x18] sm:$0xff] %v38439_v14  ;;  %v38450_v53 = vsel %vm38410_vm4, %v21687_v60, 0.0  ;;  %v21688_v55 = vmax.f32 %v21666_v2, 0.0  ;;  %v21669_v7 = vadd.f32 %v38375_v29, %v21135_v36  ;;  %vm38467_vm4 = vcmp.eq.s32.totalorder %v21752_v59, 1  ;;  %v38525_v60 = vld [vmem:[%s40173_s21 + $0x10] sm:$0x3f] }
0x1390   : > { %21844 = vst [vmem:[#allocation3 + $0x20] sm:$0xff] %v38450_v53  ;;  %v21689_v44 = vmax.f32 %v21667_v11, 0.0  ;;  %v21690_v63 = vmax.f32 %v21668_v17, 0.0  ;;  %v21204_v31 = vpop.f32.mrb[234].mxu1  ;;  %v21768_v6 = vrot.slane %v38391_v9, %v40183_v35  ;;  %v21772_v26 = vrot.slane %v38391_v9, %v40184_v57 }
0x1391   : > { %v38464_v8 = vsel %vm38414_vm5, %v21688_v55, 0.0  ;;  %v21691_v22 = vmax.f32 %v21669_v7, 0.0  ;;  %v21670_v15 = vadd.f32 %v38375_v29, %v21204_v31  ;;  %v21206_v52 = vpop.f32.mrb[235].mxu1  ;;  %v21275_v34 = vpop.f32.mrb[10].mxu0  ;;  %vm21808_vm5 = vcmp.eq.s32.totalorder %v21756_v54, 1 }
0x1392   : > { %21845 = vst [vmem:[#allocation3 + $0x28] sm:$0xff] %v38464_v8  ;;  %v38474_v49 = vsel %vm38420_vm0, %v21689_v44, 0.0  ;;  %v38478_v12 = vsel %vm38424_vm1, %v21690_v63, 0.0  ;;  %v21671_v38 = vadd.f32 %v38375_v29, %v21206_v52  ;;  %v21672_v1 = vadd.f32 %v38375_v29, %v21275_v34  ;;  %v21277_v50 = vpop.f32.mrb[11].mxu0  ;;  %21922 = vrot.lane.b32.xlu0 %v38464_v8, %s33067_s23 }
0x1393   : > { %21846 = vst [vmem:[#allocation3 + $0x30] sm:$0xff] %v38474_v49  ;;  %21847 = vst [vmem:[#allocation3 + $0x38] sm:$0xff] %v38478_v12  ;;  %v38488_v16 = vsel %vm38431_vm15, %v21691_v22, 0.0  ;;  %v21692_v40 = vmax.f32 %v21670_v15, 0.0  ;;  %v21673_v62 = vadd.f32 %v38375_v29, %v21277_v50  ;;  %21924 = vrot.lane.b32.xlu1 %v38474_v49, %s33067_s23  ;;  %vm21809_vm15 = vcmp.eq.s32.totalorder %v21760_v21, 1 }
0x1394   : > { %21848 = vst [vmem:[#allocation3 + $0x40] sm:$0xff] %v38488_v16  ;;  %v21693_v18 = vmax.f32 %v21671_v38, 0.0  ;;  %v21694_v3 = vmax.f32 %v21672_v1, 0.0  ;;  %v21346_v23 = vpop.f32.mrb[236].mxu1  ;;  %vm13631_vm0 = vcmp.gt.f32.partialorder %v38525_v60, 0.0  ;;  %vm21811_vm1 = vcmp.eq.s32.totalorder %v21768_v6, 1 }
0x1395   : > { %v38498_v51 = vsel %vm38443_vm14, %v21692_v40, 0.0  ;;  %v21695_v24 = vmax.f32 %v21673_v62, 0.0  ;;  %v21674_v56 = vadd.f32 %v38375_v29, %v21346_v23  ;;  %v21348_v20 = vpop.f32.mrb[237].mxu1  ;;  %vm21810_vm14 = vcmp.eq.s32.totalorder %v21764_v61, 1 }
0x1396   : > { %21849 = vst [vmem:[#allocation3 + $0x48] sm:$0xff] %v38498_v51  ;;  %v38504_v42 = vsel %vm38456_vm2, %v21693_v18, 0.0  ;;  %v38508_v37 = vsel %vm38467_vm4, %v21694_v3, 0.0  ;;  %v21675_v48 = vadd.f32 %v38375_v29, %v21348_v20  ;;  %22793 = vrot.lane.b32.xlu0 %v38464_v8, %s33068_s2  ;;  %vm21812_vm2 = vcmp.eq.s32.totalorder %v21772_v26, 1 }
0x1397   : > { %21850 = vst [vmem:[#allocation3 + $0x50] sm:$0xff] %v38504_v42  ;;  %21851 = vst [vmem:[#allocation3 + $0x58] sm:$0xff] %v38508_v37  ;;  %v38515_v0 = vsel %vm21808_vm5, %v21695_v24, 0.0  ;;  %v21696_v25 = vmax.f32 %v21674_v56, 0.0  ;;  %22795 = vrot.lane.b32.xlu1 %v38474_v49, %s33068_s2  ;;  %v21708_v17 = vsel %vm13631_vm0, 1, %v40174_v30 }
0x1398   : > { %21852 = vst [vmem:[#allocation3 + $0x60] sm:$0xff] %v38515_v0  ;;  %v21697_v19 = vmax.f32 %v21675_v48, 0.0  ;;  %v21784_v55 = vrot.slane %v21708_v17, %v40179_v39  ;;  %v21776_v7 = vrot.slane %v21708_v17, %v40175_v27  ;;  %v21788_v30 = vrot.slane %v21708_v17, %v40180_v10  ;;  %v21913_v48 = vpop.permute.xlu1 %21912 }
0x1399   : > { %v38527_v2 = vsel %vm21809_vm15, %v21696_v25, 0.0  ;;  %v21780_v44 = vrot.slane %v21708_v17, %v40176_v46  ;;  %v21792_v52 = vrot.slane %v21708_v17, %v40181_v43  ;;  %v21796_v38 = vrot.slane %v21708_v17, %v40182_v33 }
0x139a   : > { %21853 = vst [vmem:[#allocation3 + $0x68] sm:$0xff] %v38527_v2  ;;  %v38532_v45 = vsel %vm21810_vm14, %v21697_v19, 0.0  ;;  %v21417_v41 = vpop.f32.mrb[12].mxu0  ;;  %21930 = vrot.lane.b32.xlu0 %v38498_v51, %s33067_s23  ;;  %vm21815_vm4 = vcmp.eq.s32.totalorder %v21784_v55, 1  ;;  %vm38565_vm5 = vcmp.eq.s32.totalorder %v21776_v7, 1  ;;  %vm21816_vm15 = vcmp.eq.s32.totalorder %v21788_v30, 1 }
0x139b   : > { %21854 = vst [vmem:[#allocation3 + $0x70] sm:$0xff] %v38532_v45  ;;  %v21676_v35 = vadd.f32 %v38375_v29, %v21417_v41  ;;  %v21419_v59 = vpop.f32.mrb[13].mxu0  ;;  %21932 = vrot.lane.b32.xlu1 %v38504_v42, %s33067_s23  ;;  %vm21814_vm14 = vcmp.eq.s32.totalorder %v21780_v44, 1 }
0x139c   : > { %v21677_v9 = vadd.f32 %v38375_v29, %v21419_v59  ;;  %v38684_v25 = vpop.permute.xlu1 %22783 }
0x139d   : > { %v21698_v57 = vmax.f32 %v21676_v35, 0.0 }
0x139e   : > { %v21699_v11 = vmax.f32 %v21677_v9, 0.0  ;;  %22801 = vrot.lane.b32.xlu0 %v38498_v51, %s33068_s2 }
0x139f   : > { %v38547_v36 = vsel %vm21811_vm1, %v21698_v57, 0.0  ;;  %21940 = vrot.lane.b32.xlu1 %v38532_v45, %s33067_s23  ;;  %vm21817_vm1 = vcmp.eq.s32.totalorder %v21792_v52, 1 }
0x13a0   : > { %21855 = vst [vmem:[#allocation3 + $0x78] sm:$0xff] %v38547_v36  ;;  %v38552_v4 = vsel %vm21812_vm2, %v21699_v11, 0.0  ;;  %vm21818_vm2 = vcmp.eq.s32.totalorder %v21796_v38, 1 }
0x13a1   : > { %21856 = vst [vmem:[#allocation3 + $0x80] sm:$0xff] %v38552_v4 }
0x13a2   : > { %21938 = vrot.lane.b32.xlu0 %v38527_v2, %s33067_s23 }
0x13a3   : > { %v21559_v54 = vpop.f32.mrb[14].mxu0  ;;  %21914 = vrot.lane.b32.xlu1 %v38405_v13, %s33067_s23 }
0x13a4   : > { %v21680_v63 = vadd.f32 %v38375_v29, %v21559_v54  ;;  %v21488_v31 = vpop.f32.mrb[238].mxu1  ;;  %v21561_v5 = vpop.f32.mrb[15].mxu0 }
0x13a5   : > { %v21678_v39 = vadd.f32 %v38375_v29, %v21488_v31  ;;  %v21681_v10 = vadd.f32 %v38375_v29, %v21561_v5  ;;  %v21490_v22 = vpop.f32.mrb[239].mxu1  ;;  %v38748_v31 = vld [vmem:[%s40205_s27 + $0x1] sm:$0x1]  ;;  %s40207_s27 = smov 77  }
0x13a6   : > { %v21702_v15 = vmax.f32 %v21680_v63, 0.0  ;;  %v21679_v46 = vadd.f32 %v38375_v29, %v21490_v22 }
0x13a7   : > { %v21700_v34 = vmax.f32 %v21678_v39, 0.0  ;;  %v21703_v58 = vmax.f32 %v21681_v10, 0.0  ;;  %22785 = vrot.lane.b32.xlu1 %v38405_v13, %s33068_s2 }
0x13a8   : > { %v38575_v1 = vsel %vm21815_vm4, %v21702_v15, 0.0  ;;  %v21701_v50 = vmax.f32 %v21679_v46, 0.0  ;;  %v21630_v40 = vpop.f32.mrb[240].mxu1  ;;  %vm21862_vm4 = vcmask 130048  }
0x13a9   : > { %21859 = vst [vmem:[#allocation3 + $0x98] sm:$0xff] %v38575_v1  ;;  %v38580_v62 = vsel %vm38565_vm5, %v21700_v34, 0.0  ;;  %v38582_v61 = vsel %vm21816_vm15, %v21703_v58, 0.0  ;;  %v21682_v43 = vadd.f32 %v38375_v29, %v21630_v40  ;;  %v21632_v18 = vpop.f32.mrb[241].mxu1 }
0x13aa   : > { %21857 = vst [vmem:[#allocation3 + $0x88] sm:$0xff] %v38580_v62  ;;  %21860 = vst [vmem:[#allocation3 + $0xa0] sm:$0xff] %v38582_v61  ;;  %v38587_v33 = vsel %vm21814_vm14, %v21701_v50, 0.0  ;;  %v21683_v3 = vadd.f32 %v38375_v29, %v21632_v18  ;;  %v38644_v29 = vld [vmem:[#allocation2] sm:$0xff] }
0x13ab   : > { %21858 = vst [vmem:[#allocation3 + $0x90] sm:$0xff] %v38587_v33  ;;  %v21704_v23 = vmax.f32 %v21682_v43, 0.0  ;;  %21948 = vrot.lane.b32.xlu0 %v38587_v33, %s33067_s23  ;;  %21920 = vrot.lane.b32.xlu1 %v38450_v53, %s33067_s23 }
0x13ac   : > { %v21705_v24 = vmax.f32 %v21683_v3, 0.0 }
0x13ad   : > { %v38595_v56 = vsel %vm21817_vm1, %v21704_v23, 0.0 }
0x13ae   : > { %21861 = vst [vmem:[#allocation3 + $0xa8] sm:$0xff] %v38595_v56  ;;  %v21840_v20 = vsel %vm21818_vm2, %v21705_v24, 0.0 }
0x13af   : > { %21863 = vst.msk [vmem:[#allocation3 + $0xb0] sm:$0xff] %vm21862_vm4, %v21840_v20  ;;  %21916 = vrot.lane.b32.xlu0 %v38407_v47, %s33067_s23  ;;  %22791 = vrot.lane.b32.xlu1 %v38450_v53, %s33068_s2 }
0x13b3   : > { %22787 = vrot.lane.b32.xlu0 %v38407_v47, %s33068_s2  ;;  %21928 = vrot.lane.b32.xlu1 %v38488_v16, %s33067_s23 }
0x13b7   : > { %21918 = vrot.lane.b32.xlu0 %v38439_v14, %s33067_s23  ;;  %22799 = vrot.lane.b32.xlu1 %v38488_v16, %s33068_s2 }
0x13bb   : > { %22789 = vrot.lane.b32.xlu0 %v38439_v14, %s33068_s2  ;;  %21936 = vrot.lane.b32.xlu1 %v38515_v0, %s33067_s23 }
0x13bf   : > { %21926 = vrot.lane.b32.xlu0 %v38478_v12, %s33067_s23  ;;  %22803 = vrot.lane.b32.xlu1 %v38504_v42, %s33068_s2 }
0x13c3   : > { %22797 = vrot.lane.b32.xlu0 %v38478_v12, %s33068_s2  ;;  %21944 = vrot.lane.b32.xlu1 %v38552_v4, %s33067_s23 }
0x13c7   : > { %21934 = vrot.lane.b32.xlu0 %v38508_v37, %s33067_s23  ;;  %21952 = vrot.lane.b32.xlu1 %v38582_v61, %s33067_s23 }
0x13cb   : > { %22805 = vrot.lane.b32.xlu0 %v38508_v37, %s33068_s2  ;;  %22807 = vrot.lane.b32.xlu1 %v38515_v0, %s33068_s2 }
0x13cf   : > { %21942 = vrot.lane.b32.xlu0 %v38547_v36, %s33067_s23  ;;  %22811 = vrot.lane.b32.xlu1 %v38532_v45, %s33068_s2 }
0x13d3   : > { %21950 = vrot.lane.b32.xlu0 %v38575_v1, %s33067_s23  ;;  %22815 = vrot.lane.b32.xlu1 %v38552_v4, %s33068_s2 }
0x13d7   : > { %22809 = vrot.lane.b32.xlu0 %v38527_v2, %s33068_s2  ;;  %23658 = vrot.lane.b32.xlu1 %v38405_v13, %s33070_s22 }
0x13db   : > { %22813 = vrot.lane.b32.xlu0 %v38547_v36, %s33068_s2  ;;  %23656 = vrot.lane.b32.xlu1 %v38644_v29, %s33070_s22 }
0x13df   : > { %22821 = vrot.lane.b32.xlu0 %v38575_v1, %s33068_s2  ;;  %23664 = vrot.lane.b32.xlu1 %v38450_v53, %s33070_s22 }
0x13e3   : > { %22819 = vrot.lane.b32.xlu0 %v38587_v33, %s33068_s2  ;;  %23668 = vrot.lane.b32.xlu1 %v38474_v49, %s33070_s22 }
0x13e7   : > { %23660 = vrot.lane.b32.xlu0 %v38407_v47, %s33070_s22  ;;  %23672 = vrot.lane.b32.xlu1 %v38488_v16, %s33070_s22 }
0x13eb   : > { %23662 = vrot.lane.b32.xlu0 %v38439_v14, %s33070_s22  ;;  %22823 = vrot.lane.b32.xlu1 %v38582_v61, %s33068_s2 }
0x13ef   : > { %23666 = vrot.lane.b32.xlu0 %v38464_v8, %s33070_s22  ;;  %23676 = vrot.lane.b32.xlu1 %v38504_v42, %s33070_s22 }
0x13f3   : > { %23670 = vrot.lane.b32.xlu0 %v38478_v12, %s33070_s22  ;;  %23680 = vrot.lane.b32.xlu1 %v38515_v0, %s33070_s22 }
0x13f7   : > { %23674 = vrot.lane.b32.xlu0 %v38498_v51, %s33070_s22  ;;  %23684 = vrot.lane.b32.xlu1 %v38532_v45, %s33070_s22 }
0x13fb   : > { %23678 = vrot.lane.b32.xlu0 %v38508_v37, %s33070_s22  ;;  %23688 = vrot.lane.b32.xlu1 %v38552_v4, %s33070_s22 }
0x13ff   : > { %23682 = vrot.lane.b32.xlu0 %v38527_v2, %s33070_s22  ;;  %24599 = vrot.lane.b32.xlu1 %v38405_v13, %s33069_s24 }
0x1403   : > { %23686 = vrot.lane.b32.xlu0 %v38547_v36, %s33070_s22  ;;  %24597 = vrot.lane.b32.xlu1 %v38644_v29, %s33069_s24 }
0x1404   : > { %v21923_v19 = vpop.permute.xlu0 %21922 }
0x1405   : > { %v38690_v6 = vpop.permute.xlu1 %21924 }
0x1406   : > { %v21961_v34 = vsel %vm13724_vm6, %v21923_v19, %v38690_v6 }
0x1407   : > { %23694 = vrot.lane.b32.xlu0 %v38575_v1, %s33070_s22  ;;  %24605 = vrot.lane.b32.xlu1 %v38450_v53, %s33069_s24 }
0x1408   : > { %v38696_v26 = vpop.permute.xlu0 %22793 }
0x1409   : > { %v38698_v41 = vpop.permute.xlu1 %22795 }
0x140b   : > { %23692 = vrot.lane.b32.xlu0 %v38587_v33, %s33070_s22  ;;  %24609 = vrot.lane.b32.xlu1 %v38474_v49, %s33069_s24 }
0x140c   : > { %v38704_v35 = vpop.permute.xlu0 %21930 }
0x140d   : > { %v38706_v59 = vpop.permute.xlu1 %21932 }
0x140e   : > { %v21965_v3 = vsel %vm13724_vm6, %v38704_v35, %v38706_v59 }
0x140f   : > { %24601 = vrot.lane.b32.xlu0 %v38407_v47, %s33069_s24  ;;  %23696 = vrot.lane.b32.xlu1 %v38582_v61, %s33070_s22 }
0x1410   : > { %v38714_v57 = vpop.permute.xlu0 %22801 }
0x1411   : > { %v38712_v9 = vpop.permute.xlu1 %21940 }
0x1413   : > { %24603 = vrot.lane.b32.xlu0 %v38439_v14, %s33069_s24  ;;  %24613 = vrot.lane.b32.xlu1 %v38488_v16, %s33069_s24 }
0x1414   : > { %v38724_v17 = vpop.permute.xlu0 %21938 }
0x1415   : > { %v21915_v11 = vpop.permute.xlu1 %21914 }
0x1416   : > { %v21956_v5 = vsel %vm13724_vm6, %v21913_v48, %v21915_v11 }
0x1417   : > { %24607 = vrot.lane.b32.xlu0 %v38464_v8, %s33069_s24  ;;  %24617 = vrot.lane.b32.xlu1 %v38504_v42, %s33069_s24 }
0x1419   : > { %v38726_v55 = vpop.permute.xlu1 %22785 }
0x141b   : > { %24611 = vrot.lane.b32.xlu0 %v38478_v12, %s33069_s24  ;;  %24621 = vrot.lane.b32.xlu1 %v38515_v0, %s33069_s24 }
0x141d   : > { %v38732_v7 = vpop.permute.xlu0 %21948  ;;  %v21921_v30 = vpop.permute.xlu1 %21920 }
0x141e   : > { %v21960_v38 = vsel %vm13724_vm6, %v21921_v30, %v21923_v19 }
0x141f   : > { %24615 = vrot.lane.b32.xlu0 %v38498_v51, %s33069_s24  ;;  %24625 = vrot.lane.b32.xlu1 %v38532_v45, %s33069_s24 }
0x1421   : > { %v21917_v54 = vpop.permute.xlu0 %21916  ;;  %v38738_v44 = vpop.permute.xlu1 %22791 }
0x1422   : > { %v21957_v63 = vsel %vm13724_vm6, %v21915_v11, %v21917_v54  ;;  %v21969_v11 = vsel %vm13724_vm6, %v38724_v17, %v38712_v9 }
0x1423   : > { %24619 = vrot.lane.b32.xlu0 %v38508_v37, %s33069_s24  ;;  %24629 = vrot.lane.b32.xlu1 %v38552_v4, %s33069_s24 }
0x1424   : > { %22002 = vmatprep.subr.mxu1 %v21957_v63 }
0x1425   : > { %22003 = vmatpush1.msra.mxu1 %v21956_v5  ;;  %v38751_v39 = vpop.permute.xlu0 %22787  ;;  %v21929_v21 = vpop.permute.xlu1 %21928 }
0x1426   : > { %31403 = vmatmul.mubr.msk.f32.vlgmr.msra.gmra.mrb[242].mxu1 %vm1016_vm3, %v38748_v31  ;;  %v21964_v20 = vsel %vm13724_vm6, %v21929_v21, %v38704_v35 }
0x1427   : > { %24623 = vrot.lane.b32.xlu0 %v38527_v2, %s33069_s24  ;;  %26305 = vrot.lane.b32.xlu1 %v38407_v47, %s33071_s5 }
0x1428   : > { %22137 = vmatprep.mubr.f32.mxu1 %v38644_v29 }
0x1429   : > { %v21919_v10 = vpop.permute.xlu0 %21918  ;;  %v38760_v22 = vpop.permute.xlu1 %22799 }
0x142a   : > { %v21959_v15 = vsel %vm13724_vm6, %v21919_v10, %v21921_v30  ;;  %v21958_v46 = vsel %vm13724_vm6, %v21917_v54, %v21919_v10 }
0x142b   : > { %24627 = vrot.lane.b32.xlu0 %v38547_v36, %s33069_s24  ;;  %26303 = vrot.lane.b32.xlu1 %v38405_v13, %s33071_s5 }
0x142c   : > { %22073 = vmatprep.subr.mxu1 %v21959_v15 }
0x142d   : > { %22074 = vmatpush1.msra.mxu1 %v21958_v46  ;;  %v38768_v52 = vpop.permute.xlu0 %22789  ;;  %v21937_v58 = vpop.permute.xlu1 %21936 }
0x142e   : > { %31404 = vmatmul.mubr.msk.f32.vlgmr.msra.gmra.mrb[244].mxu1 %vm1016_vm3, %v38748_v31  ;;  %22144 = vmatprep.subr.mxu1 %v21961_v34  ;;  %v22828_v34 = vsel %vm14596_vm7, %v38726_v55, %v38751_v39 }
0x142f   : > { %22145 = vmatpush1.msra.mxu1 %v21960_v38  ;;  %24635 = vrot.lane.b32.xlu0 %v38575_v1, %s33069_s24 }
0x1430   : > { %26311 = vrot.lane.b32.xlu1 %v38464_v8, %s33071_s5  ;;  %22208 = vmatprep.mubr.f32.mxu1 %v38644_v29 }
0x1431   : > { %v21927_v50 = vpop.permute.xlu0 %21926  ;;  %v38780_v40 = vpop.permute.xlu1 %22803 }
0x1432   : > { %31405 = vmatmul.mubr.msk.f32.vlgmr.msra.gmra.mrb[246].mxu1 %vm1016_vm3, %v38748_v31  ;;  %v21963_v43 = vsel %vm13724_vm6, %v21927_v50, %v21929_v21  ;;  %v21962_v18 = vsel %vm13724_vm6, %v38690_v6, %v21927_v50  ;;  %v22827_v50 = vsel %vm14596_vm7, %v38684_v25, %v38726_v55 }
0x1433   : > { %24633 = vrot.lane.b32.xlu0 %v38587_v33, %s33069_s24  ;;  %22215 = vmatprep.subr.mxu1 %v21963_v43  ;;  %v22830_v43 = vsel %vm14596_vm7, %v38768_v52, %v38738_v44 }
0x1434   : > { %24637 = vrot.lane.b32.xlu1 %v38582_v61, %s33069_s24  ;;  %22216 = vmatpush1.msra.mxu1 %v21962_v18  ;;  %v38882_v18 = vld [vmem:[%s40206_s4] sm:$0x1] }
0x1435   : > { %22279 = vmatprep.mubr.f32.mxu1 %v38644_v29  ;;  %v38795_v23 = vpop.permute.xlu0 %22797  ;;  %22286 = vmatprep.subr.mxu1 %v21965_v3  ;;  %v38797_v24 = vpop.permute.xlu1 %21944  ;;  %v22832_v3 = vsel %vm14596_vm7, %v38696_v26, %v38698_v41 }
0x1436   : > { %31406 = vmatmul.mubr.msk.f32.vlgmr.msra.gmra.mrb[248].mxu1 %vm1016_vm3, %v38748_v31 }
0x1437   : > { %22287 = vmatpush1.msra.mxu1 %v21964_v20  ;;  %26307 = vrot.lane.b32.xlu0 %v38439_v14, %s33071_s5 }
0x1438   : > { %26315 = vrot.lane.b32.xlu1 %v38478_v12, %s33071_s5  ;;  %22350 = vmatprep.mubr.f32.mxu1 %v38644_v29 }
0x1439   : > { %v21935_v48 = vpop.permute.xlu0 %21934  ;;  %v38808_v19 = vpop.permute.xlu1 %21952 }
0x143a   : > { %31407 = vmatmul.mubr.msk.f32.vlgmr.msra.gmra.mrb[250].mxu1 %vm1016_vm3, %v38748_v31  ;;  %v21967_v6 = vsel %vm13724_vm6, %v21935_v48, %v21937_v58  ;;  %v21966_v35 = vsel %vm13724_vm6, %v38706_v59, %v21935_v48  ;;  %v21968_v59 = vsel %vm13724_vm6, %v21937_v58, %v38724_v17 }
0x143b   : > { %26309 = vrot.lane.b32.xlu0 %v38450_v53, %s33071_s5  ;;  %22357 = vmatprep.subr.mxu1 %v21967_v6 }
0x143c   : > { %26319 = vrot.lane.b32.xlu1 %v38498_v51, %s33071_s5  ;;  %22358 = vmatpush1.msra.mxu1 %v21966_v35 }
0x143d   : > { %22421 = vmatprep.mubr.f32.mxu1 %v38644_v29  ;;  %v38823_v30 = vpop.permute.xlu0 %22805  ;;  %22428 = vmatprep.subr.mxu1 %v21969_v11  ;;  %v38825_v54 = vpop.permute.xlu1 %22807 }
0x143e   : > { %31408 = vmatmul.mubr.msk.f32.vlgmr.msra.gmra.mrb[252].mxu1 %vm1016_vm3, %v38748_v31 }
0x143f   : > { %22429 = vmatpush1.msra.mxu1 %v21968_v59  ;;  %26313 = vrot.lane.b32.xlu0 %v38474_v49, %s33071_s5 }
0x1440   : > { %26323 = vrot.lane.b32.xlu1 %v38508_v37, %s33071_s5  ;;  %22492 = vmatprep.mubr.f32.mxu1 %v38644_v29 }
0x1441   : > { %v21943_v63 = vpop.permute.xlu0 %21942  ;;  %v38836_v5 = vpop.permute.xlu1 %22811 }
0x1442   : > { %31409 = vmatmul.mubr.msk.f32.vlgmr.msra.gmra.mrb[254].mxu1 %vm1016_vm3, %v38748_v31  ;;  %v21971_v21 = vsel %vm13724_vm6, %v21943_v63, %v38797_v24  ;;  %v21970_v17 = vsel %vm13724_vm6, %v38712_v9, %v21943_v63 }
0x1443   : > { %26317 = vrot.lane.b32.xlu0 %v38488_v16, %s33071_s5  ;;  %22499 = vmatprep.subr.mxu1 %v21971_v21 }
0x1444   : > { %26327 = vrot.lane.b32.xlu1 %v38527_v2, %s33071_s5  ;;  %22500 = vmatpush1.msra.mxu1 %v21970_v17 }
0x1445   : > { %22563 = vmatprep.mubr.f32.mxu1 %v38644_v29  ;;  %v21951_v10 = vpop.permute.xlu0 %21950  ;;  %v38849_v15 = vpop.permute.xlu1 %22815 }
0x1446   : > { %31410 = vmatmul.mubr.msk.f32.vlgmr.msra.gmra.mrb[0].mxu1 %vm1016_vm3, %v38748_v31  ;;  %v21975_v46 = vsel %vm13724_vm6, %v21951_v10, %v38808_v19  ;;  %v21974_v9 = vsel %vm13724_vm6, %v38732_v7, %v21951_v10 }
0x1447   : > { %26321 = vrot.lane.b32.xlu0 %v38504_v42, %s33071_s5  ;;  %22641 = vmatprep.subr.mxu1 %v21975_v46 }
0x1448   : > { %26331 = vrot.lane.b32.xlu1 %v38547_v36, %s33071_s5  ;;  %22642 = vmatpush1.msra.mxu1 %v21974_v9 }
0x1449   : > { %22705 = vmatprep.mubr.f32.mxu1 %v38644_v29  ;;  %v38865_v58 = vpop.permute.xlu0 %22809  ;;  %22873 = vmatprep.subr.mxu1 %v22828_v34  ;;  %v38867_v38 = vpop.permute.xlu1 %23658 }
0x144a   : > { %31412 = vmatmul.mubr.msk.f32.vlgmr.msra.gmra.mrb[4].mxu1 %vm1016_vm3, %v38748_v31  ;;  %v22829_v31 = vsel %vm14596_vm7, %v38751_v39, %v38768_v52  ;;  %v22831_v39 = vsel %vm14596_vm7, %v38738_v44, %v38696_v26  ;;  %v22834_v52 = vsel %vm14596_vm7, %v38795_v23, %v38760_v22  ;;  %v22833_v26 = vsel %vm14596_vm7, %v38698_v41, %v38795_v23 }
0x144b   : > { %22874 = vmatpush1.msra.mxu1 %v22827_v50  ;;  %26325 = vrot.lane.b32.xlu0 %v38515_v0, %s33071_s5  ;;  %v22836_v44 = vsel %vm14596_vm7, %v38714_v57, %v38780_v40  ;;  %v22835_v41 = vsel %vm14596_vm7, %v38760_v22, %v38714_v57  ;;  %v22838_v23 = vsel %vm14596_vm7, %v38823_v30, %v38825_v54 }
0x144c   : > { %26335 = vrot.lane.b32.xlu1 %v38580_v62, %s33071_s5  ;;  %22944 = vmatprep.subr.mxu1 %v22830_v43  ;;  %v22837_v57 = vsel %vm14596_vm7, %v38780_v40, %v38823_v30  ;;  %v22840_v22 = vsel %vm14596_vm7, %v38865_v58, %v38836_v5  ;;  %v22839_v40 = vsel %vm14596_vm7, %v38825_v54, %v38865_v58 }
0x144d   : > { %22937 = vmatprep.mubr.f32.mxu1 %v38644_v29  ;;  %v38887_v25 = vpop.permute.xlu0 %22813  ;;  %v38889_v55 = vpop.permute.xlu1 %23656 }
0x144e   : > { %31414 = vmatmul.mubr.msk.f32.vlgmr.msra.gmra.mrb[242].mxu1 %vm1016_vm3, %v38882_v18  ;;  %v22842_v30 = vsel %vm14596_vm7, %v38887_v25, %v38849_v15  ;;  %v22841_v54 = vsel %vm14596_vm7, %v38836_v5, %v38887_v25 }
0x144f   : > { %22945 = vmatpush1.msra.mxu1 %v22829_v31  ;;  %26329 = vrot.lane.b32.xlu0 %v38532_v45, %s33071_s5 }
0x1450   : > { %23015 = vmatprep.subr.mxu1 %v22832_v3  ;;  %26343 = vrot.lane.b32.xlu1 %v38595_v56, %s33071_s5  ;;  %v23700_v3 = vsel %vm15470_vm8, %v38889_v55, %v38867_v38 }
0x1451   : > { %23008 = vmatprep.mubr.f32.mxu1 %v38644_v29  ;;  %v38904_v20 = vpop.permute.xlu0 %22821  ;;  %v38906_v48 = vpop.permute.xlu1 %23664 }
0x1452   : > { %31415 = vmatmul.mubr.msk.f32.vlgmr.msra.gmra.mrb[244].mxu1 %vm1016_vm3, %v38882_v18 }
0x1453   : > { %23016 = vmatpush1.msra.mxu1 %v22831_v39  ;;  %26333 = vrot.lane.b32.xlu0 %v38552_v4, %s33071_s5  ;;  %v39029_v39 = vld [vmem:[%s40206_s4 + $0x2] sm:$0x1] }
0x1454   : > { %23086 = vmatprep.subr.mxu1 %v22834_v52  ;;  %27200 = vrot.lane.b32.xlu1 %v38407_v47, %s40207_s27 }
0x1455   : > { %23079 = vmatprep.mubr.f32.mxu1 %v38644_v29  ;;  %v38921_v6 = vpop.permute.xlu0 %22819  ;;  %v38923_v35 = vpop.permute.xlu1 %23668 }
0x1456   : > { %31416 = vmatmul.mubr.msk.f32.vlgmr.msra.gmra.mrb[246].mxu1 %vm1016_vm3, %v38882_v18  ;;  %v22845_v5 = vsel %vm14596_vm7, %v38921_v6, %v38904_v20 }
0x1457   : > { %23087 = vmatpush1.msra.mxu1 %v22833_v26  ;;  %26339 = vrot.lane.b32.xlu0 %v38575_v1, %s33071_s5 }
0x1458   : > { %23157 = vmatprep.subr.mxu1 %v22836_v44  ;;  %27198 = vrot.lane.b32.xlu1 %v38405_v13, %s40207_s27 }
0x1459   : > { %23150 = vmatprep.mubr.f32.mxu1 %v38644_v29  ;;  %v38938_v11 = vpop.permute.xlu0 %23660  ;;  %v38940_v59 = vpop.permute.xlu1 %23672 }
0x145a   : > { %31417 = vmatmul.mubr.msk.f32.vlgmr.msra.gmra.mrb[248].mxu1 %vm1016_vm3, %v38882_v18  ;;  %v23701_v43 = vsel %vm15470_vm8, %v38867_v38, %v38938_v11 }
0x145b   : > { %23158 = vmatpush1.msra.mxu1 %v22835_v41  ;;  %27202 = vrot.lane.b32.xlu0 %v38439_v14, %s40207_s27 }
0x145c   : > { %23228 = vmatprep.subr.mxu1 %v22838_v23  ;;  %27206 = vrot.lane.b32.xlu1 %v38464_v8, %s40207_s27 }
0x145d   : > { %23221 = vmatprep.mubr.f32.mxu1 %v38644_v29  ;;  %v23663_v63 = vpop.permute.xlu0 %23662  ;;  %v38955_v21 = vpop.permute.xlu1 %22823 }
0x145e   : > { %31418 = vmatmul.mubr.msk.f32.vlgmr.msra.gmra.mrb[250].mxu1 %vm1016_vm3, %v38882_v18  ;;  %v22846_v34 = vsel %vm14596_vm7, %v38904_v20, %v38955_v21  ;;  %v23703_v20 = vsel %vm15470_vm8, %v23663_v63, %v38906_v48  ;;  %v23702_v52 = vsel %vm15470_vm8, %v38938_v11, %v23663_v63 }
0x145f   : > { %23229 = vmatpush1.msra.mxu1 %v22837_v57  ;;  %27204 = vrot.lane.b32.xlu0 %v38450_v53, %s40207_s27 }
0x1460   : > { %23299 = vmatprep.subr.mxu1 %v22840_v22  ;;  %27210 = vrot.lane.b32.xlu1 %v38478_v12, %s40207_s27 }
0x1461   : > { %23292 = vmatprep.mubr.f32.mxu1 %v38644_v29  ;;  %v23667_v17 = vpop.permute.xlu0 %23666  ;;  %v38970_v10 = vpop.permute.xlu1 %23676 }
0x1462   : > { %31419 = vmatmul.mubr.msk.f32.vlgmr.msra.gmra.mrb[252].mxu1 %vm1016_vm3, %v38882_v18  ;;  %v23705_v26 = vsel %vm15470_vm8, %v23667_v17, %v38923_v35  ;;  %v23704_v11 = vsel %vm15470_vm8, %v38906_v48, %v23667_v17 }
0x1463   : > { %23300 = vmatpush1.msra.mxu1 %v22839_v40  ;;  %27208 = vrot.lane.b32.xlu0 %v38474_v49, %s40207_s27 }
0x1464   : > { %23370 = vmatprep.subr.mxu1 %v22842_v30  ;;  %27214 = vrot.lane.b32.xlu1 %v38498_v51, %s40207_s27 }
0x1465   : > { %23363 = vmatprep.mubr.f32.mxu1 %v38644_v29  ;;  %v23671_v46 = vpop.permute.xlu0 %23670  ;;  %v38985_v9 = vpop.permute.xlu1 %23680 }
0x1466   : > { %31420 = vmatmul.mubr.msk.f32.vlgmr.msra.gmra.mrb[254].mxu1 %vm1016_vm3, %v38882_v18  ;;  %v23707_v23 = vsel %vm15470_vm8, %v23671_v46, %v38940_v59  ;;  %v23706_v48 = vsel %vm15470_vm8, %v38923_v35, %v23671_v46 }
0x1467   : > { %23371 = vmatpush1.msra.mxu1 %v22841_v54  ;;  %27212 = vrot.lane.b32.xlu0 %v38488_v16, %s40207_s27 }
0x1468   : > { %23512 = vmatprep.subr.mxu1 %v22846_v34  ;;  %27218 = vrot.lane.b32.xlu1 %v38508_v37, %s40207_s27 }
0x1469   : > { %23434 = vmatprep.mubr.f32.mxu1 %v38644_v29  ;;  %v23675_v58 = vpop.permute.xlu0 %23674  ;;  %v39000_v50 = vpop.permute.xlu1 %23684 }
0x146a   : > { %31421 = vmatmul.mubr.msk.f32.vlgmr.msra.gmra.mrb[0].mxu1 %vm1016_vm3, %v38882_v18  ;;  %v23709_v22 = vsel %vm15470_vm8, %v23675_v58, %v38970_v10  ;;  %v23708_v35 = vsel %vm15470_vm8, %v38940_v59, %v23675_v58 }
0x146b   : > { %23513 = vmatpush1.msra.mxu1 %v22845_v5  ;;  %27216 = vrot.lane.b32.xlu0 %v38504_v42, %s40207_s27 }
0x146c   : > { %23746 = vmatprep.subr.mxu1 %v23701_v43  ;;  %27222 = vrot.lane.b32.xlu1 %v38527_v2, %s40207_s27 }
0x146d   : > { %23576 = vmatprep.mubr.f32.mxu1 %v38644_v29  ;;  %v23679_v25 = vpop.permute.xlu0 %23678  ;;  %v39015_v31 = vpop.permute.xlu1 %23688 }
0x146e   : > { %31423 = vmatmul.mubr.msk.f32.vlgmr.msra.gmra.mrb[4].mxu1 %vm1016_vm3, %v38882_v18  ;;  %v23711_v30 = vsel %vm15470_vm8, %v23679_v25, %v38985_v9  ;;  %v23710_v59 = vsel %vm15470_vm8, %v38970_v10, %v23679_v25 }
0x146f   : > { %23747 = vmatpush1.msra.mxu1 %v23700_v3  ;;  %27220 = vrot.lane.b32.xlu0 %v38515_v0, %s40207_s27 }
0x1470   : > { %23817 = vmatprep.subr.mxu1 %v23703_v20  ;;  %27226 = vrot.lane.b32.xlu1 %v38547_v36, %s40207_s27 }
0x1471   : > { %23810 = vmatprep.mubr.f32.mxu1 %v38644_v29  ;;  %v23683_v38 = vpop.permute.xlu0 %23682  ;;  %v39034_v55 = vpop.permute.xlu1 %24599 }
0x1472   : > { %31426 = vmatmul.mubr.msk.f32.vlgmr.msra.gmra.mrb[242].mxu1 %vm1016_vm3, %v39029_v39  ;;  %v23713_v54 = vsel %vm15470_vm8, %v23683_v38, %v39000_v50  ;;  %v23712_v10 = vsel %vm15470_vm8, %v38985_v9, %v23683_v38 }
0x1473   : > { %23818 = vmatpush1.msra.mxu1 %v23702_v52  ;;  %27224 = vrot.lane.b32.xlu0 %v38532_v45, %s40207_s27 }
0x1474   : > { %23888 = vmatprep.subr.mxu1 %v23705_v26  ;;  %27230 = vrot.lane.b32.xlu1 %v38580_v62, %s40207_s27 }
0x1475   : > { %23881 = vmatprep.mubr.f32.mxu1 %v38644_v29  ;;  %v23687_v44 = vpop.permute.xlu0 %23686  ;;  %v39047_v41 = vpop.permute.xlu1 %24597 }
0x1476   : > { %31427 = vmatmul.mubr.msk.f32.vlgmr.msra.gmra.mrb[244].mxu1 %vm1016_vm3, %v39029_v39  ;;  %v23715_v34 = vsel %vm15470_vm8, %v23687_v44, %v39015_v31  ;;  %v23714_v9 = vsel %vm15470_vm8, %v39000_v50, %v23687_v44  ;;  %v24643_v20 = vsel %vm16414_vm9, %v39047_v41, %v39034_v55 }
0x1477   : > { %23889 = vmatpush1.msra.mxu1 %v23704_v11  ;;  %27228 = vrot.lane.b32.xlu0 %v38552_v4, %s40207_s27 }
0x1478   : > { %23959 = vmatprep.subr.mxu1 %v23707_v23  ;;  %27238 = vrot.lane.b32.xlu1 %v38595_v56, %s40207_s27 }
0x1479   : > { %23952 = vmatprep.mubr.f32.mxu1 %v38644_v29  ;;  %v23695_v63 = vpop.permute.xlu0 %23694  ;;  %v39060_v57 = vpop.permute.xlu1 %24605 }
0x147a   : > { %31428 = vmatmul.mubr.msk.f32.vlgmr.msra.gmra.mrb[246].mxu1 %vm1016_vm3, %v39029_v39 }
0x147b   : > { %23960 = vmatpush1.msra.mxu1 %v23706_v48  ;;  %27234 = vrot.lane.b32.xlu0 %v38575_v1, %s40207_s27 }
0x147c   : > { %24030 = vmatprep.subr.mxu1 %v23709_v22  ;;  %28095 = vrot.lane.b32.xlu1 %v38407_v47, %s40208_s1 }
0x147d   : > { %24023 = vmatprep.mubr.f32.mxu1 %v38644_v29  ;;  %v39073_v17 = vpop.permute.xlu0 %23692  ;;  %v39075_v40 = vpop.permute.xlu1 %24609 }
0x147e   : > { %31429 = vmatmul.mubr.msk.f32.vlgmr.msra.gmra.mrb[248].mxu1 %vm1016_vm3, %v39029_v39  ;;  %v23718_v50 = vsel %vm15470_vm8, %v39073_v17, %v23695_v63 }
0x147f   : > { %24031 = vmatpush1.msra.mxu1 %v23708_v35  ;;  %28097 = vrot.lane.b32.xlu0 %v38439_v14, %s40208_s1 }
0x1480   : > { %24101 = vmatprep.subr.mxu1 %v23711_v30  ;;  %28093 = vrot.lane.b32.xlu1 %v38405_v13, %s40208_s1 }
0x1481   : > { %24094 = vmatprep.mubr.f32.mxu1 %v38644_v29  ;;  %v24602_v47 = vpop.permute.xlu0 %24601  ;;  %v39088_v46 = vpop.permute.xlu1 %23696 }
0x1482   : > { %31430 = vmatmul.mubr.msk.f32.vlgmr.msra.gmra.mrb[250].mxu1 %vm1016_vm3, %v39029_v39  ;;  %v23719_v5 = vsel %vm15470_vm8, %v23695_v63, %v39088_v46  ;;  %v24644_v3 = vsel %vm16414_vm9, %v39034_v55, %v24602_v47 }
0x1483   : > { %24102 = vmatpush1.msra.mxu1 %v23710_v59  ;;  %21946 = vrot.lane.b32.xlu0 %v38580_v62, %s33067_s23 }
0x1484   : > { %24172 = vmatprep.subr.mxu1 %v23713_v54  ;;  %28099 = vrot.lane.b32.xlu1 %v38450_v53, %s40208_s1 }
0x1485   : > { %24165 = vmatprep.mubr.f32.mxu1 %v38644_v29  ;;  %v24604_v13 = vpop.permute.xlu0 %24603  ;;  %v39101_v14 = vpop.permute.xlu1 %24613 }
0x1486   : > { %31431 = vmatmul.mubr.msk.f32.vlgmr.msra.gmra.mrb[252].mxu1 %vm1016_vm3, %v39029_v39  ;;  %v24645_v52 = vsel %vm16414_vm9, %v24602_v47, %v24604_v13 }
0x1487   : > { %24173 = vmatpush1.msra.mxu1 %v23712_v10  ;;  %26341 = vrot.lane.b32.xlu0 %v38582_v61, %s33071_s5 }
0x1488   : > { %24243 = vmatprep.subr.mxu1 %v23715_v34  ;;  %21954 = vrot.lane.b32.xlu1 %v38595_v56, %s33067_s23 }
0x1489   : > { %24236 = vmatprep.mubr.f32.mxu1 %v38644_v29  ;;  %v24608_v53 = vpop.permute.xlu0 %24607  ;;  %v39114_v58 = vpop.permute.xlu1 %24617 }
0x148a   : > { %31432 = vmatmul.mubr.msk.f32.vlgmr.msra.gmra.mrb[254].mxu1 %vm1016_vm3, %v39029_v39  ;;  %v24648_v26 = vsel %vm16414_vm9, %v24608_v53, %v39075_v40  ;;  %v24647_v11 = vsel %vm16414_vm9, %v39060_v57, %v24608_v53 }
0x148b   : > { %24244 = vmatpush1.msra.mxu1 %v23714_v9  ;;  %28101 = vrot.lane.b32.xlu0 %v38464_v8, %s40208_s1  ;;  %v32747_v9 = vld [vmem:[#allocation3 + $0x18] sm:$0xff] }
0x148c   : > { %24385 = vmatprep.subr.mxu1 %v23719_v5  ;;  %28105 = vrot.lane.b32.xlu1 %v38478_v12, %s40208_s1 }
0x148d   : > { %24307 = vmatprep.mubr.f32.mxu1 %v38644_v29  ;;  %v24612_v43 = vpop.permute.xlu0 %24611  ;;  %v39127_v25 = vpop.permute.xlu1 %24621 }
0x148e   : > { %31433 = vmatmul.mubr.msk.f32.vlgmr.msra.gmra.mrb[0].mxu1 %vm1016_vm3, %v39029_v39  ;;  %v24650_v23 = vsel %vm16414_vm9, %v24612_v43, %v39101_v14  ;;  %v24649_v63 = vsel %vm16414_vm9, %v39075_v40, %v24612_v43  ;;  %v39273_v43 = vld [vmem:[#allocation3 + $0xb0] sm:$0xff] }
0x148f   : > { %24386 = vmatpush1.msra.mxu1 %v23718_v50  ;;  %28103 = vrot.lane.b32.xlu0 %v38474_v49, %s40208_s1  ;;  %v24646_v49 = vsel %vm16414_vm9, %v24604_v13, %v39060_v57  ;;  %v32749_v50 = vld [vmem:[#allocation3 + $0x20] sm:$0xff] }
0x1490   : > { %24690 = vmatprep.subr.mxu1 %v24644_v3  ;;  %28107 = vrot.lane.b32.xlu1 %v38488_v16, %s40208_s1  ;;  %v39154_v16 = vld [vmem:[%s40206_s4 + $0x3] sm:$0x1] }
0x1491   : > { %24449 = vmatprep.mubr.f32.mxu1 %v38644_v29  ;;  %v24616_v8 = vpop.permute.xlu0 %24615  ;;  %v39140_v12 = vpop.permute.xlu1 %24625 }
0x1492   : > { %31435 = vmatmul.mubr.msk.f32.vlgmr.msra.gmra.mrb[4].mxu1 %vm1016_vm3, %v39029_v39  ;;  %v24652_v57 = vsel %vm16414_vm9, %v24616_v8, %v39114_v58 }
0x1493   : > { %24691 = vmatpush1.msra.mxu1 %v24643_v20  ;;  %22817 = vrot.lane.b32.xlu0 %v38580_v62, %s33068_s2 }
0x1494   : > { %24761 = vmatprep.subr.mxu1 %v24646_v49  ;;  %22825 = vrot.lane.b32.xlu1 %v38595_v56, %s33068_s2  ;;  %s40209_s2 = smov 75  }
0x1495   : > { %24754 = vmatprep.mubr.f32.mxu1 %v38644_v29  ;;  %v24620_v38 = vpop.permute.xlu0 %24619  ;;  %v39159_v55 = vpop.permute.xlu1 %24629 }
0x1496   : > { %31438 = vmatmul.mubr.msk.f32.vlgmr.msra.gmra.mrb[242].mxu1 %vm1016_vm3, %v39154_v16  ;;  %v24654_v22 = vsel %vm16414_vm9, %v24620_v38, %v39127_v25  ;;  %v24653_v35 = vsel %vm16414_vm9, %v39114_v58, %v24620_v38  ;;  %v32746_v58 = vld [vmem:[#allocation3 + $0x10] sm:$0xff]  ;;  %v32751_v38 = vld [vmem:[#allocation3 + $0x28] sm:$0xff] }
0x1497   : > { %24762 = vmatpush1.msra.mxu1 %v24645_v52  ;;  %28109 = vrot.lane.b32.xlu0 %v38498_v51, %s40208_s1  ;;  %v32752_v52 = vld [vmem:[#allocation3 + $0x40] sm:$0xff] }
0x1498   : > { %24832 = vmatprep.subr.mxu1 %v24648_v26  ;;  %28113 = vrot.lane.b32.xlu1 %v38508_v37, %s40208_s1 }
0x1499   : > { %24825 = vmatprep.mubr.f32.mxu1 %v38644_v29  ;;  %v24624_v44 = vpop.permute.xlu0 %24623  ;;  %v39171_v41 = vpop.permute.xlu1 %26305 }
0x149a   : > { %31439 = vmatmul.mubr.msk.f32.vlgmr.msra.gmra.mrb[244].mxu1 %vm1016_vm3, %v39154_v16  ;;  %v24655_v47 = vsel %vm16414_vm9, %v39127_v25, %v24624_v44  ;;  %v32748_v25 = vld [vmem:[#allocation3 + $0x8] sm:$0xff] }
0x149b   : > { %24833 = vmatpush1.msra.mxu1 %v24647_v11  ;;  %28111 = vrot.lane.b32.xlu0 %v38504_v42, %s40208_s1  ;;  %v32754_v11 = vld [vmem:[#allocation3 + $0x50] sm:$0xff] }
0x149c   : > { %24903 = vmatprep.subr.mxu1 %v24650_v23  ;;  %28115 = vrot.lane.b32.xlu1 %v38515_v0, %s40208_s1  ;;  %v24651_v0 = vsel %vm16414_vm9, %v39101_v14, %v24616_v8 }
0x149d   : > { %24896 = vmatprep.mubr.f32.mxu1 %v38644_v29  ;;  %v24628_v51 = vpop.permute.xlu0 %24627  ;;  %v39184_v37 = vpop.permute.xlu1 %26303 }
0x149e   : > { %31440 = vmatmul.mubr.msk.f32.vlgmr.msra.gmra.mrb[246].mxu1 %vm1016_vm3, %v39154_v16  ;;  %v24657_v54 = vsel %vm16414_vm9, %v39140_v12, %v24628_v51 }
0x149f   : > { %24904 = vmatpush1.msra.mxu1 %v24649_v63  ;;  %23690 = vrot.lane.b32.xlu0 %v38580_v62, %s33070_s22  ;;  %v32755_v63 = vld [vmem:[#allocation3 + $0x48] sm:$0xff] }
0x14a0   : > { %24974 = vmatprep.subr.mxu1 %v24652_v57  ;;  %23698 = vrot.lane.b32.xlu1 %v38595_v56, %s33070_s22  ;;  %v32756_v57 = vld [vmem:[#allocation3 + $0x60] sm:$0xff] }
0x14a1   : > { %24967 = vmatprep.mubr.f32.mxu1 %v38644_v29  ;;  %v24636_v42 = vpop.permute.xlu0 %24635 }
0x14a2   : > { %31441 = vmatmul.mubr.msk.f32.vlgmr.msra.gmra.mrb[248].mxu1 %vm1016_vm3, %v39154_v16  ;;  %v39201_v48 = vpop.permute.xlu1 %26311 }
0x14a3   : > { %24975 = vmatpush1.msra.mxu1 %v24651_v0  ;;  %28117 = vrot.lane.b32.xlu0 %v38527_v2, %s40208_s1  ;;  %v24656_v2 = vsel %vm16414_vm9, %v24624_v44, %v39140_v12  ;;  %v32750_v12 = vld [vmem:[#allocation3 + $0x30] sm:$0xff]  ;;  %v32757_v0 = vld [vmem:[#allocation3 + $0x58] sm:$0xff] }
0x14a4   : > { %25045 = vmatprep.subr.mxu1 %v24654_v22  ;;  %28121 = vrot.lane.b32.xlu1 %v38547_v36, %s40208_s1  ;;  %v39330_v22 = vld [vmem:[#allocation3 + $0x70] sm:$0xff] }
0x14a5   : > { %25038 = vmatprep.mubr.f32.mxu1 %v38644_v29  ;;  %v39210_v40 = vpop.permute.xlu0 %24633 }
0x14a6   : > { %31442 = vmatmul.mubr.msk.f32.vlgmr.msra.gmra.mrb[250].mxu1 %vm1016_vm3, %v39154_v16  ;;  %v39216_v30 = vpop.permute.xlu1 %24637  ;;  %v24661_v34 = vsel %vm16414_vm9, %v39210_v40, %v24636_v42 }
0x14a7   : > { %25046 = vmatpush1.msra.mxu1 %v24653_v35  ;;  %28119 = vrot.lane.b32.xlu0 %v38532_v45, %s40208_s1  ;;  %v24658_v45 = vsel %vm16414_vm9, %v24628_v51, %v39159_v55  ;;  %v24662_v14 = vsel %vm16414_vm9, %v24636_v42, %v39216_v30 }
0x14a8   : > { %25116 = vmatprep.subr.mxu1 %v24656_v2  ;;  %28123 = vrot.lane.b32.xlu1 %v38552_v4, %s40208_s1 }
0x14a9   : > { %25109 = vmatprep.mubr.f32.mxu1 %v38644_v29  ;;  %v39225_v36 = vpop.permute.xlu0 %26307 }
0x14aa   : > { %31443 = vmatmul.mubr.msk.f32.vlgmr.msra.gmra.mrb[252].mxu1 %vm1016_vm3, %v39154_v16  ;;  %v39231_v59 = vpop.permute.xlu1 %26315 }
0x14ab   : > { %25117 = vmatpush1.msra.mxu1 %v24655_v47  ;;  %27236 = vrot.lane.b32.xlu0 %v38582_v61, %s40207_s27  ;;  %v32759_v47 = vld [vmem:[#allocation3 + $0x68] sm:$0xff] }
0x14ac   : > { %25187 = vmatprep.subr.mxu1 %v24658_v45  ;;  %24639 = vrot.lane.b32.xlu1 %v38595_v56, %s33069_s24  ;;  %v32760_v45 = vld [vmem:[#allocation3 + $0x80] sm:$0xff] }
0x14ad   : > { %25180 = vmatprep.mubr.f32.mxu1 %v38644_v29  ;;  %v39240_v4 = vpop.permute.xlu0 %26309 }
0x14ae   : > { %31444 = vmatmul.mubr.msk.f32.vlgmr.msra.gmra.mrb[254].mxu1 %vm1016_vm3, %v39154_v16  ;;  %v39246_v13 = vpop.permute.xlu1 %26319 }
0x14af   : > { %25188 = vmatpush1.msra.mxu1 %v24657_v54  ;;  %24631 = vrot.lane.b32.xlu0 %v38580_v62, %s33069_s24 }
0x14b0   : > { %25329 = vmatprep.subr.mxu1 %v24662_v14  ;;  %28129 = vrot.lane.b32.xlu1 %v38575_v1, %s40208_s1  ;;  %v32761_v14 = vld [vmem:[#allocation3 + $0x78] sm:$0xff] }
0x14b1   : > { %25251 = vmatprep.mubr.f32.mxu1 %v38644_v29  ;;  %v39255_v10 = vpop.permute.xlu0 %26313 }
0x14b2   : > { %31445 = vmatmul.mubr.msk.f32.vlgmr.msra.gmra.mrb[0].mxu1 %vm1016_vm3, %v39154_v16  ;;  %v39261_v53 = vpop.permute.xlu1 %26323 }
0x14b3   : > { %25330 = vmatpush1.msra.mxu1 %v24661_v34  ;;  %28125 = vrot.lane.b32.xlu0 %v38580_v62, %s40208_s1  ;;  %v39280_v62 = vld [vmem:[%s40206_s4 + $0x4] sm:$0x1]  ;;  %v32762_v34 = vld [vmem:[#allocation3 + $0xa0] sm:$0xff] }
0x14b4   : > { %25498 = vmatprep.subr.mxu1 %v32746_v58  ;;  %28992 = vrot.lane.b32.xlu1 %v32747_v9, %s40209_s2 }
0x14b5   : > { %25393 = vmatprep.mubr.f32.mxu1 %v38644_v29  ;;  %v39267_v1 = vpop.permute.xlu0 %26317 }
0x14b6   : > { %31447 = vmatmul.mubr.msk.f32.vlgmr.msra.gmra.mrb[4].mxu1 %vm1016_vm3, %v39154_v16  ;;  %v39271_v5 = vpop.permute.xlu1 %26327 }
0x14b7   : > { %25499 = vmatpush1.msra.mxu1 %v32748_v25  ;;  %24641 = vrot.lane.b32.xlu0 %v39273_v43, %s33069_s24 }
0x14b8   : > { %25569 = vmatprep.subr.mxu1 %v32749_v50  ;;  %28994 = vrot.lane.b32.xlu1 %v32749_v50, %s40209_s2  ;;  %v26348_v50 = vsel %vm18119_vm10, %v39171_v41, %v39225_v36 }
0x14b9   : > { %25562 = vmatprep.mubr.f32.mxu1 %v38644_v29  ;;  %v39284_v3 = vpop.permute.xlu0 %26321 }
0x14ba   : > { %31450 = vmatmul.mubr.msk.f32.vlgmr.msra.gmra.mrb[242].mxu1 %vm1016_vm3, %v39280_v62  ;;  %v39288_v8 = vpop.permute.xlu1 %26331 }
0x14bb   : > { %25570 = vmatpush1.msra.mxu1 %v32747_v9  ;;  %28133 = vrot.lane.b32.xlu0 %v38595_v56, %s40208_s1  ;;  %v32753_v56 = vld [vmem:[#allocation3 + $0x38] sm:$0xff] }
0x14bc   : > { %25640 = vmatprep.subr.mxu1 %v32750_v12  ;;  %26337 = vrot.lane.b32.xlu1 %v38587_v33, %s33071_s5 }
0x14bd   : > { %25633 = vmatprep.mubr.f32.mxu1 %v38644_v29  ;;  %v39295_v20 = vpop.permute.xlu0 %26325 }
0x14be   : > { %31451 = vmatmul.mubr.msk.f32.vlgmr.msra.gmra.mrb[244].mxu1 %vm1016_vm3, %v39280_v62  ;;  %v39299_v49 = vpop.permute.xlu1 %26335 }
0x14bf   : > { %25641 = vmatpush1.msra.mxu1 %v32751_v38  ;;  %28990 = vrot.lane.b32.xlu0 %v32746_v58, %s40209_s2 }
0x14c0   : > { %25711 = vmatprep.subr.mxu1 %v32752_v52  ;;  %29000 = vrot.lane.b32.xlu1 %v32753_v56, %s40209_s2 }
0x14c1   : > { %25704 = vmatprep.mubr.f32.mxu1 %v38644_v29  ;;  %v39304_v26 = vpop.permute.xlu0 %26329 }
0x14c2   : > { %31452 = vmatmul.mubr.msk.f32.vlgmr.msra.gmra.mrb[246].mxu1 %vm1016_vm3, %v39280_v62  ;;  %v39308_v44 = vpop.permute.xlu1 %26343 }
0x14c3   : > { %25712 = vmatpush1.msra.mxu1 %v32753_v56  ;;  %28988 = vrot.lane.b32.xlu0 %v32748_v25, %s40209_s2  ;;  %v39361_v25 = vld [vmem:[#allocation3 + $0x98] sm:$0xff] }
0x14c4   : > { %25782 = vmatprep.subr.mxu1 %v32754_v11  ;;  %28131 = vrot.lane.b32.xlu1 %v38582_v61, %s40208_s1 }
0x14c5   : > { %25775 = vmatprep.mubr.f32.mxu1 %v38644_v29  ;;  %v39314_v23 = vpop.permute.xlu0 %26333 }
0x14c6   : > { %31453 = vmatmul.mubr.msk.f32.vlgmr.msra.gmra.mrb[248].mxu1 %vm1016_vm3, %v39280_v62  ;;  %v39318_v51 = vpop.permute.xlu1 %27200 }
0x14c7   : > { %25783 = vmatpush1.msra.mxu1 %v32755_v63  ;;  %28996 = vrot.lane.b32.xlu0 %v32751_v38, %s40209_s2 }
0x14c8   : > { %25853 = vmatprep.subr.mxu1 %v32756_v57  ;;  %29002 = vrot.lane.b32.xlu1 %v32752_v52, %s40209_s2  ;;  %v26347_v52 = vsel %vm18119_vm10, %v39184_v37, %v39171_v41  ;;  %v26349_v37 = vsel %vm18119_vm10, %v39225_v36, %v39240_v4 }
0x14c9   : > { %25846 = vmatprep.mubr.f32.mxu1 %v38644_v29  ;;  %v39323_v61 = vpop.permute.xlu0 %26339 }
0x14ca   : > { %31454 = vmatmul.mubr.msk.f32.vlgmr.msra.gmra.mrb[250].mxu1 %vm1016_vm3, %v39280_v62  ;;  %v39327_v42 = vpop.permute.xlu1 %27198 }
0x14cb   : > { %25854 = vmatpush1.msra.mxu1 %v32757_v0  ;;  %28998 = vrot.lane.b32.xlu0 %v32750_v12, %s40209_s2  ;;  %v39368_v12 = vld [vmem:[#allocation3 + $0x90] sm:$0xff] }
0x14cc   : > { %25924 = vmatprep.subr.mxu1 %v39330_v22  ;;  %27232 = vrot.lane.b32.xlu1 %v38587_v33, %s40207_s27 }
0x14cd   : > { %25917 = vmatprep.mubr.f32.mxu1 %v38644_v29  ;;  %v39336_v35 = vpop.permute.xlu0 %27202 }
0x14ce   : > { %31455 = vmatmul.mubr.msk.f32.vlgmr.msra.gmra.mrb[252].mxu1 %vm1016_vm3, %v39280_v62  ;;  %v39340_v2 = vpop.permute.xlu1 %27206 }
0x14cf   : > { %25925 = vmatpush1.msra.mxu1 %v32759_v47  ;;  %26345 = vrot.lane.b32.xlu0 %v39273_v43, %s33071_s5 }
0x14d0   : > { %25995 = vmatprep.subr.mxu1 %v32760_v45  ;;  %29008 = vrot.lane.b32.xlu1 %v32757_v0, %s40209_s2  ;;  %v26352_v0 = vsel %vm18119_vm10, %v39255_v10, %v39231_v59 }
0x14d1   : > { %25988 = vmatprep.mubr.f32.mxu1 %v38644_v29  ;;  %v39346_v33 = vpop.permute.xlu0 %27204 }
0x14d2   : > { %31456 = vmatmul.mubr.msk.f32.vlgmr.msra.gmra.mrb[254].mxu1 %vm1016_vm3, %v39280_v62  ;;  %v39350_v54 = vpop.permute.xlu1 %27210 }
0x14d3   : > { %25996 = vmatpush1.msra.mxu1 %v32761_v14  ;;  %29004 = vrot.lane.b32.xlu0 %v32755_v63, %s40209_s2  ;;  %v39390_v63 = vld [vmem:[%s40206_s4 + $0x5] sm:$0x1] }
0x14d4   : > { %26137 = vmatprep.subr.mxu1 %v32762_v34  ;;  %29010 = vrot.lane.b32.xlu1 %v32756_v57, %s40209_s2 }
0x14d5   : > { %26059 = vmatprep.mubr.f32.mxu1 %v38644_v29  ;;  %v39355_v58 = vpop.permute.xlu0 %27208 }
0x14d6   : > { %31457 = vmatmul.mubr.msk.f32.vlgmr.msra.gmra.mrb[0].mxu1 %vm1016_vm3, %v39280_v62  ;;  %v39359_v9 = vpop.permute.xlu1 %27214 }
0x14d7   : > { %26138 = vmatpush1.msra.mxu1 %v39361_v25  ;;  %29006 = vrot.lane.b32.xlu0 %v32754_v11, %s40209_s2  ;;  %v26350_v11 = vsel %vm18119_vm10, %v39240_v4, %v39201_v48  ;;  %v26351_v4 = vsel %vm18119_vm10, %v39201_v48, %v39255_v10  ;;  %v26353_v10 = vsel %vm18119_vm10, %v39231_v59, %v39267_v1 }
0x14d8   : > { %26393 = vmatprep.subr.mxu1 %v26348_v50  ;;  %28127 = vrot.lane.b32.xlu1 %v39368_v12, %s40208_s1  ;;  %v26355_v59 = vsel %vm18119_vm10, %v39246_v13, %v39284_v3 }
0x14d9   : > { %26201 = vmatprep.mubr.f32.mxu1 %v38644_v29  ;;  %v39373_v38 = vpop.permute.xlu0 %27212 }
0x14da   : > { %31459 = vmatmul.mubr.msk.f32.vlgmr.msra.gmra.mrb[4].mxu1 %vm1016_vm3, %v39280_v62  ;;  %v39380_v56 = vpop.permute.xlu1 %27218 }
0x14db   : > { %26394 = vmatpush1.msra.mxu1 %v26347_v52  ;;  %27240 = vrot.lane.b32.xlu0 %v39273_v43, %s40207_s27  ;;  %v26358_v52 = vsel %vm18119_vm10, %v39295_v20, %v39271_v5  ;;  %s32328_s27 = smul.u32 22, %s40220_s0 }
0x14dc   : > { %26464 = vmatprep.subr.mxu1 %v26350_v11  ;;  %29016 = vrot.lane.b32.xlu1 %v32761_v14, %s40209_s2  ;;  %v39456_v11 = vld [vmem:[#allocation3 + $0x88] sm:$0xff] }
0x14dd   : > { %26457 = vmatprep.mubr.f32.mxu1 %v38644_v29  ;;  %v39394_v41 = vpop.permute.xlu0 %27216  ;;  %v39408_v29 = vld [vmem:[#allocation2] sm:$0xff] }
0x14de   : > { %31462 = vmatmul.mubr.msk.f32.vlgmr.msra.gmra.mrb[242].mxu1 %vm1016_vm3, %v39390_v63  ;;  %v39401_v57 = vpop.permute.xlu1 %27222 }
0x14df   : > { %26465 = vmatpush1.msra.mxu1 %v26349_v37  ;;  %29012 = vrot.lane.b32.xlu0 %v32759_v47, %s40209_s2  ;;  %v26354_v47 = vsel %vm18119_vm10, %v39267_v1, %v39246_v13  ;;  %v26360_v37 = vsel %vm18119_vm10, %v39304_v26, %v39288_v8 }
0x14e0   : > { %26535 = vmatprep.subr.mxu1 %v26352_v0  ;;  %29018 = vrot.lane.b32.xlu1 %v32760_v45, %s40209_s2 }
0x14e1   : > { %26528 = vmatprep.mubr.f32.mxu1 %v39408_v29  ;;  %v39411_v36 = vpop.permute.xlu0 %27220 }
0x14e2   : > { %31463 = vmatmul.mubr.msk.f32.vlgmr.msra.gmra.mrb[244].mxu1 %vm1016_vm3, %v39390_v63  ;;  %v39418_v14 = vpop.permute.xlu1 %27226 }
0x14e3   : > { %26536 = vmatpush1.msra.mxu1 %v26351_v4  ;;  %29014 = vrot.lane.b32.xlu0 %v39330_v22, %s40209_s2  ;;  %v26356_v22 = vsel %vm18119_vm10, %v39284_v3, %v39261_v53  ;;  %v26357_v3 = vsel %vm18119_vm10, %v39261_v53, %v39295_v20  ;;  %v26359_v53 = vsel %vm18119_vm10, %v39271_v5, %v39304_v26  ;;  %v21864_v5 = vld [vmem:[#allocation4] sm:$0x1] }
0x14e4   : > { %26606 = vmatprep.subr.mxu1 %v26354_v47  ;;  %29022 = vrot.lane.b32.xlu1 %v39368_v12, %s40209_s2  ;;  %v26362_v4 = vsel %vm18119_vm10, %v39314_v23, %v39299_v49  ;;  %v26361_v26 = vsel %vm18119_vm10, %v39288_v8, %v39314_v23  ;;  %v32768_v8 = vld [vmem:[%s40206_s4 + $0x1] sm:$0x1] }
0x14e5   : > { %26599 = vmatprep.mubr.f32.mxu1 %v39408_v29  ;;  %v39428_v48 = vpop.permute.xlu0 %27224 }
0x14e6   : > { %31464 = vmatmul.mubr.msk.f32.vlgmr.msra.gmra.mrb[246].mxu1 %vm1016_vm3, %v39390_v63  ;;  %v39435_v45 = vpop.permute.xlu1 %27230 }
0x14e7   : > { %26607 = vmatpush1.msra.mxu1 %v26353_v10  ;;  %28135 = vrot.lane.b32.xlu0 %v39273_v43, %s40208_s1 }
0x14e8   : > { %26677 = vmatprep.subr.mxu1 %v26356_v22  ;;  %29026 = vrot.lane.b32.xlu1 %v32762_v34, %s40209_s2 }
0x14e9   : > { %26670 = vmatprep.mubr.f32.mxu1 %v39408_v29  ;;  %v39444_v50 = vpop.permute.xlu0 %27228 }
0x14ea   : > { %31465 = vmatmul.mubr.msk.f32.vlgmr.msra.gmra.mrb[248].mxu1 %vm1016_vm3, %v39390_v63  ;;  %v39451_v1 = vpop.permute.xlu1 %27238 }
0x14eb   : > { %26678 = vmatpush1.msra.mxu1 %v26355_v59  ;;  %29020 = vrot.lane.b32.xlu0 %v39456_v11, %s40209_s2 }
0x14ec   : > { %26748 = vmatprep.subr.mxu1 %v26358_v52  ;;  %29030 = vrot.lane.b32.xlu1 %v39273_v43, %s40209_s2 }
0x14ed   : > { %26741 = vmatprep.mubr.f32.mxu1 %v39408_v29  ;;  %v39463_v13 = vpop.permute.xlu0 %27234 }
0x14ee   : > { %31466 = vmatmul.mubr.msk.f32.vlgmr.msra.gmra.mrb[250].mxu1 %vm1016_vm3, %v39390_v63  ;;  %v39470_v34 = vpop.permute.xlu1 %28095 }
0x14ef   : > { %26749 = vmatpush1.msra.mxu1 %v26357_v3  ;;  %29024 = vrot.lane.b32.xlu0 %v39361_v25, %s40209_s2  ;;  %v39490_v25 = vld [vmem:[#allocation3 + $0xa8] sm:$0xff] }
0x14f0   : > { %26819 = vmatprep.subr.mxu1 %v26360_v37  ;;  %26812 = vmatprep.mubr.f32.mxu1 %v39408_v29  ;;  %v27243_v37 = vsel %vm19015_vm11, %v39318_v51, %v39336_v35 }
0x14f1   : > { %v39478_v0 = vpop.permute.xlu0 %28097 }
0x14f2   : > { %31467 = vmatmul.mubr.msk.f32.vlgmr.msra.gmra.mrb[252].mxu1 %vm1016_vm3, %v39390_v63  ;;  %v39485_v20 = vpop.permute.xlu1 %28093 }
0x14f3   : > { %26820 = vmatpush1.msra.mxu1 %v26359_v53  ;;  %29028 = vrot.lane.b32.xlu0 %v39490_v25, %s40209_s2  ;;  %s40211_s2 = sld [smem:[#allocation78_spill]] }
0x14f4   : > { %26890 = vmatprep.subr.mxu1 %v26362_v4  ;;  %26883 = vmatprep.mubr.f32.mxu1 %v39408_v29  ;;  %v27242_v4 = vsel %vm19015_vm11, %v39327_v42, %v39318_v51  ;;  %v27244_v42 = vsel %vm19015_vm11, %v39336_v35, %v39346_v33 }
0x14f5   : > { %v21947_v47 = vpop.permute.xlu0 %21946 }
0x14f6   : > { %v21972_v10 = vsel %vm13724_vm6, %v38797_v24, %v21947_v47  ;;  %31468 = vmatmul.mubr.msk.f32.vlgmr.msra.gmra.mrb[254].mxu1 %vm1016_vm3, %v39390_v63  ;;  %v39502_v22 = vpop.permute.xlu1 %28099  ;;  %v21973_v59 = vsel %vm13724_vm6, %v21947_v47, %v38732_v7  ;;  %v27245_v47 = vsel %vm19015_vm11, %v39346_v33, %v39340_v2 }
0x14f7   : > { %26891 = vmatpush1.msra.mxu1 %v26361_v26  ;;  %22570 = vmatprep.subr.mxu0 %v21973_v59 }
0x14f8   : > { %29883 = vperm.xlu0 %32459, %v21864_v5   ;;  %22571 = vmatpush1.msra.mxu0 %v21972_v10  ;;  %v39541_v5 = vld [vmem:[%s40206_s4 + $0x6] sm:$0x1]  ;;  %v27247_v10 = vsel %vm19015_vm11, %v39355_v58, %v39350_v54 }
0x14f9   : > { %26954 = vmatprep.mubr.f32.mxu1 %v39408_v29  ;;  %v26342_v52 = vpop.permute.xlu0 %26341  ;;  %31411 = vmatmul.mubr.msk.f32.vlgmr.msra.gmra.mrb[16].mxu0 %vm1016_vm3, %v32768_v8  ;;  %s39911_s22 = scalar_lea.vmem %s40211_s2, %s32328_s27 }
0x14fa   : > { %v26365_v24 = vsel %vm18119_vm10, %v39323_v61, %v26342_v52  ;;  %31469 = vmatmul.mubr.msk.f32.vlgmr.msra.gmra.mrb[0].mxu1 %vm1016_vm3, %v39390_v63  ;;  %v21955_v7 = vpop.permute.xlu1 %21954  ;;  %v26366_v23 = vsel %vm18119_vm10, %v26342_v52, %v39308_v44  ;;  %22776 = vmatprep.mubr.f32.mxu0 %v39408_v29  ;;  %v27246_v52 = vsel %vm19015_vm11, %v39340_v2, %v39355_v58 }
0x14fb   : > { %v21976_v3 = vsel %vm13724_vm6, %v38808_v19, %v21955_v7  ;;  %22712 = vmatprep.subr.mxu0 %v21955_v7  ;;  %27032 = vmatprep.subr.mxu1 %v26366_v23  ;;  %v27251_v7 = vsel %vm19015_vm11, %v39394_v41, %v39380_v56  ;;  %v27253_v23 = vsel %vm19015_vm11, %v39411_v36, %v39401_v57  ;;  %vm40213_vm6 = vcmp.gt.f32.partialorder %v38372_v32, 0.0 }
0x14fc   : > { %22713 = vmatpush1.msra.mxu0 %v21976_v3  ;;  %27033 = vmatpush1.msra.mxu1 %v26365_v24  ;;  %v27249_v24 = vsel %vm19015_vm11, %v39373_v38, %v39359_v9 }
0x14fd   : > { %27096 = vmatprep.mubr.f32.mxu1 %v39408_v29  ;;  %v39524_v53 = vpop.permute.xlu0 %28101  ;;  %27288 = vmatprep.subr.mxu1 %v27243_v37 }
0x14fe   : > { %31471 = vmatmul.mubr.msk.f32.vlgmr.msra.gmra.mrb[4].mxu1 %vm1016_vm3, %v39390_v63  ;;  %v39531_v19 = vpop.permute.xlu1 %28105  ;;  %31413 = vmatmul.mubr.msk.f32.vlgmr.msra.gmra.mrb[18].mxu0 %vm1016_vm3, %v32768_v8 }
0x14ff   : > { %27289 = vmatpush1.msra.mxu1 %v27242_v4  ;;  %27352 = vmatprep.mubr.f32.mxu1 %v39408_v29  ;;  %v27255_v4 = vsel %vm19015_vm11, %v39428_v48, %v39418_v14 }
0x1500   : > { %27359 = vmatprep.subr.mxu1 %v27245_v47  ;;  %23505 = vmatprep.mubr.f32.mxu0 %v39408_v29  ;;  %v27257_v47 = vsel %vm19015_vm11, %v39444_v50, %v39435_v45 }
0x1501   : > { %v39544_v51 = vpop.permute.xlu0 %28103 }
0x1502   : > { %31474 = vmatmul.mubr.msk.f32.vlgmr.msra.gmra.mrb[242].mxu1 %vm1016_vm3, %v39541_v5  ;;  %v39551_v26 = vpop.permute.xlu1 %28107 }
0x1503   : > { %27360 = vmatpush1.msra.mxu1 %v27244_v42  ;;  %27423 = vmatprep.mubr.f32.mxu1 %v39408_v29 }
0x1504   : > { %27430 = vmatprep.subr.mxu1 %v27247_v10 }
0x1505   : > { %v22818_v59 = vpop.permute.xlu0 %22817 }
0x1506   : > { %v22843_v35 = vsel %vm14596_vm7, %v38849_v15, %v22818_v59  ;;  %31475 = vmatmul.mubr.msk.f32.vlgmr.msra.gmra.mrb[244].mxu1 %vm1016_vm3, %v39541_v5  ;;  %v22826_v33 = vpop.permute.xlu1 %22825  ;;  %v22844_v8 = vsel %vm14596_vm7, %v22818_v59, %v38921_v6  ;;  %v27248_v15 = vsel %vm19015_vm11, %v39350_v54, %v39373_v38 }
0x1507   : > { %27431 = vmatpush1.msra.mxu1 %v27246_v52  ;;  %23441 = vmatprep.subr.mxu0 %v22844_v8  ;;  %v22847_v6 = vsel %vm14596_vm7, %v38955_v21, %v22826_v33  ;;  %v27250_v21 = vsel %vm19015_vm11, %v39359_v9, %v39394_v41  ;;  %v27252_v9 = vsel %vm19015_vm11, %v39380_v56, %v39411_v36 }
0x1508   : > { %27501 = vmatprep.subr.mxu1 %v27249_v24  ;;  %23442 = vmatpush1.msra.mxu0 %v22843_v35  ;;  %v28137_v52 = vsel %vm19911_vm12, %v39485_v20, %v39470_v34  ;;  %v28140_v24 = vsel %vm19911_vm12, %v39502_v22, %v39524_v53 }
0x1509   : > { %27494 = vmatprep.mubr.f32.mxu1 %v39408_v29  ;;  %v39570_v2 = vpop.permute.xlu0 %28109  ;;  %23583 = vmatprep.subr.mxu0 %v22826_v33 }
0x150a   : > { %31476 = vmatmul.mubr.msk.f32.vlgmr.msra.gmra.mrb[246].mxu1 %vm1016_vm3, %v39541_v5  ;;  %v39579_v58 = vpop.permute.xlu1 %28113  ;;  %31422 = vmatmul.mubr.msk.f32.vlgmr.msra.gmra.mrb[16].mxu0 %vm1016_vm3, %v38882_v18 }
0x150b   : > { %27502 = vmatpush1.msra.mxu1 %v27248_v15  ;;  %23584 = vmatpush1.msra.mxu0 %v22847_v6  ;;  %v28142_v15 = vsel %vm19911_vm12, %v39544_v51, %v39531_v19 }
0x150c   : > { %27572 = vmatprep.subr.mxu1 %v27251_v7  ;;  %27565 = vmatprep.mubr.f32.mxu1 %v39408_v29 }
0x150d   : > { %v39587_v54 = vpop.permute.xlu0 %28111  ;;  %23647 = vmatprep.mubr.f32.mxu0 %v39408_v29 }
0x150e   : > { %31477 = vmatmul.mubr.msk.f32.vlgmr.msra.gmra.mrb[248].mxu1 %vm1016_vm3, %v39541_v5  ;;  %v39595_v38 = vpop.permute.xlu1 %28115  ;;  %31424 = vmatmul.mubr.msk.f32.vlgmr.msra.gmra.mrb[18].mxu0 %vm1016_vm3, %v38882_v18 }
0x150f   : > { %27573 = vmatpush1.msra.mxu1 %v27250_v21  ;;  %27636 = vmatprep.mubr.f32.mxu1 %v39408_v29 }
0x1510   : > { %27643 = vmatprep.subr.mxu1 %v27253_v23  ;;  %24378 = vmatprep.mubr.f32.mxu0 %v39408_v29  ;;  %v28144_v23 = vsel %vm19911_vm12, %v39551_v26, %v39570_v2 }
0x1511   : > { %v23691_v3 = vpop.permute.xlu0 %23690 }
0x1512   : > { %v23716_v41 = vsel %vm15470_vm8, %v39015_v31, %v23691_v3  ;;  %31478 = vmatmul.mubr.msk.f32.vlgmr.msra.gmra.mrb[250].mxu1 %vm1016_vm3, %v39541_v5  ;;  %v23699_v18 = vpop.permute.xlu1 %23698  ;;  %v23717_v37 = vsel %vm15470_vm8, %v23691_v3, %v39073_v17  ;;  %v27254_v31 = vsel %vm19015_vm11, %v39401_v57, %v39428_v48  ;;  %v28146_v3 = vsel %vm19911_vm12, %v39587_v54, %v39579_v58 }
0x1513   : > { %27644 = vmatpush1.msra.mxu1 %v27252_v9  ;;  %24314 = vmatprep.subr.mxu0 %v23717_v37  ;;  %v23720_v17 = vsel %vm15470_vm8, %v39088_v46, %v23699_v18  ;;  %v27256_v46 = vsel %vm19015_vm11, %v39418_v14, %v39444_v50 }
0x1514   : > { %27714 = vmatprep.subr.mxu1 %v27255_v4  ;;  %24315 = vmatpush1.msra.mxu0 %v23716_v41 }
0x1515   : > { %27707 = vmatprep.mubr.f32.mxu1 %v39408_v29  ;;  %v39617_v56 = vpop.permute.xlu0 %28117  ;;  %24456 = vmatprep.subr.mxu0 %v23699_v18 }
0x1516   : > { %31479 = vmatmul.mubr.msk.f32.vlgmr.msra.gmra.mrb[252].mxu1 %vm1016_vm3, %v39541_v5  ;;  %v39626_v36 = vpop.permute.xlu1 %28121  ;;  %31434 = vmatmul.mubr.msk.f32.vlgmr.msra.gmra.mrb[16].mxu0 %vm1016_vm3, %v39029_v39 }
0x1517   : > { %27715 = vmatpush1.msra.mxu1 %v27254_v31  ;;  %24457 = vmatpush1.msra.mxu0 %v23720_v17 }
0x1518   : > { %27785 = vmatprep.subr.mxu1 %v27257_v47  ;;  %27778 = vmatprep.mubr.f32.mxu1 %v39408_v29 }
0x1519   : > { %v39634_v57 = vpop.permute.xlu0 %28119  ;;  %24520 = vmatprep.mubr.f32.mxu0 %v39408_v29 }
0x151a   : > { %31480 = vmatmul.mubr.msk.f32.vlgmr.msra.gmra.mrb[254].mxu1 %vm1016_vm3, %v39541_v5  ;;  %v39642_v48 = vpop.permute.xlu1 %28123  ;;  %31436 = vmatmul.mubr.msk.f32.vlgmr.msra.gmra.mrb[18].mxu0 %vm1016_vm3, %v39029_v39  ;;  %v28138_v39 = vsel %vm19911_vm12, %v39470_v34, %v39478_v0  ;;  %v39675_v34 = vld [vmem:[%s40206_s4 + $0x7] sm:$0x1] }
0x151b   : > { %27786 = vmatpush1.msra.mxu1 %v27256_v46  ;;  %27849 = vmatprep.mubr.f32.mxu1 %v39408_v29  ;;  %v28151_v41 = vsel %vm19911_vm12, %v39626_v36, %v39642_v48 }
0x151c   : > { %25322 = vmatprep.mubr.f32.mxu0 %v39408_v29 }
0x151d   : > { %v27237_v42 = vpop.permute.xlu0 %27236 }
0x151e   : > { %v27260_v10 = vsel %vm19015_vm11, %v39463_v13, %v27237_v42  ;;  %31481 = vmatmul.mubr.msk.f32.vlgmr.msra.gmra.mrb[0].mxu1 %vm1016_vm3, %v39541_v5  ;;  %v24640_v14 = vpop.permute.xlu1 %24639  ;;  %v27261_v50 = vsel %vm19015_vm11, %v27237_v42, %v39451_v1 }
0x151f   : > { %27927 = vmatprep.subr.mxu1 %v27261_v50  ;;  %27991 = vmatprep.mubr.f32.mxu1 %v39408_v29  ;;  %v24663_v21 = vsel %vm16414_vm9, %v39216_v30, %v24640_v14 }
0x1520   : > { %27928 = vmatpush1.msra.mxu1 %v27260_v10 }
0x1521   : > { %v24632_v59 = vpop.permute.xlu0 %24631  ;;  %28183 = vmatprep.subr.mxu1 %v28138_v39 }
0x1522   : > { %v24659_v35 = vsel %vm16414_vm9, %v39159_v55, %v24632_v59  ;;  %31483 = vmatmul.mubr.msk.f32.vlgmr.msra.gmra.mrb[4].mxu1 %vm1016_vm3, %v39541_v5  ;;  %v39665_v33 = vpop.permute.xlu1 %28129  ;;  %v24660_v8 = vsel %vm16414_vm9, %v24632_v59, %v39210_v40  ;;  %v28139_v40 = vsel %vm19911_vm12, %v39478_v0, %v39502_v22  ;;  %v28141_v0 = vsel %vm19911_vm12, %v39524_v53, %v39544_v51 }
0x1523   : > { %28184 = vmatpush1.msra.mxu1 %v28137_v52  ;;  %25258 = vmatprep.subr.mxu0 %v24660_v8  ;;  %v28143_v51 = vsel %vm19911_vm12, %v39531_v19, %v39551_v26  ;;  %v28148_v19 = vsel %vm19911_vm12, %v39595_v38, %v39617_v56 }
0x1524   : > { %28254 = vmatprep.subr.mxu1 %v28140_v24  ;;  %25259 = vmatpush1.msra.mxu0 %v24659_v35 }
0x1525   : > { %28247 = vmatprep.mubr.f32.mxu1 %v39408_v29  ;;  %v39678_v55 = vpop.permute.xlu0 %28125  ;;  %31446 = vmatmul.mubr.msk.f32.vlgmr.msra.gmra.mrb[16].mxu0 %vm1016_vm3, %v39154_v16 }
0x1526   : > { %31486 = vmatmul.mubr.msk.f32.vlgmr.msra.gmra.mrb[242].mxu1 %vm1016_vm3, %v39675_v34  ;;  %v39687_v20 = vpop.permute.xlu1 %28992  ;;  %25464 = vmatprep.mubr.f32.mxu0 %v39408_v29 }
0x1527   : > { %28255 = vmatpush1.msra.mxu1 %v28139_v40  ;;  %28318 = vmatprep.mubr.f32.mxu1 %v39408_v29 }
0x1528   : > { %28325 = vmatprep.subr.mxu1 %v28142_v15 }
0x1529   : > { %v24642_v6 = vpop.permute.xlu0 %24641 }
0x152a   : > { %31487 = vmatmul.mubr.msk.f32.vlgmr.msra.gmra.mrb[244].mxu1 %vm1016_vm3, %v39675_v34  ;;  %v39699_v22 = vpop.permute.xlu1 %28994  ;;  %v24664_v7 = vsel %vm16414_vm9, %v24640_v14, %v24642_v6 }
0x152b   : > { %28326 = vmatpush1.msra.mxu1 %v28141_v0  ;;  %25400 = vmatprep.subr.mxu0 %v24664_v7  ;;  %v29034_v42 = vsel %vm20807_vm13, %v39687_v20, %v39699_v22 }
0x152c   : > { %28396 = vmatprep.subr.mxu1 %v28144_v23  ;;  %25401 = vmatpush1.msra.mxu0 %v24663_v21 }
0x152d   : > { %28389 = vmatprep.mubr.f32.mxu1 %v39408_v29  ;;  %v39708_v53 = vpop.permute.xlu0 %28133  ;;  %31448 = vmatmul.mubr.msk.f32.vlgmr.msra.gmra.mrb[18].mxu0 %vm1016_vm3, %v39154_v16 }
0x152e   : > { %26066 = vmatprep.subr.mxu0 %v39368_v12  ;;  %31488 = vmatmul.mubr.msk.f32.vlgmr.msra.gmra.mrb[246].mxu1 %vm1016_vm3, %v39675_v34  ;;  %v26338_v30 = vpop.permute.xlu1 %26337  ;;  %v28145_v12 = vsel %vm19911_vm12, %v39570_v2, %v39587_v54  ;;  %v28147_v2 = vsel %vm19911_vm12, %v39579_v58, %v39595_v38  ;;  %v28150_v54 = vsel %vm19911_vm12, %v39634_v57, %v39626_v36 }
0x152f   : > { %28397 = vmatpush1.msra.mxu1 %v28143_v51  ;;  %26067 = vmatpush1.msra.mxu0 %v39456_v11  ;;  %v28152_v38 = vsel %vm19911_vm12, %v39642_v48, %v39678_v55 }
0x1530   : > { %28467 = vmatprep.subr.mxu1 %v28146_v3  ;;  %26208 = vmatprep.subr.mxu0 %v39273_v43  ;;  %v26364_v43 = vsel %vm18119_vm10, %v26338_v30, %v39323_v61 }
0x1531   : > { %26130 = vmatprep.mubr.f32.mxu0 %v39408_v29  ;;  %28460 = vmatprep.mubr.f32.mxu1 %v39408_v29  ;;  %v28991_v16 = vpop.permute.xlu0 %28990 }
0x1532   : > { %31458 = vmatmul.mubr.msk.f32.vlgmr.msra.gmra.mrb[16].mxu0 %vm1016_vm3, %v39280_v62  ;;  %31489 = vmatmul.mubr.msk.f32.vlgmr.msra.gmra.mrb[248].mxu1 %vm1016_vm3, %v39675_v34  ;;  %v39732_v11 = vpop.permute.xlu1 %29000  ;;  %v29033_v36 = vsel %vm20807_vm13, %v28991_v16, %v39687_v20 }
0x1533   : > { %26209 = vmatpush1.msra.mxu0 %v39490_v25  ;;  %28468 = vmatpush1.msra.mxu1 %v28145_v12  ;;  %v26363_v25 = vsel %vm18119_vm10, %v39299_v49, %v26338_v30 }
0x1534   : > { %26961 = vmatprep.subr.mxu0 %v26364_v43  ;;  %28538 = vmatprep.subr.mxu1 %v28148_v19 }
0x1535   : > { %26272 = vmatprep.mubr.f32.mxu0 %v39408_v29  ;;  %28531 = vmatprep.mubr.f32.mxu1 %v39408_v29  ;;  %v28989_v26 = vpop.permute.xlu0 %28988 }
0x1536   : > { %31460 = vmatmul.mubr.msk.f32.vlgmr.msra.gmra.mrb[18].mxu0 %vm1016_vm3, %v39280_v62  ;;  %31490 = vmatmul.mubr.msk.f32.vlgmr.msra.gmra.mrb[250].mxu1 %vm1016_vm3, %v39675_v34  ;;  %v28132_v61 = vpop.permute.xlu1 %28131  ;;  %v28149_v62 = vsel %vm19911_vm12, %v39617_v56, %v39634_v57  ;;  %v29032_v46 = vsel %vm20807_vm13, %v28989_v26, %v28991_v16 }
0x1537   : > { %26962 = vmatpush1.msra.mxu0 %v26363_v25  ;;  %28539 = vmatpush1.msra.mxu1 %v28147_v2  ;;  %v28156_v37 = vsel %vm19911_vm12, %v28132_v61, %v39708_v53  ;;  %v28155_v56 = vsel %vm19911_vm12, %v39665_v33, %v28132_v61 }
0x1538   : > { %28609 = vmatprep.subr.mxu1 %v28150_v54  ;;  %28602 = vmatprep.mubr.f32.mxu1 %v39408_v29 }
0x1539   : > { %v28997_v58 = vpop.permute.xlu0 %28996  ;;  %27025 = vmatprep.mubr.f32.mxu0 %v39408_v29 }
0x153a   : > { %31491 = vmatmul.mubr.msk.f32.vlgmr.msra.gmra.mrb[252].mxu1 %vm1016_vm3, %v39675_v34  ;;  %v39761_v49 = vpop.permute.xlu1 %29002  ;;  %31470 = vmatmul.mubr.msk.f32.vlgmr.msra.gmra.mrb[16].mxu0 %vm1016_vm3, %v39390_v63 }
0x153b   : > { %28610 = vmatpush1.msra.mxu1 %v28149_v62  ;;  %28673 = vmatprep.mubr.f32.mxu1 %v39408_v29  ;;  %v29038_v40 = vsel %vm20807_vm13, %v39732_v11, %v39761_v49 }
0x153c   : > { %28680 = vmatprep.subr.mxu1 %v28152_v38  ;;  %27167 = vmatprep.mubr.f32.mxu0 %v39408_v29 }
0x153d   : > { %v28999_v9 = vpop.permute.xlu0 %28998 }
0x153e   : > { %31492 = vmatmul.mubr.msk.f32.vlgmr.msra.gmra.mrb[254].mxu1 %vm1016_vm3, %v39675_v34  ;;  %v27233_v18 = vpop.permute.xlu1 %27232  ;;  %v29037_v14 = vsel %vm20807_vm13, %v28999_v9, %v39732_v11  ;;  %v29036_v39 = vsel %vm20807_vm13, %v28997_v58, %v28999_v9 }
0x153f   : > { %28681 = vmatpush1.msra.mxu1 %v28151_v41  ;;  %28744 = vmatprep.mubr.f32.mxu1 %v39408_v29  ;;  %v27259_v47 = vsel %vm19015_vm11, %v27233_v18, %v39463_v13  ;;  %v27258_v57 = vsel %vm19015_vm11, %v39435_v45, %v27233_v18  ;;  %v29035_v13 = vsel %vm20807_vm13, %v39699_v22, %v28997_v58  ;;  %v39804_v45 = vld [vmem:[%s40206_s4 + $0x8] sm:$0x1] }
0x1540   : > { %28822 = vmatprep.subr.mxu1 %v28156_v37 }
0x1541   : > { %v26346_v4 = vpop.permute.xlu0 %26345 }
0x1542   : > { %v26367_v31 = vsel %vm18119_vm10, %v39308_v44, %v26346_v4  ;;  %31493 = vmatmul.mubr.msk.f32.vlgmr.msra.gmra.mrb[0].mxu1 %vm1016_vm3, %v39675_v34  ;;  %v39784_v17 = vpop.permute.xlu1 %29008  ;;  %27103 = vmatprep.subr.mxu0 %v26346_v4 }
0x1543   : > { %28823 = vmatpush1.msra.mxu1 %v28155_v56  ;;  %27104 = vmatpush1.msra.mxu0 %v26367_v31 }
0x1544   : > { %29078 = vmatprep.subr.mxu1 %v29033_v36  ;;  %27856 = vmatprep.subr.mxu0 %v27259_v47 }
0x1545   : > { %28886 = vmatprep.mubr.f32.mxu1 %v39408_v29  ;;  %v29005_v44 = vpop.permute.xlu0 %29004  ;;  %31472 = vmatmul.mubr.msk.f32.vlgmr.msra.gmra.mrb[18].mxu0 %vm1016_vm3, %v39390_v63 }
0x1546   : > { %27857 = vmatpush1.msra.mxu0 %v27258_v57  ;;  %31495 = vmatmul.mubr.msk.f32.vlgmr.msra.gmra.mrb[4].mxu1 %vm1016_vm3, %v39675_v34  ;;  %v29011_v48 = vpop.permute.xlu1 %29010  ;;  %v29039_v35 = vsel %vm20807_vm13, %v39761_v49, %v29005_v44 }
0x1547   : > { %29079 = vmatpush1.msra.mxu1 %v29032_v46  ;;  %29142 = vmatprep.mubr.f32.mxu1 %v39408_v29  ;;  %v29042_v22 = vsel %vm20807_vm13, %v39784_v17, %v29011_v48  ;;  %v40210_v46 = vld [vmem:[#allocation31_spill] sm:$0xff] }
0x1548   : > { %29149 = vmatprep.subr.mxu1 %v29035_v13  ;;  %27920 = vmatprep.mubr.f32.mxu0 %v39408_v29 }
0x1549   : > { %v29007_v63 = vpop.permute.xlu0 %29006  ;;  %31482 = vmatmul.mubr.msk.f32.vlgmr.msra.gmra.mrb[16].mxu0 %vm1016_vm3, %v39541_v5 }
0x154a   : > { %31498 = vmatmul.mubr.msk.f32.vlgmr.msra.gmra.mrb[242].mxu1 %vm1016_vm3, %v39804_v45  ;;  %v28128_v10 = vpop.permute.xlu1 %28127  ;;  %28062 = vmatprep.mubr.f32.mxu0 %v39408_v29  ;;  %v29041_v20 = vsel %vm20807_vm13, %v29007_v63, %v39784_v17 }
0x154b   : > { %29150 = vmatpush1.msra.mxu1 %v29034_v42  ;;  %29213 = vmatprep.mubr.f32.mxu1 %v39408_v29  ;;  %v28154_v8 = vsel %vm19911_vm12, %v28128_v10, %v39665_v33  ;;  %v28153_v24 = vsel %vm19911_vm12, %v39678_v55, %v28128_v10 }
0x154c   : > { %29220 = vmatprep.subr.mxu1 %v29037_v14 }
0x154d   : > { %v27241_v50 = vpop.permute.xlu0 %27240 }
0x154e   : > { %v27262_v59 = vsel %vm19015_vm11, %v39451_v1, %v27241_v50  ;;  %31499 = vmatmul.mubr.msk.f32.vlgmr.msra.gmra.mrb[244].mxu1 %vm1016_vm3, %v39804_v45  ;;  %v29017_v52 = vpop.permute.xlu1 %29016  ;;  %27998 = vmatprep.subr.mxu0 %v27241_v50 }
0x154f   : > { %29221 = vmatpush1.msra.mxu1 %v29036_v39  ;;  %27999 = vmatpush1.msra.mxu0 %v27262_v59 }
0x1550   : > { %29291 = vmatprep.subr.mxu1 %v29039_v35  ;;  %28751 = vmatprep.subr.mxu0 %v28154_v8 }
0x1551   : > { %29284 = vmatprep.mubr.f32.mxu1 %v39408_v29  ;;  %v29013_v1 = vpop.permute.xlu0 %29012  ;;  %31484 = vmatmul.mubr.msk.f32.vlgmr.msra.gmra.mrb[18].mxu0 %vm1016_vm3, %v39541_v5  ;;  %v29040_v5 = vsel %vm20807_vm13, %v29005_v44, %v29007_v63 }
0x1552   : > { %28752 = vmatpush1.msra.mxu0 %v28153_v24  ;;  %31500 = vmatmul.mubr.msk.f32.vlgmr.msra.gmra.mrb[246].mxu1 %vm1016_vm3, %v39804_v45  ;;  %v29019_v33 = vpop.permute.xlu1 %29018  ;;  %v29043_v15 = vsel %vm20807_vm13, %v29011_v48, %v29013_v1 }
0x1553   : > { %29292 = vmatpush1.msra.mxu1 %v29038_v40  ;;  %29355 = vmatprep.mubr.f32.mxu1 %v39408_v29  ;;  %v29046_v16 = vsel %vm20807_vm13, %v29017_v52, %v29019_v33 }
0x1554   : > { %29362 = vmatprep.subr.mxu1 %v29041_v20  ;;  %28815 = vmatprep.mubr.f32.mxu0 %v39408_v29 }
0x1555   : > { %v29015_v55 = vpop.permute.xlu0 %29014  ;;  %31494 = vmatmul.mubr.msk.f32.vlgmr.msra.gmra.mrb[16].mxu0 %vm1016_vm3, %v39675_v34 }
0x1556   : > { %31501 = vmatmul.mubr.msk.f32.vlgmr.msra.gmra.mrb[248].mxu1 %vm1016_vm3, %v39804_v45  ;;  %28957 = vmatprep.mubr.f32.mxu0 %v39408_v29  ;;  %v29023_v6 = vpop.permute.xlu1 %29022  ;;  %v29045_v21 = vsel %vm20807_vm13, %v29015_v55, %v29017_v52  ;;  %v29044_v51 = vsel %vm20807_vm13, %v29013_v1, %v29015_v55 }
0x1557   : > { %29363 = vmatpush1.msra.mxu1 %v29040_v5  ;;  %29426 = vmatprep.mubr.f32.mxu1 %v39408_v29 }
0x1558   : > { %29433 = vmatprep.subr.mxu1 %v29043_v15 }
0x1559   : > { %v28136_v0 = vpop.permute.xlu0 %28135 }
0x155a   : > { %v28157_v7 = vsel %vm19911_vm12, %v39708_v53, %v28136_v0  ;;  %31502 = vmatmul.mubr.msk.f32.vlgmr.msra.gmra.mrb[250].mxu1 %vm1016_vm3, %v39804_v45  ;;  %28893 = vmatprep.subr.mxu0 %v28136_v0  ;;  %v29027_v30 = vpop.permute.xlu1 %29026 }
0x155b   : > { %29434 = vmatpush1.msra.mxu1 %v29042_v22  ;;  %28894 = vmatpush1.msra.mxu0 %v28157_v7 }
0x155c   : > { %29504 = vmatprep.subr.mxu1 %v29045_v21  ;;  %29497 = vmatprep.mubr.f32.mxu1 %v39408_v29 }
0x155d   : > { %v29021_v23 = vpop.permute.xlu0 %29020  ;;  %31496 = vmatmul.mubr.msk.f32.vlgmr.msra.gmra.mrb[18].mxu0 %vm1016_vm3, %v39675_v34 }
0x155e   : > { %31503 = vmatmul.mubr.msk.f32.vlgmr.msra.gmra.mrb[252].mxu1 %vm1016_vm3, %v39804_v45  ;;  %v29047_v53 = vsel %vm20807_vm13, %v29019_v33, %v29021_v23  ;;  %29710 = vmatprep.mubr.f32.mxu0 %v39408_v29  ;;  %v29048_v12 = vsel %vm20807_vm13, %v29021_v23, %v29023_v6  ;;  %v29031_v11 = vpop.permute.xlu1 %29030 }
0x155f   : > { %29505 = vmatpush1.msra.mxu1 %v29044_v51  ;;  %29568 = vmatprep.mubr.f32.mxu1 %v39408_v29 }
0x1560   : > { %29575 = vmatprep.subr.mxu1 %v29047_v53 }
0x1561   : > { %v29025_v3 = vpop.permute.xlu0 %29024 }
0x1562   : > { %31504 = vmatmul.mubr.msk.f32.vlgmr.msra.gmra.mrb[254].mxu1 %vm1016_vm3, %v39804_v45  ;;  %v29049_v34 = vsel %vm20807_vm13, %v29023_v6, %v29025_v3  ;;  %v29050_v2 = vsel %vm20807_vm13, %v29025_v3, %v29027_v30 }
0x1563   : > { %29576 = vmatpush1.msra.mxu1 %v29046_v16  ;;  %29646 = vmatprep.subr.mxu0 %v29049_v34 }
0x1564   : > { %29639 = vmatprep.mubr.f32.mxu1 %v39408_v29  ;;  %29647 = vmatpush1.msra.mxu0 %v29048_v12 }
0x1565   : > { %v29029_v43 = vpop.permute.xlu0 %29028  ;;  %31506 = vmatmul.mubr.msk.f32.vlgmr.msra.gmra.mrb[16].mxu0 %vm1016_vm3, %v39804_v45  ;;  %29788 = vmatprep.subr.mxu0 %v29031_v11 }
0x1566   : > { %v29052_v19 = vsel %vm20807_vm13, %v29029_v43, %v29031_v11  ;;  %31505 = vmatmul.mubr.msk.f32.vlgmr.msra.gmra.mrb[0].mxu1 %vm1016_vm3, %v39804_v45  ;;  %v29051_v26 = vsel %vm20807_vm13, %v29027_v30, %v29029_v43  ;;  %29852 = vmatprep.mubr.f32.mxu0 %v39408_v29 }
0x1567   : > { %29717 = vmatprep.subr.mxu1 %v29051_v26  ;;  %29789 = vmatpush1.msra.mxu0 %v29052_v19 }
0x1568   : > { %29718 = vmatpush1.msra.mxu1 %v29050_v2  ;;  %29781 = vmatprep.mubr.f32.mxu1 %v39408_v29 }
0x1569   : > { %31508 = vmatmul.mubr.msk.f32.vlgmr.msra.gmra.mrb[18].mxu0 %vm1016_vm3, %v39804_v45 }
0x156a   : > { %31507 = vmatmul.mubr.msk.f32.vlgmr.msra.gmra.mrb[4].mxu1 %vm1016_vm3, %v39804_v45  ;;  %vm40212_vm3 = vcmp.gt.f32.partialorder %v38363_v28, 0.0 }
0x1577   : > { %v29884_v25 = vpop.permute.xlu0 %29883 }
0x1578   : > { %v39885_v61 = vrot.slane %v29884_v25, %v40175_v27 }
0x161d   : > { %v29144_v54 = vpop.f32.mrb[242].mxu1 }
0x161e   : > { %v29890_v58 = vadd.f32 %v39885_v61, %v29144_v54  ;;  %v29146_v62 = vpop.f32.mrb[243].mxu1 }
0x161f   : > { %v29891_v49 = vadd.f32 %v39885_v61, %v29146_v62 }
0x1620   : > { %v29912_v38 = vmax.f32 %v29890_v58, 0.0 }
0x1621   : > { %v29913_v9 = vmax.f32 %v29891_v49, 0.0  ;;  %v29215_v41 = vpop.f32.mrb[244].mxu1 }
0x1622   : > { %v29892_v29 = vadd.f32 %v39885_v61, %v29215_v41  ;;  %v29217_v18 = vpop.f32.mrb[245].mxu1 }
0x1623   : > { %v29956_v37 = vcombine.low %v29912_v38, %v29913_v9  ;;  %v29893_v4 = vadd.f32 %v39885_v61, %v29217_v18 }
0x1624   : > { %v29914_v56 = vmax.f32 %v29892_v29, 0.0 }
0x1625   : > { %v29915_v31 = vmax.f32 %v29893_v4, 0.0  ;;  %v29286_v27 = vpop.f32.mrb[246].mxu1  ;;  %v29966_v48 = vrot.slane %v29956_v37, %v40210_v46 }
0x1626   : > { %v29894_v17 = vadd.f32 %v39885_v61, %v29286_v27  ;;  %v29288_v36 = vpop.f32.mrb[247].mxu1 }
0x1627   : > { %v29957_v47 = vcombine.low %v29914_v56, %v29915_v31  ;;  %v29895_v57 = vadd.f32 %v39885_v61, %v29288_v36 }
0x1628   : > { %v29916_v44 = vmax.f32 %v29894_v17, 0.0 }
0x1629   : > { %v29973_v13 = vrot.slane %v29957_v47, %v40210_v46  ;;  %v29917_v45 = vmax.f32 %v29895_v57, 0.0  ;;  %v29357_v63 = vpop.f32.mrb[248].mxu1 }
0x162a   : > { %v29896_v42 = vadd.f32 %v39885_v61, %v29357_v63  ;;  %v29359_v10 = vpop.f32.mrb[249].mxu1 }
0x162b   : > { %v29988_v14 = vcombine.low %v29966_v48, %v29973_v13  ;;  %v29958_v50 = vcombine.low %v29916_v44, %v29917_v45  ;;  %v29897_v39 = vadd.f32 %v39885_v61, %v29359_v10 }
0x162c   : > { %v29918_v59 = vmax.f32 %v29896_v42, 0.0 }
0x162d   : > { %v29919_v52 = vmax.f32 %v29897_v39, 0.0  ;;  %v29428_v35 = vpop.f32.mrb[250].mxu1  ;;  %v29980_v20 = vrot.slane %v29958_v50, %v40210_v46  ;;  %v29996_v51 = vrot.slane %v29988_v14, %v40210_v46 }
0x162e   : > { %v29898_v8 = vadd.f32 %v39885_v61, %v29428_v35  ;;  %v29430_v24 = vpop.f32.mrb[251].mxu1 }
0x162f   : > { %v29959_v1 = vcombine.low %v29918_v59, %v29919_v52  ;;  %v29899_v40 = vadd.f32 %v39885_v61, %v29430_v24 }
0x1630   : > { %v29920_v33 = vmax.f32 %v29898_v8, 0.0 }
0x1631   : > { %v29987_v55 = vrot.slane %v29959_v1, %v40210_v46  ;;  %v29921_v5 = vmax.f32 %v29899_v40, 0.0  ;;  %v29499_v15 = vpop.f32.mrb[252].mxu1 }
0x1632   : > { %v29900_v6 = vadd.f32 %v39885_v61, %v29499_v15  ;;  %v29501_v0 = vpop.f32.mrb[253].mxu1 }
0x1633   : > { %v29989_v22 = vcombine.low %v29980_v20, %v29987_v55  ;;  %v30005_v7 = vcombine.low %v29920_v33, %v29921_v5  ;;  %v29901_v21 = vadd.f32 %v39885_v61, %v29501_v0 }
0x1634   : > { %v29922_v23 = vmax.f32 %v29900_v6, 0.0 }
0x1635   : > { %v30003_v30 = vrot.slane %v29989_v22, %v40210_v46  ;;  %v29923_v53 = vmax.f32 %v29901_v21, 0.0  ;;  %v29570_v3 = vpop.f32.mrb[254].mxu1  ;;  %v30015_v19 = vrot.slane %v30005_v7, %v40210_v46  ;;  %v40214_v7 = vlaneseq }
0x1636   : > { %v29902_v16 = vadd.f32 %v39885_v61, %v29570_v3  ;;  %v29572_v34 = vpop.f32.mrb[255].mxu1 }
0x1637   : > { %v30004_v12 = vcombine.low %v29996_v51, %v30003_v30  ;;  %v30006_v11 = vcombine.low %v29922_v23, %v29923_v53  ;;  %v29903_v43 = vadd.f32 %v39885_v61, %v29572_v34  ;;  %vm30102_vm7 = vcmp.lt.s32.totalorder %v40214_v7, 656 }
0x1638   : > { %v29924_v26 = vmax.f32 %v29902_v16, 0.0  ;;  %v29712_v2 = vpop.f32.mrb[16].mxu0 }
0x1639   : > { %v30097_v25 = vsel %vm40212_vm3, %v30004_v12, 0.0  ;;  %v30022_v54 = vrot.slane %v30006_v11, %v40210_v46  ;;  %v29925_v58 = vmax.f32 %v29903_v43, 0.0  ;;  %v29641_v62 = vpop.f32.mrb[0].mxu1  ;;  %v29906_v49 = vadd.f32 %v39885_v61, %v29712_v2  ;;  %v29714_v38 = vpop.f32.mrb[17].mxu0 }
0x163a   : > { %30100 = vst [vmem:[%s39911_s22] sm:$0xff] %v30097_v25  ;;  %v29904_v9 = vadd.f32 %v39885_v61, %v29641_v62  ;;  %v29643_v41 = vpop.f32.mrb[1].mxu1  ;;  %v29907_v29 = vadd.f32 %v39885_v61, %v29714_v38 }
0x163b   : > { %v30037_v18 = vcombine.low %v30015_v19, %v30022_v54  ;;  %v30007_v37 = vcombine.low %v29924_v26, %v29925_v58  ;;  %v29928_v4 = vmax.f32 %v29906_v49, 0.0  ;;  %v29905_v56 = vadd.f32 %v39885_v61, %v29643_v41 }
0x163c   : > { %v29926_v28 = vmax.f32 %v29904_v9, 0.0  ;;  %v29929_v31 = vmax.f32 %v29907_v29, 0.0  ;;  %v29854_v27 = vpop.f32.mrb[18].mxu0 }
0x163d   : > { %v29927_v17 = vmax.f32 %v29905_v56, 0.0  ;;  %v29783_v36 = vpop.f32.mrb[4].mxu1  ;;  %v29910_v47 = vadd.f32 %v39885_v61, %v29854_v27  ;;  %v29856_v57 = vpop.f32.mrb[19].mxu0  ;;  %v30029_v39 = vrot.slane %v30007_v37, %v40210_v46  ;;  %v30045_v1 = vrot.slane %v30037_v18, %v40210_v46 }
0x163e   : > { %v30054_v44 = vcombine.low %v29928_v4, %v29929_v31  ;;  %v29908_v48 = vadd.f32 %v39885_v61, %v29783_v36  ;;  %v29785_v13 = vpop.f32.mrb[5].mxu1  ;;  %v29911_v45 = vadd.f32 %v39885_v61, %v29856_v57 }
0x163f   : > { %v30008_v63 = vcombine.low %v29926_v28, %v29927_v17  ;;  %v29932_v42 = vmax.f32 %v29910_v47, 0.0  ;;  %v29909_v10 = vadd.f32 %v39885_v61, %v29785_v13 }
0x1640   : > { %v29930_v14 = vmax.f32 %v29908_v48, 0.0  ;;  %v29933_v50 = vmax.f32 %v29911_v45, 0.0  ;;  %v30063_v33 = vrot.slane %v30054_v44, %v40210_v46 }
0x1641   : > { %v30036_v59 = vrot.slane %v30008_v63, %v40210_v46  ;;  %v29931_v52 = vmax.f32 %v29909_v10, 0.0 }
0x1642   : > { %v30056_v35 = vcombine.low %v29932_v42, %v29933_v50 }
0x1643   : > { %v30038_v8 = vcombine.low %v30029_v39, %v30036_v59  ;;  %v30055_v24 = vcombine.low %v29930_v14, %v29931_v52 }
0x1644   : > { %v30077_v20 = vrot.slane %v30056_v35, %v40210_v46 }
0x1645   : > { %v30052_v40 = vrot.slane %v30038_v8, %v40210_v46  ;;  %v30070_v61 = vrot.slane %v30055_v24, %v40210_v46 }
0x1646   : > { %v30092_v0 = vrot.slane %v30077_v20, %v40210_v46 }
0x1647   : > { %v30053_v55 = vcombine.low %v30045_v1, %v30052_v40  ;;  %v30078_v5 = vcombine.low %v30063_v33, %v30070_v61 }
0x1649   : > { %v30098_v15 = vsel %vm40213_vm6, %v30053_v55, 0.0  ;;  %v30085_v6 = vrot.slane %v30078_v5, %v40210_v46 }
0x164a   : > { %30101 = vst [vmem:[%s39911_s22 + $0x8] sm:$0xff] %v30098_v15 }
0x164b   : > { %v30093_v22 = vcombine.low %v30085_v6, %v30092_v0 }
0x164d   : > { %v30099_v21 = vsel %vm13631_vm0, %v30093_v22, 0.0 }
0x164e   : > { %30104 = vst.msk [vmem:[%s39911_s22 + $0x10] sm:$0x3f] %vm30102_vm7, %v30099_v21 }
0x164f PF: > { %p40_p0 = scmp.ge.s32.totalorder %s33388_s30, 4   ;;  %s40215_s27 = smov %s33037_s28 }
0x1650   : > { %s40216_s28 = smov %s33041_s6  ;;  %s40217_s6 = smov %s33400_s3 }
0x1651   : > { %s40218_s2 = smov %s33388_s30  ;;  %42 = sbr.rel (!%p40_p0) target bundleno = 26 (0x1a), region = 257 }
0x1658   :  { %30124 = vsyncpa [#allocation6], 1 }
0x1659   :  { %30126 = vsyncpa [#allocation6 + $0x1], 1 }
0x165a   :  { %30127 = vsyncpa [#allocation8], 1 }
0x165b   :  { %30128 = vsyncpa [#allocation11], 1 }
0x165c   :  { %30129 = vsyncpa [#allocation14], 1 }
0x165d   :  { %30130 = vsyncpa [#allocation17], 1 }

</bundles_post_ra>
